<compile_context>
chip_gen: v6e
topology: v6e:2x2x1
jax: 0.10.0
libtpu: 0.0.40
codegen_flags: <defaults>
</compile_context>

<pallas_src>
import jax
import jax.numpy as jnp
import numpy as np
from jax.experimental import pallas as pl
from jax.experimental.pallas import tpu as pltpu


def _round_up(x, m):
    return ((x + m - 1) // m) * m


def make_cnn_encoder_params(key, max_len, latent_dim, decision_dim):
    """Deterministic synthetic parameters in PyTorch layouts."""
    last = max_len - 9 + 1 - 9 + 1 - 11 + 1
    ks = jax.random.split(key, 12)

    def init(k, shape, scale=0.1):
        return scale * jax.random.normal(k, shape, jnp.float32)

    return dict(
        conv1_w=init(ks[0], (9, decision_dim, 9)),   # (Cout, Cin, K)
        conv1_b=init(ks[1], (9,)),
        conv2_w=init(ks[2], (9, 9, 9)),
        conv2_b=init(ks[3], (9,)),
        conv3_w=init(ks[4], (10, 9, 11)),
        conv3_b=init(ks[5], (10,)),
        w1_w=init(ks[6], (435, last * 10)),          # (out, in)
        w1_b=init(ks[7], (435,)),
        mean_w=init(ks[8], (latent_dim, 435)),
        mean_b=init(ks[9], (latent_dim,)),
        logvar_w=init(ks[10], (latent_dim, 435)),
        logvar_b=init(ks[11], (latent_dim,)),
    )


def cnn_encoder_forward(x_ncw, params, *, batch_tile=128, use_bf16=False):
    B, C_in, L = x_ncw.shape
    K1, K2, K3 = 9, 9, 11
    C1, C2, C3 = 9, 9, 10
    L1 = L - K1 + 1
    L2 = L1 - K2 + 1
    L3 = L2 - K3 + 1
    HID = params["w1_b"].shape[0]            # 435
    LATENT = params["mean_b"].shape[0]
    HEAD = 2 * LATENT
    HEAD_PAD = _round_up(HEAD, 128)          # lane-dense output slab
    cdt = jnp.bfloat16 if use_bf16 else jnp.float32   # matmul operand dtype

    # ---------------- parameter / layout prep (plain JAX, done once) --------
    # Conv weights as (K, Cin, Cout): tap k feeds one small GEMM.
    wc1 = jnp.transpose(params["conv1_w"], (2, 1, 0)).astype(cdt)
    wc2 = jnp.transpose(params["conv2_w"], (2, 1, 0)).astype(cdt)
    wc3 = jnp.transpose(params["conv3_w"], (2, 1, 0)).astype(cdt)
    b1 = params["conv1_b"].reshape(1, C1).astype(jnp.float32)
    b2 = params["conv2_b"].reshape(1, C2).astype(jnp.float32)
    b3 = params["conv3_b"].reshape(1, C3).astype(jnp.float32)

    # PyTorch flatten is channel-major (flat[c*L3 + l]); the kernel produces a
    # position-major flat vector (flat[l*C3 + c]), so permute w1 rows to match.
    wl1 = jnp.transpose(params["w1_w"].reshape(HID, C3, L3),
                        (2, 1, 0)).reshape(L3 * C3, HID).astype(cdt)
    bl1 = params["w1_b"].reshape(1, HID).astype(jnp.float32)

    # Fused mean / log_var heads, padded to a 128-lane multiple -> unmasked
    # lane-dense output stores (padding sliced off outside the kernel).
    whead = jnp.concatenate([params["mean_w"].T, params["logvar_w"].T], axis=1)
    whead = jnp.pad(whead, ((0, 0), (0, HEAD_PAD - HEAD))).astype(cdt)
    bhead = jnp.concatenate([params["mean_b"], params["logvar_b"]])
    bhead = jnp.pad(bhead, (0, HEAD_PAD - HEAD)).reshape(1, HEAD_PAD)
    bhead = bhead.astype(jnp.float32)

    # ---------------- batch tiling -------------------------------------------
    # TB multiple of 8 (full sublanes); grid always >= 2 parallel steps so the
    # two v7x TensorCores both get work (no effect on v5e/v6e correctness).
    TB = min(max(batch_tile, 8), max(8, _round_up(pl.cdiv(B, 2), 8)))
    TB = _round_up(TB, 8)
    n_blocks = max(2, pl.cdiv(B, TB))
    B_pad = n_blocks * TB

    x_blc = jnp.transpose(x_ncw, (0, 2, 1)).astype(jnp.float32)   # (B, L, Cin)
    if B_pad != B:
        x_blc = jnp.pad(x_blc, ((0, B_pad - B), (0, 0), (0, 0)))
    # Lane-dense 2-D activation layout: row = b*L + l, lanes = channels.
    x_flat = x_blc.reshape(B_pad * L, C_in)

    R = TB * L                               # activation rows per grid step

    # ---------------- kernel --------------------------------------------------
    def kernel(x_ref, wc1_ref, b1_ref, wc2_ref, b2_ref, wc3_ref, b3_ref,
               wl1_ref, bl1_ref, wh_ref, bh_ref, out_ref):

        def conv_relu(h, w_ref, b_ref, K):
            # h: (R, Cin) f32.  One small GEMM per tap; f32 vreg accumulation.
            # Rows b*L + l are valid for l < Lout; invalid tail rows carry
            # garbage that is never read by later layers (valid region shrinks
            # by K-1 each layer, and taps only look forward).
            cin = h.shape[1]
            hp = jnp.concatenate(
                [h, jnp.zeros((K - 1, cin), h.dtype)], axis=0).astype(cdt)
            w = w_ref[...]                               # (K, Cin, Cout)
            y = None
            for k in range(K):                           # static unroll, K<=11
                part = jnp.dot(hp[k:k + R, :], w[k],
                               preferred_element_type=jnp.float32)
                y = part if y is None else y + part
            return jnp.maximum(y + b_ref[...], 0.0)      # (R, Cout) f32

        h1 = conv_relu(x_ref[...], wc1_ref, b1_ref, K1)  # (R, C1)
        h2 = conv_relu(h1, wc2_ref, b2_ref, K2)          # (R, C2)
        h3 = conv_relu(h2, wc3_ref, b3_ref, K3)          # (R, C3)

        # Position-major flatten: the single relayout in the whole kernel.
        flat = h3.reshape(TB, L, C3)[:, :L3, :].reshape(TB, L3 * C3)

        h = jnp.maximum(
            jnp.dot(flat.astype(cdt), wl1_ref[...],
                    preferred_element_type=jnp.float32) + bl1_ref[...], 0.0)

        out_ref[...] = (jnp.dot(h.astype(cdt), wh_ref[...],
                                preferred_element_type=jnp.float32)
                        + bh_ref[...])                   # (TB, HEAD_PAD)

    # ---------------- pallas_call ---------------------------------------------
    weights = [wc1, b1, wc2, b2, wc3, b3, wl1, bl1, whead, bhead]

    def full_spec(a):
        zeros = (0,) * a.ndim
        return pl.BlockSpec(a.shape, lambda b, _z=zeros: _z)

    in_specs = [pl.BlockSpec((R, C_in), lambda b: (b, 0))] + \
               [full_spec(a) for a in weights]
    out_specs = pl.BlockSpec((TB, HEAD_PAD), lambda b: (b, 0))
    out_shape = jax.ShapeDtypeStruct((B_pad, HEAD_PAD), jnp.float32)

    flops = (2 * B_pad * L * (K1 * C_in * C1 + K2 * C1 * C2 + K3 * C2 * C3)
             + 2 * B_pad * (L3 * C3 * HID + HID * HEAD))
    bytes_accessed = (int(x_flat.size) * 4 + B_pad * HEAD_PAD * 4
                      + sum(int(w.size) * int(w.dtype.itemsize)
                            for w in weights))

    out = pl.pallas_call(
        kernel,
        grid=(n_blocks,),
        in_specs=in_specs,
        out_specs=out_specs,
        out_shape=out_shape,
        compiler_params=pltpu.CompilerParams(
            dimension_semantics=("parallel",),
            vmem_limit_bytes=32 * 1024 * 1024),
        cost_estimate=pl.CostEstimate(flops=int(flops), transcendentals=0,
                                      bytes_accessed=int(bytes_accessed)),
    )(x_flat, *weights)

    out = out[:B]
    return out[:, :LATENT], out[:, LATENT:HEAD]


def _reference_forward(x_ncw, params):
    """Pure-JAX replica of the PyTorch forward (correctness check only)."""
    def conv(h, w, b):                       # h: (B, Cin, L), w: (Cout, Cin, K)
        K = w.shape[2]
        Lout = h.shape[2] - K + 1
        y = b[None, :, None]
        for k in range(K):
            y = y + jnp.einsum('bcl,oc->bol', h[:, :, k:k + Lout], w[:, :, k])
        return jax.nn.relu(y)

    h = conv(x_ncw, params["conv1_w"], params["conv1_b"])
    h = conv(h, params["conv2_w"], params["conv2_b"])
    h = conv(h, params["conv3_w"], params["conv3_b"])
    flat = h.reshape(h.shape[0], -1)                              # channel-major
    hh = jax.nn.relu(flat @ params["w1_w"].T + params["w1_b"])
    z_mean = hh @ params["mean_w"].T + params["mean_b"]
    z_log_var = hh @ params["logvar_w"].T + params["logvar_b"]
    return z_mean, z_log_var


if __name__ == "__main__":
    B, DECISION_DIM, MAX_LEN, LATENT = 2, 8, 32, 16
    key = jax.random.PRNGKey(0)
    kx, kp = jax.random.split(key)
    x = jax.random.normal(kx, (B, DECISION_DIM, MAX_LEN), jnp.float32)  # NCW
    params = make_cnn_encoder_params(kp, MAX_LEN, LATENT, DECISION_DIM)

    ref_mean, ref_logvar = _reference_forward(x, params)

    # Strict-parity f32 path.
    z_mean, z_log_var = cnn_encoder_forward(x, params)
    jax.block_until_ready((z_mean, z_log_var))
    assert z_mean.shape == (B, LATENT)
    assert z_log_var.shape == (B, LATENT)
    np.testing.assert_allclose(np.asarray(z_mean), np.asarray(ref_mean),
                               rtol=1e-4, atol=1e-4)
    np.testing.assert_allclose(np.asarray(z_log_var), np.asarray(ref_logvar),
                               rtol=1e-4, atol=1e-4)

    # bf16-operand path (f32 accumulation), looser tolerance.
    z_mean_bf, z_log_var_bf = cnn_encoder_forward(x, params, use_bf16=True)
    jax.block_until_ready((z_mean_bf, z_log_var_bf))
    np.testing.assert_allclose(np.asarray(z_mean_bf), np.asarray(ref_mean),
                               rtol=5e-2, atol=5e-2)
    np.testing.assert_allclose(np.asarray(z_log_var_bf), np.asarray(ref_logvar),
                               rtol=5e-2, atol=5e-2)

    print("KERNEL_OK")
</pallas_src>

<mosaic_0001>
module attributes {stable_mosaic.version = 11 : i64} {
  func.func @kernel(%arg0: i32, %arg1: memref<256x8xf32, #tpu.memory_space<vmem>>, %arg2: memref<9x8x9xf32, #tpu.memory_space<vmem>>, %arg3: memref<1x9xf32, #tpu.memory_space<vmem>>, %arg4: memref<9x9x9xf32, #tpu.memory_space<vmem>>, %arg5: memref<1x9xf32, #tpu.memory_space<vmem>>, %arg6: memref<11x9x10xf32, #tpu.memory_space<vmem>>, %arg7: memref<1x10xf32, #tpu.memory_space<vmem>>, %arg8: memref<60x435xf32, #tpu.memory_space<vmem>>, %arg9: memref<1x435xf32, #tpu.memory_space<vmem>>, %arg10: memref<435x128xf32, #tpu.memory_space<vmem>>, %arg11: memref<1x128xf32, #tpu.memory_space<vmem>>, %arg12: memref<8x128xf32, #tpu.memory_space<vmem>>) attributes {dimension_semantics = [#tpu.dimension_semantics<parallel>], iteration_bounds = array<i64: 2>, scalar_prefetch = 0 : i64, scratch_operands = 0 : i64, tpu.core_type = #tpu.core_type<tc>, window_params = [{transform_indices = @transform_0, window_bounds = array<i64: 256, 8>}, {pipeline_mode = #tpu.pipeline_mode<synchronous>, transform_indices = @transform_1, window_bounds = array<i64: 9, 8, 9>}, {pipeline_mode = #tpu.pipeline_mode<synchronous>, transform_indices = @transform_2, window_bounds = array<i64: 1, 9>}, {pipeline_mode = #tpu.pipeline_mode<synchronous>, transform_indices = @transform_3, window_bounds = array<i64: 9, 9, 9>}, {pipeline_mode = #tpu.pipeline_mode<synchronous>, transform_indices = @transform_4, window_bounds = array<i64: 1, 9>}, {pipeline_mode = #tpu.pipeline_mode<synchronous>, transform_indices = @transform_5, window_bounds = array<i64: 11, 9, 10>}, {pipeline_mode = #tpu.pipeline_mode<synchronous>, transform_indices = @transform_6, window_bounds = array<i64: 1, 10>}, {pipeline_mode = #tpu.pipeline_mode<synchronous>, transform_indices = @transform_7, window_bounds = array<i64: 60, 435>}, {pipeline_mode = #tpu.pipeline_mode<synchronous>, transform_indices = @transform_8, window_bounds = array<i64: 1, 435>}, {pipeline_mode = #tpu.pipeline_mode<synchronous>, transform_indices = @transform_9, window_bounds = array<i64: 435, 128>}, {pipeline_mode = #tpu.pipeline_mode<synchronous>, transform_indices = @transform_10, window_bounds = array<i64: 1, 128>}, {transform_indices = @transform_11, window_bounds = array<i64: 8, 128>}]} {
    %c0 = arith.constant 0 : index
    %c0_0 = arith.constant 0 : index
    %0 = vector.load %arg1[%c0, %c0_0] : memref<256x8xf32, #tpu.memory_space<vmem>>, vector<256x8xf32>
    %cst = arith.constant 0.000000e+00 : f32
    %1 = vector.broadcast %cst : f32 to vector<8x8xf32>
    %2 = tpu.concatenate %0, %1 in 0 : vector<256x8xf32>, vector<8x8xf32> -> vector<264x8xf32>
    %c0_1 = arith.constant 0 : index
    %c0_2 = arith.constant 0 : index
    %c0_3 = arith.constant 0 : index
    %3 = vector.load %arg2[%c0_1, %c0_2, %c0_3] : memref<9x8x9xf32, #tpu.memory_space<vmem>>, vector<9x8x9xf32>
    %4 = vector.extract_strided_slice %2 {offsets = [0, 0], sizes = [256, 8], strides = [1, 1]} : vector<264x8xf32> to vector<256x8xf32>
    %5 = vector.extract_strided_slice %3 {offsets = [0, 0, 0], sizes = [1, 8, 9], strides = [1, 1, 1]} : vector<9x8x9xf32> to vector<1x8x9xf32>
    %6 = vector.shape_cast %5 : vector<1x8x9xf32> to vector<8x9xf32>
    %cst_4 = arith.constant dense<0.000000e+00> : vector<256x9xf32>
    %7 = tpu.matmul %4, %6, %cst_4 {dimension_numbers = #tpu.dot_dimension_numbers<[1], [0], [0], [1], [0, 0, 1, 1], [], []>} : vector<256x8xf32>, vector<8x9xf32>, vector<256x9xf32> -> vector<256x9xf32>
    %8 = vector.extract_strided_slice %2 {offsets = [1, 0], sizes = [256, 8], strides = [1, 1]} : vector<264x8xf32> to vector<256x8xf32>
    %9 = vector.extract_strided_slice %3 {offsets = [1, 0, 0], sizes = [1, 8, 9], strides = [1, 1, 1]} : vector<9x8x9xf32> to vector<1x8x9xf32>
    %10 = vector.shape_cast %9 : vector<1x8x9xf32> to vector<8x9xf32>
    %cst_5 = arith.constant dense<0.000000e+00> : vector<256x9xf32>
    %11 = tpu.matmul %8, %10, %cst_5 {dimension_numbers = #tpu.dot_dimension_numbers<[1], [0], [0], [1], [0, 0, 1, 1], [], []>} : vector<256x8xf32>, vector<8x9xf32>, vector<256x9xf32> -> vector<256x9xf32>
    %12 = arith.addf %7, %11 : vector<256x9xf32>
    %13 = vector.extract_strided_slice %2 {offsets = [2, 0], sizes = [256, 8], strides = [1, 1]} : vector<264x8xf32> to vector<256x8xf32>
    %14 = vector.extract_strided_slice %3 {offsets = [2, 0, 0], sizes = [1, 8, 9], strides = [1, 1, 1]} : vector<9x8x9xf32> to vector<1x8x9xf32>
    %15 = vector.shape_cast %14 : vector<1x8x9xf32> to vector<8x9xf32>
    %cst_6 = arith.constant dense<0.000000e+00> : vector<256x9xf32>
    %16 = tpu.matmul %13, %15, %cst_6 {dimension_numbers = #tpu.dot_dimension_numbers<[1], [0], [0], [1], [0, 0, 1, 1], [], []>} : vector<256x8xf32>, vector<8x9xf32>, vector<256x9xf32> -> vector<256x9xf32>
    %17 = arith.addf %12, %16 : vector<256x9xf32>
    %18 = vector.extract_strided_slice %2 {offsets = [3, 0], sizes = [256, 8], strides = [1, 1]} : vector<264x8xf32> to vector<256x8xf32>
    %19 = vector.extract_strided_slice %3 {offsets = [3, 0, 0], sizes = [1, 8, 9], strides = [1, 1, 1]} : vector<9x8x9xf32> to vector<1x8x9xf32>
    %20 = vector.shape_cast %19 : vector<1x8x9xf32> to vector<8x9xf32>
    %cst_7 = arith.constant dense<0.000000e+00> : vector<256x9xf32>
    %21 = tpu.matmul %18, %20, %cst_7 {dimension_numbers = #tpu.dot_dimension_numbers<[1], [0], [0], [1], [0, 0, 1, 1], [], []>} : vector<256x8xf32>, vector<8x9xf32>, vector<256x9xf32> -> vector<256x9xf32>
    %22 = arith.addf %17, %21 : vector<256x9xf32>
    %23 = vector.extract_strided_slice %2 {offsets = [4, 0], sizes = [256, 8], strides = [1, 1]} : vector<264x8xf32> to vector<256x8xf32>
    %24 = vector.extract_strided_slice %3 {offsets = [4, 0, 0], sizes = [1, 8, 9], strides = [1, 1, 1]} : vector<9x8x9xf32> to vector<1x8x9xf32>
    %25 = vector.shape_cast %24 : vector<1x8x9xf32> to vector<8x9xf32>
    %cst_8 = arith.constant dense<0.000000e+00> : vector<256x9xf32>
    %26 = tpu.matmul %23, %25, %cst_8 {dimension_numbers = #tpu.dot_dimension_numbers<[1], [0], [0], [1], [0, 0, 1, 1], [], []>} : vector<256x8xf32>, vector<8x9xf32>, vector<256x9xf32> -> vector<256x9xf32>
    %27 = arith.addf %22, %26 : vector<256x9xf32>
    %28 = vector.extract_strided_slice %2 {offsets = [5, 0], sizes = [256, 8], strides = [1, 1]} : vector<264x8xf32> to vector<256x8xf32>
    %29 = vector.extract_strided_slice %3 {offsets = [5, 0, 0], sizes = [1, 8, 9], strides = [1, 1, 1]} : vector<9x8x9xf32> to vector<1x8x9xf32>
    %30 = vector.shape_cast %29 : vector<1x8x9xf32> to vector<8x9xf32>
    %cst_9 = arith.constant dense<0.000000e+00> : vector<256x9xf32>
    %31 = tpu.matmul %28, %30, %cst_9 {dimension_numbers = #tpu.dot_dimension_numbers<[1], [0], [0], [1], [0, 0, 1, 1], [], []>} : vector<256x8xf32>, vector<8x9xf32>, vector<256x9xf32> -> vector<256x9xf32>
    %32 = arith.addf %27, %31 : vector<256x9xf32>
    %33 = vector.extract_strided_slice %2 {offsets = [6, 0], sizes = [256, 8], strides = [1, 1]} : vector<264x8xf32> to vector<256x8xf32>
    %34 = vector.extract_strided_slice %3 {offsets = [6, 0, 0], sizes = [1, 8, 9], strides = [1, 1, 1]} : vector<9x8x9xf32> to vector<1x8x9xf32>
    %35 = vector.shape_cast %34 : vector<1x8x9xf32> to vector<8x9xf32>
    %cst_10 = arith.constant dense<0.000000e+00> : vector<256x9xf32>
    %36 = tpu.matmul %33, %35, %cst_10 {dimension_numbers = #tpu.dot_dimension_numbers<[1], [0], [0], [1], [0, 0, 1, 1], [], []>} : vector<256x8xf32>, vector<8x9xf32>, vector<256x9xf32> -> vector<256x9xf32>
    %37 = arith.addf %32, %36 : vector<256x9xf32>
    %38 = vector.extract_strided_slice %2 {offsets = [7, 0], sizes = [256, 8], strides = [1, 1]} : vector<264x8xf32> to vector<256x8xf32>
    %39 = vector.extract_strided_slice %3 {offsets = [7, 0, 0], sizes = [1, 8, 9], strides = [1, 1, 1]} : vector<9x8x9xf32> to vector<1x8x9xf32>
    %40 = vector.shape_cast %39 : vector<1x8x9xf32> to vector<8x9xf32>
    %cst_11 = arith.constant dense<0.000000e+00> : vector<256x9xf32>
    %41 = tpu.matmul %38, %40, %cst_11 {dimension_numbers = #tpu.dot_dimension_numbers<[1], [0], [0], [1], [0, 0, 1, 1], [], []>} : vector<256x8xf32>, vector<8x9xf32>, vector<256x9xf32> -> vector<256x9xf32>
    %42 = arith.addf %37, %41 : vector<256x9xf32>
    %43 = vector.extract_strided_slice %2 {offsets = [8, 0], sizes = [256, 8], strides = [1, 1]} : vector<264x8xf32> to vector<256x8xf32>
    %44 = vector.extract_strided_slice %3 {offsets = [8, 0, 0], sizes = [1, 8, 9], strides = [1, 1, 1]} : vector<9x8x9xf32> to vector<1x8x9xf32>
    %45 = vector.shape_cast %44 : vector<1x8x9xf32> to vector<8x9xf32>
    %cst_12 = arith.constant dense<0.000000e+00> : vector<256x9xf32>
    %46 = tpu.matmul %43, %45, %cst_12 {dimension_numbers = #tpu.dot_dimension_numbers<[1], [0], [0], [1], [0, 0, 1, 1], [], []>} : vector<256x8xf32>, vector<8x9xf32>, vector<256x9xf32> -> vector<256x9xf32>
    %47 = arith.addf %42, %46 : vector<256x9xf32>
    %c0_13 = arith.constant 0 : index
    %c0_14 = arith.constant 0 : index
    %48 = vector.load %arg3[%c0_13, %c0_14] : memref<1x9xf32, #tpu.memory_space<vmem>>, vector<1x9xf32>
    %49 = vector.broadcast %48 : vector<1x9xf32> to vector<256x9xf32>
    %50 = arith.addf %47, %49 : vector<256x9xf32>
    %cst_15 = arith.constant 0.000000e+00 : f32
    %51 = vector.broadcast %cst_15 : f32 to vector<256x9xf32>
    %52 = arith.maximumf %50, %51 : vector<256x9xf32>
    %cst_16 = arith.constant 0.000000e+00 : f32
    %53 = vector.broadcast %cst_16 : f32 to vector<8x9xf32>
    %54 = tpu.concatenate %52, %53 in 0 : vector<256x9xf32>, vector<8x9xf32> -> vector<264x9xf32>
    %c0_17 = arith.constant 0 : index
    %c0_18 = arith.constant 0 : index
    %c0_19 = arith.constant 0 : index
    %55 = vector.load %arg4[%c0_17, %c0_18, %c0_19] : memref<9x9x9xf32, #tpu.memory_space<vmem>>, vector<9x9x9xf32>
    %56 = vector.extract_strided_slice %54 {offsets = [0, 0], sizes = [256, 9], strides = [1, 1]} : vector<264x9xf32> to vector<256x9xf32>
    %57 = vector.extract_strided_slice %55 {offsets = [0, 0, 0], sizes = [1, 9, 9], strides = [1, 1, 1]} : vector<9x9x9xf32> to vector<1x9x9xf32>
    %58 = vector.shape_cast %57 : vector<1x9x9xf32> to vector<9x9xf32>
    %cst_20 = arith.constant dense<0.000000e+00> : vector<256x9xf32>
    %59 = tpu.matmul %56, %58, %cst_20 {dimension_numbers = #tpu.dot_dimension_numbers<[1], [0], [0], [1], [0, 0, 1, 1], [], []>} : vector<256x9xf32>, vector<9x9xf32>, vector<256x9xf32> -> vector<256x9xf32>
    %60 = vector.extract_strided_slice %54 {offsets = [1, 0], sizes = [256, 9], strides = [1, 1]} : vector<264x9xf32> to vector<256x9xf32>
    %61 = vector.extract_strided_slice %55 {offsets = [1, 0, 0], sizes = [1, 9, 9], strides = [1, 1, 1]} : vector<9x9x9xf32> to vector<1x9x9xf32>
    %62 = vector.shape_cast %61 : vector<1x9x9xf32> to vector<9x9xf32>
    %cst_21 = arith.constant dense<0.000000e+00> : vector<256x9xf32>
    %63 = tpu.matmul %60, %62, %cst_21 {dimension_numbers = #tpu.dot_dimension_numbers<[1], [0], [0], [1], [0, 0, 1, 1], [], []>} : vector<256x9xf32>, vector<9x9xf32>, vector<256x9xf32> -> vector<256x9xf32>
    %64 = arith.addf %59, %63 : vector<256x9xf32>
    %65 = vector.extract_strided_slice %54 {offsets = [2, 0], sizes = [256, 9], strides = [1, 1]} : vector<264x9xf32> to vector<256x9xf32>
    %66 = vector.extract_strided_slice %55 {offsets = [2, 0, 0], sizes = [1, 9, 9], strides = [1, 1, 1]} : vector<9x9x9xf32> to vector<1x9x9xf32>
    %67 = vector.shape_cast %66 : vector<1x9x9xf32> to vector<9x9xf32>
    %cst_22 = arith.constant dense<0.000000e+00> : vector<256x9xf32>
    %68 = tpu.matmul %65, %67, %cst_22 {dimension_numbers = #tpu.dot_dimension_numbers<[1], [0], [0], [1], [0, 0, 1, 1], [], []>} : vector<256x9xf32>, vector<9x9xf32>, vector<256x9xf32> -> vector<256x9xf32>
    %69 = arith.addf %64, %68 : vector<256x9xf32>
    %70 = vector.extract_strided_slice %54 {offsets = [3, 0], sizes = [256, 9], strides = [1, 1]} : vector<264x9xf32> to vector<256x9xf32>
    %71 = vector.extract_strided_slice %55 {offsets = [3, 0, 0], sizes = [1, 9, 9], strides = [1, 1, 1]} : vector<9x9x9xf32> to vector<1x9x9xf32>
    %72 = vector.shape_cast %71 : vector<1x9x9xf32> to vector<9x9xf32>
    %cst_23 = arith.constant dense<0.000000e+00> : vector<256x9xf32>
    %73 = tpu.matmul %70, %72, %cst_23 {dimension_numbers = #tpu.dot_dimension_numbers<[1], [0], [0], [1], [0, 0, 1, 1], [], []>} : vector<256x9xf32>, vector<9x9xf32>, vector<256x9xf32> -> vector<256x9xf32>
    %74 = arith.addf %69, %73 : vector<256x9xf32>
    %75 = vector.extract_strided_slice %54 {offsets = [4, 0], sizes = [256, 9], strides = [1, 1]} : vector<264x9xf32> to vector<256x9xf32>
    %76 = vector.extract_strided_slice %55 {offsets = [4, 0, 0], sizes = [1, 9, 9], strides = [1, 1, 1]} : vector<9x9x9xf32> to vector<1x9x9xf32>
    %77 = vector.shape_cast %76 : vector<1x9x9xf32> to vector<9x9xf32>
    %cst_24 = arith.constant dense<0.000000e+00> : vector<256x9xf32>
    %78 = tpu.matmul %75, %77, %cst_24 {dimension_numbers = #tpu.dot_dimension_numbers<[1], [0], [0], [1], [0, 0, 1, 1], [], []>} : vector<256x9xf32>, vector<9x9xf32>, vector<256x9xf32> -> vector<256x9xf32>
    %79 = arith.addf %74, %78 : vector<256x9xf32>
    %80 = vector.extract_strided_slice %54 {offsets = [5, 0], sizes = [256, 9], strides = [1, 1]} : vector<264x9xf32> to vector<256x9xf32>
    %81 = vector.extract_strided_slice %55 {offsets = [5, 0, 0], sizes = [1, 9, 9], strides = [1, 1, 1]} : vector<9x9x9xf32> to vector<1x9x9xf32>
    %82 = vector.shape_cast %81 : vector<1x9x9xf32> to vector<9x9xf32>
    %cst_25 = arith.constant dense<0.000000e+00> : vector<256x9xf32>
    %83 = tpu.matmul %80, %82, %cst_25 {dimension_numbers = #tpu.dot_dimension_numbers<[1], [0], [0], [1], [0, 0, 1, 1], [], []>} : vector<256x9xf32>, vector<9x9xf32>, vector<256x9xf32> -> vector<256x9xf32>
    %84 = arith.addf %79, %83 : vector<256x9xf32>
    %85 = vector.extract_strided_slice %54 {offsets = [6, 0], sizes = [256, 9], strides = [1, 1]} : vector<264x9xf32> to vector<256x9xf32>
    %86 = vector.extract_strided_slice %55 {offsets = [6, 0, 0], sizes = [1, 9, 9], strides = [1, 1, 1]} : vector<9x9x9xf32> to vector<1x9x9xf32>
    %87 = vector.shape_cast %86 : vector<1x9x9xf32> to vector<9x9xf32>
    %cst_26 = arith.constant dense<0.000000e+00> : vector<256x9xf32>
    %88 = tpu.matmul %85, %87, %cst_26 {dimension_numbers = #tpu.dot_dimension_numbers<[1], [0], [0], [1], [0, 0, 1, 1], [], []>} : vector<256x9xf32>, vector<9x9xf32>, vector<256x9xf32> -> vector<256x9xf32>
    %89 = arith.addf %84, %88 : vector<256x9xf32>
    %90 = vector.extract_strided_slice %54 {offsets = [7, 0], sizes = [256, 9], strides = [1, 1]} : vector<264x9xf32> to vector<256x9xf32>
    %91 = vector.extract_strided_slice %55 {offsets = [7, 0, 0], sizes = [1, 9, 9], strides = [1, 1, 1]} : vector<9x9x9xf32> to vector<1x9x9xf32>
    %92 = vector.shape_cast %91 : vector<1x9x9xf32> to vector<9x9xf32>
    %cst_27 = arith.constant dense<0.000000e+00> : vector<256x9xf32>
    %93 = tpu.matmul %90, %92, %cst_27 {dimension_numbers = #tpu.dot_dimension_numbers<[1], [0], [0], [1], [0, 0, 1, 1], [], []>} : vector<256x9xf32>, vector<9x9xf32>, vector<256x9xf32> -> vector<256x9xf32>
    %94 = arith.addf %89, %93 : vector<256x9xf32>
    %95 = vector.extract_strided_slice %54 {offsets = [8, 0], sizes = [256, 9], strides = [1, 1]} : vector<264x9xf32> to vector<256x9xf32>
    %96 = vector.extract_strided_slice %55 {offsets = [8, 0, 0], sizes = [1, 9, 9], strides = [1, 1, 1]} : vector<9x9x9xf32> to vector<1x9x9xf32>
    %97 = vector.shape_cast %96 : vector<1x9x9xf32> to vector<9x9xf32>
    %cst_28 = arith.constant dense<0.000000e+00> : vector<256x9xf32>
    %98 = tpu.matmul %95, %97, %cst_28 {dimension_numbers = #tpu.dot_dimension_numbers<[1], [0], [0], [1], [0, 0, 1, 1], [], []>} : vector<256x9xf32>, vector<9x9xf32>, vector<256x9xf32> -> vector<256x9xf32>
    %99 = arith.addf %94, %98 : vector<256x9xf32>
    %c0_29 = arith.constant 0 : index
    %c0_30 = arith.constant 0 : index
    %100 = vector.load %arg5[%c0_29, %c0_30] : memref<1x9xf32, #tpu.memory_space<vmem>>, vector<1x9xf32>
    %101 = vector.broadcast %100 : vector<1x9xf32> to vector<256x9xf32>
    %102 = arith.addf %99, %101 : vector<256x9xf32>
    %cst_31 = arith.constant 0.000000e+00 : f32
    %103 = vector.broadcast %cst_31 : f32 to vector<256x9xf32>
    %104 = arith.maximumf %102, %103 : vector<256x9xf32>
    %cst_32 = arith.constant 0.000000e+00 : f32
    %105 = vector.broadcast %cst_32 : f32 to vector<10x9xf32>
    %106 = tpu.concatenate %104, %105 in 0 : vector<256x9xf32>, vector<10x9xf32> -> vector<266x9xf32>
    %c0_33 = arith.constant 0 : index
    %c0_34 = arith.constant 0 : index
    %c0_35 = arith.constant 0 : index
    %107 = vector.load %arg6[%c0_33, %c0_34, %c0_35] : memref<11x9x10xf32, #tpu.memory_space<vmem>>, vector<11x9x10xf32>
    %108 = vector.extract_strided_slice %106 {offsets = [0, 0], sizes = [256, 9], strides = [1, 1]} : vector<266x9xf32> to vector<256x9xf32>
    %109 = vector.extract_strided_slice %107 {offsets = [0, 0, 0], sizes = [1, 9, 10], strides = [1, 1, 1]} : vector<11x9x10xf32> to vector<1x9x10xf32>
    %110 = vector.shape_cast %109 : vector<1x9x10xf32> to vector<9x10xf32>
    %cst_36 = arith.constant dense<0.000000e+00> : vector<256x10xf32>
    %111 = tpu.matmul %108, %110, %cst_36 {dimension_numbers = #tpu.dot_dimension_numbers<[1], [0], [0], [1], [0, 0, 1, 1], [], []>} : vector<256x9xf32>, vector<9x10xf32>, vector<256x10xf32> -> vector<256x10xf32>
    %112 = vector.extract_strided_slice %106 {offsets = [1, 0], sizes = [256, 9], strides = [1, 1]} : vector<266x9xf32> to vector<256x9xf32>
    %113 = vector.extract_strided_slice %107 {offsets = [1, 0, 0], sizes = [1, 9, 10], strides = [1, 1, 1]} : vector<11x9x10xf32> to vector<1x9x10xf32>
    %114 = vector.shape_cast %113 : vector<1x9x10xf32> to vector<9x10xf32>
    %cst_37 = arith.constant dense<0.000000e+00> : vector<256x10xf32>
    %115 = tpu.matmul %112, %114, %cst_37 {dimension_numbers = #tpu.dot_dimension_numbers<[1], [0], [0], [1], [0, 0, 1, 1], [], []>} : vector<256x9xf32>, vector<9x10xf32>, vector<256x10xf32> -> vector<256x10xf32>
    %116 = arith.addf %111, %115 : vector<256x10xf32>
    %117 = vector.extract_strided_slice %106 {offsets = [2, 0], sizes = [256, 9], strides = [1, 1]} : vector<266x9xf32> to vector<256x9xf32>
    %118 = vector.extract_strided_slice %107 {offsets = [2, 0, 0], sizes = [1, 9, 10], strides = [1, 1, 1]} : vector<11x9x10xf32> to vector<1x9x10xf32>
    %119 = vector.shape_cast %118 : vector<1x9x10xf32> to vector<9x10xf32>
    %cst_38 = arith.constant dense<0.000000e+00> : vector<256x10xf32>
    %120 = tpu.matmul %117, %119, %cst_38 {dimension_numbers = #tpu.dot_dimension_numbers<[1], [0], [0], [1], [0, 0, 1, 1], [], []>} : vector<256x9xf32>, vector<9x10xf32>, vector<256x10xf32> -> vector<256x10xf32>
    %121 = arith.addf %116, %120 : vector<256x10xf32>
    %122 = vector.extract_strided_slice %106 {offsets = [3, 0], sizes = [256, 9], strides = [1, 1]} : vector<266x9xf32> to vector<256x9xf32>
    %123 = vector.extract_strided_slice %107 {offsets = [3, 0, 0], sizes = [1, 9, 10], strides = [1, 1, 1]} : vector<11x9x10xf32> to vector<1x9x10xf32>
    %124 = vector.shape_cast %123 : vector<1x9x10xf32> to vector<9x10xf32>
    %cst_39 = arith.constant dense<0.000000e+00> : vector<256x10xf32>
    %125 = tpu.matmul %122, %124, %cst_39 {dimension_numbers = #tpu.dot_dimension_numbers<[1], [0], [0], [1], [0, 0, 1, 1], [], []>} : vector<256x9xf32>, vector<9x10xf32>, vector<256x10xf32> -> vector<256x10xf32>
    %126 = arith.addf %121, %125 : vector<256x10xf32>
    %127 = vector.extract_strided_slice %106 {offsets = [4, 0], sizes = [256, 9], strides = [1, 1]} : vector<266x9xf32> to vector<256x9xf32>
    %128 = vector.extract_strided_slice %107 {offsets = [4, 0, 0], sizes = [1, 9, 10], strides = [1, 1, 1]} : vector<11x9x10xf32> to vector<1x9x10xf32>
    %129 = vector.shape_cast %128 : vector<1x9x10xf32> to vector<9x10xf32>
    %cst_40 = arith.constant dense<0.000000e+00> : vector<256x10xf32>
    %130 = tpu.matmul %127, %129, %cst_40 {dimension_numbers = #tpu.dot_dimension_numbers<[1], [0], [0], [1], [0, 0, 1, 1], [], []>} : vector<256x9xf32>, vector<9x10xf32>, vector<256x10xf32> -> vector<256x10xf32>
    %131 = arith.addf %126, %130 : vector<256x10xf32>
    %132 = vector.extract_strided_slice %106 {offsets = [5, 0], sizes = [256, 9], strides = [1, 1]} : vector<266x9xf32> to vector<256x9xf32>
    %133 = vector.extract_strided_slice %107 {offsets = [5, 0, 0], sizes = [1, 9, 10], strides = [1, 1, 1]} : vector<11x9x10xf32> to vector<1x9x10xf32>
    %134 = vector.shape_cast %133 : vector<1x9x10xf32> to vector<9x10xf32>
    %cst_41 = arith.constant dense<0.000000e+00> : vector<256x10xf32>
    %135 = tpu.matmul %132, %134, %cst_41 {dimension_numbers = #tpu.dot_dimension_numbers<[1], [0], [0], [1], [0, 0, 1, 1], [], []>} : vector<256x9xf32>, vector<9x10xf32>, vector<256x10xf32> -> vector<256x10xf32>
    %136 = arith.addf %131, %135 : vector<256x10xf32>
    %137 = vector.extract_strided_slice %106 {offsets = [6, 0], sizes = [256, 9], strides = [1, 1]} : vector<266x9xf32> to vector<256x9xf32>
    %138 = vector.extract_strided_slice %107 {offsets = [6, 0, 0], sizes = [1, 9, 10], strides = [1, 1, 1]} : vector<11x9x10xf32> to vector<1x9x10xf32>
    %139 = vector.shape_cast %138 : vector<1x9x10xf32> to vector<9x10xf32>
    %cst_42 = arith.constant dense<0.000000e+00> : vector<256x10xf32>
    %140 = tpu.matmul %137, %139, %cst_42 {dimension_numbers = #tpu.dot_dimension_numbers<[1], [0], [0], [1], [0, 0, 1, 1], [], []>} : vector<256x9xf32>, vector<9x10xf32>, vector<256x10xf32> -> vector<256x10xf32>
    %141 = arith.addf %136, %140 : vector<256x10xf32>
    %142 = vector.extract_strided_slice %106 {offsets = [7, 0], sizes = [256, 9], strides = [1, 1]} : vector<266x9xf32> to vector<256x9xf32>
    %143 = vector.extract_strided_slice %107 {offsets = [7, 0, 0], sizes = [1, 9, 10], strides = [1, 1, 1]} : vector<11x9x10xf32> to vector<1x9x10xf32>
    %144 = vector.shape_cast %143 : vector<1x9x10xf32> to vector<9x10xf32>
    %cst_43 = arith.constant dense<0.000000e+00> : vector<256x10xf32>
    %145 = tpu.matmul %142, %144, %cst_43 {dimension_numbers = #tpu.dot_dimension_numbers<[1], [0], [0], [1], [0, 0, 1, 1], [], []>} : vector<256x9xf32>, vector<9x10xf32>, vector<256x10xf32> -> vector<256x10xf32>
    %146 = arith.addf %141, %145 : vector<256x10xf32>
    %147 = vector.extract_strided_slice %106 {offsets = [8, 0], sizes = [256, 9], strides = [1, 1]} : vector<266x9xf32> to vector<256x9xf32>
    %148 = vector.extract_strided_slice %107 {offsets = [8, 0, 0], sizes = [1, 9, 10], strides = [1, 1, 1]} : vector<11x9x10xf32> to vector<1x9x10xf32>
    %149 = vector.shape_cast %148 : vector<1x9x10xf32> to vector<9x10xf32>
    %cst_44 = arith.constant dense<0.000000e+00> : vector<256x10xf32>
    %150 = tpu.matmul %147, %149, %cst_44 {dimension_numbers = #tpu.dot_dimension_numbers<[1], [0], [0], [1], [0, 0, 1, 1], [], []>} : vector<256x9xf32>, vector<9x10xf32>, vector<256x10xf32> -> vector<256x10xf32>
    %151 = arith.addf %146, %150 : vector<256x10xf32>
    %152 = vector.extract_strided_slice %106 {offsets = [9, 0], sizes = [256, 9], strides = [1, 1]} : vector<266x9xf32> to vector<256x9xf32>
    %153 = vector.extract_strided_slice %107 {offsets = [9, 0, 0], sizes = [1, 9, 10], strides = [1, 1, 1]} : vector<11x9x10xf32> to vector<1x9x10xf32>
    %154 = vector.shape_cast %153 : vector<1x9x10xf32> to vector<9x10xf32>
    %cst_45 = arith.constant dense<0.000000e+00> : vector<256x10xf32>
    %155 = tpu.matmul %152, %154, %cst_45 {dimension_numbers = #tpu.dot_dimension_numbers<[1], [0], [0], [1], [0, 0, 1, 1], [], []>} : vector<256x9xf32>, vector<9x10xf32>, vector<256x10xf32> -> vector<256x10xf32>
    %156 = arith.addf %151, %155 : vector<256x10xf32>
    %157 = vector.extract_strided_slice %106 {offsets = [10, 0], sizes = [256, 9], strides = [1, 1]} : vector<266x9xf32> to vector<256x9xf32>
    %158 = vector.extract_strided_slice %107 {offsets = [10, 0, 0], sizes = [1, 9, 10], strides = [1, 1, 1]} : vector<11x9x10xf32> to vector<1x9x10xf32>
    %159 = vector.shape_cast %158 : vector<1x9x10xf32> to vector<9x10xf32>
    %cst_46 = arith.constant dense<0.000000e+00> : vector<256x10xf32>
    %160 = tpu.matmul %157, %159, %cst_46 {dimension_numbers = #tpu.dot_dimension_numbers<[1], [0], [0], [1], [0, 0, 1, 1], [], []>} : vector<256x9xf32>, vector<9x10xf32>, vector<256x10xf32> -> vector<256x10xf32>
    %161 = arith.addf %156, %160 : vector<256x10xf32>
    %c0_47 = arith.constant 0 : index
    %c0_48 = arith.constant 0 : index
    %162 = vector.load %arg7[%c0_47, %c0_48] : memref<1x10xf32, #tpu.memory_space<vmem>>, vector<1x10xf32>
    %163 = vector.broadcast %162 : vector<1x10xf32> to vector<256x10xf32>
    %164 = arith.addf %161, %163 : vector<256x10xf32>
    %cst_49 = arith.constant 0.000000e+00 : f32
    %165 = vector.broadcast %cst_49 : f32 to vector<256x10xf32>
    %166 = arith.maximumf %164, %165 : vector<256x10xf32>
    %167 = vector.shape_cast %166 : vector<256x10xf32> to vector<8x32x10xf32>
    %168 = vector.extract_strided_slice %167 {offsets = [0, 0, 0], sizes = [8, 6, 10], strides = [1, 1, 1]} : vector<8x32x10xf32> to vector<8x6x10xf32>
    %169 = vector.shape_cast %168 : vector<8x6x10xf32> to vector<8x60xf32>
    %c0_50 = arith.constant 0 : index
    %c0_51 = arith.constant 0 : index
    %170 = vector.load %arg8[%c0_50, %c0_51] : memref<60x435xf32, #tpu.memory_space<vmem>>, vector<60x435xf32>
    %cst_52 = arith.constant dense<0.000000e+00> : vector<8x435xf32>
    %171 = tpu.matmul %169, %170, %cst_52 {dimension_numbers = #tpu.dot_dimension_numbers<[1], [0], [0], [1], [0, 0, 1, 1], [], []>} : vector<8x60xf32>, vector<60x435xf32>, vector<8x435xf32> -> vector<8x435xf32>
    %c0_53 = arith.constant 0 : index
    %c0_54 = arith.constant 0 : index
    %172 = vector.load %arg9[%c0_53, %c0_54] : memref<1x435xf32, #tpu.memory_space<vmem>>, vector<1x435xf32>
    %173 = vector.broadcast %172 : vector<1x435xf32> to vector<8x435xf32>
    %174 = arith.addf %171, %173 : vector<8x435xf32>
    %cst_55 = arith.constant 0.000000e+00 : f32
    %175 = vector.broadcast %cst_55 : f32 to vector<8x435xf32>
    %176 = arith.maximumf %174, %175 : vector<8x435xf32>
    %c0_56 = arith.constant 0 : index
    %c0_57 = arith.constant 0 : index
    %177 = vector.load %arg10[%c0_56, %c0_57] : memref<435x128xf32, #tpu.memory_space<vmem>>, vector<435x128xf32>
    %cst_58 = arith.constant dense<0.000000e+00> : vector<8x128xf32>
    %178 = tpu.matmul %176, %177, %cst_58 {dimension_numbers = #tpu.dot_dimension_numbers<[1], [0], [0], [1], [0, 0, 1, 1], [], []>} : vector<8x435xf32>, vector<435x128xf32>, vector<8x128xf32> -> vector<8x128xf32>
    %c0_59 = arith.constant 0 : index
    %c0_60 = arith.constant 0 : index
    %179 = vector.load %arg11[%c0_59, %c0_60] : memref<1x128xf32, #tpu.memory_space<vmem>>, vector<1x128xf32>
    %180 = vector.broadcast %179 : vector<1x128xf32> to vector<8x128xf32>
    %181 = arith.addf %178, %180 : vector<8x128xf32>
    %c0_61 = arith.constant 0 : index
    %c0_62 = arith.constant 0 : index
    %182 = vector.load %arg12[%c0_61, %c0_62] : memref<8x128xf32, #tpu.memory_space<vmem>>, vector<8x128xf32>
    tpu.vector_store %arg12[%c0_61, %c0_62], %181 {strides = array<i32>} : memref<8x128xf32, #tpu.memory_space<vmem>>, vector<8x128xf32>,
    return
  }
  func.func @transform_0(%arg0: i32) -> (i32, i32) {
    %c0_i32 = arith.constant 0 : i32
    %c0_i32_0 = arith.constant 0 : i32
    return %arg0, %c0_i32 : i32, i32
  }
  func.func @transform_1(%arg0: i32) -> (i32, i32, i32) {
    %c0_i32 = arith.constant 0 : i32
    %c0_i32_0 = arith.constant 0 : i32
    %c0_i32_1 = arith.constant 0 : i32
    %c0_i32_2 = arith.constant 0 : i32
    return %c0_i32, %c0_i32_0, %c0_i32_1 : i32, i32, i32
  }
  func.func @transform_2(%arg0: i32) -> (i32, i32) {
    %c0_i32 = arith.constant 0 : i32
    %c0_i32_0 = arith.constant 0 : i32
    %c0_i32_1 = arith.constant 0 : i32
    return %c0_i32, %c0_i32_0 : i32, i32
  }
  func.func @transform_3(%arg0: i32) -> (i32, i32, i32) {
    %c0_i32 = arith.constant 0 : i32
    %c0_i32_0 = arith.constant 0 : i32
    %c0_i32_1 = arith.constant 0 : i32
    %c0_i32_2 = arith.constant 0 : i32
    return %c0_i32, %c0_i32_0, %c0_i32_1 : i32, i32, i32
  }
  func.func @transform_4(%arg0: i32) -> (i32, i32) {
    %c0_i32 = arith.constant 0 : i32
    %c0_i32_0 = arith.constant 0 : i32
    %c0_i32_1 = arith.constant 0 : i32
    return %c0_i32, %c0_i32_0 : i32, i32
  }
  func.func @transform_5(%arg0: i32) -> (i32, i32, i32) {
    %c0_i32 = arith.constant 0 : i32
    %c0_i32_0 = arith.constant 0 : i32
    %c0_i32_1 = arith.constant 0 : i32
    %c0_i32_2 = arith.constant 0 : i32
    return %c0_i32, %c0_i32_0, %c0_i32_1 : i32, i32, i32
  }
  func.func @transform_6(%arg0: i32) -> (i32, i32) {
    %c0_i32 = arith.constant 0 : i32
    %c0_i32_0 = arith.constant 0 : i32
    %c0_i32_1 = arith.constant 0 : i32
    return %c0_i32, %c0_i32_0 : i32, i32
  }
  func.func @transform_7(%arg0: i32) -> (i32, i32) {
    %c0_i32 = arith.constant 0 : i32
    %c0_i32_0 = arith.constant 0 : i32
    %c0_i32_1 = arith.constant 0 : i32
    return %c0_i32, %c0_i32_0 : i32, i32
  }
  func.func @transform_8(%arg0: i32) -> (i32, i32) {
    %c0_i32 = arith.constant 0 : i32
    %c0_i32_0 = arith.constant 0 : i32
    %c0_i32_1 = arith.constant 0 : i32
    return %c0_i32, %c0_i32_0 : i32, i32
  }
  func.func @transform_9(%arg0: i32) -> (i32, i32) {
    %c0_i32 = arith.constant 0 : i32
    %c0_i32_0 = arith.constant 0 : i32
    %c0_i32_1 = arith.constant 0 : i32
    return %c0_i32, %c0_i32_0 : i32, i32
  }
  func.func @transform_10(%arg0: i32) -> (i32, i32) {
    %c0_i32 = arith.constant 0 : i32
    %c0_i32_0 = arith.constant 0 : i32
    %c0_i32_1 = arith.constant 0 : i32
    return %c0_i32, %c0_i32_0 : i32, i32
  }
  func.func @transform_11(%arg0: i32) -> (i32, i32) {
    %c0_i32 = arith.constant 0 : i32
    %c0_i32_0 = arith.constant 0 : i32
    return %arg0, %c0_i32 : i32, i32
  }
}

</mosaic_0001>

<bundles_post_ra>
// kernel: tpu_custom_call.1
= control target key start
LH: loop header
LB: loop body
LE: loop exit
PB: predicated region body
PF: predicated region fallthrough
CT: control target
= control target key end

     0   :  { %s20159_s0 = inlined_call_operand.vmem [shape: f32[512,8], index: 0, kind: input, shape index: {}]   ;;  %s20160_s1 = inlined_call_operand.hbm [shape: f32[9,8,9], index: 1, kind: input, shape index: {}]   ;;  %s20161_s2 = inlined_call_operand.vmem [shape: f32[1,9], index: 2, kind: input, shape index: {}]   ;;  %s20162_s3 = inlined_call_operand.vmem [shape: f32[9,9,9], index: 3, kind: input, shape index: {}]   ;;  %s20163_s4 = inlined_call_operand.vmem [shape: f32[1,9], index: 4, kind: input, shape index: {}]   ;;  %s20164_s5 = inlined_call_operand.vmem [shape: f32[11,9,10], index: 5, kind: input, shape index: {}]   ;;  %s20165_s6 = inlined_call_operand.vmem [shape: f32[1,10], index: 6, kind: input, shape index: {}]   ;;  %s20166_s7 = inlined_call_operand.vmem [shape: f32[60,435], index: 7, kind: input, shape index: {}]   ;;  %s20167_s8 = inlined_call_operand.vmem [shape: f32[1,435], index: 8, kind: input, shape index: {}]   ;;  %s20168_s9 = inlined_call_operand.vmem [shape: f32[435,128], index: 9, kind: input, shape index: {}]   ;;  %s20169_s10 = inlined_call_operand.vmem [shape: f32[1,128], index: 10, kind: input, shape index: {}]   ;;  %s20170_s11 = inlined_call_operand.hbm [shape: f32[16,128], index: 11, kind: output, shape index: {}]  }
   0x1   :  { %20257 = sst [smem:[#allocation125_spill]] %s20159_s0 }
   0x2   :  { %16 = vsyncpa [#allocation3], 0 }
   0x3   :  { %17 = vsyncpa [#allocation4], 0 }
   0x4   :  { %19 = vsyncpa [#allocation4 + $0x1], 0  ;;  %s14881_s17 = smov 0   ;;  %s14883_s18 = smov 0  }
   0x5   :  { %s14885_s19 = smov 0   ;;  %s14887_s20 = smov 0  }
   0x6 LB: > { %s14902_s21 = sadd.s32 4294967295, %s14807_s20   ;;  %s11151_s22 = sadd.s32 4294967294, %s14807_s20   ;;  %s14807_s20 = sphi %s14887_s20, %s20806_s20   ;;  %s14803_s19 = sphi %s14885_s19, %s20805_s19   ;;  %s14799_s18 = sphi %s14883_s18, %s20804_s18   ;;  %s14795_s17 = sphi %s14881_s17, %s20803_s17  }
   0x7   : > { %s14906_s23 = sadd.s32 1, %s14807_s20   ;;  %s268_s24 = sadd.s32 1, %s14803_s19 }
   0x8   : > { %s265_s25 = ssub.s32 %s14807_s20, %s14906_s23  ;;  %p278_p0 = scmp.ne.s32.totalorder %s14803_s19, %s14799_s18 }
   0x9   : > { %p266_p1 = scmp.eq.s32.totalorder %s265_s25, 0  ;;  %p279_p2 = scmp.eq.s32.totalorder %s14902_s21, 1 }
   0xa   : > { %p284_p3 = scmp.ne.s32.totalorder %s14799_s18, %s14795_s17  ;;  %p285_p4 = scmp.eq.s32.totalorder %s11151_s22, 1 }
   0xb   : > { %s14917_s26 = scalar_select %p266_p1, %s14803_s19, %s268_s24  }
   0xc   : > { %p14919_p5 = por %p279_p2, %p278_p0  ;;  %p14923_p6 = por %p285_p4, %p284_p3 }
   0xd   : > { %20258 = sst [smem:[#allocation8_spill]] %s14917_s26  ;;  %p11152_p7 = scmp.ge.s32.totalorder %s14807_s20, 1 }
   0xe   : > { %s20260_s28 = scalar_select %p14923_p6, 1, 0 }
   0xf   : > { %p292_p8 = scmp.lt.s32.totalorder %s14807_s20, 3  ;;  %p14639_p9 = scmp.eq.s32.totalorder %s14902_s21, 0 }
  0x10   : > { %s14809_s30 = smov [#allocation2]  }
  0x11   : > { %p14930_p10 = pnand %p11152_p7, %p292_p8  ;;  %s304_s12 = sshll.u32 %s14809_s30, 4  ;;  %s305_s12 = int_to_ptr.vmem [resolvable:$true] %s304_s12 }
  0x12   : > { %s14728_s13 = scalar_lea.vmem %s305_s12, 1152  ;;  %p14736_p3 = scmp.lt.s32.totalorder %s305_s12, %s305_s12 }
  0x13   : > { %p14631_p11 = pneg %p14930_p10  ;;  %p14729_p0 = scmp.ne.s32.totalorder %s305_s12, %s14728_s13 }
  0x14   : > { %p14737_p4 = scmp.lt.s32.totalorder %s14728_s13, %s14728_s13 }
  0x15   : > { %p14632_p12 = pnand %p14639_p9, %p14631_p11 }
  0x16   : > { %p14738_p6 = por %p14737_p4, %p14736_p3 }
  0x17   : > { %p14719_p13 = pneg %p14632_p12 }
  0x19   : > { %p14731_p1 = pnand %p14729_p0, %p14719_p13 }
  0x1b   : > { %p14732_p2 = pneg %p14731_p1 }
  0x1d   : > { %p14739_p7 = pnand %p14738_p6, %p14732_p2 }
  0x1f   : > { %14742 = shalt.err (!%p14739_p7)
}
  0x20   : > { %s14810_s14 = smov 128   ;;  %s14811_s15 = smov 8  }
  0x21   : > { %14634 = dma.hbm_to_vmem [thread:$0]  (!%p14632_p12), %s20160_s1, 1152, %s305_s12, [#allocation3], %s14810_s14, %s14810_s14, %s14811_s15  }
  0x22   : > { %356 = sbr.rel (%p14930_p10) target bundleno = 2109 (0x83d), region = 64 }
  0x27   : > { %14786 = dma.done.wait (%p14639_p9), [#allocation3], 1152  }
  0x28   : > { %14788 = vsyncadd (%p14639_p9), [#allocation3], 4294966144  ;;  %s11158_s24 = sshll.u32 %s14902_s21, 5  ;;  %s20262_s0 = sld [smem:[#allocation125_spill]]  ;;  %v435_v0 = vld [vmem:[#allocation2 + $0x8] sm:$0xff]  ;;  %vm476_vm0 = vcmask 1046528  }
  0x29   : > { %p397_p8 = scmp.lt.s32.totalorder %s11158_s24, 63  ;;  %13133 = vmatprep.subr.mxu0 %v435_v0  ;;  %14623 = vmatprep.subr.mxu1 %v435_v0  ;;  %vm542_vm1 = vcmask 64512   ;;  %v436_v7 = vld [vmem:[#allocation2 + $0x10] sm:$0xff]  ;;  %v20171_v13 = vmov 0.0   ;;  %v434_v21 = vld [vmem:[#allocation2] sm:$0xff]  ;;  %v437_v42 = vld [vmem:[#allocation2 + $0x18] sm:$0xff] }
  0x2a   : > { %13134 = vmatpush3.msra.mxu0 %v435_v0  ;;  %14624 = vmatpush3.msra.mxu1 %v435_v0  ;;  %v14979_v14 = vrot.slane %v20171_v13, 1  ;;  %v15040_v46 = vld [vmem:[#allocation2 + $0x20] sm:$0xff]  ;;  %v15049_v48 = vld [vmem:[#allocation2 + $0x28] sm:$0xff]  ;;  %vm1121_vm2 = vcmask 1045504   ;;  %vm1508_vm3 = vcmask 1044480   ;;  %vm1895_vm4 = vcmask 1043456  }
  0x2b   : > { %s20808_s24 = smov (!%p397_p8, %s11158_s24), 63  ;;  %13233 = vmatprep.subr.mxu0 %v436_v7  ;;  %13183 = vmatprep.subr.mxu1 %v434_v21  ;;  %vm2282_vm5 = vcmask 1042432   ;;  %vm2669_vm6 = vcmask 1041408   ;;  %vm3056_vm7 = vcmask 1040384   ;;  %vm3887_vm8 = vcmask 72704   ;;  %s14815_s13 = smov 30  }
  0x2c   : > { %s11159_s25 = sshll.u32 %s20808_s24, 3  ;;  %20263 = vst [vmem:[#allocation9_spill] sm:$0xff] %v14979_v14  ;;  %s14817_s29 = smov 40   ;;  %vm10630_vm9 = vcmask 80896   ;;  %vm10632_vm10 = vcmask 162816   ;;  %vm10634_vm11 = vcmask 244736  }
  0x2d   : > { %s14818_s12 = smov 20   ;;  %s14819_s14 = smov 50   ;;  %vm10636_vm12 = vcmask 326656   ;;  %vm10638_vm13 = vcmask 408576   ;;  %vm10694_vm14 = vcmask 490496   ;;  %vm10918_vm15 = vcmask 416768  }
  0x2e   : > { %s14951_s26 = scalar_lea.vmem %s20262_s0, %s11159_s25  ;;  %s12118_s24 = sshll.u32 %s14902_s21, 7 }
  0x2f   : > { %v14954_v1 = vld [vmem:[%s14951_s26] sm:$0xff]  ;;  %v14957_v2 = vld [vmem:[%s14951_s26 + $0x8] sm:$0xff]  ;;  %v14970_v10 = vld [vmem:[%s14951_s26 + $0x10] sm:$0xff]  ;;  %s14820_s21 = smov [#allocation5]  }
  0x30   : > { %v477_v3 = vrot.slane %v14954_v1, 1  ;;  %v478_v4 = vrot.slane %v14957_v2, 1  ;;  %v14962_v5 = vld [vmem:[%s14951_s26 + $0xe0] sm:$0xff]  ;;  %v14965_v6 = vld [vmem:[%s14951_s26 + $0xe8] sm:$0xff]  ;;  %v14973_v11 = vld [vmem:[%s14951_s26 + $0xf0] sm:$0xff]  ;;  %v480_v16 = vrot.slane %v14970_v10, 1 }
  0x31   : > { %v532_v8 = vrot.slane %v14962_v5, 1  ;;  %v534_v9 = vrot.slane %v14965_v6, 1  ;;  %v14976_v12 = vld [vmem:[%s14951_s26 + $0x18] sm:$0xff]  ;;  %v536_v17 = vrot.slane %v14973_v11, 1  ;;  %v14989_v20 = vld [vmem:[%s14951_s26 + $0x20] sm:$0xff]  ;;  %v14998_v25 = vld [vmem:[%s14951_s26 + $0x28] sm:$0xff] }
  0x32   : > { %v479_v15 = vsel %vm476_vm0, %v477_v3, %v478_v4  ;;  %v482_v18 = vrot.slane %v14976_v12, 1  ;;  %v14986_v19 = vld [vmem:[%s14951_s26 + $0xf8] sm:$0xff]  ;;  %v484_v24 = vrot.slane %v14989_v20, 1  ;;  %v15001_v26 = vld [vmem:[%s14951_s26 + $0x30] sm:$0xff]  ;;  %v481_v27 = vsel %vm476_vm0, %v478_v4, %v480_v16  ;;  %v15023_v38 = vld [vmem:[%s14951_s26 + $0x40] sm:$0xff] }
  0x33   : > { %13135 = vmatprep.mubr.msk.f32.mxu0 %vm542_vm1, %v479_v15  ;;  %v535_v22 = vsel %vm476_vm0, %v532_v8, %v534_v9  ;;  %v538_v23 = vrot.slane %v14986_v19, 1  ;;  %v537_v28 = vsel %vm476_vm0, %v534_v9, %v536_v17  ;;  %v486_v30 = vrot.slane %v14998_v25, 1  ;;  %v15009_v31 = vld [vmem:[%s14951_s26 + $0x38] sm:$0xff]  ;;  %v15026_v39 = vld [vmem:[%s14951_s26 + $0x48] sm:$0xff]  ;;  %v15038_v45 = vld [vmem:[%s14951_s26 + $0x50] sm:$0xff] }
  0x34   : > { %13177 = vmatprep.mubr.msk.f32.mxu1 %vm542_vm1, %v535_v22  ;;  %v483_v29 = vsel %vm476_vm0, %v480_v16, %v482_v18  ;;  %13136 = vmatmul.mubr.msk.f32.vlgmr.msra.gmra.mxu0 %vm542_vm1, %v481_v27  ;;  %v485_v33 = vsel %vm476_vm0, %v482_v18, %v484_v24  ;;  %v488_v35 = vrot.slane %v15001_v26, 1  ;;  %v490_v37 = vrot.slane %v15009_v31, 1  ;;  %v15043_v47 = vld [vmem:[%s14951_s26 + $0x58] sm:$0xff]  ;;  %v15059_v53 = vld [vmem:[%s14951_s26 + $0x60] sm:$0xff]  ;;  %v15062_v54 = vld [vmem:[%s14951_s26 + $0x68] sm:$0xff] }
  0x35   : > { %13178 = vmatmul.mubr.msk.f32.vlgmr.msra.gmra.mxu1 %vm542_vm1, %v537_v28  ;;  %v539_v32 = vsel %vm476_vm0, %v536_v17, %v538_v23  ;;  %13234 = vmatpush3.msra.mxu0 %v436_v7  ;;  %v541_v34 = vsel %vm476_vm0, %v538_v23, %v14979_v14  ;;  %v487_v36 = vsel %vm476_vm0, %v484_v24, %v486_v30  ;;  %v492_v41 = vrot.slane %v15023_v38, 1  ;;  %v15076_v59 = vld [vmem:[%s14951_s26 + $0x70] sm:$0xff]  ;;  %v15079_v60 = vld [vmem:[%s14951_s26 + $0x78] sm:$0xff]  ;;  %v15092_v3 = vld [vmem:[%s14951_s26 + $0x80] sm:$0xff] }
  0x36   : > { %13138 = vmatprep.mubr.msk.f32.mxu0 %vm542_vm1, %v483_v29  ;;  %13180 = vmatprep.mubr.msk.f32.mxu1 %vm542_vm1, %v539_v32  ;;  %v489_v40 = vsel %vm476_vm0, %v486_v30, %v488_v35  ;;  %v491_v43 = vsel %vm476_vm0, %v488_v35, %v490_v37  ;;  %v494_v44 = vrot.slane %v15026_v39, 1  ;;  %v496_v50 = vrot.slane %v15038_v45, 1  ;;  %v15095_v4 = vld [vmem:[%s14951_s26 + $0x88] sm:$0xff]  ;;  %v15108_v17 = vld [vmem:[%s14951_s26 + $0x90] sm:$0xff]  ;;  %v15111_v18 = vld [vmem:[%s14951_s26 + $0x98] sm:$0xff] }
  0x37   : > { %13184 = vmatpush3.msra.mxu1 %v434_v21  ;;  %13333 = vmatprep.subr.mxu0 %v15040_v46  ;;  %v493_v49 = vsel %vm476_vm0, %v490_v37, %v492_v41  ;;  %v498_v52 = vrot.slane %v15043_v47, 1  ;;  %v500_v56 = vrot.slane %v15059_v53, 1  ;;  %v502_v58 = vrot.slane %v15062_v54, 1  ;;  %v15124_v27 = vld [vmem:[%s14951_s26 + $0xa0] sm:$0xff]  ;;  %v15127_v28 = vld [vmem:[%s14951_s26 + $0xa8] sm:$0xff]  ;;  %v15143_v35 = vld [vmem:[%s14951_s26 + $0xb8] sm:$0xff] }
  0x38   : > { %13139 = vmatmul.mubr.msk.f32.gmra.mxu0 %vm542_vm1, %v485_v33  ;;  %13283 = vmatprep.subr.mxu1 %v437_v42  ;;  %v495_v51 = vsel %vm476_vm0, %v492_v41, %v494_v44  ;;  %v497_v55 = vsel %vm476_vm0, %v494_v44, %v496_v50  ;;  %v504_v62 = vrot.slane %v15076_v59, 1  ;;  %v506_v0 = vrot.slane %v15079_v60, 1 }
  0x39   : > { %13181 = vmatmul.mubr.msk.f32.gmra.mxu1 %vm542_vm1, %v541_v34  ;;  %13141 = vmatprep.mubr.msk.f32.mxu0 %vm542_vm1, %v487_v36  ;;  %v499_v57 = vsel %vm476_vm0, %v496_v50, %v498_v52  ;;  %v501_v61 = vsel %vm476_vm0, %v498_v52, %v500_v56  ;;  %v503_v63 = vsel %vm476_vm0, %v500_v56, %v502_v58  ;;  %v508_v9 = vrot.slane %v15092_v3, 1  ;;  %v15140_v34 = vld [vmem:[%s14951_s26 + $0xb0] sm:$0xff] }
  0x3a   : > { %13185 = vmatprep.mubr.msk.f32.mxu1 %vm542_vm1, %v14954_v1  ;;  %v505_v7 = vsel %vm476_vm0, %v502_v58, %v504_v62  ;;  %v507_v15 = vsel %vm476_vm0, %v504_v62, %v506_v0  ;;  %v510_v16 = vrot.slane %v15095_v4, 1  ;;  %v512_v22 = vrot.slane %v15108_v17, 1  ;;  %v15172_v52 = vld [vmem:[%s14951_s26 + $0xd0] sm:$0xff] }
  0x3b   : > { %v509_v21 = vsel %vm476_vm0, %v506_v0, %v508_v9  ;;  %v514_v24 = vrot.slane %v15111_v18, 1  ;;  %v516_v30 = vrot.slane %v15124_v27, 1  ;;  %v518_v33 = vrot.slane %v15127_v28, 1 }
  0x3c   : > { %13142 = vmatmul.mubr.msk.f32.gmra.mxu0 %vm542_vm1, %v489_v40  ;;  %v511_v23 = vsel %vm476_vm0, %v508_v9, %v510_v16  ;;  %v513_v29 = vsel %vm476_vm0, %v510_v16, %v512_v22  ;;  %v520_v37 = vrot.slane %v15140_v34, 1  ;;  %v522_v41 = vrot.slane %v15143_v35, 1 }
  0x3d   : > { %13186 = vmatmul.mubr.msk.f32.vlgmr.msra.gmra.mxu1 %vm542_vm1, %v14957_v2  ;;  %13144 = vmatprep.mubr.msk.f32.mxu0 %vm542_vm1, %v491_v43  ;;  %v515_v32 = vsel %vm476_vm0, %v512_v22, %v514_v24  ;;  %v517_v36 = vsel %vm476_vm0, %v514_v24, %v516_v30  ;;  %v519_v40 = vsel %vm476_vm0, %v516_v30, %v518_v33  ;;  %v15159_v43 = vld [vmem:[%s14951_s26 + $0xc8] sm:$0xff]  ;;  %v1122_v0 = vrot.slane %v14954_v1, 2 }
  0x3e   : > { %13188 = vmatprep.mubr.msk.f32.mxu1 %vm542_vm1, %v14970_v10  ;;  %13284 = vmatpush3.msra.mxu1 %v437_v42  ;;  %v15156_v42 = vld [vmem:[%s14951_s26 + $0xc0] sm:$0xff]  ;;  %v521_v44 = vsel %vm476_vm0, %v518_v33, %v520_v37  ;;  %v523_v50 = vsel %vm476_vm0, %v520_v37, %v522_v41  ;;  %v1137_v37 = vrot.slane %v15023_v38, 2 }
  0x3f   : > { %13383 = vmatprep.subr.mxu1 %v15049_v48 }
  0x40   : > { %13145 = vmatmul.mubr.msk.f32.gmra.mxu0 %vm542_vm1, %v493_v49  ;;  %v524_v49 = vrot.slane %v15156_v42, 1 }
  0x41   : > { %13189 = vmatmul.mubr.msk.f32.gmra.mxu1 %vm542_vm1, %v14976_v12  ;;  %13147 = vmatprep.mubr.msk.f32.mxu0 %vm542_vm1, %v495_v51  ;;  %v526_v51 = vrot.slane %v15159_v43, 1 }
  0x42   : > { %13191 = vmatprep.mubr.msk.f32.mxu1 %vm542_vm1, %v14989_v20  ;;  %v525_v56 = vsel %vm476_vm0, %v522_v41, %v524_v49  ;;  %v1139_v41 = vrot.slane %v15026_v39, 2 }
  0x43   : > { %v527_v58 = vsel %vm476_vm0, %v524_v49, %v526_v51  ;;  %v1510_v49 = vrot.slane %v14957_v2, 3 }
  0x44   : > { %13148 = vmatmul.mubr.msk.f32.gmra.mxu0 %vm542_vm1, %v497_v55  ;;  %v15175_v55 = vld [vmem:[%s14951_s26 + $0xd8] sm:$0xff] }
  0x45   : > { %13192 = vmatmul.mubr.msk.f32.gmra.mxu1 %vm542_vm1, %v14998_v25  ;;  %13150 = vmatprep.mubr.msk.f32.mxu0 %vm542_vm1, %v499_v57  ;;  %v528_v57 = vrot.slane %v15172_v52, 1 }
  0x46   : > { %13194 = vmatprep.mubr.msk.f32.mxu1 %vm542_vm1, %v15001_v26 }
  0x47   : > { %v529_v62 = vsel %vm476_vm0, %v526_v51, %v528_v57  ;;  %v1141_v51 = vrot.slane %v15038_v45, 2 }
  0x48   : > { %13151 = vmatmul.mubr.msk.f32.gmra.mxu0 %vm542_vm1, %v501_v61  ;;  %v530_v61 = vrot.slane %v15175_v55, 1 }
  0x49   : > { %13195 = vmatmul.mubr.msk.f32.gmra.mxu1 %vm542_vm1, %v15009_v31  ;;  %13153 = vmatprep.mubr.msk.f32.mxu0 %vm542_vm1, %v503_v63 }
  0x4a   : > { %13197 = vmatprep.mubr.msk.f32.mxu1 %vm542_vm1, %v15023_v38  ;;  %v531_v63 = vsel %vm476_vm0, %v528_v57, %v530_v61  ;;  %v533_v9 = vsel %vm476_vm0, %v530_v61, %v532_v8  ;;  %v1129_v8 = vrot.slane %v14989_v20, 2  ;;  %v1140_v57 = vsel %vm1121_vm2, %v1137_v37, %v1139_v41 }
  0x4b   : > { %v1143_v61 = vrot.slane %v15043_v47, 2 }
  0x4c   : > { %13154 = vmatmul.mubr.msk.f32.gmra.mxu0 %vm542_vm1, %v505_v7  ;;  %v1123_v7 = vrot.slane %v14957_v2, 2 }
  0x4d   : > { %13198 = vmatmul.mubr.msk.f32.gmra.mxu1 %vm542_vm1, %v15026_v39  ;;  %13156 = vmatprep.mubr.msk.f32.mxu0 %vm542_vm1, %v507_v15  ;;  %v1125_v15 = vrot.slane %v14970_v10, 2 }
  0x4e   : > { %13200 = vmatprep.mubr.msk.f32.mxu1 %vm542_vm1, %v15038_v45  ;;  %v1124_v16 = vsel %vm1121_vm2, %v1122_v0, %v1123_v7 }
  0x4f   : > { %v1126_v22 = vsel %vm1121_vm2, %v1123_v7, %v1125_v15  ;;  %v1145_v7 = vrot.slane %v15059_v53, 2 }
  0x50   : > { %13157 = vmatmul.mubr.msk.f32.gmra.mxu0 %vm542_vm1, %v509_v21  ;;  %v1127_v21 = vrot.slane %v14976_v12, 2 }
  0x51   : > { %13201 = vmatmul.mubr.msk.f32.gmra.mxu1 %vm542_vm1, %v15043_v47  ;;  %13159 = vmatprep.mubr.msk.f32.mxu0 %vm542_vm1, %v511_v23  ;;  %v1131_v23 = vrot.slane %v14998_v25, 2 }
  0x52   : > { %13203 = vmatprep.mubr.msk.f32.mxu1 %vm542_vm1, %v15059_v53  ;;  %v1128_v24 = vsel %vm1121_vm2, %v1125_v15, %v1127_v21  ;;  %v1130_v30 = vsel %vm1121_vm2, %v1127_v21, %v1129_v8  ;;  %v1144_v15 = vsel %vm1121_vm2, %v1141_v51, %v1143_v61  ;;  %v1147_v21 = vrot.slane %v15062_v54, 2 }
  0x53   : > { %v1132_v33 = vsel %vm1121_vm2, %v1129_v8, %v1131_v23  ;;  %v15273_v8 = vld [vmem:[#allocation2 + $0x38] sm:$0xff] }
  0x54   : > { %13160 = vmatmul.mubr.msk.f32.gmra.mxu0 %vm542_vm1, %v513_v29  ;;  %v15219_v29 = vld [vmem:[#allocation2 + $0x30] sm:$0xff] }
  0x55   : > { %13204 = vmatmul.mubr.msk.f32.gmra.mxu1 %vm542_vm1, %v15062_v54  ;;  %13162 = vmatprep.mubr.msk.f32.mxu0 %vm542_vm1, %v515_v32  ;;  %v1133_v32 = vrot.slane %v15001_v26, 2 }
  0x56   : > { %13206 = vmatprep.mubr.msk.f32.mxu1 %vm542_vm1, %v15076_v59 }
  0x58   : > { %13163 = vmatmul.mubr.msk.f32.gmra.mxu0 %vm542_vm1, %v517_v36  ;;  %v1135_v36 = vrot.slane %v15009_v31, 2 }
  0x59   : > { %13207 = vmatmul.mubr.msk.f32.gmra.mxu1 %vm542_vm1, %v15079_v60  ;;  %13165 = vmatprep.mubr.msk.f32.mxu0 %vm542_vm1, %v519_v40 }
  0x5a   : > { %13209 = vmatprep.mubr.msk.f32.mxu1 %vm542_vm1, %v15092_v3  ;;  %v1136_v40 = vsel %vm1121_vm2, %v1133_v32, %v1135_v36 }
  0x5c   : > { %13166 = vmatmul.mubr.msk.f32.gmra.mxu0 %vm542_vm1, %v521_v44  ;;  %v1509_v44 = vrot.slane %v14954_v1, 3 }
  0x5d   : > { %13210 = vmatmul.mubr.msk.f32.gmra.mxu1 %vm542_vm1, %v15095_v4  ;;  %13168 = vmatprep.mubr.msk.f32.mxu0 %vm542_vm1, %v523_v50  ;;  %v1138_v50 = vsel %vm1121_vm2, %v1135_v36, %v1137_v37  ;;  %v1522_v37 = vrot.slane %v15009_v31, 3 }
  0x5e   : > { %13212 = vmatprep.mubr.msk.f32.mxu1 %vm542_vm1, %v15108_v17 }
  0x60   : > { %13169 = vmatmul.mubr.msk.f32.gmra.mxu0 %vm542_vm1, %v525_v56  ;;  %v1512_v56 = vrot.slane %v14970_v10, 3 }
  0x61   : > { %13213 = vmatmul.mubr.msk.f32.gmra.mxu1 %vm542_vm1, %v15111_v18  ;;  %13171 = vmatprep.mubr.msk.f32.mxu0 %vm542_vm1, %v527_v58  ;;  %v1511_v58 = vsel %vm1508_vm3, %v1509_v44, %v1510_v49  ;;  %v1153_v44 = vrot.slane %v15092_v3, 2 }
  0x62   : > { %13215 = vmatprep.mubr.msk.f32.mxu1 %vm542_vm1, %v15124_v27  ;;  %v1513_v0 = vsel %vm1508_vm3, %v1510_v49, %v1512_v56  ;;  %v1524_v49 = vrot.slane %v15023_v38, 3 }
  0x64   : > { %13172 = vmatmul.mubr.msk.f32.gmra.mxu0 %vm542_vm1, %v529_v62  ;;  %v1514_v62 = vrot.slane %v14976_v12, 3 }
  0x65   : > { %13216 = vmatmul.mubr.msk.f32.gmra.mxu1 %vm542_vm1, %v15127_v28  ;;  %13174 = vmatprep.mubr.msk.f32.mxu0 %vm542_vm1, %v531_v63  ;;  %v1142_v63 = vsel %vm1121_vm2, %v1139_v41, %v1141_v51  ;;  %v1155_v51 = vrot.slane %v15095_v4, 2 }
  0x66   : > { %13218 = vmatprep.mubr.msk.f32.mxu1 %vm542_vm1, %v15140_v34 }
  0x68   : > { %13175 = vmatmul.mubr.msk.f32.gmra.mxu0 %vm542_vm1, %v533_v9  ;;  %v1516_v9 = vrot.slane %v14989_v20, 3 }
  0x69   : > { %13219 = vmatmul.mubr.msk.f32.gmra.mxu1 %vm542_vm1, %v15143_v35  ;;  %13235 = vmatprep.mubr.msk.f32.mxu0 %vm542_vm1, %v1124_v16  ;;  %v1515_v16 = vsel %vm1508_vm3, %v1512_v56, %v1514_v62  ;;  %v1526_v56 = vrot.slane %v15026_v39, 3 }
  0x6a   : > { %13221 = vmatprep.mubr.msk.f32.mxu1 %vm542_vm1, %v15156_v42 }
  0x6c   : > { %13236 = vmatmul.mubr.msk.f32.vlgmr.msra.gmra.mxu0 %vm542_vm1, %v1126_v22  ;;  %v1518_v22 = vrot.slane %v14998_v25, 3 }
  0x6d   : > { %13222 = vmatmul.mubr.msk.f32.gmra.mxu1 %vm542_vm1, %v15159_v43  ;;  %13334 = vmatpush3.msra.mxu0 %v15040_v46  ;;  %v1134_v46 = vsel %vm1121_vm2, %v1131_v23, %v1133_v32  ;;  %v1146_v23 = vsel %vm1121_vm2, %v1143_v61, %v1145_v7  ;;  %v1520_v32 = vrot.slane %v15001_v26, 3  ;;  %v1157_v61 = vrot.slane %v15108_v17, 2 }
  0x6e   : > { %13224 = vmatprep.mubr.msk.f32.mxu1 %vm542_vm1, %v15172_v52  ;;  %13238 = vmatprep.mubr.msk.f32.mxu0 %vm542_vm1, %v1128_v24  ;;  %v1517_v24 = vsel %vm1508_vm3, %v1514_v62, %v1516_v9  ;;  %v1519_v36 = vsel %vm1508_vm3, %v1516_v9, %v1518_v22  ;;  %v1528_v62 = vrot.slane %v15038_v45, 3  ;;  %v1530_v9 = vrot.slane %v15043_v47, 3 }
  0x6f   : > { %13433 = vmatprep.subr.mxu0 %v15219_v29  ;;  %v1521_v41 = vsel %vm1508_vm3, %v1518_v22, %v1520_v32  ;;  %v1532_v22 = vrot.slane %v15059_v53, 3 }
  0x70   : > { %13239 = vmatmul.mubr.msk.f32.gmra.mxu0 %vm542_vm1, %v1130_v30  ;;  %v1149_v30 = vrot.slane %v15076_v59, 2 }
  0x71   : > { %13225 = vmatmul.mubr.msk.f32.gmra.mxu1 %vm542_vm1, %v15175_v55  ;;  %13241 = vmatprep.mubr.msk.f32.mxu0 %vm542_vm1, %v1132_v33  ;;  %v1148_v33 = vsel %vm1121_vm2, %v1145_v7, %v1147_v21  ;;  %v1159_v7 = vrot.slane %v15111_v18, 2 }
  0x72   : > { %13227 = vmatprep.mubr.msk.f32.mxu1 %vm542_vm1, %v14962_v5 }
  0x74   : > { %13242 = vmatmul.mubr.msk.f32.gmra.mxu0 %vm542_vm1, %v1134_v46  ;;  %v1151_v46 = vrot.slane %v15079_v60, 2 }
  0x75   : > { %13228 = vmatmul.mubr.msk.f32.gmra.mxu1 %vm542_vm1, %v14965_v6  ;;  %13244 = vmatprep.mubr.msk.f32.mxu0 %vm542_vm1, %v1136_v40  ;;  %v1150_v40 = vsel %vm1121_vm2, %v1147_v21, %v1149_v30  ;;  %v1161_v21 = vrot.slane %v15124_v27, 2 }
  0x76   : > { %13230 = vmatprep.mubr.msk.f32.mxu1 %vm542_vm1, %v14973_v11 }
  0x78   : > { %13245 = vmatmul.mubr.msk.f32.gmra.mxu0 %vm542_vm1, %v1138_v50  ;;  %v1523_v50 = vsel %vm1508_vm3, %v1520_v32, %v1522_v37  ;;  %v1534_v32 = vrot.slane %v15062_v54, 3 }
  0x79   : > { %13231 = vmatmul.mubr.msk.f32.gmra.mxu1 %vm542_vm1, %v14986_v19  ;;  %13247 = vmatprep.mubr.msk.f32.mxu0 %vm542_vm1, %v1140_v57  ;;  %v1154_v57 = vsel %vm1121_vm2, %v1151_v46, %v1153_v44 }
  0x7a   : > { %13285 = vmatprep.mubr.msk.f32.mxu1 %vm542_vm1, %v1511_v58  ;;  %v1525_v58 = vsel %vm1508_vm3, %v1522_v37, %v1524_v49  ;;  %v1536_v37 = vrot.slane %v15076_v59, 3 }
  0x7c   : > { %13248 = vmatmul.mubr.msk.f32.gmra.mxu0 %vm542_vm1, %v1142_v63  ;;  %v1156_v63 = vsel %vm1121_vm2, %v1153_v44, %v1155_v51  ;;  %v1167_v44 = vrot.slane %v15143_v35, 2 }
  0x7d   : > { %13286 = vmatmul.mubr.msk.f32.vlgmr.msra.gmra.mxu1 %vm542_vm1, %v1513_v0  ;;  %13250 = vmatprep.mubr.msk.f32.mxu0 %vm542_vm1, %v1144_v15  ;;  %v1527_v0 = vsel %vm1508_vm3, %v1524_v49, %v1526_v56  ;;  %v1158_v15 = vsel %vm1121_vm2, %v1155_v51, %v1157_v61  ;;  %v1538_v49 = vrot.slane %v15079_v60, 3  ;;  %v1169_v51 = vrot.slane %v15156_v42, 2 }
  0x7e   : > { %13288 = vmatprep.mubr.msk.f32.mxu1 %vm542_vm1, %v1515_v16  ;;  %13384 = vmatpush3.msra.mxu1 %v15049_v48  ;;  %v1152_v48 = vsel %vm1121_vm2, %v1149_v30, %v1151_v46  ;;  %v1529_v16 = vsel %vm1508_vm3, %v1526_v56, %v1528_v62  ;;  %v1163_v30 = vrot.slane %v15127_v28, 2  ;;  %v1165_v46 = vrot.slane %v15140_v34, 2 }
  0x7f   : > { %13483 = vmatprep.subr.mxu1 %v15273_v8  ;;  %v1540_v56 = vrot.slane %v15092_v3, 3 }
  0x80   : > { %13251 = vmatmul.mubr.msk.f32.gmra.mxu0 %vm542_vm1, %v1146_v23  ;;  %v1160_v23 = vsel %vm1121_vm2, %v1157_v61, %v1159_v7  ;;  %v1171_v61 = vrot.slane %v15159_v43, 2 }
  0x81   : > { %13289 = vmatmul.mubr.msk.f32.gmra.mxu1 %vm542_vm1, %v1517_v24  ;;  %13253 = vmatprep.mubr.msk.f32.mxu0 %vm542_vm1, %v1148_v33  ;;  %v1531_v24 = vsel %vm1508_vm3, %v1528_v62, %v1530_v9  ;;  %v1162_v33 = vsel %vm1121_vm2, %v1159_v7, %v1161_v21  ;;  %v1542_v62 = vrot.slane %v15095_v4, 3  ;;  %v1173_v7 = vrot.slane %v15172_v52, 2 }
  0x82   : > { %13291 = vmatprep.mubr.msk.f32.mxu1 %vm542_vm1, %v1519_v36  ;;  %v1533_v36 = vsel %vm1508_vm3, %v1530_v9, %v1532_v22  ;;  %v1544_v9 = vrot.slane %v15108_v17, 3 }
  0x84   : > { %13254 = vmatmul.mubr.msk.f32.gmra.mxu0 %vm542_vm1, %v1150_v40  ;;  %v1164_v40 = vsel %vm1121_vm2, %v1161_v21, %v1163_v30  ;;  %v1175_v21 = vrot.slane %v15175_v55, 2 }
  0x85   : > { %13292 = vmatmul.mubr.msk.f32.gmra.mxu1 %vm542_vm1, %v1521_v41  ;;  %13256 = vmatprep.mubr.msk.f32.mxu0 %vm542_vm1, %v1152_v48  ;;  %v1535_v41 = vsel %vm1508_vm3, %v1532_v22, %v1534_v32  ;;  %v1166_v48 = vsel %vm1121_vm2, %v1163_v30, %v1165_v46  ;;  %v1546_v22 = vrot.slane %v15111_v18, 3  ;;  %v1177_v30 = vrot.slane %v14962_v5, 2 }
  0x86   : > { %13294 = vmatprep.mubr.msk.f32.mxu1 %vm542_vm1, %v1523_v50  ;;  %v1537_v50 = vsel %vm1508_vm3, %v1534_v32, %v1536_v37  ;;  %v1548_v32 = vrot.slane %v15124_v27, 3 }
  0x88   : > { %13257 = vmatmul.mubr.msk.f32.gmra.mxu0 %vm542_vm1, %v1154_v57  ;;  %v1168_v57 = vsel %vm1121_vm2, %v1165_v46, %v1167_v44  ;;  %v1179_v46 = vrot.slane %v14965_v6, 2 }
  0x89   : > { %13295 = vmatmul.mubr.msk.f32.gmra.mxu1 %vm542_vm1, %v1525_v58  ;;  %13259 = vmatprep.mubr.msk.f32.mxu0 %vm542_vm1, %v1156_v63  ;;  %v1539_v58 = vsel %vm1508_vm3, %v1536_v37, %v1538_v49  ;;  %v1170_v63 = vsel %vm1121_vm2, %v1167_v44, %v1169_v51  ;;  %v1550_v37 = vrot.slane %v15127_v28, 3  ;;  %v1181_v44 = vrot.slane %v14973_v11, 2 }
  0x8a   : > { %13297 = vmatprep.mubr.msk.f32.mxu1 %vm542_vm1, %v1527_v0  ;;  %v1541_v0 = vsel %vm1508_vm3, %v1538_v49, %v1540_v56  ;;  %v1552_v49 = vrot.slane %v15140_v34, 3 }
  0x8c   : > { %13260 = vmatmul.mubr.msk.f32.gmra.mxu0 %vm542_vm1, %v1158_v15  ;;  %v1172_v15 = vsel %vm1121_vm2, %v1169_v51, %v1171_v61  ;;  %v1183_v51 = vrot.slane %v14986_v19, 2 }
  0x8d   : > { %13298 = vmatmul.mubr.msk.f32.gmra.mxu1 %vm542_vm1, %v1529_v16  ;;  %13262 = vmatprep.mubr.msk.f32.mxu0 %vm542_vm1, %v1160_v23  ;;  %v1543_v16 = vsel %vm1508_vm3, %v1540_v56, %v1542_v62  ;;  %v1174_v23 = vsel %vm1121_vm2, %v1171_v61, %v1173_v7  ;;  %v1554_v56 = vrot.slane %v15143_v35, 3  ;;  %v1553_v61 = vsel %vm1508_vm3, %v1550_v37, %v1552_v49 }
  0x8e   : > { %13300 = vmatprep.mubr.msk.f32.mxu1 %vm542_vm1, %v1531_v24  ;;  %v1545_v24 = vsel %vm1508_vm3, %v1542_v62, %v1544_v9  ;;  %v1556_v62 = vrot.slane %v15156_v42, 3 }
  0x90   : > { %13263 = vmatmul.mubr.msk.f32.gmra.mxu0 %vm542_vm1, %v1162_v33  ;;  %v1176_v33 = vsel %vm1121_vm2, %v1173_v7, %v1175_v21  ;;  %v1555_v7 = vsel %vm1508_vm3, %v1552_v49, %v1554_v56  ;;  %v1905_v49 = vrot.slane %v14998_v25, 4 }
  0x91   : > { %13301 = vmatmul.mubr.msk.f32.gmra.mxu1 %vm542_vm1, %v1533_v36  ;;  %13265 = vmatprep.mubr.msk.f32.mxu0 %vm542_vm1, %v1164_v40  ;;  %v1547_v36 = vsel %vm1508_vm3, %v1544_v9, %v1546_v22  ;;  %v1178_v40 = vsel %vm1121_vm2, %v1175_v21, %v1177_v30  ;;  %v1896_v9 = vrot.slane %v14954_v1, 4  ;;  %v1557_v21 = vsel %vm1508_vm3, %v1554_v56, %v1556_v62 }
  0x92   : > { %13303 = vmatprep.mubr.msk.f32.mxu1 %vm542_vm1, %v1535_v41  ;;  %v1549_v41 = vsel %vm1508_vm3, %v1546_v22, %v1548_v32  ;;  %v1560_v22 = vrot.slane %v15172_v52, 3 }
  0x94   : > { %13266 = vmatmul.mubr.msk.f32.gmra.mxu0 %vm542_vm1, %v1166_v48  ;;  %v1180_v48 = vsel %vm1121_vm2, %v1177_v30, %v1179_v46 }
  0x95   : > { %13304 = vmatmul.mubr.msk.f32.gmra.mxu1 %vm542_vm1, %v1537_v50  ;;  %13268 = vmatprep.mubr.msk.f32.mxu0 %vm542_vm1, %v1168_v57  ;;  %v1551_v50 = vsel %vm1508_vm3, %v1548_v32, %v1550_v37  ;;  %v15386_v57 = vrot.slane %v20171_v13, 2  ;;  %v1562_v32 = vrot.slane %v15175_v55, 3  ;;  %v1564_v37 = vrot.slane %v14962_v5, 3 }
  0x96   : > { %13306 = vmatprep.mubr.msk.f32.mxu1 %vm542_vm1, %v1539_v58  ;;  %v1182_v58 = vsel %vm1121_vm2, %v1179_v46, %v1181_v44 }
  0x97   : > { %20264 = vst [vmem:[#allocation10_spill] sm:$0xff] %v15386_v57 }
  0x98   : > { %13269 = vmatmul.mubr.msk.f32.gmra.mxu0 %vm542_vm1, %v1170_v63  ;;  %v1558_v63 = vrot.slane %v15159_v43, 3 }
  0x99   : > { %13307 = vmatmul.mubr.msk.f32.gmra.mxu1 %vm542_vm1, %v1541_v0  ;;  %13271 = vmatprep.mubr.msk.f32.mxu0 %vm542_vm1, %v1172_v15  ;;  %v1184_v0 = vsel %vm1121_vm2, %v1181_v44, %v1183_v51  ;;  %v1897_v15 = vrot.slane %v14957_v2, 4  ;;  %v1566_v44 = vrot.slane %v14965_v6, 3  ;;  %v1568_v6 = vrot.slane %v14973_v11, 3 }
  0x9a   : > { %13309 = vmatprep.mubr.msk.f32.mxu1 %vm542_vm1, %v1543_v16  ;;  %v1186_v16 = vsel %vm1121_vm2, %v1183_v51, %v15386_v57  ;;  %v1565_v51 = vsel %vm1508_vm3, %v1562_v32, %v1564_v37  ;;  %v15442_v11 = vrot.slane %v20171_v13, 3  ;;  %v15847_v57 = vld [vmem:[%s14951_s26 + $0xb8] sm:$0xff] }
  0x9b   : > { %v1898_v30 = vsel %vm1895_vm4, %v1896_v9, %v1897_v15  ;;  %v1913_v9 = vrot.slane %v15026_v39, 4  ;;  %20276 = vst [vmem:[#allocation22_spill] sm:$0xff] %v15847_v57 }
  0x9c   : > { %13272 = vmatmul.mubr.msk.f32.gmra.mxu0 %vm542_vm1, %v1174_v23  ;;  %v1899_v23 = vrot.slane %v14970_v10, 4  ;;  %20265 = vst [vmem:[#allocation11_spill] sm:$0xff] %v15442_v11 }
  0x9d   : > { %13310 = vmatmul.mubr.msk.f32.gmra.mxu1 %vm542_vm1, %v1545_v24  ;;  %13274 = vmatprep.mubr.msk.f32.mxu0 %vm542_vm1, %v1176_v33  ;;  %v1559_v24 = vsel %vm1508_vm3, %v1556_v62, %v1558_v63  ;;  %v1901_v33 = vrot.slane %v14976_v12, 4 }
  0x9e   : > { %13312 = vmatprep.mubr.msk.f32.mxu1 %vm542_vm1, %v1547_v36  ;;  %v1561_v36 = vsel %vm1508_vm3, %v1558_v63, %v1560_v22  ;;  %v1900_v46 = vsel %vm1895_vm4, %v1897_v15, %v1899_v23  ;;  %v1570_v63 = vrot.slane %v14986_v19, 3  ;;  %v1911_v19 = vrot.slane %v15023_v38, 4 }
  0xa0   : > { %13275 = vmatmul.mubr.msk.f32.gmra.mxu0 %vm542_vm1, %v1178_v40  ;;  %v1903_v40 = vrot.slane %v14989_v20, 4  ;;  %v1571_v15 = vsel %vm1508_vm3, %v1568_v6, %v1570_v63 }
  0xa1   : > { %13313 = vmatmul.mubr.msk.f32.gmra.mxu1 %vm542_vm1, %v1549_v41  ;;  %13277 = vmatprep.mubr.msk.f32.mxu0 %vm542_vm1, %v1180_v48  ;;  %v1563_v41 = vsel %vm1508_vm3, %v1560_v22, %v1562_v32  ;;  %v1902_v48 = vsel %vm1895_vm4, %v1899_v23, %v1901_v33  ;;  %v2284_v22 = vrot.slane %v14957_v2, 5  ;;  %v1573_v23 = vsel %vm1508_vm3, %v1570_v63, %v15442_v11 }
  0xa2   : > { %13315 = vmatprep.mubr.msk.f32.mxu1 %vm542_vm1, %v1551_v50  ;;  %v15423_v50 = vld [vmem:[#allocation2 + $0x40] sm:$0xff]  ;;  %v1904_v56 = vsel %vm1895_vm4, %v1901_v33, %v1903_v40  ;;  %v1906_v62 = vsel %vm1895_vm4, %v1903_v40, %v1905_v49  ;;  %v1914_v2 = vsel %vm1895_vm4, %v1911_v19, %v1913_v9  ;;  %v1917_v33 = vrot.slane %v15043_v47, 4 }
  0xa3   : > { %v2290_v40 = vrot.slane %v14989_v20, 5  ;;  %v1927_v63 = vrot.slane %v15092_v3, 4 }
  0xa4   : > { %13278 = vmatmul.mubr.msk.f32.gmra.mxu0 %vm542_vm1, %v1182_v58  ;;  %v1907_v58 = vrot.slane %v15001_v26, 4 }
  0xa5   : > { %13316 = vmatmul.mubr.msk.f32.gmra.mxu1 %vm542_vm1, %v1553_v61  ;;  %13280 = vmatprep.mubr.msk.f32.mxu0 %vm542_vm1, %v1184_v0  ;;  %v1567_v61 = vsel %vm1508_vm3, %v1564_v37, %v1566_v44  ;;  %v1569_v0 = vsel %vm1508_vm3, %v1566_v44, %v1568_v6  ;;  %v1919_v37 = vrot.slane %v15059_v53, 4  ;;  %v1921_v44 = vrot.slane %v15062_v54, 4 }
  0xa6   : > { %13318 = vmatprep.mubr.msk.f32.mxu1 %vm542_vm1, %v1555_v7  ;;  %v1908_v7 = vsel %vm1895_vm4, %v1905_v49, %v1907_v58  ;;  %v2292_v49 = vrot.slane %v14998_v25, 5 }
  0xa7   : > { %v1922_v6 = vsel %vm1895_vm4, %v1919_v37, %v1921_v44 }
  0xa8   : > { %13281 = vmatmul.mubr.msk.f32.gmra.mxu0 %vm542_vm1, %v1186_v16  ;;  %v2293_v25 = vsel %vm2282_vm5, %v2290_v40, %v2292_v49 }
  0xa9   : > { %13319 = vmatmul.mubr.msk.f32.gmra.mxu1 %vm542_vm1, %v1557_v21  ;;  %13335 = vmatprep.mubr.msk.f32.mxu0 %vm542_vm1, %v1898_v30  ;;  %v2283_v21 = vrot.slane %v14954_v1, 5  ;;  %v1915_v30 = vrot.slane %v15038_v45, 4  ;;  %v2286_v1 = vrot.slane %v14970_v10, 5 }
  0xaa   : > { %13321 = vmatprep.mubr.msk.f32.mxu1 %vm542_vm1, %v1559_v24 }
  0xab   : > { %v2285_v32 = vsel %vm2282_vm5, %v2283_v21, %v2284_v22  ;;  %v2287_v10 = vsel %vm2282_vm5, %v2284_v22, %v2286_v1  ;;  %v1933_v21 = vrot.slane %v15111_v18, 4  ;;  %v2304_v22 = vrot.slane %v15043_v47, 5 }
  0xac   : > { %13336 = vmatmul.mubr.msk.f32.vlgmr.msra.gmra.mxu0 %vm542_vm1, %v1900_v46  ;;  %v1916_v46 = vsel %vm1895_vm4, %v1913_v9, %v1915_v30  ;;  %v1931_v9 = vrot.slane %v15108_v17, 4 }
  0xad   : > { %13322 = vmatmul.mubr.msk.f32.gmra.mxu1 %vm542_vm1, %v1561_v36  ;;  %13434 = vmatpush3.msra.mxu0 %v15219_v29  ;;  %v1909_v29 = vrot.slane %v15009_v31, 4  ;;  %v2288_v36 = vrot.slane %v14976_v12, 5 }
  0xae   : > { %13324 = vmatprep.mubr.msk.f32.mxu1 %vm542_vm1, %v1563_v41  ;;  %13338 = vmatprep.mubr.msk.f32.mxu0 %vm542_vm1, %v1902_v48  ;;  %v1918_v41 = vsel %vm1895_vm4, %v1915_v30, %v1917_v33  ;;  %v1920_v48 = vsel %vm1895_vm4, %v1917_v33, %v1919_v37  ;;  %v2306_v30 = vrot.slane %v15059_v53, 5  ;;  %v1941_v37 = vrot.slane %v15143_v35, 4 }
  0xaf   : > { %13533 = vmatprep.subr.mxu0 %v15423_v50  ;;  %v1910_v16 = vsel %vm1895_vm4, %v1907_v58, %v1909_v29  ;;  %v1912_v24 = vsel %vm1895_vm4, %v1909_v29, %v1911_v19  ;;  %v2289_v12 = vsel %vm2282_vm5, %v2286_v1, %v2288_v36  ;;  %v2291_v20 = vsel %vm2282_vm5, %v2288_v36, %v2290_v40 }
  0xb0   : > { %13339 = vmatmul.mubr.msk.f32.gmra.mxu0 %vm542_vm1, %v1904_v56  ;;  %v2294_v56 = vrot.slane %v15001_v26, 5  ;;  %v1925_v58 = vrot.slane %v15079_v60, 4  ;;  %v2298_v29 = vrot.slane %v15023_v38, 5  ;;  %v1934_v1 = vsel %vm1895_vm4, %v1931_v9, %v1933_v21 }
  0xb1   : > { %13325 = vmatmul.mubr.msk.f32.gmra.mxu1 %vm542_vm1, %v1565_v51  ;;  %13341 = vmatprep.mubr.msk.f32.mxu0 %vm542_vm1, %v1906_v62  ;;  %v1923_v51 = vrot.slane %v15076_v59, 4  ;;  %v2307_v53 = vsel %vm2282_vm5, %v2304_v22, %v2306_v30  ;;  %v1939_v36 = vrot.slane %v15140_v34, 4  ;;  %v2312_v40 = vrot.slane %v15079_v60, 5 }
  0xb2   : > { %13327 = vmatprep.mubr.msk.f32.mxu1 %vm542_vm1, %v1567_v61  ;;  %v2296_v61 = vrot.slane %v15009_v31, 5  ;;  %v2295_v62 = vsel %vm2282_vm5, %v2292_v49, %v2294_v56  ;;  %v1928_v19 = vsel %vm1895_vm4, %v1925_v58, %v1927_v63 }
  0xb3   : > { %v1924_v26 = vsel %vm1895_vm4, %v1921_v44, %v1923_v51  ;;  %v1926_v31 = vsel %vm1895_vm4, %v1923_v51, %v1925_v58  ;;  %v2314_v44 = vrot.slane %v15092_v3, 5  ;;  %v1942_v49 = vsel %vm1895_vm4, %v1939_v36, %v1941_v37 }
  0xb4   : > { %13342 = vmatmul.mubr.msk.f32.gmra.mxu0 %vm542_vm1, %v1908_v7  ;;  %v2300_v7 = vrot.slane %v15026_v39, 5  ;;  %v2299_v38 = vsel %vm2282_vm5, %v2296_v61, %v2298_v29  ;;  %v1949_v58 = vrot.slane %v15175_v55, 4 }
  0xb5   : > { %13328 = vmatmul.mubr.msk.f32.gmra.mxu1 %vm542_vm1, %v1569_v0  ;;  %13344 = vmatprep.mubr.msk.f32.mxu0 %vm542_vm1, %v1910_v16  ;;  %v1929_v0 = vrot.slane %v15095_v4, 4  ;;  %v2315_v3 = vsel %vm2282_vm5, %v2312_v40, %v2314_v44 }
  0xb6   : > { %13330 = vmatprep.mubr.msk.f32.mxu1 %vm542_vm1, %v1571_v15  ;;  %v2302_v15 = vrot.slane %v15038_v45, 5  ;;  %v2301_v39 = vsel %vm2282_vm5, %v2298_v29, %v2300_v7 }
  0xb7   : > { %v1930_v16 = vsel %vm1895_vm4, %v1927_v63, %v1929_v0  ;;  %v2322_v63 = vrot.slane %v15124_v27, 5 }
  0xb8   : > { %13345 = vmatmul.mubr.msk.f32.gmra.mxu0 %vm542_vm1, %v1912_v24  ;;  %v2303_v45 = vsel %vm2282_vm5, %v2300_v7, %v2302_v15  ;;  %v1935_v24 = vrot.slane %v15124_v27, 4  ;;  %v2305_v47 = vsel %vm2282_vm5, %v2302_v15, %v2304_v22  ;;  %v15586_v7 = vld [vmem:[%s14951_s26 + $0xf0] sm:$0xff] }
  0xb9   : > { %13331 = vmatmul.mubr.msk.f32.gmra.mxu1 %vm542_vm1, %v1573_v23  ;;  %13347 = vmatprep.mubr.msk.f32.mxu0 %vm542_vm1, %v1914_v2  ;;  %v1932_v23 = vsel %vm1895_vm4, %v1929_v0, %v1931_v9  ;;  %v1937_v2 = vrot.slane %v15127_v28, 4  ;;  %v15591_v9 = vld [vmem:[%s14951_s26 + $0xf8] sm:$0xff] }
  0xba   : > { %13385 = vmatprep.mubr.msk.f32.mxu1 %vm542_vm1, %v2285_v32  ;;  %v2308_v32 = vrot.slane %v15062_v54, 5  ;;  %v1936_v33 = vsel %vm1895_vm4, %v1933_v21, %v1935_v24  ;;  %v15600_v21 = vrot.slane %v20171_v13, 4 }
  0xbc   : > { %13348 = vmatmul.mubr.msk.f32.gmra.mxu0 %vm542_vm1, %v1916_v46  ;;  %v2310_v46 = vrot.slane %v15076_v59, 5  ;;  %v2309_v54 = vsel %vm2282_vm5, %v2306_v30, %v2308_v32  ;;  %20266 = vst [vmem:[#allocation12_spill] sm:$0xff] %v15600_v21  ;;  %v15611_v30 = vld [vmem:[%s14951_s26] sm:$0xff] }
  0xbd   : > { %13386 = vmatmul.mubr.msk.f32.vlgmr.msra.gmra.mxu1 %vm542_vm1, %v2287_v10  ;;  %13350 = vmatprep.mubr.msk.f32.mxu0 %vm542_vm1, %v1918_v41  ;;  %v1938_v10 = vsel %vm1895_vm4, %v1935_v24, %v1937_v2  ;;  %v1940_v41 = vsel %vm1895_vm4, %v1937_v2, %v1939_v36  ;;  %v2332_v24 = vrot.slane %v15159_v43, 5 }
  0xbe   : > { %13388 = vmatprep.mubr.msk.f32.mxu1 %vm542_vm1, %v2289_v12  ;;  %13484 = vmatpush3.msra.mxu1 %v15273_v8  ;;  %v2297_v8 = vsel %vm2282_vm5, %v2294_v56, %v2296_v61  ;;  %v2311_v59 = vsel %vm2282_vm5, %v2308_v32, %v2310_v46  ;;  %v1943_v12 = vrot.slane %v15156_v42, 4  ;;  %v2313_v60 = vsel %vm2282_vm5, %v2310_v46, %v2312_v40 }
  0xbf   : > { %v1947_v56 = vrot.slane %v15172_v52, 4  ;;  %v2320_v61 = vrot.slane %v15111_v18, 5  ;;  %v2334_v32 = vrot.slane %v15172_v52, 5 }
  0xc0   : > { %13351 = vmatmul.mubr.msk.f32.gmra.mxu0 %vm542_vm1, %v1920_v48  ;;  %v1945_v48 = vrot.slane %v15159_v43, 4  ;;  %v1944_v51 = vsel %vm1895_vm4, %v1941_v37, %v1943_v12 }
  0xc1   : > { %13389 = vmatmul.mubr.msk.f32.gmra.mxu1 %vm542_vm1, %v2291_v20  ;;  %13353 = vmatprep.mubr.msk.f32.mxu0 %vm542_vm1, %v1922_v6  ;;  %v2316_v20 = vrot.slane %v15095_v4, 5  ;;  %v2318_v6 = vrot.slane %v15108_v17, 5  ;;  %v1950_v18 = vsel %vm1895_vm4, %v1947_v56, %v1949_v58  ;;  %v2323_v27 = vsel %vm2282_vm5, %v2320_v61, %v2322_v63 }
  0xc2   : > { %13391 = vmatprep.mubr.msk.f32.mxu1 %vm542_vm1, %v2293_v25  ;;  %v1946_v25 = vsel %vm1895_vm4, %v1943_v12, %v1945_v48  ;;  %v1948_v17 = vsel %vm1895_vm4, %v1945_v48, %v1947_v56  ;;  %v2335_v52 = vsel %vm2282_vm5, %v2332_v24, %v2334_v32 }
  0xc3   : > { %v2317_v4 = vsel %vm2282_vm5, %v2314_v44, %v2316_v20  ;;  %v2321_v29 = vsel %vm2282_vm5, %v2318_v6, %v2320_v61  ;;  %v15674_v61 = vld [vmem:[%s14951_s26 + $0x38] sm:$0xff] }
  0xc4   : > { %13354 = vmatmul.mubr.msk.f32.gmra.mxu0 %vm542_vm1, %v1924_v26  ;;  %v1951_v26 = vrot.slane %v14962_v5, 4 }
  0xc5   : > { %13392 = vmatmul.mubr.msk.f32.gmra.mxu1 %vm542_vm1, %v2295_v62  ;;  %13356 = vmatprep.mubr.msk.f32.mxu0 %vm542_vm1, %v1926_v31  ;;  %v2319_v62 = vsel %vm2282_vm5, %v2316_v20, %v2318_v6  ;;  %v15575_v31 = vld [vmem:[%s14951_s26 + $0xe8] sm:$0xff]  ;;  %v15666_v6 = vld [vmem:[%s14951_s26 + $0x30] sm:$0xff] }
  0xc6   : > { %13394 = vmatprep.mubr.msk.f32.mxu1 %vm542_vm1, %v2297_v8  ;;  %v1953_v5 = vrot.slane %v15575_v31, 4  ;;  %v2324_v8 = vrot.slane %v15127_v28, 5  ;;  %v1952_v0 = vsel %vm1895_vm4, %v1949_v58, %v1951_v26  ;;  %v1957_v28 = vrot.slane %v15591_v9, 4 }
  0xc8   : > { %13357 = vmatmul.mubr.msk.f32.gmra.mxu0 %vm542_vm1, %v1928_v19  ;;  %v1955_v19 = vrot.slane %v15586_v7, 4  ;;  %v1954_v15 = vsel %vm1895_vm4, %v1951_v26, %v1953_v5  ;;  %v2683_v26 = vrot.slane %v15674_v61, 6 }
  0xc9   : > { %13395 = vmatmul.mubr.msk.f32.gmra.mxu1 %vm542_vm1, %v2299_v38  ;;  %13359 = vmatprep.mubr.msk.f32.mxu0 %vm542_vm1, %v1930_v16  ;;  %v2326_v38 = vrot.slane %v15140_v34, 5  ;;  %v2325_v16 = vsel %vm2282_vm5, %v2322_v63, %v2324_v8  ;;  %v15684_v63 = vrot.slane %v20171_v13, 5 }
  0xca   : > { %13397 = vmatprep.mubr.msk.f32.mxu1 %vm542_vm1, %v2301_v39  ;;  %v2328_v39 = vrot.slane %v15143_v35, 5  ;;  %v1956_v34 = vsel %vm1895_vm4, %v1953_v5, %v1955_v19  ;;  %v2330_v35 = vrot.slane %v15156_v42, 5  ;;  %v1960_v42 = vsel %vm1895_vm4, %v1957_v28, %v15600_v21  ;;  %v15691_v5 = vld [vmem:[%s14951_s26 + $0x48] sm:$0xff] }
  0xcb   : > { %v2327_v22 = vsel %vm2282_vm5, %v2324_v8, %v2326_v38  ;;  %20267 = vst [vmem:[#allocation13_spill] sm:$0xff] %v15684_v63  ;;  %v2687_v8 = vrot.slane %v15691_v5, 6 }
  0xcc   : > { %13360 = vmatmul.mubr.msk.f32.gmra.mxu0 %vm542_vm1, %v1932_v23  ;;  %v1958_v23 = vsel %vm1895_vm4, %v1955_v19, %v1957_v28  ;;  %v2331_v43 = vsel %vm2282_vm5, %v2328_v39, %v2330_v35  ;;  %v2333_v36 = vsel %vm2282_vm5, %v2330_v35, %v2332_v24  ;;  %v3057_v19 = vrot.slane %v15611_v30, 7 }
  0xcd   : > { %13398 = vmatmul.mubr.msk.f32.gmra.mxu1 %vm542_vm1, %v2303_v45  ;;  %13362 = vmatprep.mubr.msk.f32.mxu0 %vm542_vm1, %v1934_v1  ;;  %v2329_v45 = vsel %vm2282_vm5, %v2326_v38, %v2328_v39  ;;  %v2670_v1 = vrot.slane %v15611_v30, 6 }
  0xce   : > { %13400 = vmatprep.mubr.msk.f32.mxu1 %vm542_vm1, %v2305_v47  ;;  %v15615_v47 = vld [vmem:[%s14951_s26 + $0x8] sm:$0xff] }
  0xcf   : > { %v2671_v2 = vrot.slane %v15615_v47, 6  ;;  %v3058_v38 = vrot.slane %v15615_v47, 7 }
  0xd0   : > { %13363 = vmatmul.mubr.msk.f32.gmra.mxu0 %vm542_vm1, %v1936_v33  ;;  %v15627_v33 = vld [vmem:[%s14951_s26 + $0x10] sm:$0xff] }
  0xd1   : > { %13401 = vmatmul.mubr.msk.f32.gmra.mxu1 %vm542_vm1, %v2307_v53  ;;  %13365 = vmatprep.mubr.msk.f32.mxu0 %vm542_vm1, %v1938_v10  ;;  %v2673_v53 = vrot.slane %v15627_v33, 6  ;;  %v2672_v46 = vsel %vm2669_vm6, %v2670_v1, %v2671_v2  ;;  %v2336_v10 = vrot.slane %v15175_v55, 5  ;;  %v3059_v30 = vsel %vm3056_vm7, %v3057_v19, %v3058_v38  ;;  %v15717_v1 = vld [vmem:[%s14951_s26 + $0x58] sm:$0xff] }
  0xd2   : > { %13403 = vmatprep.mubr.msk.f32.mxu1 %vm542_vm1, %v2309_v54  ;;  %v15634_v54 = vld [vmem:[%s14951_s26 + $0x18] sm:$0xff] }
  0xd3   : > { %v2675_v37 = vrot.slane %v15634_v54, 6  ;;  %v2674_v40 = vsel %vm2669_vm6, %v2671_v2, %v2673_v53  ;;  %v2337_v44 = vsel %vm2282_vm5, %v2334_v32, %v2336_v10  ;;  %v2691_v2 = vrot.slane %v15717_v1, 6 }
  0xd4   : > { %13366 = vmatmul.mubr.msk.f32.gmra.mxu0 %vm542_vm1, %v1940_v41  ;;  %v15644_v41 = vld [vmem:[%s14951_s26 + $0xe0] sm:$0xff] }
  0xd5   : > { %13404 = vmatmul.mubr.msk.f32.gmra.mxu1 %vm542_vm1, %v2311_v59  ;;  %13368 = vmatprep.mubr.msk.f32.mxu0 %vm542_vm1, %v1942_v49  ;;  %v2338_v55 = vrot.slane %v15644_v41, 5  ;;  %v15648_v59 = vld [vmem:[%s14951_s26 + $0x20] sm:$0xff]  ;;  %v2340_v49 = vrot.slane %v15575_v31, 5  ;;  %v2676_v20 = vsel %vm2669_vm6, %v2673_v53, %v2675_v37 }
  0xd6   : > { %13406 = vmatprep.mubr.msk.f32.mxu1 %vm542_vm1, %v2313_v60  ;;  %v2677_v12 = vrot.slane %v15648_v59, 6  ;;  %v15654_v60 = vld [vmem:[%s14951_s26 + $0x28] sm:$0xff] }
  0xd7   : > { %v2679_v48 = vrot.slane %v15654_v60, 6 }
  0xd8   : > { %13369 = vmatmul.mubr.msk.f32.gmra.mxu0 %vm542_vm1, %v1944_v51  ;;  %v2342_v51 = vrot.slane %v15586_v7, 5  ;;  %v2678_v56 = vsel %vm2669_vm6, %v2675_v37, %v2677_v12  ;;  %v3064_v37 = vrot.slane %v15648_v59, 7 }
  0xd9   : > { %13407 = vmatmul.mubr.msk.f32.gmra.mxu1 %vm542_vm1, %v2315_v3  ;;  %13371 = vmatprep.mubr.msk.f32.mxu0 %vm542_vm1, %v1946_v25  ;;  %v2339_v3 = vsel %vm2282_vm5, %v2336_v10, %v2338_v55  ;;  %v2681_v25 = vrot.slane %v15666_v6, 6  ;;  %v2680_v58 = vsel %vm2669_vm6, %v2677_v12, %v2679_v48 }
  0xda   : > { %13409 = vmatprep.mubr.msk.f32.mxu1 %vm542_vm1, %v2317_v4  ;;  %v2341_v4 = vsel %vm2282_vm5, %v2338_v55, %v2340_v49 }
  0xdc   : > { %13372 = vmatmul.mubr.msk.f32.gmra.mxu0 %vm542_vm1, %v1948_v17  ;;  %v2343_v17 = vsel %vm2282_vm5, %v2340_v49, %v2342_v51 }
  0xdd   : > { %13410 = vmatmul.mubr.msk.f32.gmra.mxu1 %vm542_vm1, %v2319_v62  ;;  %13374 = vmatprep.mubr.msk.f32.mxu0 %vm542_vm1, %v1950_v18  ;;  %v2682_v62 = vsel %vm2669_vm6, %v2679_v48, %v2681_v25  ;;  %v15687_v18 = vld [vmem:[%s14951_s26 + $0x40] sm:$0xff]  ;;  %v3066_v48 = vrot.slane %v15654_v60, 7 }
  0xde   : > { %13412 = vmatprep.mubr.msk.f32.mxu1 %vm542_vm1, %v2321_v29  ;;  %v2685_v29 = vrot.slane %v15687_v18, 6 }
  0xe0   : > { %13375 = vmatmul.mubr.msk.f32.gmra.mxu0 %vm542_vm1, %v1952_v0  ;;  %v2686_v39 = vsel %vm2669_vm6, %v2683_v26, %v2685_v29  ;;  %v2688_v24 = vsel %vm2669_vm6, %v2685_v29, %v2687_v8  ;;  %v3067_v29 = vsel %vm3056_vm7, %v3064_v37, %v3066_v48 }
  0xe1   : > { %13413 = vmatmul.mubr.msk.f32.gmra.mxu1 %vm542_vm1, %v2323_v27  ;;  %13377 = vmatprep.mubr.msk.f32.mxu0 %vm542_vm1, %v1954_v15  ;;  %v2684_v27 = vsel %vm2669_vm6, %v2681_v25, %v2683_v26 }
  0xe2   : > { %13415 = vmatprep.mubr.msk.f32.mxu1 %vm542_vm1, %v2325_v16 }
  0xe4   : > { %13378 = vmatmul.mubr.msk.f32.gmra.mxu0 %vm542_vm1, %v1956_v34  ;;  %v15708_v34 = vld [vmem:[%s14951_s26 + $0x50] sm:$0xff] }
  0xe5   : > { %13416 = vmatmul.mubr.msk.f32.gmra.mxu1 %vm542_vm1, %v2327_v22  ;;  %13380 = vmatprep.mubr.msk.f32.mxu0 %vm542_vm1, %v1958_v23  ;;  %v2689_v22 = vrot.slane %v15708_v34, 6  ;;  %v3060_v23 = vrot.slane %v15627_v33, 7 }
  0xe6   : > { %13418 = vmatprep.mubr.msk.f32.mxu1 %vm542_vm1, %v2329_v45 }
  0xe7   : > { %v2690_v53 = vsel %vm2669_vm6, %v2687_v8, %v2689_v22  ;;  %v2692_v55 = vsel %vm2669_vm6, %v2689_v22, %v2691_v2  ;;  %v15759_v8 = vld [vmem:[%s14951_s26 + $0x78] sm:$0xff] }
  0xe8   : > { %13381 = vmatmul.mubr.msk.f32.gmra.mxu0 %vm542_vm1, %v1960_v42  ;;  %v3062_v42 = vrot.slane %v15634_v54, 7  ;;  %20271 = vst [vmem:[#allocation17_spill] sm:$0xff] %v15759_v8 }
  0xe9   : > { %13419 = vmatmul.mubr.msk.f32.gmra.mxu1 %vm542_vm1, %v2331_v43  ;;  %13435 = vmatprep.mubr.msk.f32.mxu0 %vm542_vm1, %v2672_v46  ;;  %v15730_v46 = vld [vmem:[%s14951_s26 + $0x60] sm:$0xff] }
  0xea   : > { %13421 = vmatprep.mubr.msk.f32.mxu1 %vm542_vm1, %v2333_v36  ;;  %v3061_v36 = vsel %vm3056_vm7, %v3058_v38, %v3060_v23  ;;  %v2693_v10 = vrot.slane %v15730_v46, 6  ;;  %v3063_v12 = vsel %vm3056_vm7, %v3060_v23, %v3062_v42  ;;  %v15774_v23 = vld [vmem:[%s14951_s26 + $0x80] sm:$0xff] }
  0xeb   : > { %20272 = vst [vmem:[#allocation18_spill] sm:$0xff] %v15774_v23  ;;  %v3088_v11 = vrot.slane %v15774_v23, 7 }
  0xec   : > { %13436 = vmatmul.mubr.msk.f32.vlgmr.msra.gmra.mxu0 %vm542_vm1, %v2674_v40 }
  0xed   : > { %13422 = vmatmul.mubr.msk.f32.gmra.mxu1 %vm542_vm1, %v2335_v52  ;;  %13534 = vmatpush3.msra.mxu0 %v15423_v50  ;;  %v2344_v50 = vrot.slane %v15591_v9, 5 }
  0xee   : > { %13424 = vmatprep.mubr.msk.f32.mxu1 %vm542_vm1, %v2337_v44  ;;  %13438 = vmatprep.mubr.msk.f32.mxu0 %vm542_vm1, %v2676_v20  ;;  %v15739_v44 = vld [vmem:[%s14951_s26 + $0x68] sm:$0xff] }
  0xef   : > { %v2345_v0 = vsel %vm2282_vm5, %v2342_v51, %v2344_v50  ;;  %v2347_v16 = vsel %vm2282_vm5, %v2344_v50, %v15684_v63  ;;  %v2695_v49 = vrot.slane %v15739_v44, 6  ;;  %v3068_v50 = vrot.slane %v15666_v6, 7 }
  0xf0   : > { %13439 = vmatmul.mubr.msk.f32.gmra.mxu0 %vm542_vm1, %v2678_v56 }
  0xf1   : > { %13425 = vmatmul.mubr.msk.f32.gmra.mxu1 %vm542_vm1, %v2339_v3  ;;  %13441 = vmatprep.mubr.msk.f32.mxu0 %vm542_vm1, %v2680_v58  ;;  %v15746_v3 = vld [vmem:[%s14951_s26 + $0x70] sm:$0xff]  ;;  %v3065_v58 = vsel %vm3056_vm7, %v3062_v42, %v3064_v37  ;;  %v3069_v22 = vsel %vm3056_vm7, %v3066_v48, %v3068_v50 }
  0xf2   : > { %13427 = vmatprep.mubr.msk.f32.mxu1 %vm542_vm1, %v2341_v4  ;;  %20270 = vst [vmem:[#allocation16_spill] sm:$0xff] %v15746_v3  ;;  %v2697_v56 = vrot.slane %v15746_v3, 6  ;;  %v2694_v4 = vsel %vm2669_vm6, %v2691_v2, %v2693_v10  ;;  %v3084_v13 = vrot.slane %v15746_v3, 7  ;;  %v15893_v3 = vld [vmem:[%s14951_s26 + $0xd8] sm:$0xff] }
  0xf4   : > { %v13137_v28 = vpop.f32.mrf.mxu0  ;;  %13442 = vmatmul.mubr.msk.f32.gmra.mxu0 %vm542_vm1, %v2682_v62  ;;  %v2696_v62 = vsel %vm2669_vm6, %v2693_v10, %v2695_v49  ;;  %v3074_v10 = vrot.slane %v15691_v5, 7 }
  0xf5   : > { %v15698_v15 = vpop.f32.mrf.mxu1  ;;  %13428 = vmatmul.mubr.msk.f32.gmra.mxu1 %vm542_vm1, %v2343_v17  ;;  %13444 = vmatprep.mubr.msk.f32.mxu0 %vm542_vm1, %v2684_v27  ;;  %v3070_v27 = vrot.slane %v15674_v61, 7 }
  0xf6   : > { %13430 = vmatprep.mubr.msk.f32.mxu1 %vm542_vm1, %v2345_v0  ;;  %v673_v35 = vpop.f32.mrf.mxu0  ;;  %v2699_v0 = vrot.slane %v15759_v8, 6 }
  0xf7   : > { %v15712_v45 = vpop.f32.mrf.mxu1 }
  0xf8   : > { %20268 = vst [vmem:[#allocation14_spill] sm:$0xff] %v15712_v45  ;;  %v13140_v43 = vpop.f32.mrf.mxu0  ;;  %13445 = vmatmul.mubr.msk.f32.gmra.mxu0 %vm542_vm1, %v2686_v39  ;;  %v2700_v42 = vsel %vm2669_vm6, %v2697_v56, %v2699_v0  ;;  %v15878_v45 = vld [vmem:[%s14951_s26 + $0xd0] sm:$0xff] }
  0xf9   : > { %v15721_v32 = vpop.f32.mrf.mxu1  ;;  %13431 = vmatmul.mubr.msk.f32.gmra.mxu1 %vm542_vm1, %v2347_v16  ;;  %13447 = vmatprep.mubr.msk.f32.mxu0 %vm542_vm1, %v2688_v24  ;;  %v2698_v16 = vsel %vm2669_vm6, %v2695_v49, %v2697_v56  ;;  %v3072_v24 = vrot.slane %v15687_v18, 7  ;;  %v15790_v49 = vld [vmem:[%s14951_s26 + $0x90] sm:$0xff] }
  0xfa   : > { %13485 = vmatprep.mubr.msk.f32.mxu1 %vm542_vm1, %v3059_v30  ;;  %v683_v52 = vpop.f32.mrf.mxu0  ;;  %v2705_v48 = vrot.slane %v15790_v49, 6 }
  0xfb   : > { %v15734_v40 = vpop.f32.mrf.mxu1  ;;  %v3073_v56 = vsel %vm3056_vm7, %v3070_v27, %v3072_v24 }
  0xfc   : > { %20269 = vst [vmem:[#allocation15_spill] sm:$0xff] %v15734_v40  ;;  %v13143_v20 = vpop.f32.mrf.mxu0  ;;  %13448 = vmatmul.mubr.msk.f32.gmra.mxu0 %vm542_vm1, %v2690_v53  ;;  %v15781_v53 = vld [vmem:[%s14951_s26 + $0x88] sm:$0xff] }
  0xfd   : > { %v13187_v51 = vpop.f32.mrf.mxu1  ;;  %13486 = vmatmul.mubr.msk.f32.vlgmr.msra.gmra.mxu1 %vm542_vm1, %v3061_v36  ;;  %13450 = vmatprep.mubr.msk.f32.mxu0 %vm542_vm1, %v2692_v55  ;;  %20273 = vst [vmem:[#allocation19_spill] sm:$0xff] %v15781_v53  ;;  %v2703_v36 = vrot.slane %v15781_v53, 6 }
  0xfe   : > { %v15749_v25 = vadd.f32 %v13187_v51, %v13137_v28  ;;  %13488 = vmatprep.mubr.msk.f32.mxu1 %vm542_vm1, %v3063_v12  ;;  %v693_v26 = vpop.f32.mrf.mxu0 }
  0xff   : > { %v962_v17 = vpop.f32.mrf.mxu1 }
 0x100   : > { %v15763_v19 = vadd.f32 %v962_v17, %v673_v35  ;;  %v13146_v38 = vpop.f32.mrf.mxu0  ;;  %13451 = vmatmul.mubr.msk.f32.gmra.mxu0 %vm542_vm1, %v2694_v4  ;;  %v2701_v35 = vrot.slane %v15774_v23, 6  ;;  %v3076_v4 = vrot.slane %v15708_v34, 7 }
 0x101   : > { %v13190_v28 = vpop.f32.mrf.mxu1  ;;  %13489 = vmatmul.mubr.msk.f32.gmra.mxu1 %vm542_vm1, %v3065_v58  ;;  %13453 = vmatprep.mubr.msk.f32.mxu0 %vm542_vm1, %v2696_v62  ;;  %v3075_v62 = vsel %vm3056_vm7, %v3072_v24, %v3074_v10 }
 0x102   : > { %v15768_v39 = vadd.f32 %v13190_v28, %v13140_v43  ;;  %13491 = vmatprep.mubr.msk.f32.mxu1 %vm542_vm1, %v3067_v29  ;;  %v703_v30 = vpop.f32.mrf.mxu0  ;;  %v3071_v43 = vsel %vm3056_vm7, %v3068_v50, %v3070_v27  ;;  %v2704_v17 = vsel %vm2669_vm6, %v2701_v35, %v2703_v36  ;;  %v15803_v29 = vld [vmem:[%s14951_s26 + $0x98] sm:$0xff]  ;;  %v3078_v28 = vrot.slane %v15717_v1, 7 }
 0x103   : > { %v972_v2 = vpop.f32.mrf.mxu1  ;;  %20274 = vst [vmem:[#allocation20_spill] sm:$0xff] %v15803_v29  ;;  %v3077_v24 = vsel %vm3056_vm7, %v3074_v10, %v3076_v4 }
 0x104   : > { %v15785_v37 = vadd.f32 %v972_v2, %v683_v52  ;;  %v13149_v55 = vpop.f32.mrf.mxu0  ;;  %13454 = vmatmul.mubr.msk.f32.gmra.mxu0 %vm542_vm1, %v2698_v16  ;;  %v2702_v52 = vsel %vm2669_vm6, %v2699_v0, %v2701_v35 }
 0x105   : > { %v13193_v12 = vpop.f32.mrf.mxu1  ;;  %13492 = vmatmul.mubr.msk.f32.gmra.mxu1 %vm542_vm1, %v3069_v22  ;;  %13456 = vmatprep.mubr.msk.f32.mxu0 %vm542_vm1, %v2700_v42  ;;  %v2706_v22 = vsel %vm2669_vm6, %v2703_v36, %v2705_v48  ;;  %v3080_v42 = vrot.slane %v15730_v46, 7  ;;  %v15825_v36 = vld [vmem:[%s14951_s26 + $0xa8] sm:$0xff] }
 0x106   : > { %v15793_v51 = vadd.f32 %v13193_v12, %v13143_v20  ;;  %13494 = vmatprep.mubr.msk.f32.mxu1 %vm542_vm1, %v3071_v43  ;;  %v713_v58 = vpop.f32.mrf.mxu0  ;;  %v2707_v20 = vrot.slane %v15803_v29, 6  ;;  %20275 = vst [vmem:[#allocation21_spill] sm:$0xff] %v15825_v36 }
 0x107   : > { %v982_v50 = vpop.f32.mrf.mxu1 }
 0x108   : > { %v15807_v16 = vadd.f32 %v982_v50, %v693_v26  ;;  %v13152_v0 = vpop.f32.mrf.mxu0  ;;  %13457 = vmatmul.mubr.msk.f32.gmra.mxu0 %vm542_vm1, %v2702_v52  ;;  %v15818_v26 = vld [vmem:[%s14951_s26 + $0xa0] sm:$0xff]  ;;  %v2708_v52 = vsel %vm2669_vm6, %v2705_v48, %v2707_v20  ;;  %v3082_v50 = vrot.slane %v15739_v44, 7 }
 0x109   : > { %v13196_v27 = vpop.f32.mrf.mxu1  ;;  %13495 = vmatmul.mubr.msk.f32.gmra.mxu1 %vm542_vm1, %v3073_v56  ;;  %13459 = vmatprep.mubr.msk.f32.mxu0 %vm542_vm1, %v2704_v17  ;;  %v2709_v2 = vrot.slane %v15818_v26, 6  ;;  %v2711_v56 = vrot.slane %v15825_v36, 6 }
 0x10a   : > { %v15812_v35 = vadd.f32 %v13196_v27, %v13146_v38  ;;  %13497 = vmatprep.mubr.msk.f32.mxu1 %vm542_vm1, %v3075_v62  ;;  %v723_v43 = vpop.f32.mrf.mxu0  ;;  %v3079_v38 = vsel %vm3056_vm7, %v3076_v4, %v3078_v28  ;;  %v15834_v27 = vld [vmem:[%s14951_s26 + $0xb0] sm:$0xff]  ;;  %v3083_v63 = vsel %vm3056_vm7, %v3080_v42, %v3082_v50 }
 0x10b   : > { %v992_v12 = vpop.f32.mrf.mxu1  ;;  %v2713_v48 = vrot.slane %v15834_v27, 6 }
 0x10c   : > { %v15829_v10 = vadd.f32 %v992_v12, %v703_v30  ;;  %v13155_v17 = vpop.f32.mrf.mxu0  ;;  %13460 = vmatmul.mubr.msk.f32.gmra.mxu0 %vm542_vm1, %v2706_v22  ;;  %v2710_v30 = vsel %vm2669_vm6, %v2707_v20, %v2709_v2  ;;  %v3081_v12 = vsel %vm3056_vm7, %v3078_v28, %v3080_v42  ;;  %v3085_v42 = vsel %vm3056_vm7, %v3082_v50, %v3084_v13 }
 0x10d   : > { %v13199_v62 = vpop.f32.mrf.mxu1  ;;  %13498 = vmatmul.mubr.msk.f32.gmra.mxu1 %vm542_vm1, %v3077_v24  ;;  %13462 = vmatprep.mubr.msk.f32.mxu0 %vm542_vm1, %v2708_v52  ;;  %v2712_v24 = vsel %vm2669_vm6, %v2709_v2, %v2711_v56  ;;  %v3086_v52 = vrot.slane %v15759_v8, 7 }
 0x10e   : > { %v15837_v4 = vadd.f32 %v13199_v62, %v13149_v55  ;;  %13500 = vmatprep.mubr.msk.f32.mxu1 %vm542_vm1, %v3079_v38  ;;  %v733_v21 = vpop.f32.mrf.mxu0  ;;  %v2715_v55 = vrot.slane %v15847_v57, 6  ;;  %v2714_v62 = vsel %vm2669_vm6, %v2711_v56, %v2713_v48  ;;  %v15869_v56 = vld [vmem:[%s14951_s26 + $0xc8] sm:$0xff] }
 0x10f   : > { %v1002_v22 = vpop.f32.mrf.mxu1 }
 0x110   : > { %v15851_v38 = vadd.f32 %v1002_v22, %v713_v58  ;;  %v13158_v20 = vpop.f32.mrf.mxu0  ;;  %13463 = vmatmul.mubr.msk.f32.gmra.mxu0 %vm542_vm1, %v2710_v30  ;;  %v15862_v58 = vld [vmem:[%s14951_s26 + $0xc0] sm:$0xff]  ;;  %s14816_s26 = smov 10  }
 0x111   : > { %v13202_v28 = vpop.f32.mrf.mxu1  ;;  %13501 = vmatmul.mubr.msk.f32.gmra.mxu1 %vm542_vm1, %v3081_v12  ;;  %13465 = vmatprep.mubr.msk.f32.mxu0 %vm542_vm1, %v2712_v24  ;;  %v2717_v22 = vrot.slane %v15862_v58, 6  ;;  %v2716_v12 = vsel %vm2669_vm6, %v2713_v48, %v2715_v55  ;;  %v2719_v24 = vrot.slane %v15869_v56, 6  ;;  %v2721_v48 = vrot.slane %v15878_v45, 6 }
 0x112   : > { %v15856_v2 = vadd.f32 %v13202_v28, %v13152_v0  ;;  %13503 = vmatprep.mubr.msk.f32.mxu1 %vm542_vm1, %v3083_v63  ;;  %v743_v30 = vpop.f32.mrf.mxu0  ;;  %v3087_v0 = vsel %vm3056_vm7, %v3084_v13, %v3086_v52  ;;  %v3090_v63 = vrot.slane %v15781_v53, 7  ;;  %v3092_v53 = vrot.slane %v15790_v49, 7 }
 0x113   : > { %v1012_v14 = vpop.f32.mrf.mxu1 }
 0x114   : > { %v15873_v50 = vadd.f32 %v1012_v14, %v723_v43  ;;  %v13161_v28 = vpop.f32.mrf.mxu0  ;;  %13466 = vmatmul.mubr.msk.f32.gmra.mxu0 %vm542_vm1, %v2714_v62  ;;  %v2718_v14 = vsel %vm2669_vm6, %v2715_v55, %v2717_v22  ;;  %v3089_v43 = vsel %vm3056_vm7, %v3086_v52, %v3088_v11  ;;  %v3091_v8 = vsel %vm3056_vm7, %v3088_v11, %v3090_v63 }
 0x115   : > { %v13205_v40 = vpop.f32.mrf.mxu1  ;;  %13504 = vmatmul.mubr.msk.f32.gmra.mxu1 %vm542_vm1, %v3085_v42  ;;  %13468 = vmatprep.mubr.msk.f32.mxu0 %vm542_vm1, %v2716_v12  ;;  %v2720_v42 = vsel %vm2669_vm6, %v2717_v22, %v2719_v24  ;;  %v2722_v52 = vsel %vm2669_vm6, %v2719_v24, %v2721_v48  ;;  %v3093_v11 = vsel %vm3056_vm7, %v3090_v63, %v3092_v53  ;;  %v2725_v22 = vrot.slane %v15644_v41, 6 }
 0x116   : > { %v15881_v13 = vadd.f32 %v13205_v40, %v13155_v17  ;;  %13506 = vmatprep.mubr.msk.f32.mxu1 %vm542_vm1, %v3087_v0  ;;  %v15888_v23 = vpop.f32.mrf.mxu0  ;;  %v2723_v40 = vrot.slane %v15893_v3, 6  ;;  %v3094_v17 = vrot.slane %v15803_v29, 7  ;;  %v3098_v24 = vrot.slane %v15825_v36, 7 }
 0x117   : > { %20277 = vst [vmem:[#allocation23_spill] sm:$0xff] %v15888_v23  ;;  %v1022_v62 = vpop.f32.mrf.mxu1  ;;  %v2729_v63 = vrot.slane %v15586_v7, 6 }
 0x118   : > { %v15897_v12 = vadd.f32 %v1022_v62, %v733_v21  ;;  %v13164_v55 = vpop.f32.mrf.mxu0  ;;  %13469 = vmatmul.mubr.msk.f32.gmra.mxu0 %vm542_vm1, %v2718_v14  ;;  %v3096_v21 = vrot.slane %v15818_v26, 7  ;;  %v2724_v14 = vsel %vm2669_vm6, %v2721_v48, %v2723_v40 }
 0x119   : > { %v13208_v0 = vpop.f32.mrf.mxu1  ;;  %13507 = vmatmul.mubr.msk.f32.gmra.mxu1 %vm542_vm1, %v3089_v43  ;;  %13471 = vmatprep.mubr.msk.f32.mxu0 %vm542_vm1, %v2720_v42  ;;  %v3095_v43 = vsel %vm3056_vm7, %v3092_v53, %v3094_v17  ;;  %v2726_v53 = vsel %vm2669_vm6, %v2723_v40, %v2725_v22 }
 0x11a   : > { %v15902_v23 = vadd.f32 %v13208_v0, %v13158_v20  ;;  %13509 = vmatprep.mubr.msk.f32.mxu1 %vm542_vm1, %v3091_v8  ;;  %v15909_v62 = vpop.f32.mrf.mxu0  ;;  %v2727_v20 = vrot.slane %v15575_v31, 6  ;;  %v3097_v48 = vsel %vm3056_vm7, %v3094_v17, %v3096_v21 }
 0x11b   : > { %20278 = vst [vmem:[#allocation24_spill] sm:$0xff] %v15909_v62  ;;  %v1032_v29 = vpop.f32.mrf.mxu1 }
 0x11c   : > { %v15915_v42 = vadd.f32 %v1032_v29, %v743_v30  ;;  %v13167_v8 = vpop.f32.mrf.mxu0  ;;  %13472 = vmatmul.mubr.msk.f32.gmra.mxu0 %vm542_vm1, %v2722_v52  ;;  %v3100_v29 = vrot.slane %v15834_v27, 7  ;;  %v2728_v52 = vsel %vm2669_vm6, %v2725_v22, %v2727_v20  ;;  %v2730_v40 = vsel %vm2669_vm6, %v2727_v20, %v2729_v63 }
 0x11d   : > { %v13211_v0 = vpop.f32.mrf.mxu1  ;;  %13510 = vmatmul.mubr.msk.f32.gmra.mxu1 %vm542_vm1, %v3093_v11  ;;  %13474 = vmatprep.mubr.msk.f32.mxu0 %vm542_vm1, %v2724_v14  ;;  %v3099_v11 = vsel %vm3056_vm7, %v3096_v21, %v3098_v24  ;;  %v3102_v14 = vrot.slane %v15847_v57, 7  ;;  %v20281_v21 = vmov 0.0   ;;  %v3106_v20 = vrot.slane %v15869_v56, 7 }
 0x11e   : > { %v15920_v62 = vadd.f32 %v13211_v0, %v13161_v28  ;;  %13512 = vmatprep.mubr.msk.f32.mxu1 %vm542_vm1, %v3095_v43  ;;  %v15927_v30 = vpop.f32.mrf.mxu0  ;;  %v2731_v28 = vrot.slane %v15591_v9, 6  ;;  %v3101_v22 = vsel %vm3056_vm7, %v3098_v24, %v3100_v29 }
 0x11f   : > { %20279 = vst [vmem:[#allocation25_spill] sm:$0xff] %v15927_v30  ;;  %v15929_v36 = vpop.f32.mrf.mxu1  ;;  %v15944_v30 = vrot.slane %v20281_v21, 6 }
 0x120   : > { %20280 = vst [vmem:[#allocation26_spill] sm:$0xff] %v15929_v36  ;;  %v13170_v0 = vpop.f32.mrf.mxu0  ;;  %13475 = vmatmul.mubr.msk.f32.gmra.mxu0 %vm542_vm1, %v2726_v53  ;;  %v3104_v36 = vrot.slane %v15862_v58, 7 }
 0x121   : > { %v13214_v43 = vpop.f32.mrf.mxu1  ;;  %13513 = vmatmul.mubr.msk.f32.gmra.mxu1 %vm542_vm1, %v3097_v48  ;;  %13477 = vmatprep.mubr.msk.f32.mxu0 %vm542_vm1, %v2728_v52  ;;  %20282 = vst [vmem:[#allocation27_spill] sm:$0xff] %v15944_v30  ;;  %v2732_v48 = vsel %vm2669_vm6, %v2729_v63, %v2731_v28 }
 0x122   : > { %v15938_v17 = vadd.f32 %v13214_v43, %v13164_v55  ;;  %13515 = vmatprep.mubr.msk.f32.mxu1 %vm542_vm1, %v3099_v11  ;;  %v15947_v57 = vpop.f32.mrf.mxu0  ;;  %v3103_v55 = vsel %vm3056_vm7, %v3100_v29, %v3102_v14  ;;  %v2734_v11 = vsel %vm2669_vm6, %v2731_v28, %v15944_v30  ;;  %v3105_v63 = vsel %vm3056_vm7, %v3102_v14, %v3104_v36 }
 0x123   : > { %20283 = vst [vmem:[#allocation28_spill] sm:$0xff] %v15947_v57  ;;  %v15949_v53 = vpop.f32.mrf.mxu1  ;;  %v3108_v29 = vrot.slane %v15878_v45, 7  ;;  %v3112_v14 = vrot.slane %v15644_v41, 7 }
 0x124   : > { %20284 = vst [vmem:[#allocation29_spill] sm:$0xff] %v15949_v53  ;;  %v13173_v52 = vpop.f32.mrf.mxu0  ;;  %13478 = vmatmul.mubr.msk.f32.gmra.mxu0 %vm542_vm1, %v2730_v40  ;;  %v3107_v40 = vsel %vm3056_vm7, %v3104_v36, %v3106_v20 }
 0x125   : > { %v13217_v43 = vpop.f32.mrf.mxu1  ;;  %13516 = vmatmul.mubr.msk.f32.gmra.mxu1 %vm542_vm1, %v3101_v22  ;;  %13480 = vmatprep.mubr.msk.f32.mxu0 %vm542_vm1, %v2732_v48  ;;  %v3109_v28 = vsel %vm3056_vm7, %v3106_v20, %v3108_v29 }
 0x126   : > { %v15956_v24 = vadd.f32 %v13217_v43, %v13167_v8  ;;  %13518 = vmatprep.mubr.msk.f32.mxu1 %vm542_vm1, %v3103_v55  ;;  %v15964_v57 = vpop.f32.mrf.mxu0  ;;  %v3110_v8 = vrot.slane %v15893_v3, 7 }
 0x127   : > { %v15966_v53 = vpop.f32.mrf.mxu1 }
 0x128   : > { %v13176_v22 = vpop.f32.mrf.mxu0  ;;  %13481 = vmatmul.mubr.msk.f32.gmra.mxu0 %vm542_vm1, %v2734_v11  ;;  %v3111_v30 = vsel %vm3056_vm7, %v3108_v29, %v3110_v8  ;;  %v3114_v11 = vrot.slane %v15575_v31, 7  ;;  %v3113_v29 = vsel %vm3056_vm7, %v3110_v8, %v3112_v14 }
 0x129   : > { %v13220_v43 = vpop.f32.mrf.mxu1  ;;  %13519 = vmatmul.mubr.msk.f32.gmra.mxu1 %vm542_vm1, %v3105_v63  ;;  %13535 = vmatprep.mubr.msk.f32.mxu0 %vm542_vm1, %v15615_v47 }
 0x12a   : > { %v15972_v48 = vadd.f32 %v13220_v43, %v13170_v0  ;;  %13521 = vmatprep.mubr.msk.f32.mxu1 %vm542_vm1, %v3107_v40  ;;  %v15979_v36 = vpop.f32.mrf.mxu0  ;;  %v3116_v40 = vrot.slane %v15586_v7, 7 }
 0x12b   : > { %20285 = vst [vmem:[#allocation30_spill] sm:$0xff] %v15979_v36  ;;  %v15981_v55 = vpop.f32.mrf.mxu1 }
 0x12c   : > { %v13237_v0 = vpop.f32.mrf.mxu0  ;;  %13536 = vmatmul.mubr.msk.f32.vlgmr.msra.gmra.mxu0 %vm542_vm1, %v15627_v33  ;;  %v3118_v33 = vrot.slane %v15591_v9, 7  ;;  %v3117_v8 = vsel %vm3056_vm7, %v3114_v11, %v3116_v40 }
 0x12d   : > { %v13223_v63 = vpop.f32.mrf.mxu1  ;;  %13522 = vmatmul.mubr.msk.f32.gmra.mxu1 %vm542_vm1, %v3109_v28  ;;  %v1477_v20 = vadd.f32 %v13237_v0, %v15749_v25  ;;  %13538 = vmatprep.mubr.msk.f32.mxu0 %vm542_vm1, %v15634_v54  ;;  %v3115_v28 = vsel %vm3056_vm7, %v3112_v14, %v3114_v11 }
 0x12e   : > { %v15988_v47 = vadd.f32 %v13223_v63, %v13173_v52  ;;  %13524 = vmatprep.mubr.msk.f32.mxu1 %vm542_vm1, %v3111_v30  ;;  %v1317_v36 = vpop.f32.mrf.mxu0  ;;  %v3119_v0 = vsel %vm3056_vm7, %v3116_v40, %v3118_v33 }
 0x12f   : > { %v15996_v43 = vpop.f32.mrf.mxu1  ;;  %v16001_v52 = vadd.f32 %v1317_v36, %v15763_v19  ;;  %v16014_v19 = vrot.slane %v20281_v21, 7 }
 0x130   : > { %v13240_v63 = vpop.f32.mrf.mxu0  ;;  %13539 = vmatmul.mubr.msk.f32.gmra.mxu0 %vm542_vm1, %v15648_v59 }
 0x131   : > { %v13226_v25 = vpop.f32.mrf.mxu1  ;;  %13525 = vmatmul.mubr.msk.f32.gmra.mxu1 %vm542_vm1, %v3113_v29  ;;  %v1479_v30 = vadd.f32 %v13240_v63, %v15768_v39  ;;  %13541 = vmatprep.mubr.msk.f32.mxu0 %vm542_vm1, %v15654_v60  ;;  %20286 = vst [vmem:[#allocation31_spill] sm:$0xff] %v16014_v19  ;;  %v3776_v63 = vld [vmem:[%s20162_s3 + $0x18] sm:$0x1] }
 0x132   : > { %v16006_v54 = vadd.f32 %v13226_v25, %v13176_v22  ;;  %13527 = vmatprep.mubr.msk.f32.mxu1 %vm542_vm1, %v3115_v28  ;;  %v1327_v36 = vpop.f32.mrf.mxu0  ;;  %13583 = vmatprep.subr.msk.mxu1 %vm3056_vm7, %v3776_v63 }
 0x133   : > { %v16016_v14 = vpop.f32.mrf.mxu1  ;;  %v16020_v59 = vadd.f32 %v1327_v36, %v15785_v37  ;;  %v3121_v37 = vsel %vm3056_vm7, %v3118_v33, %v16014_v19  ;;  %13584 = vmatpush3.msk.msra.mxu1 %vm3056_vm7, %v3776_v63  ;;  %v20289_v63 = vld [vmem:[#allocation18_spill] sm:$0xff] }
 0x134   : > { %v13243_v39 = vpop.f32.mrf.mxu0  ;;  %13542 = vmatmul.mubr.msk.f32.gmra.mxu0 %vm542_vm1, %v15666_v6 }
 0x135   : > { %v13229_v22 = vpop.f32.mrf.mxu1  ;;  %13528 = vmatmul.mubr.msk.f32.gmra.mxu1 %vm542_vm1, %v3117_v8  ;;  %v1481_v11 = vadd.f32 %v13243_v39, %v15793_v51  ;;  %13544 = vmatprep.mubr.msk.f32.mxu0 %vm542_vm1, %v15674_v61 }
 0x136   : > { %v16026_v60 = vadd.f32 %v13229_v22, %v15698_v15  ;;  %13530 = vmatprep.mubr.msk.f32.mxu1 %vm542_vm1, %v3119_v0  ;;  %v1337_v40 = vpop.f32.mrf.mxu0 }
 0x137   : > { %v16034_v29 = vpop.f32.mrf.mxu1  ;;  %v16037_v28 = vadd.f32 %v1337_v40, %v15807_v16  ;;  %v20287_v40 = vld [vmem:[#allocation16_spill] sm:$0xff] }
 0x138   : > { %v13246_v25 = vpop.f32.mrf.mxu0  ;;  %13545 = vmatmul.mubr.msk.f32.gmra.mxu0 %vm542_vm1, %v15687_v18 }
 0x139   : > { %v13232_v6 = vpop.f32.mrf.mxu1  ;;  %13531 = vmatmul.mubr.msk.f32.gmra.mxu1 %vm542_vm1, %v3121_v37  ;;  %v1483_v61 = vadd.f32 %v13246_v25, %v15812_v35  ;;  %13547 = vmatprep.mubr.msk.f32.mxu0 %vm542_vm1, %v15691_v5 }
 0x13a   : > { %v16043_v15 = vadd.f32 %v13232_v6, %v15721_v32  ;;  %v1347_v33 = vpop.f32.mrf.mxu0 }
 0x13b   : > { %v16048_v51 = vpop.f32.mrf.mxu1  ;;  %v16051_v16 = vadd.f32 %v1347_v33, %v15829_v10 }
 0x13c   : > { %v13249_v8 = vpop.f32.mrf.mxu0  ;;  %13548 = vmatmul.mubr.msk.f32.gmra.mxu0 %vm542_vm1, %v15708_v34 }
 0x13d   : > { %v13287_v18 = vpop.f32.mrf.mxu1  ;;  %v1485_v32 = vadd.f32 %v13249_v8, %v15837_v4  ;;  %13550 = vmatprep.mubr.msk.f32.mxu0 %vm542_vm1, %v15717_v1 }
 0x13e   : > { %v16060_v5 = vadd.f32 %v13287_v18, %v1477_v20  ;;  %v1357_v35 = vpop.f32.mrf.mxu0 }
 0x13f   : > { %v16065_v10 = vpop.f32.mrf.mxu1  ;;  %v16068_v36 = vadd.f32 %v1357_v35, %v15851_v38 }
 0x140   : > { %v13252_v0 = vpop.f32.mrf.mxu0  ;;  %13551 = vmatmul.mubr.msk.f32.gmra.mxu0 %vm542_vm1, %v15730_v46 }
 0x141   : > { %v13290_v22 = vpop.f32.mrf.mxu1  ;;  %v1487_v34 = vadd.f32 %v13252_v0, %v15856_v2  ;;  %13553 = vmatprep.mubr.msk.f32.mxu0 %vm542_vm1, %v15739_v44  ;;  %v20288_v2 = vld [vmem:[#allocation17_spill] sm:$0xff] }
 0x142   : > { %v16073_v4 = vadd.f32 %v13290_v22, %v1479_v30  ;;  %v1367_v1 = vpop.f32.mrf.mxu0 }
 0x143   : > { %v16077_v20 = vpop.f32.mrf.mxu1  ;;  %v16080_v39 = vadd.f32 %v1367_v1, %v15873_v50 }
 0x144   : > { %v13255_v38 = vpop.f32.mrf.mxu0  ;;  %13554 = vmatmul.mubr.msk.f32.gmra.mxu0 %vm542_vm1, %v20287_v40 }
 0x145   : > { %v13293_v37 = vpop.f32.mrf.mxu1  ;;  %v1489_v46 = vadd.f32 %v13255_v38, %v15881_v13  ;;  %13556 = vmatprep.mubr.msk.f32.mxu0 %vm542_vm1, %v20288_v2  ;;  %v20290_v13 = vld [vmem:[#allocation19_spill] sm:$0xff] }
 0x146   : > { %v16085_v6 = vadd.f32 %v13293_v37, %v1481_v11  ;;  %v1377_v30 = vpop.f32.mrf.mxu0 }
 0x147   : > { %v16089_v44 = vpop.f32.mrf.mxu1  ;;  %v16092_v25 = vadd.f32 %v1377_v30, %v15897_v12 }
 0x148   : > { %v13258_v50 = vpop.f32.mrf.mxu0  ;;  %13557 = vmatmul.mubr.msk.f32.gmra.mxu0 %vm542_vm1, %v20289_v63 }
 0x149   : > { %v13296_v33 = vpop.f32.mrf.mxu1  ;;  %v1491_v8 = vadd.f32 %v13258_v50, %v15902_v23  ;;  %13559 = vmatprep.mubr.msk.f32.mxu0 %vm542_vm1, %v20290_v13  ;;  %v20292_v23 = vld [vmem:[#allocation20_spill] sm:$0xff] }
 0x14a   : > { %v16097_v18 = vadd.f32 %v13296_v33, %v1483_v61  ;;  %v1387_v11 = vpop.f32.mrf.mxu0 }
 0x14b   : > { %v16101_v35 = vpop.f32.mrf.mxu1  ;;  %v16104_v0 = vadd.f32 %v1387_v11, %v15915_v42 }
 0x14c   : > { %v13261_v12 = vpop.f32.mrf.mxu0  ;;  %13560 = vmatmul.mubr.msk.f32.gmra.mxu0 %vm542_vm1, %v15790_v49  ;;  %v20293_v49 = vld [vmem:[#allocation21_spill] sm:$0xff] }
 0x14d   : > { %20291 = vst [vmem:[#allocation16_spill] sm:$0xff] %v16104_v0  ;;  %v13299_v22 = vpop.f32.mrf.mxu1  ;;  %v1493_v1 = vadd.f32 %v13261_v12, %v15920_v62  ;;  %13562 = vmatprep.mubr.msk.f32.mxu0 %vm542_vm1, %v20292_v23 }
 0x14e   : > { %v16109_v38 = vadd.f32 %v13299_v22, %v1485_v32  ;;  %v16113_v61 = vpop.f32.mrf.mxu0 }
 0x14f   : > { %v16115_v37 = vpop.f32.mrf.mxu1 }
 0x150   : > { %v13264_v40 = vpop.f32.mrf.mxu0  ;;  %13563 = vmatmul.mubr.msk.f32.gmra.mxu0 %vm542_vm1, %v15818_v26  ;;  %v20294_v26 = vld [vmem:[#allocation22_spill] sm:$0xff] }
 0x151   : > { %v13302_v2 = vpop.f32.mrf.mxu1  ;;  %v1495_v42 = vadd.f32 %v13264_v40, %v15938_v17  ;;  %13565 = vmatprep.mubr.msk.f32.mxu0 %vm542_vm1, %v20293_v49 }
 0x152   : > { %v16120_v30 = vadd.f32 %v13302_v2, %v1487_v34  ;;  %v16124_v62 = vpop.f32.mrf.mxu0 }
 0x153   : > { %v16126_v32 = vpop.f32.mrf.mxu1 }
 0x154   : > { %v13267_v50 = vpop.f32.mrf.mxu0  ;;  %13566 = vmatmul.mubr.msk.f32.gmra.mxu0 %vm542_vm1, %v15834_v27 }
 0x155   : > { %v13305_v33 = vpop.f32.mrf.mxu1  ;;  %v1497_v63 = vadd.f32 %v13267_v50, %v15956_v24  ;;  %13568 = vmatprep.mubr.msk.f32.mxu0 %vm542_vm1, %v20294_v26 }
 0x156   : > { %v16131_v13 = vadd.f32 %v13305_v33, %v1489_v46  ;;  %v16135_v17 = vpop.f32.mrf.mxu0  ;;  %v3775_v46 = vld [vmem:[%s20162_s3 + $0x10] sm:$0xff] }
 0x157   : > { %v16137_v34 = vpop.f32.mrf.mxu1  ;;  %13585 = vmatprep.subr.mxu1 %v3775_v46 }
 0x158   : > { %v13270_v11 = vpop.f32.mrf.mxu0  ;;  %13569 = vmatmul.mubr.msk.f32.gmra.mxu0 %vm542_vm1, %v15862_v58  ;;  %13586 = vmatpush3.msra.mxu1 %v3775_v46 }
 0x159   : > { %v13308_v12 = vpop.f32.mrf.mxu1  ;;  %v1499_v22 = vadd.f32 %v13270_v11, %v15972_v48  ;;  %13571 = vmatprep.mubr.msk.f32.mxu0 %vm542_vm1, %v15869_v56 }
 0x15a   : > { %v16142_v23 = vadd.f32 %v13308_v12, %v1491_v8  ;;  %v16146_v27 = vpop.f32.mrf.mxu0 }
 0x15b   : > { %20295 = vst [vmem:[#allocation17_spill] sm:$0xff] %v16146_v27  ;;  %v16148_v24 = vpop.f32.mrf.mxu1 }
 0x15c   : > { %20296 = vst [vmem:[#allocation18_spill] sm:$0xff] %v16148_v24  ;;  %v13273_v40 = vpop.f32.mrf.mxu0  ;;  %13572 = vmatmul.mubr.msk.f32.gmra.mxu0 %vm542_vm1, %v15878_v45 }
 0x15d   : > { %v13311_v2 = vpop.f32.mrf.mxu1  ;;  %v1501_v58 = vadd.f32 %v13273_v40, %v15988_v47  ;;  %13574 = vmatprep.mubr.msk.f32.mxu0 %vm542_vm1, %v15893_v3 }
 0x15e   : > { %v16156_v48 = vadd.f32 %v13311_v2, %v1493_v1  ;;  %v16160_v56 = vpop.f32.mrf.mxu0 }
 0x15f   : > { %20297 = vst [vmem:[#allocation19_spill] sm:$0xff] %v16160_v56  ;;  %v16162_v8 = vpop.f32.mrf.mxu1 }
 0x160   : > { %20298 = vst [vmem:[#allocation20_spill] sm:$0xff] %v16162_v8  ;;  %v13276_v49 = vpop.f32.mrf.mxu0  ;;  %13575 = vmatmul.mubr.msk.f32.gmra.mxu0 %vm542_vm1, %v15644_v41 }
 0x161   : > { %v13314_v50 = vpop.f32.mrf.mxu1  ;;  %v1503_v45 = vadd.f32 %v13276_v49, %v16006_v54  ;;  %13577 = vmatprep.mubr.msk.f32.mxu0 %vm542_vm1, %v15575_v31 }
 0x162   : > { %v16167_v33 = vadd.f32 %v13314_v50, %v1495_v42  ;;  %v16171_v47 = vpop.f32.mrf.mxu0 }
 0x163   : > { %20299 = vst [vmem:[#allocation21_spill] sm:$0xff] %v16171_v47  ;;  %v16173_v3 = vpop.f32.mrf.mxu1 }
 0x164   : > { %20300 = vst [vmem:[#allocation22_spill] sm:$0xff] %v16173_v3  ;;  %v13279_v1 = vpop.f32.mrf.mxu0  ;;  %13578 = vmatmul.mubr.msk.f32.gmra.mxu0 %vm542_vm1, %v15586_v7 }
 0x165   : > { %v13317_v26 = vpop.f32.mrf.mxu1  ;;  %v1505_v11 = vadd.f32 %v13279_v1, %v16026_v60  ;;  %13580 = vmatprep.mubr.msk.f32.mxu0 %vm542_vm1, %v15591_v9 }
 0x166   : > { %v16178_v12 = vadd.f32 %v13317_v26, %v1497_v63  ;;  %v16182_v41 = vpop.f32.mrf.mxu0 }
 0x167   : > { %20301 = vst [vmem:[#allocation32_spill] sm:$0xff] %v16182_v41  ;;  %v16184_v54 = vpop.f32.mrf.mxu1 }
 0x168   : > { %20302 = vst [vmem:[#allocation33_spill] sm:$0xff] %v16184_v54  ;;  %v13282_v31 = vpop.f32.mrf.mxu0  ;;  %13581 = vmatmul.mubr.f32.gmra.mxu0 %v20281_v21 }
 0x169   : > { %v13320_v42 = vpop.f32.mrf.mxu1  ;;  %v1507_v46 = vadd.f32 %v13282_v31, %v16043_v15  ;;  %v3774_v31 = vld [vmem:[%s20162_s3 + $0x8] sm:$0x1] }
 0x16a   : > { %v16188_v40 = vadd.f32 %v13320_v42, %v1499_v22  ;;  %v16190_v7 = vpop.f32.mrf.mxu0  ;;  %13635 = vmatprep.subr.msk.mxu0 %vm3056_vm7, %v3774_v31 }
 0x16b   : > { %20303 = vst [vmem:[#allocation34_spill] sm:$0xff] %v16190_v7  ;;  %v16192_v60 = vpop.f32.mrf.mxu1  ;;  %13636 = vmatpush3.msk.msra.mxu0 %vm3056_vm7, %v3774_v31 }
 0x16c   : > { %20304 = vst [vmem:[#allocation35_spill] sm:$0xff] %v16192_v60  ;;  %v13337_v2 = vpop.f32.mrf.mxu0 }
 0x16d   : > { %v13323_v63 = vpop.f32.mrf.mxu1  ;;  %v16197_v9 = vadd.f32 %v13337_v2, %v16060_v5  ;;  %v3773_v5 = vld [vmem:[%s20162_s3] sm:$0xff] }
 0x16e   : > { %v16194_v49 = vadd.f32 %v13323_v63, %v1501_v58  ;;  %v16201_v1 = vpop.f32.mrf.mxu0  ;;  %13637 = vmatprep.subr.mxu0 %v3773_v5 }
 0x16f   : > { %v16199_v50 = vpop.f32.mrf.mxu1  ;;  %13638 = vmatpush3.msra.mxu0 %v3773_v5 }
 0x170   : > { %20305 = vst [vmem:[#allocation36_spill] sm:$0xff] %v16199_v50  ;;  %v13340_v21 = vpop.f32.mrf.mxu0 }
 0x171   : > { %v13326_v26 = vpop.f32.mrf.mxu1  ;;  %v16206_v22 = vadd.f32 %v13340_v21, %v16073_v4 }
 0x172   : > { %v16203_v15 = vadd.f32 %v13326_v26, %v1503_v45  ;;  %v16213_v42 = vpop.f32.mrf.mxu0 }
 0x173   : > { %v16211_v58 = vpop.f32.mrf.mxu1 }
 0x174   : > { %20306 = vst [vmem:[#allocation37_spill] sm:$0xff] %v16211_v58  ;;  %v13343_v63 = vpop.f32.mrf.mxu0 }
 0x175   : > { %v13329_v45 = vpop.f32.mrf.mxu1  ;;  %v2255_v4 = vadd.f32 %v13343_v63, %v16085_v6 }
 0x176   : > { %v16220_v21 = vadd.f32 %v13329_v45, %v1505_v11  ;;  %v16225_v26 = vpop.f32.mrf.mxu0 }
 0x177   : > { %v16223_v2 = vpop.f32.mrf.mxu1 }
 0x178   : > { %20307 = vst [vmem:[#allocation38_spill] sm:$0xff] %v16223_v2  ;;  %v13346_v58 = vpop.f32.mrf.mxu0 }
 0x179   : > { %v13332_v19 = vpop.f32.mrf.mxu1  ;;  %v2257_v31 = vadd.f32 %v13346_v58, %v16097_v18 }
 0x17a   : > { %v16227_v50 = vadd.f32 %v13332_v19, %v1507_v46  ;;  %v16232_v7 = vpop.f32.mrf.mxu0  ;;  %v16244_v19 = vld [vmem:[%s20162_s3 + $0x28] sm:$0x1] }
 0x17b   : > { %v16230_v60 = vpop.f32.mrf.mxu1  ;;  %20309 = vst [vmem:[#allocation40_spill] sm:$0xff] %v16232_v7  ;;  %20311 = vst [vmem:[#allocation42_spill] sm:$0xff] %v16244_v19  ;;  %13687 = vmatprep.subr.msk.mxu1 %vm3056_vm7, %v16244_v19 }
 0x17c   : > { %20308 = vst [vmem:[#allocation39_spill] sm:$0xff] %v16230_v60  ;;  %v13349_v54 = vpop.f32.mrf.mxu0 }
 0x17d   : > { %v16234_v11 = vpop.f32.mrf.mxu1  ;;  %v2259_v6 = vadd.f32 %v13349_v54, %v16109_v38 }
 0x17e   : > { %v16237_v5 = vpop.f32.mrf.mxu0 }
 0x17f   : > { %20310 = vst [vmem:[#allocation41_spill] sm:$0xff] %v16237_v5  ;;  %v16239_v45 = vpop.f32.mrf.mxu1 }
 0x180   : > { %v13352_v46 = vpop.f32.mrf.mxu0 }
 0x181   : > { %v16246_v18 = vpop.f32.mrf.mxu1  ;;  %v2261_v58 = vadd.f32 %v13352_v46, %v16120_v30 }
 0x182   : > { %v16251_v63 = vpop.f32.mrf.mxu0 }
 0x183   : > { %20312 = vst [vmem:[#allocation43_spill] sm:$0xff] %v16251_v63  ;;  %v16253_v38 = vpop.f32.mrf.mxu1 }
 0x184   : > { %v13355_v54 = vpop.f32.mrf.mxu0 }
 0x185   : > { %v13393_v60 = vpop.f32.mrf.mxu1  ;;  %v2263_v2 = vadd.f32 %v13355_v54, %v16131_v13 }
 0x186   : > { %v16256_v41 = vadd.f32 %v13393_v60, %v2255_v4  ;;  %v16258_v3 = vpop.f32.mrf.mxu0 }
 0x187   : > { %20313 = vst [vmem:[#allocation44_spill] sm:$0xff] %v16258_v3  ;;  %v16260_v5 = vpop.f32.mrf.mxu1 }
 0x188   : > { %20314 = vst [vmem:[#allocation45_spill] sm:$0xff] %v16260_v5  ;;  %v13358_v47 = vpop.f32.mrf.mxu0 }
 0x189   : > { %v13396_v8 = vpop.f32.mrf.mxu1  ;;  %v2265_v19 = vadd.f32 %v13358_v47, %v16142_v23 }
 0x18a   : > { %v16263_v56 = vadd.f32 %v13396_v8, %v2257_v31  ;;  %v16265_v30 = vpop.f32.mrf.mxu0 }
 0x18b   : > { %20315 = vst [vmem:[#allocation46_spill] sm:$0xff] %v16265_v30  ;;  %v16267_v46 = vpop.f32.mrf.mxu1 }
 0x18c   : > { %20316 = vst [vmem:[#allocation47_spill] sm:$0xff] %v16267_v46  ;;  %v13361_v63 = vpop.f32.mrf.mxu0 }
 0x18d   : > { %v13399_v7 = vpop.f32.mrf.mxu1  ;;  %v2267_v13 = vadd.f32 %v13361_v63, %v16156_v48 }
 0x18e   : > { %v16270_v60 = vadd.f32 %v13399_v7, %v2259_v6  ;;  %v16272_v4 = vpop.f32.mrf.mxu0 }
 0x18f   : > { %20317 = vst [vmem:[#allocation48_spill] sm:$0xff] %v16272_v4  ;;  %v16274_v54 = vpop.f32.mrf.mxu1 }
 0x190   : > { %20318 = vst [vmem:[#allocation49_spill] sm:$0xff] %v16274_v54  ;;  %v13364_v3 = vpop.f32.mrf.mxu0 }
 0x191   : > { %v13402_v24 = vpop.f32.mrf.mxu1  ;;  %v2269_v23 = vadd.f32 %v13364_v3, %v16167_v33 }
 0x192   : > { %v16277_v8 = vadd.f32 %v13402_v24, %v2261_v58  ;;  %v16279_v47 = vpop.f32.mrf.mxu0 }
 0x193   : > { %20319 = vst [vmem:[#allocation50_spill] sm:$0xff] %v16279_v47  ;;  %v16281_v31 = vpop.f32.mrf.mxu1 }
 0x194   : > { %20320 = vst [vmem:[#allocation51_spill] sm:$0xff] %v16281_v31  ;;  %v13367_v30 = vpop.f32.mrf.mxu0 }
 0x195   : > { %v13405_v46 = vpop.f32.mrf.mxu1  ;;  %v2271_v48 = vadd.f32 %v13367_v30, %v16178_v12 }
 0x196   : > { %v16284_v7 = vadd.f32 %v13405_v46, %v2263_v2  ;;  %v16286_v6 = vpop.f32.mrf.mxu0 }
 0x197   : > { %20321 = vst [vmem:[#allocation52_spill] sm:$0xff] %v16286_v6  ;;  %v16288_v63 = vpop.f32.mrf.mxu1 }
 0x198   : > { %20322 = vst [vmem:[#allocation53_spill] sm:$0xff] %v16288_v63  ;;  %v13370_v4 = vpop.f32.mrf.mxu0 }
 0x199   : > { %v13408_v54 = vpop.f32.mrf.mxu1  ;;  %v2273_v33 = vadd.f32 %v13370_v4, %v16188_v40 }
 0x19a   : > { %v16291_v24 = vadd.f32 %v13408_v54, %v2265_v19  ;;  %v16293_v3 = vpop.f32.mrf.mxu0 }
 0x19b   : > { %20323 = vst [vmem:[#allocation54_spill] sm:$0xff] %v16293_v3  ;;  %v16295_v58 = vpop.f32.mrf.mxu1 }
 0x19c   : > { %20324 = vst [vmem:[#allocation55_spill] sm:$0xff] %v16295_v58  ;;  %v13373_v47 = vpop.f32.mrf.mxu0 }
 0x19d   : > { %v13411_v31 = vpop.f32.mrf.mxu1  ;;  %v2275_v12 = vadd.f32 %v13373_v47, %v16194_v49 }
 0x19e   : > { %v16298_v2 = vadd.f32 %v13411_v31, %v2267_v13  ;;  %v16300_v30 = vpop.f32.mrf.mxu0 }
 0x19f   : > { %20325 = vst [vmem:[#allocation56_spill] sm:$0xff] %v16300_v30  ;;  %v16302_v46 = vpop.f32.mrf.mxu1 }
 0x1a0   : > { %20326 = vst [vmem:[#allocation57_spill] sm:$0xff] %v16302_v46  ;;  %v13376_v6 = vpop.f32.mrf.mxu0 }
 0x1a1   : > { %v13414_v63 = vpop.f32.mrf.mxu1  ;;  %v2277_v40 = vadd.f32 %v13376_v6, %v16203_v15 }
 0x1a2   : > { %v16305_v19 = vadd.f32 %v13414_v63, %v2269_v23  ;;  %v16307_v4 = vpop.f32.mrf.mxu0 }
 0x1a3   : > { %20327 = vst [vmem:[#allocation58_spill] sm:$0xff] %v16307_v4  ;;  %v16309_v54 = vpop.f32.mrf.mxu1 }
 0x1a4   : > { %20328 = vst [vmem:[#allocation59_spill] sm:$0xff] %v16309_v54  ;;  %v13379_v3 = vpop.f32.mrf.mxu0 }
 0x1a5   : > { %v13417_v58 = vpop.f32.mrf.mxu1  ;;  %v2279_v49 = vadd.f32 %v13379_v3, %v16220_v21 }
 0x1a6   : > { %v16312_v13 = vadd.f32 %v13417_v58, %v2271_v48  ;;  %v16314_v47 = vpop.f32.mrf.mxu0 }
 0x1a7   : > { %20329 = vst [vmem:[#allocation60_spill] sm:$0xff] %v16314_v47  ;;  %v16316_v31 = vpop.f32.mrf.mxu1 }
 0x1a8   : > { %20330 = vst [vmem:[#allocation61_spill] sm:$0xff] %v16316_v31  ;;  %v13382_v30 = vpop.f32.mrf.mxu0 }
 0x1a9   : > { %v13420_v46 = vpop.f32.mrf.mxu1  ;;  %v2281_v15 = vadd.f32 %v13382_v30, %v16227_v50 }
 0x1aa   : > { %v2660_v23 = vadd.f32 %v13420_v46, %v2273_v33  ;;  %v16319_v6 = vpop.f32.mrf.mxu0  ;;  %v16338_v33 = vld [vmem:[%s20162_s3 + $0x38] sm:$0x1] }
 0x1ab   : > { %20331 = vst [vmem:[#allocation62_spill] sm:$0xff] %v16319_v6  ;;  %v16321_v63 = vpop.f32.mrf.mxu1  ;;  %20335 = vst [vmem:[#allocation66_spill] sm:$0xff] %v16338_v33  ;;  %13739 = vmatprep.subr.msk.mxu0 %vm3056_vm7, %v16338_v33 }
 0x1ac   : > { %20332 = vst [vmem:[#allocation63_spill] sm:$0xff] %v16321_v63  ;;  %v16323_v54 = vpop.f32.mrf.mxu0 }
 0x1ad   : > { %v13423_v4 = vpop.f32.mrf.mxu1 }
 0x1ae   : > { %v2662_v0 = vadd.f32 %v13423_v4, %v2275_v12  ;;  %v16327_v48 = vpop.f32.mrf.mxu0 }
 0x1af   : > { %v16325_v21 = vpop.f32.mrf.mxu1 }
 0x1b0   : > { %20333 = vst [vmem:[#allocation64_spill] sm:$0xff] %v16325_v21  ;;  %v16329_v58 = vpop.f32.mrf.mxu0 }
 0x1b1   : > { %v13426_v3 = vpop.f32.mrf.mxu1 }
 0x1b2   : > { %v2664_v47 = vadd.f32 %v13426_v3, %v2277_v40  ;;  %v16333_v50 = vpop.f32.mrf.mxu0 }
 0x1b3   : > { %v16331_v31 = vpop.f32.mrf.mxu1 }
 0x1b4   : > { %20334 = vst [vmem:[#allocation65_spill] sm:$0xff] %v16331_v31  ;;  %v13443_v30 = vpop.f32.mrf.mxu0 }
 0x1b5   : > { %v13429_v12 = vpop.f32.mrf.mxu1  ;;  %v16343_v4 = vadd.f32 %v13443_v30, %v16256_v41 }
 0x1b6   : > { %v2666_v46 = vadd.f32 %v13429_v12, %v2279_v49  ;;  %v16347_v40 = vpop.f32.mrf.mxu0 }
 0x1b7   : > { %20336 = vst [vmem:[#allocation67_spill] sm:$0xff] %v16343_v4  ;;  %v16345_v6 = vpop.f32.mrf.mxu1 }
 0x1b8   : > { %20337 = vst [vmem:[#allocation68_spill] sm:$0xff] %v16345_v6  ;;  %v13446_v31 = vpop.f32.mrf.mxu0 }
 0x1b9   : > { %v13432_v3 = vpop.f32.mrf.mxu1  ;;  %v16352_v63 = vadd.f32 %v13446_v31, %v16263_v56 }
 0x1ba   : > { %v16349_v21 = vadd.f32 %v13432_v3, %v2281_v15  ;;  %v16356_v33 = vpop.f32.mrf.mxu0 }
 0x1bb   : > { %20338 = vst [vmem:[#allocation69_spill] sm:$0xff] %v16352_v63  ;;  %v16354_v5 = vpop.f32.mrf.mxu1  ;;  %20340 = vst [vmem:[#allocation71_spill] sm:$0xff] %v16356_v33 }
 0x1bc   : > { %20339 = vst [vmem:[#allocation70_spill] sm:$0xff] %v16354_v5  ;;  %v13449_v27 = vpop.f32.mrf.mxu0 }
 0x1bd   : > { %v16358_v49 = vpop.f32.mrf.mxu1  ;;  %v16361_v41 = vadd.f32 %v13449_v27, %v16270_v60 }
 0x1be   : > { %v16363_v12 = vpop.f32.mrf.mxu0 }
 0x1bf   : > { %20341 = vst [vmem:[#allocation72_spill] sm:$0xff] %v16361_v41  ;;  %20342 = vst [vmem:[#allocation73_spill] sm:$0xff] %v16363_v12  ;;  %v16365_v30 = vpop.f32.mrf.mxu1 }
 0x1c0   : > { %v13452_v6 = vpop.f32.mrf.mxu0 }
 0x1c1   : > { %v16367_v15 = vpop.f32.mrf.mxu1  ;;  %v16370_v56 = vadd.f32 %v13452_v6, %v16277_v8 }
 0x1c2   : > { %v16372_v31 = vpop.f32.mrf.mxu0 }
 0x1c3   : > { %20343 = vst [vmem:[#allocation74_spill] sm:$0xff] %v16370_v56  ;;  %20344 = vst [vmem:[#allocation75_spill] sm:$0xff] %v16372_v31  ;;  %v16374_v3 = vpop.f32.mrf.mxu1 }
 0x1c4   : > { %v13455_v5 = vpop.f32.mrf.mxu0 }
 0x1c5   : > { %v16376_v63 = vpop.f32.mrf.mxu1  ;;  %v16379_v27 = vadd.f32 %v13455_v5, %v16284_v7 }
 0x1c6   : > { %v16381_v60 = vpop.f32.mrf.mxu0 }
 0x1c7   : > { %20345 = vst [vmem:[#allocation76_spill] sm:$0xff] %v16379_v27  ;;  %20346 = vst [vmem:[#allocation77_spill] sm:$0xff] %v16381_v60  ;;  %v16383_v41 = vpop.f32.mrf.mxu1 }
 0x1c8   : > { %v13458_v12 = vpop.f32.mrf.mxu0 }
 0x1c9   : > { %v16385_v33 = vpop.f32.mrf.mxu1  ;;  %v16388_v8 = vadd.f32 %v13458_v12, %v16291_v24 }
 0x1ca   : > { %20347 = vst [vmem:[#allocation78_spill] sm:$0xff] %v16385_v33  ;;  %v16390_v6 = vpop.f32.mrf.mxu0 }
 0x1cb   : > { %20348 = vst [vmem:[#allocation79_spill] sm:$0xff] %v16388_v8  ;;  %20349 = vst [vmem:[#allocation80_spill] sm:$0xff] %v16390_v6  ;;  %v16392_v56 = vpop.f32.mrf.mxu1 }
 0x1cc   : > { %v13461_v31 = vpop.f32.mrf.mxu0 }
 0x1cd   : > { %v16394_v4 = vpop.f32.mrf.mxu1  ;;  %v16397_v5 = vadd.f32 %v13461_v31, %v16298_v2 }
 0x1ce   : > { %20350 = vst [vmem:[#allocation81_spill] sm:$0xff] %v16394_v4  ;;  %v16399_v7 = vpop.f32.mrf.mxu0 }
 0x1cf   : > { %20351 = vst [vmem:[#allocation82_spill] sm:$0xff] %v16397_v5  ;;  %20352 = vst [vmem:[#allocation83_spill] sm:$0xff] %v16399_v7  ;;  %v16401_v27 = vpop.f32.mrf.mxu1 }
 0x1d0   : > { %20353 = vst [vmem:[#allocation84_spill] sm:$0xff] %v16401_v27  ;;  %v13464_v60 = vpop.f32.mrf.mxu0 }
 0x1d1   : > { %v16404_v33 = vadd.f32 %v13464_v60, %v16305_v19  ;;  %v16406_v24 = vpop.f32.mrf.mxu1 }
 0x1d2   : > { %20355 = vst [vmem:[#allocation86_spill] sm:$0xff] %v16406_v24  ;;  %v16408_v12 = vpop.f32.mrf.mxu0 }
 0x1d3   : > { %20354 = vst [vmem:[#allocation85_spill] sm:$0xff] %v16404_v33  ;;  %20356 = vst [vmem:[#allocation87_spill] sm:$0xff] %v16408_v12  ;;  %v16410_v6 = vpop.f32.mrf.mxu1 }
 0x1d4   : > { %v13467_v8 = vpop.f32.mrf.mxu0  ;;  %20357 = vst [vmem:[#allocation88_spill] sm:$0xff] %v16410_v6 }
 0x1d5   : > { %v16413_v4 = vadd.f32 %v13467_v8, %v16312_v13  ;;  %v16417_v5 = vpop.f32.mrf.mxu1 }
 0x1d6   : > { %v16415_v2 = vpop.f32.mrf.mxu0 }
 0x1d7   : > { %20358 = vst [vmem:[#allocation89_spill] sm:$0xff] %v16413_v4  ;;  %20359 = vst [vmem:[#allocation90_spill] sm:$0xff] %v16415_v2  ;;  %v16423_v60 = vpop.f32.mrf.mxu1  ;;  %v20370_v2 = vld [vmem:[#allocation25_spill] sm:$0xff] }
 0x1d8   : > { %v13470_v31 = vpop.f32.mrf.mxu0 }
 0x1d9   : > { %v16419_v7 = vadd.f32 %v13470_v31, %v2660_v23  ;;  %v16429_v24 = vpop.f32.mrf.mxu1  ;;  %v1863_v23 = vadd.f32 %v16065_v10, %v16001_v52  ;;  %v1063_v52 = vadd.f32 %v15966_v53, %v20370_v2  ;;  %v20372_v53 = vld [vmem:[#allocation30_spill] sm:$0xff] }
 0x1da   : > { %v16421_v27 = vpop.f32.mrf.mxu0  ;;  %v1093_v2 = vadd.f32 %v16016_v14, %v20372_v53  ;;  %v1869_v14 = vadd.f32 %v16101_v35, %v16051_v16  ;;  %v1871_v16 = vadd.f32 %v16115_v37, %v16068_v36  ;;  %v1873_v35 = vadd.f32 %v16126_v32, %v16080_v39  ;;  %v20375_v37 = vld [vmem:[#allocation17_spill] sm:$0xff] }
 0x1db   : > { %20360 = vst [vmem:[#allocation91_spill] sm:$0xff] %v16419_v7  ;;  %20361 = vst [vmem:[#allocation92_spill] sm:$0xff] %v16421_v27  ;;  %v16437_v31 = vpop.f32.mrf.mxu1  ;;  %v16511_v36 = vadd.f32 %v16137_v34, %v16092_v25  ;;  %v20376_v39 = vld [vmem:[#allocation45_spill] sm:$0xff] }
 0x1dc   : > { %v13473_v19 = vpop.f32.mrf.mxu0 }
 0x1dd   : > { %v16425_v33 = vadd.f32 %v13473_v19, %v2662_v0  ;;  %v2250_v0 = vadd.f32 %v16201_v1, %v1863_v23  ;;  %v2638_v19 = vadd.f32 %v16234_v11, %v16197_v9  ;;  %v16456_v23 = vpop.f32.mrf.mxu1  ;;  %v20371_v11 = vld [vmem:[#allocation28_spill] sm:$0xff] }
 0x1de   : > { %v16427_v12 = vpop.f32.mrf.mxu0 }
 0x1df   : > { %20362 = vst [vmem:[#allocation93_spill] sm:$0xff] %v16425_v33  ;;  %20363 = vst [vmem:[#allocation94_spill] sm:$0xff] %v16427_v12  ;;  %v20366_v33 = vld [vmem:[#allocation23_spill] sm:$0xff]  ;;  %v3025_v1 = vadd.f32 %v16323_v54, %v2638_v19  ;;  %v2640_v54 = vadd.f32 %v16246_v18, %v16206_v22  ;;  %v16490_v22 = vld [vmem:[%s20161_s2] ss:$0 sm:$0xff] }
 0x1e0   : > { %v13476_v6 = vpop.f32.mrf.mxu0 }
 0x1e1   : > { %v16431_v13 = vadd.f32 %v13476_v6, %v2664_v47  ;;  %v20367_v47 = vld [vmem:[#allocation26_spill] sm:$0xff] }
 0x1e2   : > { %v16433_v8 = vpop.f32.mrf.mxu0  ;;  %v1043_v6 = vadd.f32 %v20367_v47, %v20366_v33  ;;  %v1073_v33 = vadd.f32 %v15981_v55, %v20371_v11  ;;  %v3412_v55 = vadd.f32 %v16358_v49, %v3025_v1  ;;  %v16495_v49 = vpop.f32.mrf.mxu1 }
 0x1e3   : > { %20364 = vst [vmem:[#allocation95_spill] sm:$0xff] %v16431_v13  ;;  %20365 = vst [vmem:[#allocation96_spill] sm:$0xff] %v16433_v8  ;;  %v20368_v13 = vld [vmem:[#allocation24_spill] sm:$0xff]  ;;  %v20369_v8 = vld [vmem:[#allocation29_spill] sm:$0xff] }
 0x1e4   : > { %v13479_v4 = vpop.f32.mrf.mxu0  ;;  %v1053_v12 = vadd.f32 %v20369_v8, %v20368_v13  ;;  %v1083_v13 = vadd.f32 %v15996_v43, %v15964_v57  ;;  %v20373_v8 = vld [vmem:[#allocation14_spill] sm:$0xff]  ;;  %v1867_v43 = vadd.f32 %v16089_v44, %v16037_v28 }
 0x1e5   : > { %v16439_v7 = vadd.f32 %v13479_v4, %v2666_v46  ;;  %v1865_v46 = vadd.f32 %v16077_v20, %v16020_v59  ;;  %v2637_v4 = vadd.f32 %v16239_v45, %v2250_v0  ;;  %v16469_v59 = vadd.f32 %v16034_v29, %v20373_v8  ;;  %v20374_v0 = vld [vmem:[#allocation15_spill] sm:$0xff] }
 0x1e6   : > { %v16441_v27 = vpop.f32.mrf.mxu0  ;;  %v16480_v57 = vadd.f32 %v16048_v51, %v20374_v0  ;;  %v1492_v29 = vadd.f32 %v16113_v61, %v1043_v6  ;;  %v1494_v44 = vadd.f32 %v16124_v62, %v1053_v12  ;;  %v2254_v61 = vadd.f32 %v16225_v26, %v1867_v43  ;;  %v20377_v12 = vld [vmem:[#allocation16_spill] sm:$0xff]  ;;  %v20383_v43 = vld [vmem:[#allocation21_spill] sm:$0xff] }
 0x1e7   : > { %v2252_v45 = vadd.f32 %v16213_v42, %v1865_v46  ;;  %v16507_v6 = vadd.f32 %v16135_v17, %v1063_v52  ;;  %v16514_v62 = vadd.f32 %v20375_v37, %v1073_v33  ;;  %v16522_v46 = vpop.f32.mrf.mxu1  ;;  %v20380_v33 = vld [vmem:[#allocation67_spill] sm:$0xff] }
 0x1e8   : > { %v13482_v10 = vpop.f32.mrf.mxu0  ;;  %v2641_v32 = vadd.f32 %v20376_v39, %v2254_v61  ;;  %v3416_v53 = vadd.f32 %v16376_v63, %v20380_v33 }
 0x1e9   : > { %v16459_v9 = vadd.f32 %v13482_v10, %v16349_v21  ;;  %v3024_v21 = vadd.f32 %v16327_v48, %v2637_v4  ;;  %v2639_v18 = vadd.f32 %v16253_v38, %v2252_v45  ;;  %v3027_v48 = vadd.f32 %v16329_v58, %v2640_v54  ;;  %v20379_v4 = vld [vmem:[#allocation40_spill] sm:$0xff]  ;;  %v20381_v54 = vld [vmem:[#allocation19_spill] sm:$0xff] }
 0x1ea   : > { %v16471_v20 = vpop.f32.mrf.mxu0  ;;  %v2256_v25 = vadd.f32 %v20379_v4, %v1869_v14  ;;  %v3028_v34 = vadd.f32 %v16347_v40, %v2641_v32  ;;  %v16541_v40 = vadd.f32 %v20383_v43, %v1093_v2  ;;  %v20384_v14 = vld [vmem:[#allocation47_spill] sm:$0xff]  ;;  %v20392_v4 = vld [vmem:[#allocation49_spill] sm:$0xff] }
 0x1eb   : > { %v3411_v51 = vadd.f32 %v16365_v30, %v3024_v21  ;;  %v3026_v38 = vadd.f32 %v16333_v50, %v2639_v18  ;;  %v3414_v58 = vadd.f32 %v16367_v15, %v3027_v48  ;;  %v20378_v50 = vld [vmem:[#allocation18_spill] sm:$0xff]  ;;  %v16535_v21 = vadd.f32 %v20381_v54, %v1083_v13  ;;  %v20385_v48 = vld [vmem:[#allocation41_spill] sm:$0xff]  ;;  %v3779_v13 = vld [vmem:[%s20162_s3 + $0x30] sm:$0xff] }
 0x1ec   : > { %v13537_v42 = vpop.f32.mrf.mxu0  ;;  %v16519_v10 = vadd.f32 %v20378_v50, %v20377_v12  ;;  %v3415_v63 = vadd.f32 %v16383_v41, %v3028_v34  ;;  %v20386_v2 = vld [vmem:[#allocation71_spill] sm:$0xff]  ;;  %v20389_v12 = vld [vmem:[#allocation66_spill] sm:$0xff] }
 0x1ed   : > { %v3671_v28 = vadd.f32 %v13537_v42, %v3412_v55  ;;  %v3413_v15 = vadd.f32 %v16374_v3, %v3026_v38  ;;  %v20382_v55 = vld [vmem:[#allocation20_spill] sm:$0xff]  ;;  %v2643_v42 = vadd.f32 %v20384_v14, %v2256_v25  ;;  %v20390_v50 = vld [vmem:[#allocation22_spill] sm:$0xff] }
 0x1ee   : > { %v3511_v19 = vpop.f32.mrf.mxu0  ;;  %v16538_v0 = vadd.f32 %v20382_v55, %v1492_v29 }
 0x1ef   : > { %v3710_v30 = vadd.f32 %v16490_v22, %v3671_v28  ;;  %v3670_v47 = vadd.f32 %v3511_v19, %v3411_v51  ;;  %v2258_v51 = vadd.f32 %v20385_v48, %v1871_v16  ;;  %v16546_v28 = vpop.f32.mrf.mxu1  ;;  %v3030_v29 = vadd.f32 %v20386_v2, %v2643_v42  ;;  %v20394_v42 = vld [vmem:[#allocation72_spill] sm:$0xff] }
 0x1f0   : > { %v13540_v26 = vpop.f32.mrf.mxu0 }
 0x1f1   : > { %v3709_v17 = vadd.f32 %v16490_v22, %v3670_v47  ;;  %v3673_v52 = vadd.f32 %v13540_v26, %v3414_v58  ;;  %v16527_v1 = vmax.f32 %v3710_v30, 0.0  ;;  %v20387_v30 = vld [vmem:[#allocation69_spill] sm:$0xff]  ;;  %v20388_v47 = vld [vmem:[#allocation78_spill] sm:$0xff]  ;;  %v2645_v25 = vadd.f32 %v20392_v4, %v2258_v51 }
 0x1f2   : > { %v3521_v11 = vpop.f32.mrf.mxu0  ;;  %v3418_v37 = vadd.f32 %v20388_v47, %v20387_v30  ;;  %v3417_v33 = vadd.f32 %v16392_v56, %v3030_v29  ;;  %v20397_v29 = vld [vmem:[#allocation51_spill] sm:$0xff]  ;;  %v20401_v4 = vld [vmem:[#allocation86_spill] sm:$0xff] }
 0x1f3   : > { %v16531_v8 = vmax.f32 %v3709_v17, 0.0  ;;  %v3712_v3 = vadd.f32 %v16490_v22, %v3673_v52  ;;  %v3672_v45 = vadd.f32 %v3521_v11, %v3413_v15  ;;  %v3824_v16 = vrot.slane %v16527_v1, 1  ;;  %v20391_v17 = vld [vmem:[#allocation43_spill] sm:$0xff] }
 0x1f4   : > { %v13543_v18 = vpop.f32.mrf.mxu0  ;;  %v16569_v15 = vadd.f32 %v20390_v50, %v1494_v44  ;;  %v2260_v52 = vadd.f32 %v20391_v17, %v1873_v35  ;;  %v16584_v44 = vld [vmem:[%s20162_s3 + $0x58] sm:$0x1]  ;;  %v20399_v50 = vld [vmem:[#allocation75_spill] sm:$0xff] }
 0x1f5   : > { %v3711_v61 = vadd.f32 %v16490_v22, %v3672_v45  ;;  %v3675_v19 = vadd.f32 %v13543_v18, %v3416_v53  ;;  %13639 = vmatprep.mubr.msk.f32.mxu0 %vm3887_vm8, %v16531_v8  ;;  %v16555_v38 = vmax.f32 %v3712_v3, 0.0  ;;  %v3823_v41 = vrot.slane %v16531_v8, 1  ;;  %v16575_v53 = vpop.f32.mrf.mxu1  ;;  %v20393_v35 = vld [vmem:[#allocation73_spill] sm:$0xff] }
 0x1f6   : > { %v3531_v58 = vpop.f32.mrf.mxu0  ;;  %13640 = vmatmul.mubr.msk.f32.vlgmr.msra.gmra.mxu0 %vm3887_vm8, %v16527_v1  ;;  %v3032_v54 = vadd.f32 %v20393_v35, %v2645_v25  ;;  %v20395_v18 = vld [vmem:[#allocation81_spill] sm:$0xff] }
 0x1f7   : > { %v16563_v39 = vmax.f32 %v3711_v61, 0.0  ;;  %v3714_v32 = vadd.f32 %v16490_v22, %v3675_v19  ;;  %v3674_v26 = vadd.f32 %v3531_v58, %v3415_v63  ;;  %13740 = vmatpush3.msk.msra.mxu0 %vm3056_vm7, %v20389_v12  ;;  %v3825_v11 = vsel %vm476_vm0, %v3823_v41, %v3824_v16  ;;  %v20396_v19 = vld [vmem:[#allocation44_spill] sm:$0xff] }
 0x1f8   : > { %v13546_v34 = vpop.f32.mrf.mxu0  ;;  %13741 = vmatprep.subr.mxu0 %v3779_v13  ;;  %13587 = vmatprep.mubr.msk.f32.mxu1 %vm3887_vm8, %v3825_v11  ;;  %v3828_v14 = vrot.slane %v16555_v38, 1  ;;  %v3420_v48 = vadd.f32 %v20395_v18, %v20394_v42  ;;  %v2262_v2 = vadd.f32 %v20396_v19, %v16511_v36  ;;  %v2647_v58 = vadd.f32 %v20397_v29, %v2260_v52  ;;  %v20400_v52 = vld [vmem:[#allocation74_spill] sm:$0xff]  ;;  %v20403_v42 = vld [vmem:[#allocation32_spill] sm:$0xff] }
 0x1f9   : > { %v3713_v3 = vadd.f32 %v16490_v22, %v3674_v26  ;;  %v3677_v45 = vadd.f32 %v13546_v34, %v3418_v37  ;;  %13642 = vmatprep.mubr.msk.f32.mxu0 %vm3887_vm8, %v16563_v39  ;;  %v16587_v55 = vmax.f32 %v3714_v32, 0.0  ;;  %v3826_v43 = vrot.slane %v16563_v39, 1  ;;  %13742 = vmatpush3.msra.mxu0 %v3779_v13  ;;  %v3777_v37 = vld [vmem:[%s20162_s3 + $0x20] sm:$0xff]  ;;  %v20398_v32 = vld [vmem:[#allocation84_spill] sm:$0xff]  ;;  %v16609_v13 = vpop.f32.mrf.mxu1 }
 0x1fa   : > { %v3541_v56 = vpop.f32.mrf.mxu0  ;;  %13643 = vmatmul.mubr.msk.f32.gmra.mxu0 %vm3887_vm8, %v16555_v38  ;;  %13843 = vmatprep.subr.msk.mxu0 %vm3056_vm7, %v16584_v44  ;;  %v3419_v26 = vadd.f32 %v20398_v32, %v3032_v54  ;;  %v3034_v17 = vadd.f32 %v20399_v50, %v2647_v58  ;;  %v3422_v25 = vadd.f32 %v20401_v4, %v20400_v52  ;;  %v20402_v11 = vld [vmem:[#allocation42_spill] sm:$0xff]  ;;  %v20409_v4 = vld [vmem:[#allocation33_spill] sm:$0xff] }
 0x1fb   : > { %v16595_v51 = vmax.f32 %v3713_v3, 0.0  ;;  %v3716_v63 = vadd.f32 %v16490_v22, %v3677_v45  ;;  %v3676_v61 = vadd.f32 %v3541_v56, %v3417_v33  ;;  %v3827_v30 = vsel %vm476_vm0, %v3824_v16, %v3826_v43 }
 0x1fc   : > { %v13549_v41 = vpop.f32.mrf.mxu0  ;;  %v3829_v47 = vsel %vm476_vm0, %v3826_v43, %v3828_v14  ;;  %13588 = vmatmul.mubr.msk.f32.vlgmr.msra.gmra.mxu1 %vm3887_vm8, %v3827_v30  ;;  %v3832_v3 = vrot.slane %v16587_v55, 1  ;;  %v16634_v43 = vld [vmem:[%s20162_s3 + $0x48] sm:$0x1]  ;;  %v16638_v18 = vadd.f32 %v20403_v42, %v16469_v59  ;;  %v16645_v30 = vpop.f32.mrf.mxu1 }
 0x1fd   : > { %v3715_v36 = vadd.f32 %v16490_v22, %v3676_v61  ;;  %v3679_v12 = vadd.f32 %v13549_v41, %v3420_v48  ;;  %13645 = vmatprep.mubr.msk.f32.mxu0 %vm3887_vm8, %v16595_v51  ;;  %v3830_v16 = vrot.slane %v16595_v51, 1  ;;  %v16619_v34 = vmax.f32 %v3716_v63, 0.0  ;;  %13688 = vmatpush3.msk.msra.mxu1 %vm3056_vm7, %v20402_v11  ;;  %v20404_v48 = vld [vmem:[#allocation46_spill] sm:$0xff]  ;;  %v20405_v61 = vld [vmem:[#allocation53_spill] sm:$0xff]  ;;  %v20410_v11 = vld [vmem:[#allocation48_spill] sm:$0xff] }
 0x1fe   : > { %13590 = vmatprep.mubr.msk.f32.mxu1 %vm3887_vm8, %v3829_v47  ;;  %v3551_v33 = vpop.f32.mrf.mxu0  ;;  %13646 = vmatmul.mubr.msk.f32.gmra.mxu0 %vm3887_vm8, %v16587_v55  ;;  %v2264_v63 = vadd.f32 %v20404_v48, %v16519_v10  ;;  %v2649_v19 = vadd.f32 %v20405_v61, %v2262_v2  ;;  %v20407_v10 = vld [vmem:[#allocation77_spill] sm:$0xff]  ;;  %v16674_v61 = vpop.f32.mrf.mxu1 }
 0x1ff   : > { %v16625_v45 = vmax.f32 %v3715_v36, 0.0  ;;  %v3718_v35 = vadd.f32 %v16490_v22, %v3679_v12  ;;  %v3678_v54 = vadd.f32 %v3551_v33, %v3419_v26  ;;  %v3831_v56 = vsel %vm476_vm0, %v3828_v14, %v3830_v16  ;;  %13689 = vmatprep.subr.mxu1 %v3777_v37  ;;  %v20406_v14 = vld [vmem:[#allocation88_spill] sm:$0xff] }
 0x200   : > { %v13552_v29 = vpop.f32.mrf.mxu0  ;;  %v3833_v58 = vsel %vm476_vm0, %v3830_v16, %v3832_v3  ;;  %13690 = vmatpush3.msra.mxu1 %v3777_v37  ;;  %v3421_v41 = vadd.f32 %v20406_v14, %v3034_v17  ;;  %v3036_v2 = vadd.f32 %v20407_v10, %v2649_v19  ;;  %v20408_v26 = vld [vmem:[#allocation76_spill] sm:$0xff]  ;;  %v3836_v16 = vrot.slane %v16619_v34, 1 }
 0x201   : > { %v3717_v47 = vadd.f32 %v16490_v22, %v3678_v54  ;;  %v3681_v32 = vadd.f32 %v13552_v29, %v3422_v25  ;;  %13591 = vmatmul.mubr.msk.f32.gmra.mxu1 %vm3887_vm8, %v3831_v56  ;;  %13648 = vmatprep.mubr.msk.f32.mxu0 %vm3887_vm8, %v16625_v45  ;;  %v3834_v59 = vrot.slane %v16625_v45, 1  ;;  %v3424_v36 = vadd.f32 %v16417_v5, %v20408_v26  ;;  %v20415_v26 = vld [vmem:[#allocation50_spill] sm:$0xff] }
 0x202   : > { %v16655_v37 = vmax.f32 %v3718_v35, 0.0  ;;  %13593 = vmatprep.mubr.msk.f32.mxu1 %vm3887_vm8, %v3833_v58  ;;  %v3561_v12 = vpop.f32.mrf.mxu0  ;;  %13791 = vmatprep.subr.msk.mxu1 %vm3056_vm7, %v16634_v43  ;;  %v1883_v25 = vadd.f32 %v20409_v4, %v16507_v6  ;;  %v2266_v33 = vadd.f32 %v20410_v11, %v16538_v0  ;;  %v20411_v35 = vld [vmem:[#allocation55_spill] sm:$0xff]  ;;  %v3423_v48 = vadd.f32 %v16423_v60, %v3036_v2  ;;  %v20412_v0 = vld [vmem:[#allocation80_spill] sm:$0xff]  ;;  %v20414_v2 = vld [vmem:[#allocation34_spill] sm:$0xff]  ;;  %v16703_v11 = vpop.f32.mrf.mxu1 }
 0x203   : > { %v16661_v50 = vmax.f32 %v3717_v47, 0.0  ;;  %v3720_v17 = vadd.f32 %v16490_v22, %v3681_v32  ;;  %v3680_v52 = vadd.f32 %v3561_v12, %v3421_v41  ;;  %13649 = vmatmul.mubr.msk.f32.gmra.mxu0 %vm3887_vm8, %v16619_v34  ;;  %v3835_v5 = vsel %vm476_vm0, %v3832_v3, %v3834_v59  ;;  %v20416_v12 = vld [vmem:[#allocation57_spill] sm:$0xff] }
 0x204   : > { %v2651_v54 = vadd.f32 %v20411_v35, %v2264_v63  ;;  %v13555_v56 = vpop.f32.mrf.mxu0  ;;  %v3837_v42 = vsel %vm476_vm0, %v3834_v59, %v3836_v16  ;;  %v20413_v63 = vld [vmem:[#allocation79_spill] sm:$0xff]  ;;  %v3840_v41 = vrot.slane %v16655_v37, 1 }
 0x205   : > { %v3719_v19 = vadd.f32 %v16490_v22, %v3680_v52  ;;  %v3683_v29 = vadd.f32 %v13555_v56, %v3424_v36  ;;  %13594 = vmatmul.mubr.msk.f32.gmra.mxu1 %vm3887_vm8, %v3835_v5  ;;  %13651 = vmatprep.mubr.msk.f32.mxu0 %vm3887_vm8, %v16661_v50  ;;  %v3838_v6 = vrot.slane %v16661_v50, 1  ;;  %v3426_v58 = vadd.f32 %v16429_v24, %v20413_v63  ;;  %v20420_v63 = vld [vmem:[#allocation52_spill] sm:$0xff] }
 0x206   : > { %v3038_v3 = vadd.f32 %v20412_v0, %v2651_v54  ;;  %v16684_v14 = vmax.f32 %v3720_v17, 0.0  ;;  %13596 = vmatprep.mubr.msk.f32.mxu1 %vm3887_vm8, %v3837_v42  ;;  %v3571_v60 = vpop.f32.mrf.mxu0  ;;  %v16696_v24 = vadd.f32 %v20414_v2, %v16480_v57  ;;  %v2268_v36 = vadd.f32 %v20415_v26, %v16569_v15  ;;  %v20417_v15 = vld [vmem:[#allocation83_spill] sm:$0xff]  ;;  %v16729_v26 = vpop.f32.mrf.mxu1 }
 0x207   : > { %v16688_v47 = vmax.f32 %v3719_v19, 0.0  ;;  %v3722_v32 = vadd.f32 %v16490_v22, %v3683_v29  ;;  %v3682_v59 = vadd.f32 %v3571_v60, %v3423_v48  ;;  %13652 = vmatmul.mubr.msk.f32.gmra.mxu0 %vm3887_vm8, %v16655_v37  ;;  %v3839_v10 = vsel %vm476_vm0, %v3836_v16, %v3838_v6  ;;  %v20421_v60 = vld [vmem:[#allocation59_spill] sm:$0xff] }
 0x208   : > { %v2653_v17 = vadd.f32 %v20416_v12, %v2266_v33  ;;  %v13558_v52 = vpop.f32.mrf.mxu0  ;;  %v3841_v5 = vsel %vm476_vm0, %v3838_v6, %v3840_v41  ;;  %v3425_v4 = vadd.f32 %v16437_v31, %v3038_v3  ;;  %v20418_v33 = vld [vmem:[#allocation82_spill] sm:$0xff]  ;;  %v3844_v48 = vrot.slane %v16684_v14, 1  ;;  %v20419_v3 = vld [vmem:[#allocation35_spill] sm:$0xff] }
 0x209   : > { %v3721_v35 = vadd.f32 %v16490_v22, %v3682_v59  ;;  %v3685_v54 = vadd.f32 %v13558_v52, %v3426_v58  ;;  %13597 = vmatmul.mubr.msk.f32.gmra.mxu1 %vm3887_vm8, %v3839_v10  ;;  %13654 = vmatprep.mubr.msk.f32.mxu0 %vm3887_vm8, %v16688_v47  ;;  %v3842_v57 = vrot.slane %v16688_v47, 1  ;;  %v3428_v56 = vadd.f32 %v16456_v23, %v20418_v33  ;;  %v20425_v33 = vld [vmem:[#allocation54_spill] sm:$0xff] }
 0x20a   : > { %v3040_v16 = vadd.f32 %v20417_v15, %v2653_v17  ;;  %v16713_v42 = vmax.f32 %v3722_v32, 0.0  ;;  %13599 = vmatprep.mubr.msk.f32.mxu1 %vm3887_vm8, %v3841_v5  ;;  %v3581_v31 = vpop.f32.mrf.mxu0  ;;  %v1885_v23 = vadd.f32 %v20419_v3, %v16514_v62  ;;  %v2270_v58 = vadd.f32 %v20420_v63, %v1883_v25  ;;  %v20422_v25 = vld [vmem:[#allocation87_spill] sm:$0xff]  ;;  %v16755_v63 = vpop.f32.mrf.mxu1 }
 0x20b   : > { %v16717_v19 = vmax.f32 %v3721_v35, 0.0  ;;  %v3724_v29 = vadd.f32 %v16490_v22, %v3685_v54  ;;  %v3684_v6 = vadd.f32 %v3581_v31, %v3425_v4  ;;  %13655 = vmatmul.mubr.msk.f32.gmra.mxu0 %vm3887_vm8, %v16684_v14  ;;  %v3843_v0 = vsel %vm476_vm0, %v3840_v41, %v3842_v57  ;;  %v20426_v31 = vld [vmem:[#allocation61_spill] sm:$0xff] }
 0x20c   : > { %v2655_v32 = vadd.f32 %v20421_v60, %v2268_v36  ;;  %v13561_v59 = vpop.f32.mrf.mxu0  ;;  %v3845_v10 = vsel %vm476_vm0, %v3842_v57, %v3844_v48  ;;  %v3427_v2 = vadd.f32 %v16495_v49, %v3040_v16  ;;  %v20423_v36 = vld [vmem:[#allocation85_spill] sm:$0xff]  ;;  %v3848_v4 = vrot.slane %v16713_v42, 1  ;;  %v20424_v16 = vld [vmem:[#allocation36_spill] sm:$0xff] }
 0x20d   : > { %v3723_v12 = vadd.f32 %v16490_v22, %v3684_v6  ;;  %v3687_v17 = vadd.f32 %v13561_v59, %v3428_v56  ;;  %13600 = vmatmul.mubr.msk.f32.gmra.mxu1 %vm3887_vm8, %v3843_v0  ;;  %13657 = vmatprep.mubr.msk.f32.mxu0 %vm3887_vm8, %v16717_v19  ;;  %v3846_v62 = vrot.slane %v16717_v19, 1  ;;  %v3430_v52 = vadd.f32 %v16522_v46, %v20423_v36  ;;  %v20430_v36 = vld [vmem:[#allocation56_spill] sm:$0xff] }
 0x20e   : > { %v3042_v41 = vadd.f32 %v20422_v25, %v2655_v32  ;;  %v16739_v5 = vmax.f32 %v3724_v29, 0.0  ;;  %13602 = vmatprep.mubr.msk.f32.mxu1 %vm3887_vm8, %v3845_v10  ;;  %v3591_v49 = vpop.f32.mrf.mxu0  ;;  %v1887_v46 = vadd.f32 %v20424_v16, %v16535_v21  ;;  %v2272_v56 = vadd.f32 %v20425_v33, %v1885_v23  ;;  %v16781_v33 = vpop.f32.mrf.mxu1 }
 0x20f   : > { %v16743_v35 = vmax.f32 %v3723_v12, 0.0  ;;  %v3726_v54 = vadd.f32 %v16490_v22, %v3687_v17  ;;  %v3686_v57 = vadd.f32 %v3591_v49, %v3427_v2  ;;  %13658 = vmatmul.mubr.msk.f32.gmra.mxu0 %vm3887_vm8, %v16713_v42  ;;  %v3847_v15 = vsel %vm476_vm0, %v3844_v48, %v3846_v62  ;;  %v20427_v48 = vld [vmem:[#allocation90_spill] sm:$0xff]  ;;  %v20431_v49 = vld [vmem:[#allocation63_spill] sm:$0xff] }
 0x210   : > { %v2657_v29 = vadd.f32 %v20426_v31, %v2270_v58  ;;  %v13564_v6 = vpop.f32.mrf.mxu0  ;;  %v3849_v0 = vsel %vm476_vm0, %v3846_v62, %v3848_v4  ;;  %v3429_v3 = vadd.f32 %v16546_v28, %v3042_v41  ;;  %v20428_v58 = vld [vmem:[#allocation89_spill] sm:$0xff]  ;;  %v3852_v2 = vrot.slane %v16739_v5, 1 }
 0x211   : > { %v3725_v60 = vadd.f32 %v16490_v22, %v3686_v57  ;;  %v3689_v32 = vadd.f32 %v13564_v6, %v3430_v52  ;;  %13603 = vmatmul.mubr.msk.f32.gmra.mxu1 %vm3887_vm8, %v3847_v15  ;;  %13660 = vmatprep.mubr.msk.f32.mxu0 %vm3887_vm8, %v16743_v35  ;;  %v3850_v21 = vrot.slane %v16743_v35, 1  ;;  %v3432_v59 = vadd.f32 %v16575_v53, %v20428_v58  ;;  %v20429_v41 = vld [vmem:[#allocation37_spill] sm:$0xff]  ;;  %v20435_v58 = vld [vmem:[#allocation58_spill] sm:$0xff] }
 0x212   : > { %v3044_v23 = vadd.f32 %v20427_v48, %v2657_v29  ;;  %v16765_v10 = vmax.f32 %v3726_v54, 0.0  ;;  %13605 = vmatprep.mubr.msk.f32.mxu1 %vm3887_vm8, %v3849_v0  ;;  %v3601_v28 = vpop.f32.mrf.mxu0  ;;  %v1889_v53 = vadd.f32 %v20429_v41, %v16541_v40  ;;  %v2274_v52 = vadd.f32 %v20430_v36, %v1887_v46  ;;  %v13529_v36 = vpop.f32.mrf.mxu1 }
 0x213   : > { %v16769_v12 = vmax.f32 %v3725_v60, 0.0  ;;  %v3728_v17 = vadd.f32 %v16490_v22, %v3689_v32  ;;  %v3688_v62 = vadd.f32 %v3601_v28, %v3429_v3  ;;  %13661 = vmatmul.mubr.msk.f32.gmra.mxu0 %vm3887_vm8, %v16739_v5  ;;  %v3851_v25 = vsel %vm476_vm0, %v3848_v4, %v3850_v21  ;;  %v20432_v4 = vld [vmem:[#allocation92_spill] sm:$0xff] }
 0x214   : > { %v2659_v54 = vadd.f32 %v20431_v49, %v2272_v56  ;;  %v13567_v57 = vpop.f32.mrf.mxu0  ;;  %v3853_v15 = vsel %vm476_vm0, %v3850_v21, %v3852_v2  ;;  %v3431_v16 = vadd.f32 %v16609_v13, %v3044_v23  ;;  %v20433_v56 = vld [vmem:[#allocation91_spill] sm:$0xff]  ;;  %v3856_v3 = vrot.slane %v16765_v10, 1  ;;  %v20434_v23 = vld [vmem:[#allocation38_spill] sm:$0xff]  ;;  %v20436_v28 = vld [vmem:[#allocation64_spill] sm:$0xff] }
 0x215   : > { %v3727_v31 = vadd.f32 %v16490_v22, %v3688_v62  ;;  %v3691_v29 = vadd.f32 %v13567_v57, %v3432_v59  ;;  %13606 = vmatmul.mubr.msk.f32.gmra.mxu1 %vm3887_vm8, %v3851_v25  ;;  %13663 = vmatprep.mubr.msk.f32.mxu0 %vm3887_vm8, %v16769_v12  ;;  %v3854_v40 = vrot.slane %v16769_v12, 1  ;;  %v3434_v6 = vadd.f32 %v16645_v30, %v20433_v56  ;;  %v20438_v57 = vld [vmem:[#allocation93_spill] sm:$0xff]  ;;  %v20440_v56 = vld [vmem:[#allocation60_spill] sm:$0xff] }
 0x216   : > { %v3046_v46 = vadd.f32 %v20432_v4, %v2659_v54  ;;  %v16791_v0 = vmax.f32 %v3728_v17, 0.0  ;;  %13608 = vmatprep.mubr.msk.f32.mxu1 %vm3887_vm8, %v3853_v15  ;;  %v3611_v13 = vpop.f32.mrf.mxu0  ;;  %v1891_v30 = vadd.f32 %v20434_v23, %v16638_v18  ;;  %v2276_v59 = vadd.f32 %v20435_v58, %v1889_v53  ;;  %v3392_v58 = vpop.f32.mrf.mxu1 }
 0x217   : > { %v16795_v60 = vmax.f32 %v3727_v31, 0.0  ;;  %v3730_v32 = vadd.f32 %v16490_v22, %v3691_v29  ;;  %v3690_v21 = vadd.f32 %v3611_v13, %v3431_v16  ;;  %13664 = vmatmul.mubr.msk.f32.gmra.mxu0 %vm3887_vm8, %v16765_v10  ;;  %v3855_v48 = vsel %vm476_vm0, %v3852_v2, %v3854_v40  ;;  %v20437_v2 = vld [vmem:[#allocation94_spill] sm:$0xff]  ;;  %v20441_v13 = vld [vmem:[#allocation65_spill] sm:$0xff] }
 0x218   : > { %v2661_v17 = vadd.f32 %v20436_v28, %v2274_v52  ;;  %v13570_v62 = vpop.f32.mrf.mxu0  ;;  %v3857_v25 = vsel %vm476_vm0, %v3854_v40, %v3856_v3  ;;  %v3433_v41 = vadd.f32 %v16674_v61, %v3046_v46  ;;  %v3436_v52 = vadd.f32 %v16703_v11, %v20438_v57  ;;  %v20439_v46 = vld [vmem:[#allocation39_spill] sm:$0xff] }
 0x219   : > { %v3729_v49 = vadd.f32 %v16490_v22, %v3690_v21  ;;  %v3693_v54 = vadd.f32 %v13570_v62, %v3434_v6  ;;  %13609 = vmatmul.mubr.msk.f32.gmra.mxu1 %vm3887_vm8, %v3855_v48  ;;  %13666 = vmatprep.mubr.msk.f32.mxu0 %vm3887_vm8, %v16795_v60  ;;  %v3858_v18 = vrot.slane %v16795_v60, 1  ;;  %v16815_v15 = vmax.f32 %v3730_v32, 0.0  ;;  %v20443_v62 = vld [vmem:[#allocation95_spill] sm:$0xff] }
 0x21a   : > { %v3048_v53 = vadd.f32 %v20437_v2, %v2661_v17  ;;  %13611 = vmatprep.mubr.msk.f32.mxu1 %vm3887_vm8, %v3857_v25  ;;  %v3621_v61 = vpop.f32.mrf.mxu0  ;;  %v3860_v16 = vrot.slane %v16791_v0, 1  ;;  %v1893_v11 = vadd.f32 %v20439_v46, %v16696_v24  ;;  %v2278_v6 = vadd.f32 %v20440_v56, %v1891_v30 }
 0x21b   : > { %v16819_v31 = vmax.f32 %v3729_v49, 0.0  ;;  %v3732_v29 = vadd.f32 %v16490_v22, %v3693_v54  ;;  %v3692_v40 = vadd.f32 %v3621_v61, %v3433_v41  ;;  %13667 = vmatmul.mubr.msk.f32.gmra.mxu0 %vm3887_vm8, %v16791_v0  ;;  %v3859_v4 = vsel %vm476_vm0, %v3856_v3, %v3858_v18  ;;  %v20442_v3 = vld [vmem:[#allocation96_spill] sm:$0xff] }
 0x21c   : > { %v2663_v32 = vadd.f32 %v20441_v13, %v2276_v59  ;;  %v13573_v21 = vpop.f32.mrf.mxu0  ;;  %v3861_v48 = vsel %vm476_vm0, %v3858_v18, %v3860_v16  ;;  %v3435_v23 = vadd.f32 %v16729_v26, %v3048_v53  ;;  %v3438_v59 = vadd.f32 %v16755_v63, %v20443_v62  ;;  %v20445_v53 = vld [vmem:[#allocation62_spill] sm:$0xff]  ;;  %v20446_v63 = vld [vmem:[#allocation68_spill] sm:$0xff] }
 0x21d   : > { %v3731_v28 = vadd.f32 %v16490_v22, %v3692_v40  ;;  %v3695_v17 = vadd.f32 %v13573_v21, %v3436_v52  ;;  %13612 = vmatmul.mubr.msk.f32.gmra.mxu1 %vm3887_vm8, %v3859_v4  ;;  %13669 = vmatprep.mubr.msk.f32.mxu0 %vm3887_vm8, %v16819_v31  ;;  %v3862_v24 = vrot.slane %v16819_v31, 1  ;;  %v16839_v25 = vmax.f32 %v3732_v29, 0.0  ;;  %v13532_v4 = vpop.f32.mrf.mxu1 }
 0x21e   : > { %v3050_v30 = vadd.f32 %v20442_v3, %v2663_v32  ;;  %13614 = vmatprep.mubr.msk.f32.mxu1 %vm3887_vm8, %v3861_v48  ;;  %v3631_v26 = vpop.f32.mrf.mxu0  ;;  %v3864_v41 = vrot.slane %v16815_v15, 1  ;;  %v2280_v57 = vadd.f32 %v20445_v53, %v1893_v11  ;;  %v2665_v52 = vadd.f32 %v20446_v63, %v2278_v6 }
 0x21f   : > { %v16843_v49 = vmax.f32 %v3731_v28, 0.0  ;;  %v3734_v54 = vadd.f32 %v16490_v22, %v3695_v17  ;;  %v3694_v18 = vadd.f32 %v3631_v26, %v3435_v23  ;;  %13670 = vmatmul.mubr.msk.f32.gmra.mxu0 %vm3887_vm8, %v16815_v15  ;;  %v3863_v2 = vsel %vm476_vm0, %v3860_v16, %v3862_v24  ;;  %v3402_v3 = vpop.f32.mrf.mxu1 }
 0x220   : > { %v13576_v61 = vpop.f32.mrf.mxu0  ;;  %v3865_v29 = vsel %vm476_vm0, %v3862_v24, %v3864_v41  ;;  %v3437_v40 = vadd.f32 %v16781_v33, %v3050_v30  ;;  %v3052_v11 = vadd.f32 %v16441_v27, %v2665_v52  ;;  %v3440_v6 = vadd.f32 %v13529_v36, %v16439_v7  ;;  %v20448_v27 = vld [vmem:[#allocation70_spill] sm:$0xff] }
 0x221   : > { %20444 = vst [vmem:[#allocation23_spill] sm:$0xff] %v16843_v49  ;;  %v3733_v46 = vadd.f32 %v16490_v22, %v3694_v18  ;;  %v3697_v56 = vadd.f32 %v13576_v61, %v3438_v59  ;;  %13615 = vmatmul.mubr.msk.f32.gmra.mxu1 %vm3887_vm8, %v3863_v2  ;;  %13672 = vmatprep.mubr.msk.f32.mxu0 %vm3887_vm8, %v16843_v49  ;;  %v3866_v16 = vrot.slane %v16843_v49, 1  ;;  %v16860_v13 = vmax.f32 %v3734_v54, 0.0 }
 0x222   : > { %13617 = vmatprep.mubr.msk.f32.mxu1 %vm3887_vm8, %v3865_v29  ;;  %v3641_v33 = vpop.f32.mrf.mxu0  ;;  %v3868_v32 = vrot.slane %v16839_v25, 1  ;;  %v2667_v17 = vadd.f32 %v20448_v27, %v2280_v57  ;;  %v3439_v24 = vadd.f32 %v3392_v58, %v3052_v11 }
 0x223   : > { %v16864_v21 = vmax.f32 %v3733_v46, 0.0  ;;  %v3736_v48 = vadd.f32 %v16490_v22, %v3697_v56  ;;  %v3696_v23 = vadd.f32 %v3641_v33, %v3437_v40  ;;  %13673 = vmatmul.mubr.msk.f32.gmra.mxu0 %vm3887_vm8, %v16839_v25  ;;  %v3867_v28 = vsel %vm476_vm0, %v3864_v41, %v3866_v16 }
 0x224   : > { %v13579_v7 = vpop.f32.mrf.mxu0  ;;  %v3869_v36 = vsel %vm476_vm0, %v3866_v16, %v3868_v32  ;;  %v3054_v26 = vadd.f32 %v16471_v20, %v2667_v17  ;;  %v3442_v41 = vadd.f32 %v13532_v4, %v16459_v9  ;;  %v3872_v18 = vrot.slane %v16860_v13, 1 }
 0x225   : > { %20447 = vst [vmem:[#allocation26_spill] sm:$0xff] %v16864_v21  ;;  %v3735_v30 = vadd.f32 %v16490_v22, %v3696_v23  ;;  %v3699_v62 = vadd.f32 %v13579_v7, %v3440_v6  ;;  %13618 = vmatmul.mubr.msk.f32.gmra.mxu1 %vm3887_vm8, %v3867_v28  ;;  %13675 = vmatprep.mubr.msk.f32.mxu0 %vm3887_vm8, %v16864_v21  ;;  %v3870_v59 = vrot.slane %v16864_v21, 1  ;;  %v16879_v54 = vmax.f32 %v3736_v48, 0.0 }
 0x226   : > { %13620 = vmatprep.mubr.msk.f32.mxu1 %vm3887_vm8, %v3869_v36  ;;  %v3651_v58 = vpop.f32.mrf.mxu0  ;;  %v3441_v20 = vadd.f32 %v3402_v3, %v3054_v26  ;;  %v4860_v36 = vrot.slane %v16531_v8, 3 }
 0x227   : > { %v16883_v2 = vmax.f32 %v3735_v30, 0.0  ;;  %v3738_v53 = vadd.f32 %v16490_v22, %v3699_v62  ;;  %v3698_v57 = vadd.f32 %v3651_v58, %v3439_v24  ;;  %13676 = vmatmul.mubr.msk.f32.gmra.mxu0 %vm3887_vm8, %v16860_v13  ;;  %v3871_v63 = vsel %vm476_vm0, %v3868_v32, %v3870_v59 }
 0x228   : > { %v13582_v52 = vpop.f32.mrf.mxu0  ;;  %v3873_v9 = vsel %vm476_vm0, %v3870_v59, %v3872_v18  ;;  %v3876_v56 = vrot.slane %v16879_v54, 1  ;;  %v4861_v24 = vrot.slane %v16527_v1, 3  ;;  %v4863_v62 = vrot.slane %v16563_v39, 3 }
 0x229   : > { %20449 = vst [vmem:[#allocation24_spill] sm:$0xff] %v16883_v2  ;;  %v16890_v61 = vmax.f32 %v3738_v53, 0.0  ;;  %v3737_v29 = vadd.f32 %v16490_v22, %v3698_v57  ;;  %v3701_v40 = vadd.f32 %v13582_v52, %v3442_v41  ;;  %13621 = vmatmul.mubr.msk.f32.gmra.mxu1 %vm3887_vm8, %v3871_v63  ;;  %13678 = vmatprep.mubr.msk.f32.mxu0 %vm3887_vm8, %v16883_v2  ;;  %v3874_v4 = vrot.slane %v16883_v2, 1  ;;  %v3783_v63 = vld [vmem:[%s20162_s3 + $0x50] sm:$0xff] }
 0x22a   : > { %13623 = vmatprep.mubr.msk.f32.mxu1 %vm3887_vm8, %v3873_v9  ;;  %v3661_v46 = vpop.f32.mrf.mxu0  ;;  %v4862_v59 = vsel %vm1508_vm3, %v4860_v36, %v4861_v24  ;;  %v4865_v58 = vrot.slane %v16555_v38, 3  ;;  %v4864_v53 = vsel %vm1508_vm3, %v4861_v24, %v4863_v62  ;;  %v4867_v57 = vrot.slane %v16595_v51, 3  ;;  %v20452_v9 = vld [vmem:[#allocation9_spill] sm:$0xff]  ;;  %v16987_v24 = vld [vmem:[%s20162_s3 + $0x68] sm:$0x1] }
 0x22b   : > { %v16899_v16 = vmax.f32 %v3737_v29, 0.0  ;;  %v3740_v11 = vadd.f32 %v16490_v22, %v3701_v40  ;;  %v3700_v6 = vadd.f32 %v3661_v46, %v3441_v20  ;;  %13679 = vmatmul.mubr.msk.f32.gmra.mxu0 %vm3887_vm8, %v16879_v54  ;;  %v3875_v33 = vsel %vm476_vm0, %v3872_v18, %v3874_v4 }
 0x22c   : > { %v3877_v32 = vsel %vm476_vm0, %v3874_v4, %v3876_v56  ;;  %v3880_v27 = vrot.slane %v16890_v61, 1  ;;  %v4472_v18 = vrot.slane %v16531_v8, 2  ;;  %v4866_v20 = vsel %vm1508_vm3, %v4863_v62, %v4865_v58  ;;  %v16957_v4 = vld [vmem:[%s20162_s3 + $0x78] sm:$0x1] }
 0x22d   : > { %20450 = vst [vmem:[#allocation29_spill] sm:$0xff] %v16899_v16  ;;  %v16906_v48 = vmax.f32 %v3740_v11, 0.0  ;;  %v3739_v23 = vadd.f32 %v16490_v22, %v3700_v6  ;;  %13624 = vmatmul.mubr.msk.f32.gmra.mxu1 %vm3887_vm8, %v3875_v33  ;;  %13681 = vmatprep.mubr.msk.f32.mxu0 %vm3887_vm8, %v16899_v16  ;;  %v3878_v28 = vrot.slane %v16899_v16, 1  ;;  %v4473_v52 = vrot.slane %v16527_v1, 2 }
 0x22e   : > { %13626 = vmatprep.mubr.msk.f32.mxu1 %vm3887_vm8, %v3877_v32  ;;  %v4475_v40 = vrot.slane %v16563_v39, 2  ;;  %v4868_v11 = vsel %vm1508_vm3, %v4865_v58, %v4867_v57  ;;  %v4871_v6 = vrot.slane %v16625_v45, 3  ;;  %v4477_v33 = vrot.slane %v16555_v38, 2 }
 0x22f   : > { %v16915_v17 = vmax.f32 %v3739_v23, 0.0  ;;  %13682 = vmatmul.mubr.msk.f32.gmra.mxu0 %vm3887_vm8, %v16890_v61  ;;  %v3879_v7 = vsel %vm476_vm0, %v3876_v56, %v3878_v28  ;;  %v3881_v22 = vsel %vm476_vm0, %v3878_v28, %v3880_v27  ;;  %v3884_v30 = vrot.slane %v16906_v48, 1  ;;  %v3781_v28 = vld [vmem:[%s20162_s3 + $0x40] sm:$0xff] }
 0x230   : > { %v4474_v46 = vsel %vm1121_vm2, %v4472_v18, %v4473_v52  ;;  %v4869_v56 = vrot.slane %v16587_v55, 3  ;;  %v4476_v32 = vsel %vm1121_vm2, %v4473_v52, %v4475_v40  ;;  %v4479_v23 = vrot.slane %v16595_v51, 2 }
 0x231   : > { %20451 = vst [vmem:[#allocation25_spill] sm:$0xff] %v16915_v17  ;;  %13627 = vmatmul.mubr.msk.f32.gmra.mxu1 %vm3887_vm8, %v3879_v7  ;;  %13684 = vmatprep.mubr.msk.f32.mxu0 %vm3887_vm8, %v16915_v17  ;;  %v3882_v3 = vrot.slane %v16915_v17, 1  ;;  %v3886_v29 = vsel %vm476_vm0, %v3884_v30, %v20452_v9  ;;  %v4873_v7 = vrot.slane %v16619_v34, 3  ;;  %v4875_v36 = vrot.slane %v16661_v50, 3 }
 0x232   : > { %13629 = vmatprep.mubr.msk.f32.mxu1 %vm3887_vm8, %v3881_v22  ;;  %v4872_v22 = vsel %vm1508_vm3, %v4869_v56, %v4871_v6  ;;  %v4483_v62 = vrot.slane %v16625_v45, 2  ;;  %v4879_v58 = vrot.slane %v16688_v47, 3  ;;  %v4881_v52 = vrot.slane %v16684_v14, 3 }
 0x233   : > { %13685 = vmatmul.mubr.msk.f32.gmra.mxu0 %vm3887_vm8, %v16906_v48  ;;  %v3883_v26 = vsel %vm476_vm0, %v3880_v27, %v3882_v3  ;;  %v3885_v41 = vsel %vm476_vm0, %v3882_v3, %v3884_v30  ;;  %v4478_v27 = vsel %vm1121_vm2, %v4475_v40, %v4477_v33  ;;  %v4874_v3 = vsel %vm1508_vm3, %v4871_v6, %v4873_v7 }
 0x234   : > { %13743 = vmatprep.mubr.msk.f32.mxu0 %vm3887_vm8, %v4862_v59  ;;  %v4481_v30 = vrot.slane %v16587_v55, 2  ;;  %v4883_v40 = vrot.slane %v16717_v19, 3  ;;  %v4491_v6 = vrot.slane %v16688_v47, 2 }
 0x235   : > { %13630 = vmatmul.mubr.msk.f32.gmra.mxu1 %vm3887_vm8, %v3883_v26  ;;  %v4877_v26 = vrot.slane %v16655_v37, 3 }
 0x236   : > { %13632 = vmatprep.mubr.msk.f32.mxu1 %vm3887_vm8, %v3885_v41  ;;  %v4482_v59 = vsel %vm1121_vm2, %v4479_v23, %v4481_v30  ;;  %v4876_v41 = vsel %vm1508_vm3, %v4873_v7, %v4875_v36 }
 0x237   : > { %13744 = vmatmul.mubr.msk.f32.vlgmr.msra.gmra.mxu0 %vm3887_vm8, %v4864_v53  ;;  %v4878_v18 = vsel %vm1508_vm3, %v4875_v36, %v4877_v26  ;;  %v4485_v53 = vrot.slane %v16619_v34, 2 }
 0x238   : > { %13746 = vmatprep.mubr.msk.f32.mxu0 %vm3887_vm8, %v4866_v20  ;;  %13844 = vmatpush3.msk.msra.mxu0 %vm3056_vm7, %v16584_v44  ;;  %v4870_v44 = vsel %vm1508_vm3, %v4867_v57, %v4869_v56  ;;  %v4484_v57 = vsel %vm1121_vm2, %v4481_v30, %v4483_v62  ;;  %v4489_v56 = vrot.slane %v16655_v37, 2 }
 0x239   : > { %13633 = vmatmul.mubr.msk.f32.gmra.mxu1 %vm3887_vm8, %v3886_v29  ;;  %13845 = vmatprep.subr.mxu0 %v3783_v63  ;;  %v4486_v20 = vsel %vm1121_vm2, %v4483_v62, %v4485_v53  ;;  %v4880_v29 = vsel %vm1508_vm3, %v4877_v26, %v4879_v58 }
 0x23a   : > { %13691 = vmatprep.mubr.msk.f32.mxu1 %vm3887_vm8, %v4474_v46  ;;  %13846 = vmatpush3.msra.mxu0 %v3783_v63  ;;  %v4487_v63 = vrot.slane %v16661_v50, 2  ;;  %v4882_v46 = vsel %vm1508_vm3, %v4879_v58, %v4881_v52  ;;  %v4492_v7 = vsel %vm1121_vm2, %v4489_v56, %v4491_v6 }
 0x23b   : > { %13747 = vmatmul.mubr.msk.f32.gmra.mxu0 %vm3887_vm8, %v4868_v11  ;;  %13947 = vmatprep.subr.msk.mxu0 %vm3056_vm7, %v16957_v4 }
 0x23c   : > { %13749 = vmatprep.mubr.msk.f32.mxu0 %vm3887_vm8, %v4870_v44  ;;  %v4488_v11 = vsel %vm1121_vm2, %v4485_v53, %v4487_v63  ;;  %v4490_v44 = vsel %vm1121_vm2, %v4487_v63, %v4489_v56 }
 0x23d   : > { %13692 = vmatmul.mubr.msk.f32.vlgmr.msra.gmra.mxu1 %vm3887_vm8, %v4476_v32  ;;  %v4884_v32 = vsel %vm1508_vm3, %v4881_v52, %v4883_v40 }
 0x23e   : > { %13792 = vmatpush3.msk.msra.mxu1 %vm3056_vm7, %v16634_v43  ;;  %13694 = vmatprep.mubr.msk.f32.mxu1 %vm3887_vm8, %v4478_v27  ;;  %v4480_v43 = vsel %vm1121_vm2, %v4477_v33, %v4479_v23  ;;  %v4885_v33 = vrot.slane %v16713_v42, 3  ;;  %v4887_v23 = vrot.slane %v16743_v35, 3  ;;  %v4493_v27 = vrot.slane %v16684_v14, 2 }
 0x23f   : > { %13750 = vmatmul.mubr.msk.f32.gmra.mxu0 %vm3887_vm8, %v4872_v22  ;;  %13793 = vmatprep.subr.mxu1 %v3781_v28  ;;  %v4495_v22 = vrot.slane %v16717_v19, 2 }
 0x240   : > { %13752 = vmatprep.mubr.msk.f32.mxu0 %vm3887_vm8, %v4874_v3  ;;  %13794 = vmatpush3.msra.mxu1 %v3781_v28  ;;  %v4886_v28 = vsel %vm1508_vm3, %v4883_v40, %v4885_v33  ;;  %v4494_v36 = vsel %vm1121_vm2, %v4491_v6, %v4493_v27  ;;  %v4889_v3 = vrot.slane %v16739_v5, 3  ;;  %v4888_v30 = vsel %vm1508_vm3, %v4885_v33, %v4887_v23 }
 0x241   : > { %13695 = vmatmul.mubr.msk.f32.gmra.mxu1 %vm3887_vm8, %v4480_v43  ;;  %13895 = vmatprep.subr.msk.mxu1 %vm3056_vm7, %v16987_v24  ;;  %v4891_v43 = vrot.slane %v16769_v12, 3  ;;  %v4496_v26 = vsel %vm1121_vm2, %v4493_v27, %v4495_v22 }
 0x242   : > { %13697 = vmatprep.mubr.msk.f32.mxu1 %vm3887_vm8, %v4482_v59  ;;  %v4890_v62 = vsel %vm1508_vm3, %v4887_v23, %v4889_v3  ;;  %v4497_v59 = vrot.slane %v16713_v42, 2 }
 0x243   : > { %13753 = vmatmul.mubr.msk.f32.gmra.mxu0 %vm3887_vm8, %v4876_v41  ;;  %v4499_v41 = vrot.slane %v16743_v35, 2  ;;  %v4892_v53 = vsel %vm1508_vm3, %v4889_v3, %v4891_v43 }
 0x244   : > { %13755 = vmatprep.mubr.msk.f32.mxu0 %vm3887_vm8, %v4878_v18  ;;  %v4498_v58 = vsel %vm1121_vm2, %v4495_v22, %v4497_v59  ;;  %v4893_v18 = vrot.slane %v16765_v10, 3 }
 0x245   : > { %13698 = vmatmul.mubr.msk.f32.gmra.mxu1 %vm3887_vm8, %v4484_v57  ;;  %v4895_v57 = vrot.slane %v16795_v60, 3  ;;  %v4500_v52 = vsel %vm1121_vm2, %v4497_v59, %v4499_v41 }
 0x246   : > { %13700 = vmatprep.mubr.msk.f32.mxu1 %vm3887_vm8, %v4486_v20  ;;  %v4894_v63 = vsel %vm1508_vm3, %v4891_v43, %v4893_v18  ;;  %v4501_v20 = vrot.slane %v16739_v5, 2 }
 0x247   : > { %13756 = vmatmul.mubr.msk.f32.gmra.mxu0 %vm3887_vm8, %v4880_v29  ;;  %v4503_v29 = vrot.slane %v16769_v12, 2  ;;  %v4896_v56 = vsel %vm1508_vm3, %v4893_v18, %v4895_v57 }
 0x248   : > { %13758 = vmatprep.mubr.msk.f32.mxu0 %vm3887_vm8, %v4882_v46  ;;  %v4502_v40 = vsel %vm1121_vm2, %v4499_v41, %v4501_v20  ;;  %v4897_v46 = vrot.slane %v16791_v0, 3 }
 0x249   : > { %13701 = vmatmul.mubr.msk.f32.gmra.mxu1 %vm3887_vm8, %v4488_v11  ;;  %v4899_v11 = vrot.slane %v16819_v31, 3  ;;  %v4504_v33 = vsel %vm1121_vm2, %v4501_v20, %v4503_v29 }
 0x24a   : > { %13703 = vmatprep.mubr.msk.f32.mxu1 %vm3887_vm8, %v4490_v44  ;;  %v4898_v6 = vsel %vm1508_vm3, %v4895_v57, %v4897_v46  ;;  %v4505_v44 = vrot.slane %v16765_v10, 2 }
 0x24b   : > { %13759 = vmatmul.mubr.msk.f32.gmra.mxu0 %vm3887_vm8, %v4884_v32  ;;  %v4507_v32 = vrot.slane %v16795_v60, 2  ;;  %v4900_v27 = vsel %vm1508_vm3, %v4897_v46, %v4899_v11 }
 0x24c   : > { %13761 = vmatprep.mubr.msk.f32.mxu0 %vm3887_vm8, %v4886_v28  ;;  %v4506_v23 = vsel %vm1121_vm2, %v4503_v29, %v4505_v44  ;;  %v4901_v28 = vrot.slane %v16815_v15, 3 }
 0x24d   : > { %13704 = vmatmul.mubr.msk.f32.gmra.mxu1 %vm3887_vm8, %v4492_v7  ;;  %v4903_v7 = vrot.slane %v16843_v49, 3  ;;  %v4508_v3 = vsel %vm1121_vm2, %v4505_v44, %v4507_v32 }
 0x24e   : > { %13706 = vmatprep.mubr.msk.f32.mxu1 %vm3887_vm8, %v4494_v36  ;;  %v4902_v22 = vsel %vm1508_vm3, %v4899_v11, %v4901_v28  ;;  %v4509_v36 = vrot.slane %v16791_v0, 2 }
 0x24f   : > { %13762 = vmatmul.mubr.msk.f32.gmra.mxu0 %vm3887_vm8, %v4888_v30  ;;  %v4511_v30 = vrot.slane %v16819_v31, 2  ;;  %v4904_v59 = vsel %vm1508_vm3, %v4901_v28, %v4903_v7 }
 0x250   : > { %13764 = vmatprep.mubr.msk.f32.mxu0 %vm3887_vm8, %v4890_v62  ;;  %v4510_v43 = vsel %vm1121_vm2, %v4507_v32, %v4509_v36  ;;  %v4905_v62 = vrot.slane %v16839_v25, 3 }
 0x251   : > { %13707 = vmatmul.mubr.msk.f32.gmra.mxu1 %vm3887_vm8, %v4496_v26  ;;  %v4907_v26 = vrot.slane %v16864_v21, 3  ;;  %v4512_v18 = vsel %vm1121_vm2, %v4509_v36, %v4511_v30 }
 0x252   : > { %13709 = vmatprep.mubr.msk.f32.mxu1 %vm3887_vm8, %v4498_v58  ;;  %v4906_v41 = vsel %vm1508_vm3, %v4903_v7, %v4905_v62  ;;  %v4513_v58 = vrot.slane %v16815_v15, 2 }
 0x253   : > { %13765 = vmatmul.mubr.msk.f32.gmra.mxu0 %vm3887_vm8, %v4892_v53  ;;  %v4515_v53 = vrot.slane %v16843_v49, 2  ;;  %v4908_v20 = vsel %vm1508_vm3, %v4905_v62, %v4907_v26 }
 0x254   : > { %13767 = vmatprep.mubr.msk.f32.mxu0 %vm3887_vm8, %v4894_v63  ;;  %v4514_v57 = vsel %vm1121_vm2, %v4511_v30, %v4513_v58  ;;  %v4909_v63 = vrot.slane %v16860_v13, 3 }
 0x255   : > { %13710 = vmatmul.mubr.msk.f32.gmra.mxu1 %vm3887_vm8, %v4500_v52  ;;  %v4911_v52 = vrot.slane %v16883_v2, 3  ;;  %v4516_v46 = vsel %vm1121_vm2, %v4513_v58, %v4515_v53 }
 0x256   : > { %13712 = vmatprep.mubr.msk.f32.mxu1 %vm3887_vm8, %v4502_v40  ;;  %v4910_v29 = vsel %vm1508_vm3, %v4907_v26, %v4909_v63  ;;  %v4517_v40 = vrot.slane %v16839_v25, 2 }
 0x257   : > { %13768 = vmatmul.mubr.msk.f32.gmra.mxu0 %vm3887_vm8, %v4896_v56  ;;  %v4519_v56 = vrot.slane %v16864_v21, 2  ;;  %v4912_v44 = vsel %vm1508_vm3, %v4909_v63, %v4911_v52 }
 0x258   : > { %13770 = vmatprep.mubr.msk.f32.mxu0 %vm3887_vm8, %v4898_v6  ;;  %v4518_v11 = vsel %vm1121_vm2, %v4515_v53, %v4517_v40  ;;  %v4913_v6 = vrot.slane %v16879_v54, 3  ;;  %v4529_v53 = vrot.slane %v16890_v61, 2 }
 0x259   : > { %13713 = vmatmul.mubr.msk.f32.gmra.mxu1 %vm3887_vm8, %v4504_v33  ;;  %v4915_v33 = vrot.slane %v16899_v16, 3  ;;  %v4520_v28 = vsel %vm1121_vm2, %v4517_v40, %v4519_v56  ;;  %v20453_v40 = vld [vmem:[#allocation11_spill] sm:$0xff] }
 0x25a   : > { %13715 = vmatprep.mubr.msk.f32.mxu1 %vm3887_vm8, %v4506_v23  ;;  %v4914_v32 = vsel %vm1508_vm3, %v4911_v52, %v4913_v6  ;;  %v4521_v23 = vrot.slane %v16860_v13, 2 }
 0x25b   : > { %13771 = vmatmul.mubr.msk.f32.gmra.mxu0 %vm3887_vm8, %v4900_v27  ;;  %v4523_v27 = vrot.slane %v16883_v2, 2  ;;  %v4916_v36 = vsel %vm1508_vm3, %v4913_v6, %v4915_v33  ;;  %v4533_v6 = vrot.slane %v16906_v48, 2 }
 0x25c   : > { %13773 = vmatprep.mubr.msk.f32.mxu0 %vm3887_vm8, %v4902_v22  ;;  %v4522_v7 = vsel %vm1121_vm2, %v4519_v56, %v4521_v23  ;;  %v4917_v22 = vrot.slane %v16890_v61, 3  ;;  %v5639_v56 = vrot.slane %v16563_v39, 5 }
 0x25d   : > { %13716 = vmatmul.mubr.msk.f32.gmra.mxu1 %vm3887_vm8, %v4508_v3  ;;  %v4919_v3 = vrot.slane %v16915_v17, 3  ;;  %v4524_v62 = vsel %vm1121_vm2, %v4521_v23, %v4523_v27  ;;  %v5248_v23 = vrot.slane %v16531_v8, 4 }
 0x25e   : > { %13718 = vmatprep.mubr.msk.f32.mxu1 %vm3887_vm8, %v4510_v43  ;;  %v4918_v30 = vsel %vm1508_vm3, %v4915_v33, %v4917_v22  ;;  %v4525_v43 = vrot.slane %v16879_v54, 2 }
 0x25f   : > { %13774 = vmatmul.mubr.msk.f32.gmra.mxu0 %vm3887_vm8, %v4904_v59  ;;  %v4527_v59 = vrot.slane %v16899_v16, 2  ;;  %v4920_v58 = vsel %vm1508_vm3, %v4917_v22, %v4919_v3 }
 0x260   : > { %13776 = vmatprep.mubr.msk.f32.mxu0 %vm3887_vm8, %v4906_v41  ;;  %v4526_v26 = vsel %vm1121_vm2, %v4523_v27, %v4525_v43  ;;  %v4921_v41 = vrot.slane %v16906_v48, 3  ;;  %v5643_v27 = vrot.slane %v16595_v51, 5 }
 0x261   : > { %13719 = vmatmul.mubr.msk.f32.gmra.mxu1 %vm3887_vm8, %v4512_v18  ;;  %v4528_v63 = vsel %vm1121_vm2, %v4525_v43, %v4527_v59  ;;  %v4530_v52 = vsel %vm1121_vm2, %v4527_v59, %v4529_v53  ;;  %v5251_v43 = vrot.slane %v16563_v39, 4  ;;  %v5645_v59 = vrot.slane %v16587_v55, 5 }
 0x262   : > { %13721 = vmatprep.mubr.msk.f32.mxu1 %vm3887_vm8, %v4514_v57  ;;  %v4922_v18 = vsel %vm1508_vm3, %v4919_v3, %v4921_v41  ;;  %v5636_v57 = vrot.slane %v16531_v8, 5  ;;  %v20454_v3 = vld [vmem:[#allocation10_spill] sm:$0xff] }
 0x263   : > { %13777 = vmatmul.mubr.msk.f32.gmra.mxu0 %vm3887_vm8, %v4908_v20  ;;  %v4531_v20 = vrot.slane %v16915_v17, 2 }
 0x264   : > { %13779 = vmatprep.mubr.msk.f32.mxu0 %vm3887_vm8, %v4910_v29  ;;  %v5637_v29 = vrot.slane %v16527_v1, 5 }
 0x265   : > { %13722 = vmatmul.mubr.msk.f32.gmra.mxu1 %vm3887_vm8, %v4516_v46  ;;  %v4923_v46 = vsel %vm1508_vm3, %v4921_v41, %v20453_v40  ;;  %v4534_v33 = vsel %vm1121_vm2, %v4531_v20, %v4533_v6  ;;  %v5647_v41 = vrot.slane %v16625_v45, 5 }
 0x266   : > { %13724 = vmatprep.mubr.msk.f32.mxu1 %vm3887_vm8, %v4518_v11  ;;  %v5638_v11 = vsel %vm2282_vm5, %v5636_v57, %v5637_v29  ;;  %v3785_v57 = vld [vmem:[%s20162_s3 + $0x60] sm:$0xff] }
 0x267   : > { %13780 = vmatmul.mubr.msk.f32.gmra.mxu0 %vm3887_vm8, %v4912_v44  ;;  %v4532_v44 = vsel %vm1121_vm2, %v4529_v53, %v4531_v20  ;;  %v5255_v53 = vrot.slane %v16595_v51, 4  ;;  %v5649_v20 = vrot.slane %v16619_v34, 5 }
 0x268   : > { %13782 = vmatprep.mubr.msk.f32.mxu0 %vm3887_vm8, %v4914_v32  ;;  %v5641_v32 = vrot.slane %v16555_v38, 5 }
 0x269   : > { %13725 = vmatmul.mubr.msk.f32.gmra.mxu1 %vm3887_vm8, %v4520_v28  ;;  %v5640_v28 = vsel %vm2282_vm5, %v5637_v29, %v5639_v56  ;;  %v5651_v29 = vrot.slane %v16661_v50, 5 }
 0x26a   : > { %13727 = vmatprep.mubr.msk.f32.mxu1 %vm3887_vm8, %v4522_v7  ;;  %v3787_v7 = vld [vmem:[%s20162_s3 + $0x70] sm:$0xff]  ;;  %v5642_v22 = vsel %vm2282_vm5, %v5639_v56, %v5641_v32  ;;  %v5650_v56 = vsel %vm2282_vm5, %v5647_v41, %v5649_v20 }
 0x26b   : > { %13783 = vmatmul.mubr.msk.f32.gmra.mxu0 %vm3887_vm8, %v4916_v36  ;;  %v5249_v36 = vrot.slane %v16527_v1, 4 }
 0x26c   : > { %13785 = vmatprep.mubr.msk.f32.mxu0 %vm3887_vm8, %v4918_v30  ;;  %v4535_v30 = vsel %vm1121_vm2, %v4533_v6, %v20454_v3  ;;  %v5259_v6 = vrot.slane %v16625_v45, 4 }
 0x26d   : > { %13728 = vmatmul.mubr.msk.f32.gmra.mxu1 %vm3887_vm8, %v4524_v62  ;;  %v5250_v62 = vsel %vm1895_vm4, %v5248_v23, %v5249_v36  ;;  %v5655_v23 = vrot.slane %v16688_v47, 5 }
 0x26e   : > { %13730 = vmatprep.mubr.msk.f32.mxu1 %vm3887_vm8, %v4526_v26  ;;  %v5644_v26 = vsel %vm2282_vm5, %v5641_v32, %v5643_v27  ;;  %v5652_v32 = vsel %vm2282_vm5, %v5649_v20, %v5651_v29  ;;  %v5269_v20 = vrot.slane %v16684_v14, 4 }
 0x26f   : > { %13786 = vmatmul.mubr.msk.f32.gmra.mxu0 %vm3887_vm8, %v4920_v58  ;;  %v5646_v58 = vsel %vm2282_vm5, %v5643_v27, %v5645_v59  ;;  %v5261_v27 = vrot.slane %v16619_v34, 4 }
 0x270   : > { %13788 = vmatprep.mubr.msk.f32.mxu0 %vm3887_vm8, %v4922_v18  ;;  %v5252_v18 = vsel %vm1895_vm4, %v5249_v36, %v5251_v43 }
 0x271   : > { %13731 = vmatmul.mubr.msk.f32.gmra.mxu1 %vm3887_vm8, %v4528_v63  ;;  %v5262_v36 = vsel %vm1895_vm4, %v5259_v6, %v5261_v27 }
 0x272   : > { %13733 = vmatprep.mubr.msk.f32.mxu1 %vm3887_vm8, %v4530_v52  ;;  %v5648_v52 = vsel %vm2282_vm5, %v5645_v59, %v5647_v41 }
 0x273   : > { %13789 = vmatmul.mubr.msk.f32.gmra.mxu0 %vm3887_vm8, %v4923_v46  ;;  %v17198_v46 = vld [vmem:[%s20162_s3 + $0x88] sm:$0x1] }
 0x274   : > { %13847 = vmatprep.mubr.msk.f32.mxu0 %vm3887_vm8, %v5638_v11  ;;  %v5257_v11 = vrot.slane %v16587_v55, 4 }
 0x275   : > { %13734 = vmatmul.mubr.msk.f32.gmra.mxu1 %vm3887_vm8, %v4532_v44 }
 0x276   : > { %13736 = vmatprep.mubr.msk.f32.mxu1 %vm3887_vm8, %v4534_v33  ;;  %v5258_v44 = vsel %vm1895_vm4, %v5255_v53, %v5257_v11  ;;  %v5653_v33 = vrot.slane %v16655_v37, 5 }
 0x277   : > { %13848 = vmatmul.mubr.msk.f32.vlgmr.msra.gmra.mxu0 %vm3887_vm8, %v5640_v28 }
 0x278   : > { %13850 = vmatprep.mubr.msk.f32.mxu0 %vm3887_vm8, %v5642_v22  ;;  %13948 = vmatpush3.msk.msra.mxu0 %vm3056_vm7, %v16957_v4  ;;  %v5253_v4 = vrot.slane %v16555_v38, 4  ;;  %v5654_v28 = vsel %vm2282_vm5, %v5651_v29, %v5653_v33  ;;  %v5263_v22 = vrot.slane %v16661_v50, 4  ;;  %v5271_v29 = vrot.slane %v16717_v19, 4 }
 0x279   : > { %13737 = vmatmul.mubr.msk.f32.gmra.mxu1 %vm3887_vm8, %v4535_v30  ;;  %13949 = vmatprep.subr.mxu0 %v3787_v7  ;;  %v5657_v30 = vrot.slane %v16684_v14, 5 }
 0x27a   : > { %13795 = vmatprep.mubr.msk.f32.mxu1 %vm3887_vm8, %v5250_v62  ;;  %13950 = vmatpush3.msra.mxu0 %v3787_v7  ;;  %v5254_v63 = vsel %vm1895_vm4, %v5251_v43, %v5253_v4  ;;  %v5260_v7 = vsel %vm1895_vm4, %v5257_v11, %v5259_v6  ;;  %v5656_v43 = vsel %vm2282_vm5, %v5653_v33, %v5655_v23  ;;  %v5659_v62 = vrot.slane %v16717_v19, 5 }
 0x27b   : > { %13851 = vmatmul.mubr.msk.f32.gmra.mxu0 %vm3887_vm8, %v5644_v26  ;;  %v5658_v59 = vsel %vm2282_vm5, %v5655_v23, %v5657_v30  ;;  %v5265_v26 = vrot.slane %v16655_v37, 4  ;;  %v5264_v41 = vsel %vm1895_vm4, %v5261_v27, %v5263_v22  ;;  %v5665_v11 = vrot.slane %v16739_v5, 5 }
 0x27c   : > { %13853 = vmatprep.mubr.msk.f32.mxu0 %vm3887_vm8, %v5646_v58  ;;  %v5267_v58 = vrot.slane %v16688_v47, 4  ;;  %v5667_v6 = vrot.slane %v16769_v12, 5  ;;  %v5273_v33 = vrot.slane %v16713_v42, 4  ;;  %v5275_v23 = vrot.slane %v16743_v35, 4 }
 0x27d   : > { %13796 = vmatmul.mubr.msk.f32.vlgmr.msra.gmra.mxu1 %vm3887_vm8, %v5252_v18  ;;  %v5661_v18 = vrot.slane %v16713_v42, 5  ;;  %v5669_v27 = vrot.slane %v16765_v10, 5 }
 0x27e   : > { %13896 = vmatpush3.msk.msra.mxu1 %vm3056_vm7, %v16987_v24  ;;  %13798 = vmatprep.mubr.msk.f32.mxu1 %vm3887_vm8, %v5254_v63  ;;  %v5256_v24 = vsel %vm1895_vm4, %v5253_v4, %v5255_v53  ;;  %v5266_v4 = vsel %vm1895_vm4, %v5263_v22, %v5265_v26  ;;  %v5660_v53 = vsel %vm2282_vm5, %v5657_v30, %v5659_v62  ;;  %v5671_v22 = vrot.slane %v16795_v60, 5 }
 0x27f   : > { %13854 = vmatmul.mubr.msk.f32.gmra.mxu0 %vm3887_vm8, %v5648_v52  ;;  %13897 = vmatprep.subr.mxu1 %v3785_v57  ;;  %v5662_v63 = vsel %vm2282_vm5, %v5659_v62, %v5661_v18  ;;  %v5268_v52 = vsel %vm1895_vm4, %v5265_v26, %v5267_v58  ;;  %v5277_v30 = vrot.slane %v16739_v5, 4  ;;  %v5279_v62 = vrot.slane %v16769_v12, 4 }
 0x280   : > { %13856 = vmatprep.mubr.msk.f32.mxu0 %vm3887_vm8, %v5650_v56  ;;  %13898 = vmatpush3.msra.mxu1 %v3785_v57  ;;  %v5663_v57 = vrot.slane %v16743_v35, 5  ;;  %v5270_v56 = vsel %vm1895_vm4, %v5267_v58, %v5269_v20  ;;  %v5673_v26 = vrot.slane %v16791_v0, 5  ;;  %v5675_v58 = vrot.slane %v16819_v31, 5 }
 0x281   : > { %13799 = vmatmul.mubr.msk.f32.gmra.mxu1 %vm3887_vm8, %v5256_v24  ;;  %13999 = vmatprep.subr.msk.mxu1 %vm3056_vm7, %v17198_v46 }
 0x282   : > { %13801 = vmatprep.mubr.msk.f32.mxu1 %vm3887_vm8, %v5258_v44  ;;  %v5664_v24 = vsel %vm2282_vm5, %v5661_v18, %v5663_v57  ;;  %v5666_v44 = vsel %vm2282_vm5, %v5663_v57, %v5665_v11  ;;  %v5281_v18 = vrot.slane %v16765_v10, 4  ;;  %v5283_v57 = vrot.slane %v16795_v60, 4 }
 0x283   : > { %13857 = vmatmul.mubr.msk.f32.gmra.mxu0 %vm3887_vm8, %v5652_v32  ;;  %v5272_v32 = vsel %vm1895_vm4, %v5269_v20, %v5271_v29  ;;  %v5677_v20 = vrot.slane %v16815_v15, 5 }
 0x284   : > { %13859 = vmatprep.mubr.msk.f32.mxu0 %vm3887_vm8, %v5654_v28  ;;  %v5274_v28 = vsel %vm1895_vm4, %v5271_v29, %v5273_v33  ;;  %v5679_v29 = vrot.slane %v16843_v49, 5 }
 0x285   : > { %13802 = vmatmul.mubr.msk.f32.gmra.mxu1 %vm3887_vm8, %v5260_v7  ;;  %v5668_v7 = vsel %vm2282_vm5, %v5665_v11, %v5667_v6  ;;  %v5285_v11 = vrot.slane %v16791_v0, 4 }
 0x286   : > { %13804 = vmatprep.mubr.msk.f32.mxu1 %vm3887_vm8, %v5262_v36  ;;  %v5670_v36 = vsel %vm2282_vm5, %v5667_v6, %v5669_v27  ;;  %v5287_v6 = vrot.slane %v16819_v31, 4 }
 0x287   : > { %13860 = vmatmul.mubr.msk.f32.gmra.mxu0 %vm3887_vm8, %v5656_v43  ;;  %v5276_v43 = vsel %vm1895_vm4, %v5273_v33, %v5275_v23  ;;  %v5681_v33 = vrot.slane %v16839_v25, 5 }
 0x288   : > { %13862 = vmatprep.mubr.msk.f32.mxu0 %vm3887_vm8, %v5658_v59  ;;  %v5278_v59 = vsel %vm1895_vm4, %v5275_v23, %v5277_v30  ;;  %v5683_v23 = vrot.slane %v16864_v21, 5 }
 0x289   : > { %13805 = vmatmul.mubr.msk.f32.gmra.mxu1 %vm3887_vm8, %v5264_v41  ;;  %v5672_v41 = vsel %vm2282_vm5, %v5669_v27, %v5671_v22  ;;  %v5289_v27 = vrot.slane %v16815_v15, 4 }
 0x28a   : > { %13807 = vmatprep.mubr.msk.f32.mxu1 %vm3887_vm8, %v5266_v4  ;;  %v5674_v4 = vsel %vm2282_vm5, %v5671_v22, %v5673_v26  ;;  %v5291_v22 = vrot.slane %v16843_v49, 4 }
 0x28b   : > { %13863 = vmatmul.mubr.msk.f32.gmra.mxu0 %vm3887_vm8, %v5660_v53  ;;  %v5280_v53 = vsel %vm1895_vm4, %v5277_v30, %v5279_v62  ;;  %v5685_v30 = vrot.slane %v16860_v13, 5 }
 0x28c   : > { %13865 = vmatprep.mubr.msk.f32.mxu0 %vm3887_vm8, %v5662_v63  ;;  %v5282_v63 = vsel %vm1895_vm4, %v5279_v62, %v5281_v18  ;;  %v5687_v62 = vrot.slane %v16883_v2, 5 }
 0x28d   : > { %13808 = vmatmul.mubr.msk.f32.gmra.mxu1 %vm3887_vm8, %v5268_v52  ;;  %v5676_v52 = vsel %vm2282_vm5, %v5673_v26, %v5675_v58  ;;  %v5293_v26 = vrot.slane %v16839_v25, 4 }
 0x28e   : > { %13810 = vmatprep.mubr.msk.f32.mxu1 %vm3887_vm8, %v5270_v56  ;;  %v5678_v56 = vsel %vm2282_vm5, %v5675_v58, %v5677_v20  ;;  %v5295_v58 = vrot.slane %v16864_v21, 4 }
 0x28f   : > { %13866 = vmatmul.mubr.msk.f32.gmra.mxu0 %vm3887_vm8, %v5664_v24  ;;  %v5284_v24 = vsel %vm1895_vm4, %v5281_v18, %v5283_v57  ;;  %v5689_v18 = vrot.slane %v16879_v54, 5 }
 0x290   : > { %13868 = vmatprep.mubr.msk.f32.mxu0 %vm3887_vm8, %v5666_v44  ;;  %v5286_v44 = vsel %vm1895_vm4, %v5283_v57, %v5285_v11  ;;  %v5691_v57 = vrot.slane %v16899_v16, 5 }
 0x291   : > { %13811 = vmatmul.mubr.msk.f32.gmra.mxu1 %vm3887_vm8, %v5272_v32  ;;  %v5680_v32 = vsel %vm2282_vm5, %v5677_v20, %v5679_v29  ;;  %v5297_v20 = vrot.slane %v16860_v13, 4 }
 0x292   : > { %13813 = vmatprep.mubr.msk.f32.mxu1 %vm3887_vm8, %v5274_v28  ;;  %v5682_v28 = vsel %vm2282_vm5, %v5679_v29, %v5681_v33  ;;  %v5299_v29 = vrot.slane %v16883_v2, 4 }
 0x293   : > { %13869 = vmatmul.mubr.msk.f32.gmra.mxu0 %vm3887_vm8, %v5668_v7  ;;  %v5288_v7 = vsel %vm1895_vm4, %v5285_v11, %v5287_v6  ;;  %v5693_v11 = vrot.slane %v16890_v61, 5 }
 0x294   : > { %13871 = vmatprep.mubr.msk.f32.mxu0 %vm3887_vm8, %v5670_v36  ;;  %v5290_v36 = vsel %vm1895_vm4, %v5287_v6, %v5289_v27  ;;  %v5695_v6 = vrot.slane %v16915_v17, 5 }
 0x295   : > { %13814 = vmatmul.mubr.msk.f32.gmra.mxu1 %vm3887_vm8, %v5276_v43  ;;  %v5684_v43 = vsel %vm2282_vm5, %v5681_v33, %v5683_v23  ;;  %v5301_v33 = vrot.slane %v16879_v54, 4 }
 0x296   : > { %13816 = vmatprep.mubr.msk.f32.mxu1 %vm3887_vm8, %v5278_v59  ;;  %v5686_v59 = vsel %vm2282_vm5, %v5683_v23, %v5685_v30  ;;  %v5303_v23 = vrot.slane %v16899_v16, 4 }
 0x297   : > { %13872 = vmatmul.mubr.msk.f32.gmra.mxu0 %vm3887_vm8, %v5672_v41  ;;  %v5292_v41 = vsel %vm1895_vm4, %v5289_v27, %v5291_v22  ;;  %v5697_v27 = vrot.slane %v16906_v48, 5 }
 0x298   : > { %13874 = vmatprep.mubr.msk.f32.mxu0 %vm3887_vm8, %v5674_v4  ;;  %v5294_v4 = vsel %vm1895_vm4, %v5291_v22, %v5293_v26 }
 0x299   : > { %13817 = vmatmul.mubr.msk.f32.gmra.mxu1 %vm3887_vm8, %v5280_v53  ;;  %v5688_v53 = vsel %vm2282_vm5, %v5685_v30, %v5687_v62  ;;  %v5698_v22 = vsel %vm2282_vm5, %v5695_v6, %v5697_v27  ;;  %v6412_v30 = vrot.slane %v16531_v8, 7 }
 0x29a   : > { %13819 = vmatprep.mubr.msk.f32.mxu1 %vm3887_vm8, %v5282_v63  ;;  %v5690_v63 = vsel %vm2282_vm5, %v5687_v62, %v5689_v18  ;;  %v5307_v62 = vrot.slane %v16915_v17, 4 }
 0x29b   : > { %13875 = vmatmul.mubr.msk.f32.gmra.mxu0 %vm3887_vm8, %v5676_v52  ;;  %v5296_v52 = vsel %vm1895_vm4, %v5293_v26, %v5295_v58  ;;  %v6413_v26 = vrot.slane %v16527_v1, 7 }
 0x29c   : > { %13877 = vmatprep.mubr.msk.f32.mxu0 %vm3887_vm8, %v5678_v56  ;;  %v5298_v56 = vsel %vm1895_vm4, %v5295_v58, %v5297_v20 }
 0x29d   : > { %13820 = vmatmul.mubr.msk.f32.gmra.mxu1 %vm3887_vm8, %v5284_v24  ;;  %v5692_v24 = vsel %vm2282_vm5, %v5689_v18, %v5691_v57  ;;  %v6414_v18 = vsel %vm3056_vm7, %v6412_v30, %v6413_v26  ;;  %v6029_v30 = vrot.slane %v16555_v38, 6 }
 0x29e   : > { %13822 = vmatprep.mubr.msk.f32.mxu1 %vm3887_vm8, %v5286_v44  ;;  %v5694_v44 = vsel %vm2282_vm5, %v5691_v57, %v5693_v11 }
 0x29f   : > { %13878 = vmatmul.mubr.msk.f32.gmra.mxu0 %vm3887_vm8, %v5680_v32  ;;  %v5300_v32 = vsel %vm1895_vm4, %v5297_v20, %v5299_v29  ;;  %v6417_v20 = vrot.slane %v16555_v38, 7 }
 0x2a0   : > { %13880 = vmatprep.mubr.msk.f32.mxu0 %vm3887_vm8, %v5682_v28  ;;  %v5302_v28 = vsel %vm1895_vm4, %v5299_v29, %v5301_v33 }
 0x2a1   : > { %13823 = vmatmul.mubr.msk.f32.gmra.mxu1 %vm3887_vm8, %v5288_v7  ;;  %v5696_v7 = vsel %vm2282_vm5, %v5693_v11, %v5695_v6  ;;  %v6419_v11 = vrot.slane %v16595_v51, 7  ;;  %v6025_v6 = vrot.slane %v16527_v1, 6 }
 0x2a2   : > { %13825 = vmatprep.mubr.msk.f32.mxu1 %vm3887_vm8, %v5290_v36  ;;  %v5305_v36 = vrot.slane %v16890_v61, 4 }
 0x2a3   : > { %13881 = vmatmul.mubr.msk.f32.gmra.mxu0 %vm3887_vm8, %v5684_v43  ;;  %v5304_v43 = vsel %vm1895_vm4, %v5301_v33, %v5303_v23  ;;  %v20456_v33 = vld [vmem:[#allocation12_spill] sm:$0xff] }
 0x2a4   : > { %13883 = vmatprep.mubr.msk.f32.mxu0 %vm3887_vm8, %v5686_v59  ;;  %v5306_v59 = vsel %vm1895_vm4, %v5303_v23, %v5305_v36  ;;  %v5308_v57 = vsel %vm1895_vm4, %v5305_v36, %v5307_v62 }
 0x2a5   : > { %13826 = vmatmul.mubr.msk.f32.gmra.mxu1 %vm3887_vm8, %v5292_v41  ;;  %v20455_v41 = vld [vmem:[#allocation13_spill] sm:$0xff] }
 0x2a6   : > { %13828 = vmatprep.mubr.msk.f32.mxu1 %vm3887_vm8, %v5294_v4  ;;  %v5699_v58 = vsel %vm2282_vm5, %v5697_v27, %v20455_v41  ;;  %v6415_v4 = vrot.slane %v16563_v39, 7 }
 0x2a7   : > { %13884 = vmatmul.mubr.msk.f32.gmra.mxu0 %vm3887_vm8, %v5688_v53  ;;  %v5309_v53 = vrot.slane %v16906_v48, 4 }
 0x2a8   : > { %13886 = vmatprep.mubr.msk.f32.mxu0 %vm3887_vm8, %v5690_v63 }
 0x2a9   : > { %13829 = vmatmul.mubr.msk.f32.gmra.mxu1 %vm3887_vm8, %v5296_v52  ;;  %v5310_v63 = vsel %vm1895_vm4, %v5307_v62, %v5309_v53  ;;  %v6024_v52 = vrot.slane %v16531_v8, 6  ;;  %v6027_v8 = vrot.slane %v16563_v39, 6 }
 0x2aa   : > { %13831 = vmatprep.mubr.msk.f32.mxu1 %vm3887_vm8, %v5298_v56  ;;  %v6416_v56 = vsel %vm3056_vm7, %v6413_v26, %v6415_v4  ;;  %v3789_v26 = vld [vmem:[%s20162_s3 + $0x80] sm:$0xff] }
 0x2ab   : > { %13887 = vmatmul.mubr.msk.f32.gmra.mxu0 %vm3887_vm8, %v5692_v24  ;;  %v6418_v24 = vsel %vm3056_vm7, %v6415_v4, %v6417_v20  ;;  %v6026_v23 = vsel %vm2669_vm6, %v6024_v52, %v6025_v6  ;;  %v6028_v62 = vsel %vm2669_vm6, %v6025_v6, %v6027_v8  ;;  %v6030_v4 = vsel %vm2669_vm6, %v6027_v8, %v6029_v30 }
 0x2ac   : > { %13889 = vmatprep.mubr.msk.f32.mxu0 %vm3887_vm8, %v5694_v44 }
 0x2ad   : > { %13832 = vmatmul.mubr.msk.f32.gmra.mxu1 %vm3887_vm8, %v5300_v32  ;;  %v5311_v32 = vsel %vm1895_vm4, %v5309_v53, %v20456_v33 }
 0x2ae   : > { %13834 = vmatprep.mubr.msk.f32.mxu1 %vm3887_vm8, %v5302_v28  ;;  %v6421_v28 = vrot.slane %v16587_v55, 7 }
 0x2af   : > { %13890 = vmatmul.mubr.msk.f32.gmra.mxu0 %vm3887_vm8, %v5696_v7  ;;  %v6420_v7 = vsel %vm3056_vm7, %v6417_v20, %v6419_v11 }
 0x2b0   : > { %13892 = vmatprep.mubr.msk.f32.mxu0 %vm3887_vm8, %v5698_v22  ;;  %v6423_v22 = vrot.slane %v16625_v45, 7  ;;  %v6422_v36 = vsel %vm3056_vm7, %v6419_v11, %v6421_v28  ;;  %v6033_v11 = vrot.slane %v16587_v55, 6 }
 0x2b1   : > { %13835 = vmatmul.mubr.msk.f32.gmra.mxu1 %vm3887_vm8, %v5304_v43 }
 0x2b2   : > { %13837 = vmatprep.mubr.msk.f32.mxu1 %vm3887_vm8, %v5306_v59  ;;  %v6031_v59 = vrot.slane %v16595_v51, 6 }
 0x2b3   : > { %13893 = vmatmul.mubr.msk.f32.gmra.mxu0 %vm3887_vm8, %v5699_v58 }
 0x2b4   : > { %13951 = vmatprep.mubr.msk.f32.mxu0 %vm3887_vm8, %v6414_v18  ;;  %v6425_v18 = vrot.slane %v16619_v34, 7  ;;  %v6034_v8 = vsel %vm2669_vm6, %v6031_v59, %v6033_v11 }
 0x2b5   : > { %13838 = vmatmul.mubr.msk.f32.gmra.mxu1 %vm3887_vm8, %v5308_v57  ;;  %v6424_v57 = vsel %vm3056_vm7, %v6421_v28, %v6423_v22 }
 0x2b6   : > { %13840 = vmatprep.mubr.msk.f32.mxu1 %vm3887_vm8, %v5310_v63  ;;  %v13641_v29 = vpop.f32.mrf.mxu0  ;;  %v6427_v63 = vrot.slane %v16661_v50, 7 }
 0x2b7   : > { %13952 = vmatmul.mubr.msk.f32.vlgmr.msra.gmra.mxu0 %vm3887_vm8, %v6416_v56  ;;  %v6426_v56 = vsel %vm3056_vm7, %v6423_v22, %v6425_v18 }
 0x2b8   : > { %13954 = vmatprep.mubr.msk.f32.mxu0 %vm3887_vm8, %v6418_v24  ;;  %v4313_v44 = vpop.f32.mrf.mxu0  ;;  %v6035_v24 = vrot.slane %v16625_v45, 6 }
 0x2b9   : > { %13841 = vmatmul.mubr.msk.f32.gmra.mxu1 %vm3887_vm8, %v5311_v32 }
 0x2ba   : > { %13899 = vmatprep.mubr.msk.f32.mxu1 %vm3887_vm8, %v6026_v23  ;;  %v13644_v27 = vpop.f32.mrf.mxu0  ;;  %v6429_v23 = vrot.slane %v16655_v37, 7 }
 0x2bb   : > { %13955 = vmatmul.mubr.msk.f32.gmra.mxu0 %vm3887_vm8, %v6420_v7  ;;  %v6431_v7 = vrot.slane %v16688_v47, 7 }
 0x2bc   : > { %13957 = vmatprep.mubr.msk.f32.mxu0 %vm3887_vm8, %v6422_v36  ;;  %v4323_v43 = vpop.f32.mrf.mxu0  ;;  %v13589_v58 = vpop.f32.mrf.mxu1 }
 0x2bd   : > { %13900 = vmatmul.mubr.msk.f32.vlgmr.msra.gmra.mxu1 %vm3887_vm8, %v6028_v62  ;;  %v17396_v53 = vadd.f32 %v13641_v29, %v13589_v58  ;;  %v6037_v62 = vrot.slane %v16619_v34, 6 }
 0x2be   : > { %14000 = vmatpush3.msk.msra.mxu1 %vm3056_vm7, %v17198_v46  ;;  %13902 = vmatprep.mubr.msk.f32.mxu1 %vm3887_vm8, %v6030_v4  ;;  %v4021_v20 = vpop.f32.mrf.mxu1  ;;  %v13647_v52 = vpop.f32.mrf.mxu0  ;;  %v6032_v46 = vsel %vm2669_vm6, %v6029_v30, %v6031_v59  ;;  %v6430_v30 = vsel %vm3056_vm7, %v6427_v63, %v6429_v23  ;;  %v6039_v59 = vrot.slane %v16661_v50, 6 }
 0x2bf   : > { %13958 = vmatmul.mubr.msk.f32.gmra.mxu0 %vm3887_vm8, %v6424_v57  ;;  %14001 = vmatprep.subr.mxu1 %v3789_v26  ;;  %v17406_v29 = vadd.f32 %v4313_v44, %v4021_v20  ;;  %v6428_v44 = vsel %vm3056_vm7, %v6425_v18, %v6427_v63  ;;  %v6038_v18 = vsel %vm2669_vm6, %v6035_v24, %v6037_v62  ;;  %v6433_v57 = vrot.slane %v16684_v14, 7 }
 0x2c0   : > { %13960 = vmatprep.mubr.msk.f32.mxu0 %vm3887_vm8, %v6426_v56  ;;  %14002 = vmatpush3.msra.mxu1 %v3789_v26  ;;  %v4333_v32 = vpop.f32.mrf.mxu0  ;;  %v6435_v63 = vrot.slane %v16717_v19, 7 }
 0x2c1   : > { %v13592_v6 = vpop.f32.mrf.mxu1  ;;  %13903 = vmatmul.mubr.msk.f32.gmra.mxu1 %vm3887_vm8, %v6032_v46  ;;  %v6434_v46 = vsel %vm3056_vm7, %v6431_v7, %v6433_v57 }
 0x2c2   : > { %v17414_v28 = vadd.f32 %v13644_v27, %v13592_v6  ;;  %13905 = vmatprep.mubr.msk.f32.mxu1 %vm3887_vm8, %v6034_v8  ;;  %v6036_v27 = vsel %vm2669_vm6, %v6033_v11, %v6035_v24  ;;  %v6041_v6 = vrot.slane %v16655_v37, 6  ;;  %v6043_v24 = vrot.slane %v16688_v47, 6 }
 0x2c3   : > { %v4031_v22 = vpop.f32.mrf.mxu1  ;;  %v13650_v36 = vpop.f32.mrf.mxu0  ;;  %13961 = vmatmul.mubr.msk.f32.gmra.mxu0 %vm3887_vm8, %v6428_v44 }
 0x2c4   : > { %v17422_v26 = vadd.f32 %v4323_v43, %v4031_v22  ;;  %13963 = vmatprep.mubr.msk.f32.mxu0 %vm3887_vm8, %v6430_v30  ;;  %v6432_v43 = vsel %vm3056_vm7, %v6429_v23, %v6431_v7  ;;  %v6042_v22 = vsel %vm2669_vm6, %v6039_v59, %v6041_v6  ;;  %v6437_v30 = vrot.slane %v16713_v42, 7 }
 0x2c5   : > { %v13595_v58 = vpop.f32.mrf.mxu1  ;;  %v4343_v4 = vpop.f32.mrf.mxu0  ;;  %13906 = vmatmul.mubr.msk.f32.gmra.mxu1 %vm3887_vm8, %v6036_v27  ;;  %v6439_v7 = vrot.slane %v16743_v35, 7 }
 0x2c6   : > { %v17430_v20 = vadd.f32 %v13647_v52, %v13595_v58  ;;  %13908 = vmatprep.mubr.msk.f32.mxu1 %vm3887_vm8, %v6038_v18  ;;  %v6040_v52 = vsel %vm2669_vm6, %v6037_v62, %v6039_v59  ;;  %v6438_v18 = vsel %vm3056_vm7, %v6435_v63, %v6437_v30  ;;  %v6047_v59 = vrot.slane %v16717_v19, 6 }
 0x2c7   : > { %v4041_v56 = vpop.f32.mrf.mxu1  ;;  %v13653_v11 = vpop.f32.mrf.mxu0  ;;  %13964 = vmatmul.mubr.msk.f32.gmra.mxu0 %vm3887_vm8, %v6432_v43  ;;  %v6045_v43 = vrot.slane %v16684_v14, 6 }
 0x2c8   : > { %v17438_v8 = vadd.f32 %v4333_v32, %v4041_v56  ;;  %13966 = vmatprep.mubr.msk.f32.mxu0 %vm3887_vm8, %v6434_v46  ;;  %v6436_v32 = vsel %vm3056_vm7, %v6433_v57, %v6435_v63  ;;  %v6443_v63 = vrot.slane %v16769_v12, 7 }
 0x2c9   : > { %v13598_v44 = vpop.f32.mrf.mxu1  ;;  %v4353_v23 = vpop.f32.mrf.mxu0  ;;  %13909 = vmatmul.mubr.msk.f32.gmra.mxu1 %vm3887_vm8, %v6040_v52  ;;  %v6046_v52 = vsel %vm2669_vm6, %v6043_v24, %v6045_v43 }
 0x2ca   : > { %v17446_v27 = vadd.f32 %v13650_v36, %v13598_v44  ;;  %13911 = vmatprep.mubr.msk.f32.mxu1 %vm3887_vm8, %v6042_v22  ;;  %v6044_v36 = vsel %vm2669_vm6, %v6041_v6, %v6043_v24  ;;  %v6441_v44 = vrot.slane %v16739_v5, 7  ;;  %v6051_v24 = vrot.slane %v16743_v35, 6 }
 0x2cb   : > { %v4051_v58 = vpop.f32.mrf.mxu1  ;;  %v13656_v62 = vpop.f32.mrf.mxu0  ;;  %13967 = vmatmul.mubr.msk.f32.gmra.mxu0 %vm3887_vm8, %v6436_v32 }
 0x2cc   : > { %v17454_v56 = vadd.f32 %v4343_v4, %v4051_v58  ;;  %13969 = vmatprep.mubr.msk.f32.mxu0 %vm3887_vm8, %v6438_v18  ;;  %v6440_v4 = vsel %vm3056_vm7, %v6437_v30, %v6439_v7  ;;  %v6442_v58 = vsel %vm3056_vm7, %v6439_v7, %v6441_v44  ;;  %v6049_v18 = vrot.slane %v16713_v42, 6 }
 0x2cd   : > { %v13601_v46 = vpop.f32.mrf.mxu1  ;;  %v4363_v57 = vpop.f32.mrf.mxu0  ;;  %13912 = vmatmul.mubr.msk.f32.gmra.mxu1 %vm3887_vm8, %v6044_v36  ;;  %v6447_v7 = vrot.slane %v16795_v60, 7 }
 0x2ce   : > { %v17462_v22 = vadd.f32 %v13653_v11, %v13601_v46  ;;  %13914 = vmatprep.mubr.msk.f32.mxu1 %vm3887_vm8, %v6046_v52  ;;  %v6048_v11 = vsel %vm2669_vm6, %v6045_v43, %v6047_v59  ;;  %v6050_v52 = vsel %vm2669_vm6, %v6047_v59, %v6049_v18  ;;  %v6055_v59 = vrot.slane %v16769_v12, 6 }
 0x2cf   : > { %v4061_v32 = vpop.f32.mrf.mxu1  ;;  %v13659_v6 = vpop.f32.mrf.mxu0  ;;  %13970 = vmatmul.mubr.msk.f32.gmra.mxu0 %vm3887_vm8, %v6440_v4  ;;  %v6445_v4 = vrot.slane %v16765_v10, 7 }
 0x2d0   : > { %v17470_v36 = vadd.f32 %v4353_v23, %v4061_v32  ;;  %13972 = vmatprep.mubr.msk.f32.mxu0 %vm3887_vm8, %v6442_v58  ;;  %v6444_v23 = vsel %vm3056_vm7, %v6441_v44, %v6443_v63 }
 0x2d1   : > { %v13604_v46 = vpop.f32.mrf.mxu1  ;;  %v4373_v30 = vpop.f32.mrf.mxu0  ;;  %13915 = vmatmul.mubr.msk.f32.gmra.mxu1 %vm3887_vm8, %v6048_v11  ;;  %v6446_v58 = vsel %vm3056_vm7, %v6443_v63, %v6445_v4  ;;  %v6053_v11 = vrot.slane %v16739_v5, 6  ;;  %v6451_v63 = vrot.slane %v16819_v31, 7 }
 0x2d2   : > { %v17478_v33 = vadd.f32 %v13656_v62, %v13604_v46  ;;  %13917 = vmatprep.mubr.msk.f32.mxu1 %vm3887_vm8, %v6050_v52  ;;  %v6052_v62 = vsel %vm2669_vm6, %v6049_v18, %v6051_v24 }
 0x2d3   : > { %v4071_v32 = vpop.f32.mrf.mxu1  ;;  %v13662_v43 = vpop.f32.mrf.mxu0  ;;  %13973 = vmatmul.mubr.msk.f32.gmra.mxu0 %vm3887_vm8, %v6444_v23  ;;  %v6054_v52 = vsel %vm2669_vm6, %v6051_v24, %v6053_v11  ;;  %v6449_v23 = vrot.slane %v16791_v0, 7  ;;  %v6059_v24 = vrot.slane %v16795_v60, 6 }
 0x2d4   : > { %v17486_v41 = vadd.f32 %v4363_v57, %v4071_v32  ;;  %13975 = vmatprep.mubr.msk.f32.mxu0 %vm3887_vm8, %v6446_v58  ;;  %v6448_v57 = vsel %vm3056_vm7, %v6445_v4, %v6447_v7 }
 0x2d5   : > { %v13607_v46 = vpop.f32.mrf.mxu1  ;;  %v4383_v44 = vpop.f32.mrf.mxu0  ;;  %13918 = vmatmul.mubr.msk.f32.gmra.mxu1 %vm3887_vm8, %v6052_v62  ;;  %v6450_v58 = vsel %vm3056_vm7, %v6447_v7, %v6449_v23  ;;  %v6057_v62 = vrot.slane %v16765_v10, 6 }
 0x2d6   : > { %v17494_v3 = vadd.f32 %v13659_v6, %v13607_v46  ;;  %13920 = vmatprep.mubr.msk.f32.mxu1 %vm3887_vm8, %v6054_v52  ;;  %v6056_v6 = vsel %vm2669_vm6, %v6053_v11, %v6055_v59 }
 0x2d7   : > { %v4081_v32 = vpop.f32.mrf.mxu1  ;;  %v13665_v18 = vpop.f32.mrf.mxu0  ;;  %13976 = vmatmul.mubr.msk.f32.gmra.mxu0 %vm3887_vm8, %v6448_v57  ;;  %v6058_v52 = vsel %vm2669_vm6, %v6055_v59, %v6057_v62  ;;  %v6453_v57 = vrot.slane %v16815_v15, 7  ;;  %v6063_v59 = vrot.slane %v16819_v31, 6 }
 0x2d8   : > { %v17502_v40 = vadd.f32 %v4373_v30, %v4081_v32  ;;  %13978 = vmatprep.mubr.msk.f32.mxu0 %vm3887_vm8, %v6450_v58  ;;  %v6452_v30 = vsel %vm3056_vm7, %v6449_v23, %v6451_v63  ;;  %v6455_v32 = vrot.slane %v16843_v49, 7 }
 0x2d9   : > { %v13610_v46 = vpop.f32.mrf.mxu1  ;;  %v17507_v4 = vpop.f32.mrf.mxu0  ;;  %13921 = vmatmul.mubr.msk.f32.gmra.mxu1 %vm3887_vm8, %v6056_v6  ;;  %v6454_v9 = vsel %vm3056_vm7, %v6451_v63, %v6453_v57  ;;  %v6061_v6 = vrot.slane %v16791_v0, 6 }
 0x2da   : > { %20457 = vst [vmem:[#allocation28_spill] sm:$0xff] %v17507_v4  ;;  %v17512_v7 = vadd.f32 %v13662_v43, %v13610_v46  ;;  %13923 = vmatprep.mubr.msk.f32.mxu1 %vm3887_vm8, %v6058_v52  ;;  %v6060_v43 = vsel %vm2669_vm6, %v6057_v62, %v6059_v24 }
 0x2db   : > { %v4091_v11 = vpop.f32.mrf.mxu1  ;;  %v13668_v58 = vpop.f32.mrf.mxu0  ;;  %13979 = vmatmul.mubr.msk.f32.gmra.mxu0 %vm3887_vm8, %v6452_v30  ;;  %v6062_v52 = vsel %vm2669_vm6, %v6059_v24, %v6061_v6  ;;  %v6457_v30 = vrot.slane %v16839_v25, 7  ;;  %v6067_v24 = vrot.slane %v16843_v49, 6 }
 0x2dc   : > { %v17520_v4 = vadd.f32 %v4383_v44, %v4091_v11  ;;  %13981 = vmatprep.mubr.msk.f32.mxu0 %vm3887_vm8, %v6454_v9  ;;  %v6456_v44 = vsel %vm3056_vm7, %v6453_v57, %v6455_v32  ;;  %v6459_v9 = vrot.slane %v16864_v21, 7 }
 0x2dd   : > { %v13613_v46 = vpop.f32.mrf.mxu1  ;;  %v17525_v23 = vpop.f32.mrf.mxu0  ;;  %13924 = vmatmul.mubr.msk.f32.gmra.mxu1 %vm3887_vm8, %v6060_v43  ;;  %v6065_v43 = vrot.slane %v16815_v15, 6 }
 0x2de   : > { %20458 = vst [vmem:[#allocation30_spill] sm:$0xff] %v17525_v23  ;;  %v17530_v63 = vadd.f32 %v13665_v18, %v13613_v46  ;;  %13926 = vmatprep.mubr.msk.f32.mxu1 %vm3887_vm8, %v6062_v52  ;;  %v6458_v23 = vsel %vm3056_vm7, %v6455_v32, %v6457_v30  ;;  %v6064_v18 = vsel %vm2669_vm6, %v6061_v6, %v6063_v59 }
 0x2df   : > { %v17535_v62 = vpop.f32.mrf.mxu1  ;;  %v13671_v11 = vpop.f32.mrf.mxu0  ;;  %13982 = vmatmul.mubr.msk.f32.gmra.mxu0 %vm3887_vm8, %v6456_v44  ;;  %v6066_v57 = vsel %vm2669_vm6, %v6063_v59, %v6065_v43  ;;  %v6460_v32 = vsel %vm3056_vm7, %v6457_v30, %v6459_v9  ;;  %v6071_v59 = vrot.slane %v16864_v21, 6 }
 0x2e0   : > { %20459 = vst [vmem:[#allocation14_spill] sm:$0xff] %v17535_v62  ;;  %13984 = vmatprep.mubr.msk.f32.mxu0 %vm3887_vm8, %v6458_v23  ;;  %v6461_v62 = vrot.slane %v16860_v13, 7  ;;  %v6463_v23 = vrot.slane %v16883_v2, 7 }
 0x2e1   : > { %v13616_v46 = vpop.f32.mrf.mxu1  ;;  %v17543_v52 = vpop.f32.mrf.mxu0  ;;  %13927 = vmatmul.mubr.msk.f32.gmra.mxu1 %vm3887_vm8, %v6064_v18  ;;  %v6069_v18 = vrot.slane %v16839_v25, 6 }
 0x2e2   : > { %20460 = vst [vmem:[#allocation15_spill] sm:$0xff] %v17543_v52  ;;  %v17548_v44 = vadd.f32 %v13668_v58, %v13616_v46  ;;  %13929 = vmatprep.mubr.msk.f32.mxu1 %vm3887_vm8, %v6066_v57  ;;  %v6462_v52 = vsel %vm3056_vm7, %v6459_v9, %v6461_v62  ;;  %v6068_v58 = vsel %vm2669_vm6, %v6065_v43, %v6067_v24 }
 0x2e3   : > { %v17553_v6 = vpop.f32.mrf.mxu1  ;;  %v13674_v49 = vpop.f32.mrf.mxu0  ;;  %13985 = vmatmul.mubr.msk.f32.gmra.mxu0 %vm3887_vm8, %v6460_v32  ;;  %v6070_v30 = vsel %vm2669_vm6, %v6067_v24, %v6069_v18  ;;  %v6464_v9 = vsel %vm3056_vm7, %v6461_v62, %v6463_v23  ;;  %v6075_v24 = vrot.slane %v16883_v2, 6 }
 0x2e4   : > { %20461 = vst [vmem:[#allocation17_spill] sm:$0xff] %v17553_v6  ;;  %13987 = vmatprep.mubr.msk.f32.mxu0 %vm3887_vm8, %v6462_v52  ;;  %v6465_v6 = vrot.slane %v16879_v54, 7  ;;  %v6467_v52 = vrot.slane %v16899_v16, 7 }
 0x2e5   : > { %v13619_v46 = vpop.f32.mrf.mxu1  ;;  %v17561_v57 = vpop.f32.mrf.mxu0  ;;  %13930 = vmatmul.mubr.msk.f32.gmra.mxu1 %vm3887_vm8, %v6068_v58  ;;  %v6073_v58 = vrot.slane %v16860_v13, 6 }
 0x2e6   : > { %20462 = vst [vmem:[#allocation45_spill] sm:$0xff] %v17561_v57  ;;  %v17566_v32 = vadd.f32 %v13671_v11, %v13619_v46  ;;  %13932 = vmatprep.mubr.msk.f32.mxu1 %vm3887_vm8, %v6070_v30  ;;  %v6466_v57 = vsel %vm3056_vm7, %v6463_v23, %v6465_v6  ;;  %v6072_v11 = vsel %vm2669_vm6, %v6069_v18, %v6071_v59 }
 0x2e7   : > { %v17571_v43 = vpop.f32.mrf.mxu1  ;;  %v13677_v21 = vpop.f32.mrf.mxu0  ;;  %13988 = vmatmul.mubr.msk.f32.gmra.mxu0 %vm3887_vm8, %v6464_v9  ;;  %v6074_v62 = vsel %vm2669_vm6, %v6071_v59, %v6073_v58  ;;  %v6468_v23 = vsel %vm3056_vm7, %v6465_v6, %v6467_v52  ;;  %v6079_v59 = vrot.slane %v16899_v16, 6 }
 0x2e8   : > { %20463 = vst [vmem:[#allocation16_spill] sm:$0xff] %v17571_v43  ;;  %13990 = vmatprep.mubr.msk.f32.mxu0 %vm3887_vm8, %v6466_v57  ;;  %v6469_v43 = vrot.slane %v16890_v61, 7  ;;  %v6471_v57 = vrot.slane %v16915_v17, 7 }
 0x2e9   : > { %v13622_v46 = vpop.f32.mrf.mxu1  ;;  %v17579_v30 = vpop.f32.mrf.mxu0  ;;  %13933 = vmatmul.mubr.msk.f32.gmra.mxu1 %vm3887_vm8, %v6072_v11  ;;  %v6077_v11 = vrot.slane %v16879_v54, 6 }
 0x2ea   : > { %20464 = vst [vmem:[#allocation18_spill] sm:$0xff] %v17579_v30  ;;  %v17584_v9 = vadd.f32 %v13674_v49, %v13622_v46  ;;  %13935 = vmatprep.mubr.msk.f32.mxu1 %vm3887_vm8, %v6074_v62  ;;  %v6470_v30 = vsel %vm3056_vm7, %v6467_v52, %v6469_v43  ;;  %v6076_v49 = vsel %vm2669_vm6, %v6073_v58, %v6075_v24 }
 0x2eb   : > { %v17589_v18 = vpop.f32.mrf.mxu1  ;;  %v13680_v2 = vpop.f32.mrf.mxu0  ;;  %13991 = vmatmul.mubr.msk.f32.gmra.mxu0 %vm3887_vm8, %v6468_v23  ;;  %v6078_v6 = vsel %vm2669_vm6, %v6075_v24, %v6077_v11  ;;  %v6472_v52 = vsel %vm3056_vm7, %v6469_v43, %v6471_v57  ;;  %v6080_v24 = vsel %vm2669_vm6, %v6077_v11, %v6079_v59  ;;  %v6085_v11 = vrot.slane %v16906_v48, 6 }
 0x2ec   : > { %20465 = vst [vmem:[#allocation40_spill] sm:$0xff] %v17589_v18  ;;  %13993 = vmatprep.mubr.msk.f32.mxu0 %vm3887_vm8, %v6470_v30  ;;  %v6473_v18 = vrot.slane %v16906_v48, 7 }
 0x2ed   : > { %v13625_v46 = vpop.f32.mrf.mxu1  ;;  %v17597_v62 = vpop.f32.mrf.mxu0  ;;  %13936 = vmatmul.mubr.msk.f32.gmra.mxu1 %vm3887_vm8, %v6076_v49 }
 0x2ee   : > { %20466 = vst [vmem:[#allocation67_spill] sm:$0xff] %v17597_v62  ;;  %v17602_v23 = vadd.f32 %v13677_v21, %v13625_v46  ;;  %13938 = vmatprep.mubr.msk.f32.mxu1 %vm3887_vm8, %v6078_v6  ;;  %v6474_v16 = vsel %vm3056_vm7, %v6471_v57, %v6473_v18  ;;  %v6081_v62 = vrot.slane %v16890_v61, 6  ;;  %v6083_v21 = vrot.slane %v16915_v17, 6  ;;  %v20469_v57 = vld [vmem:[#allocation31_spill] sm:$0xff] }
 0x2ef   : > { %v17606_v30 = vpop.f32.mrf.mxu1  ;;  %v13683_v58 = vpop.f32.mrf.mxu0  ;;  %13994 = vmatmul.mubr.msk.f32.gmra.mxu0 %vm3887_vm8, %v6472_v52  ;;  %v6475_v52 = vsel %vm3056_vm7, %v6473_v18, %v20469_v57 }
 0x2f0   : > { %20467 = vst [vmem:[#allocation19_spill] sm:$0xff] %v17606_v30  ;;  %13996 = vmatprep.mubr.msk.f32.mxu0 %vm3887_vm8, %v6474_v16  ;;  %v6082_v43 = vsel %vm2669_vm6, %v6079_v59, %v6081_v62 }
 0x2f1   : > { %v13628_v49 = vpop.f32.mrf.mxu1  ;;  %v17614_v46 = vpop.f32.mrf.mxu0  ;;  %13939 = vmatmul.mubr.msk.f32.gmra.mxu1 %vm3887_vm8, %v6080_v24 }
 0x2f2   : > { %20468 = vst [vmem:[#allocation20_spill] sm:$0xff] %v17614_v46  ;;  %v17618_v6 = vadd.f32 %v13680_v2, %v13628_v49  ;;  %13941 = vmatprep.mubr.msk.f32.mxu1 %vm3887_vm8, %v6082_v43  ;;  %v6084_v46 = vsel %vm2669_vm6, %v6081_v62, %v6083_v21  ;;  %v6086_v2 = vsel %vm2669_vm6, %v6083_v21, %v6085_v11  ;;  %v20471_v43 = vld [vmem:[#allocation27_spill] sm:$0xff] }
 0x2f3   : > { %v17623_v30 = vpop.f32.mrf.mxu1  ;;  %v13686_v16 = vpop.f32.mrf.mxu0  ;;  %13997 = vmatmul.mubr.msk.f32.gmra.mxu0 %vm3887_vm8, %v6475_v52  ;;  %v6087_v52 = vsel %vm2669_vm6, %v6085_v11, %v20471_v43 }
 0x2f4   : > { %20470 = vst [vmem:[#allocation21_spill] sm:$0xff] %v17623_v30 }
 0x2f5   : > { %v13631_v17 = vpop.f32.mrf.mxu1  ;;  %v17628_v24 = vpop.f32.mrf.mxu0  ;;  %13942 = vmatmul.mubr.msk.f32.gmra.mxu1 %vm3887_vm8, %v6084_v46 }
 0x2f6   : > { %v17632_v59 = vadd.f32 %v13683_v58, %v13631_v17  ;;  %13944 = vmatprep.mubr.msk.f32.mxu1 %vm3887_vm8, %v6086_v2 }
 0x2f7   : > { %v17635_v18 = vpop.f32.mrf.mxu1  ;;  %v13745_v49 = vpop.f32.mrf.mxu0 }
 0x2f9   : > { %v13634_v57 = vpop.f32.mrf.mxu1  ;;  %v17639_v30 = vpop.f32.mrf.mxu0  ;;  %13945 = vmatmul.mubr.msk.f32.gmra.mxu1 %vm3887_vm8, %v6087_v52 }
 0x2fa   : > { %v17642_v62 = vadd.f32 %v13686_v16, %v13634_v57  ;;  %14003 = vmatprep.mubr.msk.f32.mxu1 %vm3887_vm8, %v16527_v1 }
 0x2fb   : > { %v17646_v17 = vpop.f32.mrf.mxu1  ;;  %v13748_v58 = vpop.f32.mrf.mxu0 }
 0x2fd   : > { %v13693_v21 = vpop.f32.mrf.mxu1  ;;  %v17648_v46 = vpop.f32.mrf.mxu0  ;;  %14004 = vmatmul.mubr.msk.f32.vlgmr.msra.gmra.mxu1 %vm3887_vm8, %v16563_v39 }
 0x2fe   : > { %v4829_v11 = vadd.f32 %v13693_v21, %v17396_v53  ;;  %14006 = vmatprep.mubr.msk.f32.mxu1 %vm3887_vm8, %v16555_v38 }
 0x2ff   : > { %v4669_v2 = vpop.f32.mrf.mxu1  ;;  %v13751_v57 = vpop.f32.mrf.mxu0 }
 0x300   : > { %v17656_v16 = vadd.f32 %v4669_v2, %v17406_v29  ;;  %v17658_v1 = vadd.f32 %v13745_v49, %v4829_v11 }
 0x301   : > { %v13696_v52 = vpop.f32.mrf.mxu1  ;;  %v17660_v43 = vpop.f32.mrf.mxu0  ;;  %14007 = vmatmul.mubr.msk.f32.gmra.mxu1 %vm3887_vm8, %v16595_v51 }
 0x302   : > { %v4831_v39 = vadd.f32 %v13696_v52, %v17414_v28  ;;  %14009 = vmatprep.mubr.msk.f32.mxu1 %vm3887_vm8, %v16587_v55 }
 0x303   : > { %v4679_v53 = vpop.f32.mrf.mxu1  ;;  %v13754_v38 = vpop.f32.mrf.mxu0 }
 0x304   : > { %v17668_v21 = vadd.f32 %v4679_v53, %v17422_v26  ;;  %v17670_v29 = vadd.f32 %v13748_v58, %v4831_v39 }
 0x305   : > { %v13699_v49 = vpop.f32.mrf.mxu1  ;;  %v17672_v11 = vpop.f32.mrf.mxu0  ;;  %14010 = vmatmul.mubr.msk.f32.gmra.mxu1 %vm3887_vm8, %v16625_v45 }
 0x306   : > { %v4833_v51 = vadd.f32 %v13699_v49, %v17430_v20  ;;  %14012 = vmatprep.mubr.msk.f32.mxu1 %vm3887_vm8, %v16619_v34 }
 0x307   : > { %v4689_v28 = vpop.f32.mrf.mxu1  ;;  %v13757_v55 = vpop.f32.mrf.mxu0 }
 0x308   : > { %v17680_v2 = vadd.f32 %v4689_v28, %v17438_v8  ;;  %v17682_v26 = vadd.f32 %v13751_v57, %v4833_v51  ;;  %v7136_v57 = vld [vmem:[%s20164_s5 + $0x18] sm:$0x1] }
 0x309   : > { %v13702_v58 = vpop.f32.mrf.mxu1  ;;  %v17684_v52 = vpop.f32.mrf.mxu0  ;;  %14013 = vmatmul.mubr.msk.f32.gmra.mxu1 %vm3887_vm8, %v16661_v50  ;;  %14051 = vmatprep.subr.msk.mxu0 %vm3056_vm7, %v7136_v57 }
 0x30a   : > { %v4835_v45 = vadd.f32 %v13702_v58, %v17446_v27  ;;  %14015 = vmatprep.mubr.msk.f32.mxu1 %vm3887_vm8, %v16655_v37  ;;  %14052 = vmatpush3.msk.msra.mxu0 %vm3056_vm7, %v7136_v57 }
 0x30b   : > { %v4699_v20 = vpop.f32.mrf.mxu1  ;;  %v13760_v34 = vpop.f32.mrf.mxu0 }
 0x30c   : > { %v17692_v39 = vadd.f32 %v4699_v20, %v17454_v56  ;;  %v17694_v8 = vadd.f32 %v13754_v38, %v4835_v45 }
 0x30d   : > { %v13705_v53 = vpop.f32.mrf.mxu1  ;;  %v17699_v49 = vpop.f32.mrf.mxu0  ;;  %14016 = vmatmul.mubr.msk.f32.gmra.mxu1 %vm3887_vm8, %v16688_v47 }
 0x30e   : > { %v4837_v37 = vadd.f32 %v13705_v53, %v17462_v22  ;;  %14018 = vmatprep.mubr.msk.f32.mxu1 %vm3887_vm8, %v16684_v14 }
 0x30f   : > { %v4709_v50 = vpop.f32.mrf.mxu1  ;;  %v13763_v27 = vpop.f32.mrf.mxu0 }
 0x310   : > { %v17709_v56 = vadd.f32 %v4709_v50, %v17470_v36  ;;  %v17711_v38 = vadd.f32 %v13757_v55, %v4837_v37 }
 0x311   : > { %v13708_v51 = vpop.f32.mrf.mxu1  ;;  %v17713_v28 = vpop.f32.mrf.mxu0  ;;  %14019 = vmatmul.mubr.msk.f32.gmra.mxu1 %vm3887_vm8, %v16717_v19 }
 0x312   : > { %v4839_v47 = vadd.f32 %v13708_v51, %v17478_v33  ;;  %14021 = vmatprep.mubr.msk.f32.mxu1 %vm3887_vm8, %v16713_v42 }
 0x313   : > { %v4719_v14 = vpop.f32.mrf.mxu1  ;;  %v13766_v22 = vpop.f32.mrf.mxu0 }
 0x314   : > { %v17721_v58 = vadd.f32 %v4719_v14, %v17486_v41  ;;  %v17723_v36 = vadd.f32 %v13760_v34, %v4839_v47 }
 0x315   : > { %v13711_v55 = vpop.f32.mrf.mxu1  ;;  %v17725_v45 = vpop.f32.mrf.mxu0  ;;  %14022 = vmatmul.mubr.msk.f32.gmra.mxu1 %vm3887_vm8, %v16743_v35 }
 0x316   : > { %v4841_v19 = vadd.f32 %v13711_v55, %v17494_v3  ;;  %14024 = vmatprep.mubr.msk.f32.mxu1 %vm3887_vm8, %v16739_v5  ;;  %v20472_v55 = vld [vmem:[#allocation23_spill] sm:$0xff] }
 0x317   : > { %v4729_v33 = vpop.f32.mrf.mxu1  ;;  %v13769_v42 = vpop.f32.mrf.mxu0 }
 0x318   : > { %v17733_v20 = vadd.f32 %v4729_v33, %v17502_v40  ;;  %v17735_v41 = vadd.f32 %v13763_v27, %v4841_v19 }
 0x319   : > { %v13714_v34 = vpop.f32.mrf.mxu1  ;;  %v17737_v57 = vpop.f32.mrf.mxu0  ;;  %14025 = vmatmul.mubr.msk.f32.gmra.mxu1 %vm3887_vm8, %v16769_v12 }
 0x31a   : > { %v4843_v35 = vadd.f32 %v13714_v34, %v17512_v7  ;;  %14027 = vmatprep.mubr.msk.f32.mxu1 %vm3887_vm8, %v16765_v10  ;;  %v20474_v34 = vld [vmem:[#allocation26_spill] sm:$0xff] }
 0x31b   : > { %v4739_v3 = vpop.f32.mrf.mxu1  ;;  %v13772_v5 = vpop.f32.mrf.mxu0 }
 0x31c   : > { %v17745_v53 = vadd.f32 %v4739_v3, %v17520_v4  ;;  %v17747_v40 = vadd.f32 %v13766_v22, %v4843_v35 }
 0x31d   : > { %v13717_v37 = vpop.f32.mrf.mxu1  ;;  %v17749_v50 = vpop.f32.mrf.mxu0  ;;  %14028 = vmatmul.mubr.msk.f32.gmra.mxu1 %vm3887_vm8, %v16795_v60 }
 0x31e   : > { %v4845_v12 = vadd.f32 %v13717_v37, %v17530_v63  ;;  %14030 = vmatprep.mubr.msk.f32.mxu1 %vm3887_vm8, %v16791_v0 }
 0x31f   : > { %v17756_v7 = vpop.f32.mrf.mxu1  ;;  %v13775_v10 = vpop.f32.mrf.mxu0 }
 0x320   : > { %v17758_v27 = vadd.f32 %v13769_v42, %v4845_v12 }
 0x321   : > { %v13720_v4 = vpop.f32.mrf.mxu1  ;;  %v17760_v51 = vpop.f32.mrf.mxu0  ;;  %14031 = vmatmul.mubr.msk.f32.gmra.mxu1 %vm3887_vm8, %v16819_v31 }
 0x322   : > { %v4847_v47 = vadd.f32 %v13720_v4, %v17548_v44  ;;  %14033 = vmatprep.mubr.msk.f32.mxu1 %vm3887_vm8, %v16815_v15 }
 0x323   : > { %v17767_v60 = vpop.f32.mrf.mxu1  ;;  %v13778_v63 = vpop.f32.mrf.mxu0 }
 0x324   : > { %v17769_v0 = vadd.f32 %v13772_v5, %v4847_v47  ;;  %v7135_v5 = vld [vmem:[%s20164_s5 + $0x10] sm:$0xff] }
 0x325   : > { %v13723_v14 = vpop.f32.mrf.mxu1  ;;  %v17771_v22 = vpop.f32.mrf.mxu0  ;;  %14034 = vmatmul.mubr.msk.f32.gmra.mxu1 %vm3887_vm8, %v20472_v55  ;;  %14053 = vmatprep.subr.mxu0 %v7135_v5  ;;  %v20478_v55 = vld [vmem:[#allocation29_spill] sm:$0xff] }
 0x326   : > { %v4849_v19 = vadd.f32 %v13723_v14, %v17566_v32  ;;  %14036 = vmatprep.mubr.msk.f32.mxu1 %vm3887_vm8, %v16839_v25  ;;  %14054 = vmatpush3.msra.mxu0 %v7135_v5 }
 0x327   : > { %v17778_v31 = vpop.f32.mrf.mxu1  ;;  %v13781_v44 = vpop.f32.mrf.mxu0 }
 0x328   : > { %v17780_v15 = vadd.f32 %v13775_v10, %v4849_v19  ;;  %v20476_v10 = vld [vmem:[#allocation24_spill] sm:$0xff] }
 0x329   : > { %v13726_v33 = vpop.f32.mrf.mxu1  ;;  %v17782_v42 = vpop.f32.mrf.mxu0  ;;  %14037 = vmatmul.mubr.msk.f32.gmra.mxu1 %vm3887_vm8, %v20474_v34 }
 0x32a   : > { %20473 = vst [vmem:[#allocation47_spill] sm:$0xff] %v17782_v42  ;;  %v4851_v35 = vadd.f32 %v13726_v33, %v17584_v9  ;;  %14039 = vmatprep.mubr.msk.f32.mxu1 %vm3887_vm8, %v16860_v13 }
 0x32b   : > { %v17789_v32 = vpop.f32.mrf.mxu1  ;;  %v13784_v3 = vpop.f32.mrf.mxu0 }
 0x32c   : > { %v17791_v25 = vadd.f32 %v13778_v63, %v4851_v35 }
 0x32d   : > { %v13729_v37 = vpop.f32.mrf.mxu1  ;;  %v17796_v12 = vpop.f32.mrf.mxu0  ;;  %14040 = vmatmul.mubr.msk.f32.gmra.mxu1 %vm3887_vm8, %v20476_v10 }
 0x32e   : > { %20475 = vst [vmem:[#allocation41_spill] sm:$0xff] %v17796_v12  ;;  %v4853_v9 = vadd.f32 %v13729_v37, %v17602_v23  ;;  %14042 = vmatprep.mubr.msk.f32.mxu1 %vm3887_vm8, %v16879_v54 }
 0x32f   : > { %v17803_v13 = vpop.f32.mrf.mxu1  ;;  %v13787_v4 = vpop.f32.mrf.mxu0 }
 0x330   : > { %v17805_v47 = vadd.f32 %v13781_v44, %v4853_v9  ;;  %v20480_v44 = vld [vmem:[#allocation25_spill] sm:$0xff]  ;;  %v20481_v9 = vmov 0.0  }
 0x331   : > { %v13732_v63 = vpop.f32.mrf.mxu1  ;;  %v17807_v14 = vpop.f32.mrf.mxu0  ;;  %14043 = vmatmul.mubr.msk.f32.gmra.mxu1 %vm3887_vm8, %v20478_v55 }
 0x332   : > { %20477 = vst [vmem:[#allocation71_spill] sm:$0xff] %v17807_v14  ;;  %v4855_v19 = vadd.f32 %v13732_v63, %v17618_v6  ;;  %14045 = vmatprep.mubr.msk.f32.mxu1 %vm3887_vm8, %v16890_v61 }
 0x333   : > { %v17814_v23 = vpop.f32.mrf.mxu1  ;;  %v13790_v54 = vpop.f32.mrf.mxu0 }
 0x334   : > { %v17816_v33 = vadd.f32 %v13784_v3, %v4855_v19 }
 0x335   : > { %v13735_v34 = vpop.f32.mrf.mxu1  ;;  %v17818_v35 = vpop.f32.mrf.mxu0  ;;  %14046 = vmatmul.mubr.msk.f32.gmra.mxu1 %vm3887_vm8, %v20480_v44 }
 0x336   : > { %20479 = vst [vmem:[#allocation69_spill] sm:$0xff] %v17818_v35  ;;  %v4857_v5 = vadd.f32 %v13735_v34, %v17632_v59  ;;  %14048 = vmatprep.mubr.msk.f32.mxu1 %vm3887_vm8, %v16906_v48 }
 0x337   : > { %v17825_v6 = vpop.f32.mrf.mxu1  ;;  %v17827_v37 = vpop.f32.mrf.mxu0 }
 0x338   : > { %v17829_v61 = vadd.f32 %v13787_v4, %v4857_v5 }
 0x339   : > { %v13738_v10 = vpop.f32.mrf.mxu1  ;;  %v17831_v3 = vpop.f32.mrf.mxu0  ;;  %14049 = vmatmul.mubr.f32.gmra.mxu1 %v20481_v9 }
 0x33a   : > { %v4859_v63 = vadd.f32 %v13738_v10, %v17642_v62 }
 0x33b   : > { %v17835_v55 = vpop.f32.mrf.mxu1  ;;  %v17837_v19 = vpop.f32.mrf.mxu0 }
 0x33c   : > { %v17839_v59 = vadd.f32 %v13790_v54, %v4859_v63 }
 0x33d   : > { %v13797_v48 = vpop.f32.mrf.mxu1  ;;  %v17841_v34 = vpop.f32.mrf.mxu0 }
 0x33e   : > { %20482 = vst [vmem:[#allocation78_spill] sm:$0xff] %v17841_v34  ;;  %v17844_v44 = vadd.f32 %v13797_v48, %v17658_v1 }
 0x33f   : > { %v17846_v4 = vpop.f32.mrf.mxu1  ;;  %v17848_v5 = vpop.f32.mrf.mxu0 }
 0x340   : > { %20483 = vst [vmem:[#allocation66_spill] sm:$0xff] %v17848_v5 }
 0x341   : > { %v13800_v35 = vpop.f32.mrf.mxu1  ;;  %v17850_v9 = vpop.f32.mrf.mxu0 }
 0x342   : > { %20484 = vst [vmem:[#allocation22_spill] sm:$0xff] %v17850_v9  ;;  %v17853_v62 = vadd.f32 %v13800_v35, %v17670_v29  ;;  %v7134_v9 = vld [vmem:[%s20164_s5 + $0x8] sm:$0x1] }
 0x343   : > { %v17855_v10 = vpop.f32.mrf.mxu1  ;;  %v17857_v54 = vpop.f32.mrf.mxu0  ;;  %14103 = vmatprep.subr.msk.mxu1 %vm3056_vm7, %v7134_v9 }
 0x344   : > { %20485 = vst [vmem:[#allocation43_spill] sm:$0xff] %v17857_v54  ;;  %14104 = vmatpush3.msk.msra.mxu1 %vm3056_vm7, %v7134_v9  ;;  %v17897_v9 = vld [vmem:[%s20164_s5 + $0x28] sm:$0x1] }
 0x345   : > { %v13803_v63 = vpop.f32.mrf.mxu1  ;;  %v17859_v14 = vpop.f32.mrf.mxu0  ;;  %20495 = vst [vmem:[#allocation86_spill] sm:$0xff] %v17897_v9  ;;  %14155 = vmatprep.subr.msk.mxu0 %vm3056_vm7, %v17897_v9 }
 0x346   : > { %20486 = vst [vmem:[#allocation49_spill] sm:$0xff] %v17859_v14  ;;  %v17862_v1 = vadd.f32 %v13803_v63, %v17682_v26  ;;  %v7133_v26 = vld [vmem:[%s20164_s5] sm:$0xff] }
 0x347   : > { %v17864_v48 = vpop.f32.mrf.mxu1  ;;  %v17866_v34 = vpop.f32.mrf.mxu0  ;;  %14105 = vmatprep.subr.mxu1 %v7133_v26 }
 0x348   : > { %20487 = vst [vmem:[#allocation73_spill] sm:$0xff] %v17862_v1  ;;  %20488 = vst [vmem:[#allocation72_spill] sm:$0xff] %v17866_v34  ;;  %14106 = vmatpush3.msra.mxu1 %v7133_v26 }
 0x349   : > { %v13806_v29 = vpop.f32.mrf.mxu1  ;;  %v17871_v35 = vpop.f32.mrf.mxu0 }
 0x34a   : > { %20489 = vst [vmem:[#allocation81_spill] sm:$0xff] %v17871_v35  ;;  %v17875_v54 = vadd.f32 %v13806_v29, %v17694_v8 }
 0x34b   : > { %v17881_v63 = vpop.f32.mrf.mxu1  ;;  %v17883_v34 = vpop.f32.mrf.mxu0 }
 0x34c   : > { %20490 = vst [vmem:[#allocation44_spill] sm:$0xff] %v17875_v54  ;;  %20491 = vst [vmem:[#allocation51_spill] sm:$0xff] %v17883_v34 }
 0x34d   : > { %v13809_v14 = vpop.f32.mrf.mxu1  ;;  %v17885_v5 = vpop.f32.mrf.mxu0 }
 0x34e   : > { %20492 = vst [vmem:[#allocation84_spill] sm:$0xff] %v17885_v5  ;;  %v17888_v35 = vadd.f32 %v13809_v14, %v17711_v38 }
 0x34f   : > { %v17890_v8 = vpop.f32.mrf.mxu1  ;;  %v17892_v29 = vpop.f32.mrf.mxu0 }
 0x350   : > { %20493 = vst [vmem:[#allocation75_spill] sm:$0xff] %v17888_v35  ;;  %20494 = vst [vmem:[#allocation74_spill] sm:$0xff] %v17892_v29 }
 0x351   : > { %v13812_v54 = vpop.f32.mrf.mxu1  ;;  %v17899_v1 = vpop.f32.mrf.mxu0 }
 0x352   : > { %20496 = vst [vmem:[#allocation42_spill] sm:$0xff] %v17899_v1  ;;  %v17904_v26 = vadd.f32 %v13812_v54, %v17723_v36 }
 0x353   : > { %v17906_v38 = vpop.f32.mrf.mxu1  ;;  %v17908_v14 = vpop.f32.mrf.mxu0 }
 0x354   : > { %20497 = vst [vmem:[#allocation32_spill] sm:$0xff] %v17904_v26  ;;  %20498 = vst [vmem:[#allocation46_spill] sm:$0xff] %v17906_v38  ;;  %v20586_v38 = vld [vmem:[#allocation67_spill] sm:$0xff] }
 0x355   : > { %20499 = vst [vmem:[#allocation53_spill] sm:$0xff] %v17908_v14  ;;  %v13815_v5 = vpop.f32.mrf.mxu1  ;;  %v17910_v29 = vpop.f32.mrf.mxu0 }
 0x356   : > { %20500 = vst [vmem:[#allocation88_spill] sm:$0xff] %v17910_v29  ;;  %v17913_v34 = vadd.f32 %v13815_v5, %v17735_v41 }
 0x357   : > { %v17915_v35 = vpop.f32.mrf.mxu1  ;;  %v17917_v12 = vpop.f32.mrf.mxu0 }
 0x358   : > { %20501 = vst [vmem:[#allocation77_spill] sm:$0xff] %v17913_v34  ;;  %20502 = vst [vmem:[#allocation76_spill] sm:$0xff] %v17915_v35  ;;  %v20582_v35 = vld [vmem:[#allocation45_spill] sm:$0xff] }
 0x359   : > { %20503 = vst [vmem:[#allocation33_spill] sm:$0xff] %v17917_v12  ;;  %v13818_v1 = vpop.f32.mrf.mxu1  ;;  %v17919_v42 = vpop.f32.mrf.mxu0 }
 0x35a   : > { %20504 = vst [vmem:[#allocation48_spill] sm:$0xff] %v17919_v42  ;;  %v17922_v36 = vadd.f32 %v13818_v1, %v17747_v40 }
 0x35b   : > { %v17924_v54 = vpop.f32.mrf.mxu1  ;;  %v17926_v9 = vpop.f32.mrf.mxu0 }
 0x35c   : > { %20505 = vst [vmem:[#allocation55_spill] sm:$0xff] %v17922_v36  ;;  %20506 = vst [vmem:[#allocation80_spill] sm:$0xff] %v17924_v54  ;;  %v20578_v54 = vld [vmem:[#allocation30_spill] sm:$0xff] }
 0x35d   : > { %20507 = vst [vmem:[#allocation79_spill] sm:$0xff] %v17926_v9  ;;  %v13821_v14 = vpop.f32.mrf.mxu1  ;;  %v17928_v26 = vpop.f32.mrf.mxu0 }
 0x35e   : > { %20508 = vst [vmem:[#allocation34_spill] sm:$0xff] %v17928_v26  ;;  %v17931_v41 = vadd.f32 %v13821_v14, %v17758_v27 }
 0x35f   : > { %v17933_v5 = vpop.f32.mrf.mxu1  ;;  %v17935_v29 = vpop.f32.mrf.mxu0 }
 0x360   : > { %20509 = vst [vmem:[#allocation50_spill] sm:$0xff] %v17931_v41  ;;  %20510 = vst [vmem:[#allocation57_spill] sm:$0xff] %v17933_v5 }
 0x361   : > { %20511 = vst [vmem:[#allocation83_spill] sm:$0xff] %v17935_v29  ;;  %v13824_v12 = vpop.f32.mrf.mxu1  ;;  %v17937_v34 = vpop.f32.mrf.mxu0 }
 0x362   : > { %20512 = vst [vmem:[#allocation82_spill] sm:$0xff] %v17937_v34  ;;  %v17940_v40 = vadd.f32 %v13824_v12, %v17769_v0 }
 0x363   : > { %v17942_v1 = vpop.f32.mrf.mxu1  ;;  %v17944_v42 = vpop.f32.mrf.mxu0 }
 0x364   : > { %20513 = vst [vmem:[#allocation35_spill] sm:$0xff] %v17940_v40  ;;  %20514 = vst [vmem:[#allocation52_spill] sm:$0xff] %v17942_v1 }
 0x365   : > { %20515 = vst [vmem:[#allocation59_spill] sm:$0xff] %v17944_v42  ;;  %v13827_v9 = vpop.f32.mrf.mxu1  ;;  %v17946_v36 = vpop.f32.mrf.mxu0 }
 0x366   : > { %20516 = vst [vmem:[#allocation87_spill] sm:$0xff] %v17946_v36  ;;  %v17949_v27 = vadd.f32 %v13827_v9, %v17780_v15 }
 0x367   : > { %v17951_v14 = vpop.f32.mrf.mxu1  ;;  %v17953_v26 = vpop.f32.mrf.mxu0 }
 0x368   : > { %20517 = vst [vmem:[#allocation85_spill] sm:$0xff] %v17949_v27  ;;  %20518 = vst [vmem:[#allocation36_spill] sm:$0xff] %v17951_v14 }
 0x369   : > { %20519 = vst [vmem:[#allocation54_spill] sm:$0xff] %v17953_v26  ;;  %v13830_v29 = vpop.f32.mrf.mxu1  ;;  %v17955_v41 = vpop.f32.mrf.mxu0 }
 0x36a   : > { %20520 = vst [vmem:[#allocation61_spill] sm:$0xff] %v17955_v41  ;;  %v17958_v0 = vadd.f32 %v13830_v29, %v17791_v25 }
 0x36b   : > { %v17960_v12 = vpop.f32.mrf.mxu1  ;;  %v17962_v34 = vpop.f32.mrf.mxu0 }
 0x36c   : > { %20521 = vst [vmem:[#allocation90_spill] sm:$0xff] %v17958_v0  ;;  %20522 = vst [vmem:[#allocation89_spill] sm:$0xff] %v17960_v12 }
 0x36d   : > { %20523 = vst [vmem:[#allocation37_spill] sm:$0xff] %v17962_v34  ;;  %v13833_v42 = vpop.f32.mrf.mxu1  ;;  %v17964_v40 = vpop.f32.mrf.mxu0 }
 0x36e   : > { %20524 = vst [vmem:[#allocation56_spill] sm:$0xff] %v17964_v40  ;;  %v17967_v15 = vadd.f32 %v13833_v42, %v17805_v47 }
 0x36f   : > { %v17969_v9 = vpop.f32.mrf.mxu1  ;;  %v17971_v36 = vpop.f32.mrf.mxu0 }
 0x370   : > { %20525 = vst [vmem:[#allocation63_spill] sm:$0xff] %v17967_v15  ;;  %20526 = vst [vmem:[#allocation92_spill] sm:$0xff] %v17969_v9 }
 0x371   : > { %20527 = vst [vmem:[#allocation91_spill] sm:$0xff] %v17971_v36  ;;  %v13836_v26 = vpop.f32.mrf.mxu1  ;;  %v17973_v27 = vpop.f32.mrf.mxu0 }
 0x372   : > { %20528 = vst [vmem:[#allocation38_spill] sm:$0xff] %v17973_v27  ;;  %v17976_v25 = vadd.f32 %v13836_v26, %v17816_v33 }
 0x373   : > { %v17978_v29 = vpop.f32.mrf.mxu1  ;;  %v17980_v41 = vpop.f32.mrf.mxu0 }
 0x374   : > { %20529 = vst [vmem:[#allocation58_spill] sm:$0xff] %v17976_v25  ;;  %20530 = vst [vmem:[#allocation64_spill] sm:$0xff] %v17978_v29 }
 0x375   : > { %20531 = vst [vmem:[#allocation94_spill] sm:$0xff] %v17980_v41  ;;  %v13839_v34 = vpop.f32.mrf.mxu1  ;;  %v17987_v47 = vpop.f32.mrf.mxu0 }
 0x376   : > { %v17983_v40 = vadd.f32 %v13839_v34, %v17829_v61  ;;  %20534 = vst [vmem:[#allocation60_spill] sm:$0xff] %v17987_v47 }
 0x377   : > { %v17985_v42 = vpop.f32.mrf.mxu1  ;;  %v17994_v33 = vpop.f32.mrf.mxu0 }
 0x378   : > { %20532 = vst [vmem:[#allocation93_spill] sm:$0xff] %v17983_v40  ;;  %20533 = vst [vmem:[#allocation39_spill] sm:$0xff] %v17985_v42 }
 0x379   : > { %v13842_v15 = vpop.f32.mrf.mxu1  ;;  %v18000_v41 = vpop.f32.mrf.mxu0 }
 0x37a   : > { %v17990_v36 = vadd.f32 %v13842_v15, %v17839_v59  ;;  %20537 = vst [vmem:[#allocation95_spill] sm:$0xff] %v18000_v41  ;;  %v18011_v59 = vld [vmem:[%s20164_s5 + $0x38] sm:$0x1]  ;;  %v20584_v41 = vld [vmem:[#allocation18_spill] sm:$0xff] }
 0x37b   : > { %v17992_v27 = vpop.f32.mrf.mxu1  ;;  %v18006_v40 = vpop.f32.mrf.mxu0  ;;  %20540 = vst [vmem:[#allocation70_spill] sm:$0xff] %v18011_v59  ;;  %14207 = vmatprep.subr.msk.mxu1 %vm3056_vm7, %v18011_v59 }
 0x37c   : > { %20535 = vst [vmem:[#allocation65_spill] sm:$0xff] %v17990_v36  ;;  %20536 = vst [vmem:[#allocation96_spill] sm:$0xff] %v17992_v27 }
 0x37d   : > { %v17996_v26 = vpop.f32.mrf.mxu1  ;;  %20539 = vst [vmem:[#allocation68_spill] sm:$0xff] %v18006_v40  ;;  %v18019_v36 = vpop.f32.mrf.mxu0  ;;  %v20579_v40 = vld [vmem:[#allocation16_spill] sm:$0xff] }
 0x37e   : > { %20543 = vst [vmem:[#allocation24_spill] sm:$0xff] %v18019_v36 }
 0x37f   : > { %v17998_v25 = vpop.f32.mrf.mxu1  ;;  %v18025_v29 = vpop.f32.mrf.mxu0 }
 0x380   : > { %20546 = vst [vmem:[#allocation97_spill] sm:$0xff] %v18025_v29 }
 0x381   : > { %v18002_v61 = vpop.f32.mrf.mxu1  ;;  %v18031_v12 = vpop.f32.mrf.mxu0 }
 0x382   : > { %20549 = vst [vmem:[#allocation100_spill] sm:$0xff] %v18031_v12 }
 0x383   : > { %v18004_v34 = vpop.f32.mrf.mxu1  ;;  %v18037_v59 = vpop.f32.mrf.mxu0 }
 0x384   : > { %20538 = vst [vmem:[#allocation62_spill] sm:$0xff] %v18004_v34  ;;  %20552 = vst [vmem:[#allocation103_spill] sm:$0xff] %v18037_v59  ;;  %v20585_v34 = vld [vmem:[#allocation21_spill] sm:$0xff] }
 0x385   : > { %v18013_v15 = vpop.f32.mrf.mxu1 }
 0x386   : > { %20541 = vst [vmem:[#allocation23_spill] sm:$0xff] %v18013_v15 }
 0x387   : > { %v18017_v47 = vpop.f32.mrf.mxu1 }
 0x388   : > { %20542 = vst [vmem:[#allocation26_spill] sm:$0xff] %v18017_v47 }
 0x389   : > { %v18021_v27 = vpop.f32.mrf.mxu1 }
 0x38a   : > { %20544 = vst [vmem:[#allocation29_spill] sm:$0xff] %v18021_v27  ;;  %v18043_v27 = vpop.f32.mrf.mxu0 }
 0x38b   : > { %v18023_v42 = vpop.f32.mrf.mxu1  ;;  %20555 = vst [vmem:[#allocation106_spill] sm:$0xff] %v18043_v27 }
 0x38c   : > { %20545 = vst [vmem:[#allocation25_spill] sm:$0xff] %v18023_v42 }
 0x38d   : > { %v18027_v9 = vpop.f32.mrf.mxu1 }
 0x38e   : > { %20547 = vst [vmem:[#allocation98_spill] sm:$0xff] %v18027_v9  ;;  %v18049_v9 = vpop.f32.mrf.mxu0 }
 0x38f   : > { %v18029_v0 = vpop.f32.mrf.mxu1  ;;  %20558 = vst [vmem:[#allocation109_spill] sm:$0xff] %v18049_v9 }
 0x390   : > { %20548 = vst [vmem:[#allocation99_spill] sm:$0xff] %v18029_v0 }
 0x391   : > { %v18033_v14 = vpop.f32.mrf.mxu1 }
 0x392   : > { %20550 = vst [vmem:[#allocation101_spill] sm:$0xff] %v18033_v14  ;;  %v18055_v14 = vpop.f32.mrf.mxu0 }
 0x393   : > { %v18035_v1 = vpop.f32.mrf.mxu1  ;;  %20561 = vst [vmem:[#allocation112_spill] sm:$0xff] %v18055_v14 }
 0x394   : > { %20551 = vst [vmem:[#allocation102_spill] sm:$0xff] %v18035_v1 }
 0x395   : > { %v18039_v5 = vpop.f32.mrf.mxu1 }
 0x396   : > { %20553 = vst [vmem:[#allocation104_spill] sm:$0xff] %v18039_v5  ;;  %v18061_v5 = vpop.f32.mrf.mxu0 }
 0x397   : > { %v18041_v36 = vpop.f32.mrf.mxu1  ;;  %20564 = vst [vmem:[#allocation115_spill] sm:$0xff] %v18061_v5  ;;  %v20575_v5 = vld [vmem:[#allocation28_spill] sm:$0xff] }
 0x398   : > { %20554 = vst [vmem:[#allocation105_spill] sm:$0xff] %v18041_v36 }
 0x399   : > { %v18045_v42 = vpop.f32.mrf.mxu1 }
 0x39a   : > { %20556 = vst [vmem:[#allocation107_spill] sm:$0xff] %v18045_v42  ;;  %v18067_v42 = vpop.f32.mrf.mxu0 }
 0x39b   : > { %v18047_v29 = vpop.f32.mrf.mxu1  ;;  %20567 = vst [vmem:[#allocation118_spill] sm:$0xff] %v18067_v42 }
 0x39c   : > { %20557 = vst [vmem:[#allocation108_spill] sm:$0xff] %v18047_v29 }
 0x39d   : > { %v18051_v0 = vpop.f32.mrf.mxu1 }
 0x39e   : > { %20559 = vst [vmem:[#allocation110_spill] sm:$0xff] %v18051_v0  ;;  %v18073_v0 = vpop.f32.mrf.mxu0 }
 0x39f   : > { %v18053_v12 = vpop.f32.mrf.mxu1  ;;  %20570 = vst [vmem:[#allocation121_spill] sm:$0xff] %v18073_v0 }
 0x3a0   : > { %20560 = vst [vmem:[#allocation111_spill] sm:$0xff] %v18053_v12 }
 0x3a1   : > { %v18057_v1 = vpop.f32.mrf.mxu1 }
 0x3a2   : > { %20562 = vst [vmem:[#allocation113_spill] sm:$0xff] %v18057_v1  ;;  %v18079_v1 = vpop.f32.mrf.mxu0 }
 0x3a3   : > { %v18059_v59 = vpop.f32.mrf.mxu1  ;;  %20573 = vst [vmem:[#allocation124_spill] sm:$0xff] %v18079_v1 }
 0x3a4   : > { %20563 = vst [vmem:[#allocation114_spill] sm:$0xff] %v18059_v59  ;;  %v20574_v59 = vld [vmem:[#allocation14_spill] sm:$0xff] }
 0x3a5   : > { %v18063_v36 = vpop.f32.mrf.mxu1  ;;  %v4394_v47 = vadd.f32 %v20575_v5, %v20574_v59  ;;  %v4444_v5 = vadd.f32 %v20586_v38, %v20585_v34  ;;  %v20587_v59 = vld [vmem:[#allocation20_spill] sm:$0xff]  ;;  %v18110_v38 = vpop.f32.mrf.mxu0  ;;  %v20598_v34 = vld [vmem:[#allocation43_spill] sm:$0xff] }
 0x3a6   : > { %20565 = vst [vmem:[#allocation116_spill] sm:$0xff] %v18063_v36 }
 0x3a7   : > { %v18065_v27 = vpop.f32.mrf.mxu1 }
 0x3a8   : > { %20566 = vst [vmem:[#allocation117_spill] sm:$0xff] %v18065_v27  ;;  %v20577_v27 = vld [vmem:[#allocation17_spill] sm:$0xff] }
 0x3a9   : > { %v18069_v29 = vpop.f32.mrf.mxu1  ;;  %v4404_v42 = vadd.f32 %v20578_v54, %v20577_v27  ;;  %v4464_v54 = vadd.f32 %v17628_v24, %v17646_v17  ;;  %v5224_v17 = vadd.f32 %v17684_v52, %v17709_v56  ;;  %v5230_v52 = vadd.f32 %v17725_v45, %v17745_v53 }
 0x3aa   : > { %20568 = vst [vmem:[#allocation119_spill] sm:$0xff] %v18069_v29  ;;  %v20580_v29 = vld [vmem:[#allocation15_spill] sm:$0xff] }
 0x3ab   : > { %v18071_v9 = vpop.f32.mrf.mxu1  ;;  %v4414_v15 = vadd.f32 %v20580_v29, %v20579_v40 }
 0x3ac   : > { %20569 = vst [vmem:[#allocation120_spill] sm:$0xff] %v18071_v9  ;;  %v20581_v9 = vld [vmem:[#allocation40_spill] sm:$0xff] }
 0x3ad   : > { %v18075_v12 = vpop.f32.mrf.mxu1  ;;  %v4424_v0 = vadd.f32 %v20582_v35, %v20581_v9  ;;  %v5218_v35 = vadd.f32 %v17648_v46, %v17668_v21  ;;  %v4848_v24 = vadd.f32 %v17778_v31, %v4414_v15  ;;  %v5228_v21 = vadd.f32 %v17713_v28, %v17733_v20  ;;  %v18137_v20 = vpop.f32.mrf.mxu0  ;;  %v20594_v9 = vld [vmem:[#allocation73_spill] sm:$0xff] }
 0x3ae   : > { %20571 = vst [vmem:[#allocation122_spill] sm:$0xff] %v18075_v12  ;;  %v5216_v12 = vadd.f32 %v17639_v30, %v17656_v16  ;;  %v5220_v30 = vadd.f32 %v17660_v43, %v17680_v2  ;;  %v5222_v16 = vadd.f32 %v17672_v11, %v17692_v39  ;;  %v5226_v43 = vadd.f32 %v17699_v49, %v17721_v58 }
 0x3af   : > { %v18077_v14 = vpop.f32.mrf.mxu1  ;;  %v4850_v46 = vadd.f32 %v17789_v32, %v4424_v0  ;;  %v5993_v11 = vadd.f32 %v17827_v37, %v17844_v44  ;;  %v4854_v39 = vadd.f32 %v17814_v23, %v4444_v5  ;;  %v5606_v49 = vadd.f32 %v17855_v10, %v5218_v35  ;;  %v20589_v44 = vld [vmem:[#allocation41_spill] sm:$0xff]  ;;  %v20590_v10 = vld [vmem:[#allocation71_spill] sm:$0xff]  ;;  %v20593_v0 = vld [vmem:[#allocation46_spill] sm:$0xff] }
 0x3b0   : > { %20572 = vst [vmem:[#allocation123_spill] sm:$0xff] %v18077_v14  ;;  %v20583_v14 = vld [vmem:[#allocation19_spill] sm:$0xff]  ;;  %v5604_v40 = vadd.f32 %v17846_v4, %v5216_v12  ;;  %v5608_v31 = vadd.f32 %v17864_v48, %v5220_v30  ;;  %v18145_v45 = vadd.f32 %v17760_v51, %v4848_v24  ;;  %v5610_v23 = vadd.f32 %v17881_v63, %v5222_v16 }
 0x3b1   : > { %v18083_v36 = vpop.f32.mrf.mxu1  ;;  %v4434_v1 = vadd.f32 %v20584_v41, %v20583_v14  ;;  %v4846_v41 = vadd.f32 %v17767_v60, %v4404_v42  ;;  %v4858_v60 = vadd.f32 %v17835_v55, %v4464_v54  ;;  %v6381_v28 = vadd.f32 %v17996_v26, %v5993_v11  ;;  %v20588_v55 = vld [vmem:[#allocation47_spill] sm:$0xff]  ;;  %v20592_v14 = vld [vmem:[#allocation78_spill] sm:$0xff]  ;;  %v20597_v26 = vld [vmem:[#allocation44_spill] sm:$0xff] }
 0x3b2   : > { %20576 = vst [vmem:[#allocation14_spill] sm:$0xff] %v18083_v36  ;;  %v4454_v36 = vadd.f32 %v20587_v59, %v17635_v18  ;;  %v4844_v18 = vadd.f32 %v17756_v7, %v4394_v47  ;;  %v5992_v58 = vadd.f32 %v17831_v3, %v5604_v40  ;;  %v5995_v3 = vadd.f32 %v17837_v19, %v17853_v62  ;;  %v18173_v62 = vpop.f32.mrf.mxu0  ;;  %v20596_v42 = vld [vmem:[#allocation22_spill] sm:$0xff]  ;;  %v20600_v40 = vld [vmem:[#allocation49_spill] sm:$0xff]  ;;  %v20601_v30 = vld [vmem:[#allocation95_spill] sm:$0xff] }
 0x3b3   : > { %v18101_v27 = vpop.f32.mrf.mxu1  ;;  %v4852_v2 = vadd.f32 %v17803_v13, %v4434_v1  ;;  %v18142_v13 = vadd.f32 %v17749_v50, %v4846_v41  ;;  %v18161_v51 = vadd.f32 %v20589_v44, %v4854_v39  ;;  %v5994_v19 = vadd.f32 %v20592_v14, %v5606_v49  ;;  %v20599_v59 = vld [vmem:[#allocation62_spill] sm:$0xff]  ;;  %v20603_v24 = vld [vmem:[#allocation75_spill] sm:$0xff] }
 0x3b4   : > { %v4856_v7 = vadd.f32 %v17825_v6, %v4454_v36  ;;  %v5232_v32 = vadd.f32 %v17737_v57, %v4844_v18  ;;  %v18151_v6 = vadd.f32 %v17771_v22, %v4850_v46  ;;  %v6380_v37 = vadd.f32 %v17998_v25, %v5992_v58  ;;  %v20591_v22 = vld [vmem:[#allocation69_spill] sm:$0xff]  ;;  %v20595_v25 = vld [vmem:[#allocation66_spill] sm:$0xff]  ;;  %v20602_v18 = vld [vmem:[#allocation76_spill] sm:$0xff]  ;;  %v18197_v58 = vpop.f32.mrf.mxu0 }
 0x3b5   : > { %v18117_v4 = vpop.f32.mrf.mxu1  ;;  %v5612_v57 = vadd.f32 %v17890_v8, %v5224_v17  ;;  %v18158_v50 = vadd.f32 %v20588_v55, %v4852_v2  ;;  %v18169_v36 = vadd.f32 %v20591_v22, %v4858_v60  ;;  %v6383_v1 = vadd.f32 %v18002_v61, %v5995_v3  ;;  %v18185_v61 = vld [vmem:[%s20163_s4] ss:$0 sm:$0xff]  ;;  %v20604_v17 = vld [vmem:[#allocation72_spill] sm:$0xff]  ;;  %v20607_v39 = vld [vmem:[#allocation51_spill] sm:$0xff] }
 0x3b6   : > { %v18164_v48 = vadd.f32 %v20590_v10, %v4856_v7  ;;  %v6769_v8 = vadd.f32 %v17994_v33, %v6381_v28  ;;  %v5614_v12 = vadd.f32 %v20593_v0, %v5226_v43  ;;  %v5997_v29 = vadd.f32 %v20595_v25, %v20594_v9  ;;  %v20605_v43 = vld [vmem:[#allocation81_spill] sm:$0xff]  ;;  %v20606_v2 = vld [vmem:[#allocation32_spill] sm:$0xff]  ;;  %v20608_v49 = vld [vmem:[#allocation23_spill] sm:$0xff] }
 0x3b7   : > { %v18131_v56 = vpop.f32.mrf.mxu1  ;;  %v5996_v47 = vadd.f32 %v20596_v42, %v5608_v31  ;;  %v5999_v15 = vadd.f32 %v20598_v34, %v20597_v26  ;;  %v6382_v54 = vadd.f32 %v20599_v59, %v5994_v19  ;;  %v5998_v33 = vadd.f32 %v20600_v40, %v5610_v23  ;;  %v20609_v3 = vld [vmem:[#allocation68_spill] sm:$0xff]  ;;  %v20611_v44 = vld [vmem:[#allocation26_spill] sm:$0xff]  ;;  %v20620_v40 = vld [vmem:[#allocation53_spill] sm:$0xff] }
 0x3b8   : > { %v6768_v16 = vadd.f32 %v20601_v30, %v6380_v37  ;;  %v5616_v41 = vadd.f32 %v20602_v18, %v5228_v21  ;;  %v6001_v46 = vadd.f32 %v20604_v17, %v20603_v24  ;;  %v6000_v11 = vadd.f32 %v20605_v43, %v5612_v57  ;;  %v20610_v55 = vld [vmem:[#allocation80_spill] sm:$0xff]  ;;  %v20613_v57 = vld [vmem:[#allocation77_spill] sm:$0xff]  ;;  %v20614_v19 = vld [vmem:[#allocation74_spill] sm:$0xff] }
 0x3b9   : > { %v18147_v53 = vpop.f32.mrf.mxu1  ;;  %v6003_v7 = vadd.f32 %v20607_v39, %v20606_v2  ;;  %v6385_v28 = vadd.f32 %v20608_v49, %v5997_v29  ;;  %v6771_v37 = vadd.f32 %v20609_v3, %v6383_v1  ;;  %v5618_v21 = vadd.f32 %v20610_v55, %v5230_v52  ;;  %v20612_v22 = vld [vmem:[#allocation84_spill] sm:$0xff]  ;;  %v20616_v1 = vld [vmem:[#allocation57_spill] sm:$0xff] }
 0x3ba   : > { %v6384_v10 = vadd.f32 %v20611_v44, %v5996_v47  ;;  %v18204_v14 = vadd.f32 %v20612_v22, %v5614_v12  ;;  %v20615_v42 = vld [vmem:[#allocation24_spill] sm:$0xff]  ;;  %v5620_v34 = vadd.f32 %v20616_v1, %v5232_v32  ;;  %v20617_v52 = vld [vmem:[#allocation29_spill] sm:$0xff]  ;;  %v20618_v47 = vld [vmem:[#allocation42_spill] sm:$0xff] }
 0x3bb   : > { %v18166_v63 = vpop.f32.mrf.mxu1  ;;  %v6770_v26 = vadd.f32 %v20615_v42, %v6382_v54  ;;  %v18217_v59 = vadd.f32 %v20618_v47, %v5616_v41  ;;  %v20619_v12 = vld [vmem:[#allocation55_spill] sm:$0xff]  ;;  %v20621_v54 = vld [vmem:[#allocation97_spill] sm:$0xff]  ;;  %v20624_v41 = vld [vmem:[#allocation50_spill] sm:$0xff] }
 0x3bc   : > { %v6773_v43 = vadd.f32 %v20621_v54, %v6385_v28  ;;  %v20622_v32 = vld [vmem:[#allocation25_spill] sm:$0xff]  ;;  %v20627_v44 = vld [vmem:[#allocation98_spill] sm:$0xff] }
 0x3bd   : > { %v14005_v5 = vpop.f32.mrf.mxu1  ;;  %v6386_v2 = vadd.f32 %v20622_v32, %v5998_v33  ;;  %v6389_v22 = vadd.f32 %v20627_v44, %v6001_v46  ;;  %v20630_v47 = vld [vmem:[#allocation70_spill] sm:$0xff]  ;;  %v20635_v32 = vld [vmem:[#allocation99_spill] sm:$0xff] }
 0x3be   : > { %v7031_v35 = vadd.f32 %v14005_v5, %v6769_v8  ;;  %v18208_v8 = vadd.f32 %v20614_v19, %v20613_v57  ;;  %v6387_v5 = vadd.f32 %v20617_v52, %v5999_v15  ;;  %v20623_v15 = vld [vmem:[#allocation88_spill] sm:$0xff]  ;;  %v20634_v54 = vld [vmem:[#allocation106_spill] sm:$0xff] }
 0x3bf   : > { %v6871_v60 = vpop.f32.mrf.mxu1  ;;  %v18231_v39 = vadd.f32 %v20623_v15, %v5618_v21  ;;  %v7139_v21 = vld [vmem:[%s20164_s5 + $0x30] sm:$0xff]  ;;  %v6388_v15 = vadd.f32 %v20635_v32, %v6000_v11 }
 0x3c0   : > { %v7070_v31 = vadd.f32 %v18185_v61, %v7031_v35  ;;  %v7030_v23 = vadd.f32 %v6871_v60, %v6768_v16  ;;  %v18221_v35 = vadd.f32 %v20620_v40, %v20619_v12  ;;  %v18223_v16 = vpop.f32.mrf.mxu0  ;;  %v20625_v60 = vld [vmem:[#allocation33_spill] sm:$0xff]  ;;  %v20628_v57 = vld [vmem:[#allocation48_spill] sm:$0xff]  ;;  %v20632_v40 = vld [vmem:[#allocation35_spill] sm:$0xff] }
 0x3c1   : > { %v14008_v0 = vpop.f32.mrf.mxu1  ;;  %v18235_v49 = vadd.f32 %v20625_v60, %v20624_v41  ;;  %v18248_v19 = vadd.f32 %v20628_v57, %v5620_v34  ;;  %v18266_v34 = vld [vmem:[%s20164_s5 + $0x58] sm:$0x1]  ;;  %v20631_v12 = vld [vmem:[#allocation52_spill] sm:$0xff] }
 0x3c2   : > { %v18210_v9 = vmax.f32 %v7070_v31, 0.0  ;;  %v7069_v25 = vadd.f32 %v18185_v61, %v7030_v23  ;;  %v7033_v29 = vadd.f32 %v14008_v0, %v6771_v37  ;;  %v20626_v23 = vld [vmem:[#allocation100_spill] sm:$0xff]  ;;  %v18255_v42 = vpop.f32.mrf.mxu0 }
 0x3c3   : > { %v6881_v30 = vpop.f32.mrf.mxu1  ;;  %v6772_v3 = vadd.f32 %v20626_v23, %v6384_v10 }
 0x3c4   : > { %v18225_v18 = vmax.f32 %v7069_v25, 0.0  ;;  %v7072_v24 = vadd.f32 %v18185_v61, %v7033_v29  ;;  %v7032_v17 = vadd.f32 %v6881_v30, %v6770_v26  ;;  %v7188_v33 = vrot.slane %v18210_v9, 1  ;;  %v20629_v25 = vld [vmem:[#allocation103_spill] sm:$0xff] }
 0x3c5   : > { %v14011_v31 = vpop.f32.mrf.mxu1  ;;  %v6775_v29 = vadd.f32 %v20629_v25, %v6387_v5  ;;  %v5622_v5 = vadd.f32 %v20631_v12, %v18142_v13  ;;  %v20633_v30 = vld [vmem:[#allocation79_spill] sm:$0xff] }
 0x3c6   : > { %v7071_v37 = vadd.f32 %v18185_v61, %v7032_v17  ;;  %v7035_v55 = vadd.f32 %v14011_v31, %v6773_v43  ;;  %14107 = vmatprep.mubr.msk.f32.mxu1 %vm3887_vm8, %v18225_v18  ;;  %v7187_v28 = vrot.slane %v18225_v18, 1  ;;  %v18250_v10 = vmax.f32 %v7072_v24, 0.0  ;;  %v20636_v31 = vld [vmem:[#allocation101_spill] sm:$0xff] }
 0x3c7   : > { %v6891_v0 = vpop.f32.mrf.mxu1  ;;  %14108 = vmatmul.mubr.msk.f32.vlgmr.msra.gmra.mxu1 %vm3887_vm8, %v18210_v9  ;;  %v18272_v24 = vadd.f32 %v20633_v30, %v20632_v40  ;;  %v6774_v43 = vadd.f32 %v20634_v54, %v6386_v2  ;;  %v6391_v23 = vadd.f32 %v20636_v31, %v6003_v7  ;;  %v20637_v2 = vld [vmem:[#allocation109_spill] sm:$0xff]  ;;  %v20641_v30 = vld [vmem:[#allocation86_spill] sm:$0xff]  ;;  %v20643_v54 = vld [vmem:[#allocation104_spill] sm:$0xff] }
 0x3c8   : > { %v18257_v26 = vmax.f32 %v7071_v37, 0.0  ;;  %v7074_v1 = vadd.f32 %v18185_v61, %v7035_v55  ;;  %v7034_v52 = vadd.f32 %v6891_v0, %v6772_v3  ;;  %v7189_v46 = vsel %vm476_vm0, %v7187_v28, %v7188_v33  ;;  %14208 = vmatpush3.msk.msra.mxu1 %vm3056_vm7, %v20630_v47  ;;  %v18290_v28 = vpop.f32.mrf.mxu0  ;;  %v7137_v0 = vld [vmem:[%s20164_s5 + $0x20] sm:$0xff] }
 0x3c9   : > { %v14014_v17 = vpop.f32.mrf.mxu1  ;;  %14055 = vmatprep.mubr.msk.f32.mxu0 %vm3887_vm8, %v7189_v46  ;;  %14209 = vmatprep.subr.mxu1 %v7139_v21  ;;  %v6777_v55 = vadd.f32 %v20637_v2, %v6389_v22  ;;  %v7192_v11 = vrot.slane %v18250_v10, 1  ;;  %v20638_v22 = vld [vmem:[#allocation36_spill] sm:$0xff] }
 0x3ca   : > { %v7073_v41 = vadd.f32 %v18185_v61, %v7034_v52  ;;  %v7037_v60 = vadd.f32 %v14014_v17, %v6775_v29  ;;  %14110 = vmatprep.mubr.msk.f32.mxu1 %vm3887_vm8, %v18257_v26  ;;  %v7190_v13 = vrot.slane %v18257_v26, 1  ;;  %14210 = vmatpush3.msra.mxu1 %v7139_v21  ;;  %v18282_v3 = vmax.f32 %v7074_v1, 0.0  ;;  %v20639_v29 = vld [vmem:[#allocation102_spill] sm:$0xff]  ;;  %v18323_v17 = vld [vmem:[%s20164_s5 + $0x48] sm:$0x1]  ;;  %v18333_v31 = vpop.f32.mrf.mxu0 }
 0x3cb   : > { %v6901_v37 = vpop.f32.mrf.mxu1  ;;  %14111 = vmatmul.mubr.msk.f32.gmra.mxu1 %vm3887_vm8, %v18250_v10  ;;  %14311 = vmatprep.subr.msk.mxu1 %vm3056_vm7, %v18266_v34  ;;  %v5624_v25 = vadd.f32 %v20638_v22, %v18145_v45  ;;  %v6390_v1 = vadd.f32 %v20639_v29, %v18204_v14  ;;  %v20640_v52 = vld [vmem:[#allocation34_spill] sm:$0xff]  ;;  %v20642_v45 = vld [vmem:[#allocation112_spill] sm:$0xff] }
 0x3cc   : > { %v18292_v44 = vmax.f32 %v7073_v41, 0.0  ;;  %v7076_v21 = vadd.f32 %v18185_v61, %v7037_v60  ;;  %v7036_v7 = vadd.f32 %v6901_v37, %v6774_v43  ;;  %v18296_v57 = vsel %vm476_vm0, %v7188_v33, %v7190_v13  ;;  %v20644_v60 = vld [vmem:[#allocation115_spill] sm:$0xff] }
 0x3cd   : > { %v18306_v46 = vadd.f32 %v20640_v52, %v5622_v5  ;;  %v14017_v47 = vpop.f32.mrf.mxu1  ;;  %14056 = vmatmul.mubr.msk.f32.vlgmr.msra.gmra.mxu0 %vm3887_vm8, %v18296_v57  ;;  %v18311_v33 = vsel %vm476_vm0, %v7190_v13, %v7192_v11  ;;  %v6776_v14 = vadd.f32 %v20642_v45, %v6388_v15  ;;  %v6393_v43 = vadd.f32 %v20643_v54, %v18208_v8  ;;  %v20647_v52 = vld [vmem:[#allocation118_spill] sm:$0xff]  ;;  %v20649_v45 = vld [vmem:[#allocation107_spill] sm:$0xff]  ;;  %v20650_v54 = vld [vmem:[#allocation121_spill] sm:$0xff] }
 0x3ce   : > { %v7075_v12 = vadd.f32 %v18185_v61, %v7036_v7  ;;  %v7039_v40 = vadd.f32 %v14017_v47, %v6777_v55  ;;  %14156 = vmatpush3.msk.msra.mxu0 %vm3056_vm7, %v20641_v30  ;;  %14058 = vmatprep.mubr.msk.f32.mxu0 %vm3887_vm8, %v18311_v33  ;;  %v7194_v5 = vrot.slane %v18292_v44, 1  ;;  %v18327_v32 = vmax.f32 %v7076_v21, 0.0  ;;  %v20645_v21 = vld [vmem:[#allocation85_spill] sm:$0xff]  ;;  %v20646_v7 = vld [vmem:[#allocation83_spill] sm:$0xff] }
 0x3cf   : > { %14113 = vmatprep.mubr.msk.f32.mxu1 %vm3887_vm8, %v18292_v44  ;;  %v6911_v41 = vpop.f32.mrf.mxu1  ;;  %v6779_v13 = vadd.f32 %v20644_v60, %v6391_v23  ;;  %v7196_v15 = vrot.slane %v18282_v3, 1  ;;  %14157 = vmatprep.subr.mxu0 %v7137_v0  ;;  %v18345_v23 = vadd.f32 %v20646_v7, %v20645_v21  ;;  %v6778_v47 = vadd.f32 %v20647_v52, %v6390_v1  ;;  %v18369_v60 = vpop.f32.mrf.mxu0  ;;  %v20653_v52 = vld [vmem:[#allocation82_spill] sm:$0xff] }
 0x3d0   : > { %v18335_v37 = vmax.f32 %v7075_v12, 0.0  ;;  %v7078_v2 = vadd.f32 %v18185_v61, %v7039_v40  ;;  %v7038_v55 = vadd.f32 %v6911_v41, %v6776_v14  ;;  %14114 = vmatmul.mubr.msk.f32.gmra.mxu1 %vm3887_vm8, %v18282_v3  ;;  %v18341_v8 = vsel %vm476_vm0, %v7192_v11, %v7194_v5  ;;  %14158 = vmatpush3.msra.mxu0 %v7137_v0  ;;  %v20648_v11 = vld [vmem:[#allocation105_spill] sm:$0xff] }
 0x3d1   : > { %v14020_v22 = vpop.f32.mrf.mxu1  ;;  %14059 = vmatmul.mubr.msk.f32.gmra.mxu0 %vm3887_vm8, %v18341_v8  ;;  %v18350_v29 = vsel %vm476_vm0, %v7194_v5, %v7196_v15  ;;  %14259 = vmatprep.subr.msk.mxu0 %vm3056_vm7, %v18323_v17  ;;  %v6392_v12 = vadd.f32 %v20648_v11, %v18217_v59  ;;  %v6395_v1 = vadd.f32 %v20649_v45, %v18221_v35  ;;  %v7200_v59 = vrot.slane %v18327_v32, 1  ;;  %v20651_v35 = vld [vmem:[#allocation89_spill] sm:$0xff]  ;;  %v20656_v45 = vld [vmem:[#allocation110_spill] sm:$0xff] }
 0x3d2   : > { %v7077_v0 = vadd.f32 %v18185_v61, %v7038_v55  ;;  %v7041_v40 = vadd.f32 %v14020_v22, %v6779_v13  ;;  %14061 = vmatprep.mubr.msk.f32.mxu0 %vm3887_vm8, %v18350_v29  ;;  %14116 = vmatprep.mubr.msk.f32.mxu1 %vm3887_vm8, %v18335_v37  ;;  %v7198_v30 = vrot.slane %v18335_v37, 1  ;;  %v18365_v14 = vmax.f32 %v7078_v2, 0.0 }
 0x3d3   : > { %v6921_v5 = vpop.f32.mrf.mxu1  ;;  %v6781_v41 = vadd.f32 %v20650_v54, %v6393_v43  ;;  %v5626_v2 = vadd.f32 %v20651_v35, %v18151_v6  ;;  %v20652_v43 = vld [vmem:[#allocation108_spill] sm:$0xff]  ;;  %v18384_v11 = vadd.f32 %v20653_v52, %v5624_v25  ;;  %v6783_v35 = vadd.f32 %v18110_v38, %v6395_v1 }
 0x3d4   : > { %v18371_v13 = vmax.f32 %v7077_v0, 0.0  ;;  %v7080_v55 = vadd.f32 %v18185_v61, %v7041_v40  ;;  %v7040_v21 = vadd.f32 %v6921_v5, %v6778_v47  ;;  %14117 = vmatmul.mubr.msk.f32.gmra.mxu1 %vm3887_vm8, %v18327_v32  ;;  %v18377_v7 = vsel %vm476_vm0, %v7196_v15, %v7198_v30  ;;  %v20655_v6 = vld [vmem:[#allocation124_spill] sm:$0xff] }
 0x3d5   : > { %v6394_v22 = vadd.f32 %v20652_v43, %v18231_v39  ;;  %v14023_v0 = vpop.f32.mrf.mxu1  ;;  %14062 = vmatmul.mubr.msk.f32.gmra.mxu0 %vm3887_vm8, %v18377_v7  ;;  %v18389_v47 = vsel %vm476_vm0, %v7198_v30, %v7200_v59  ;;  %v6780_v39 = vadd.f32 %v20655_v6, %v6392_v12  ;;  %v6397_v5 = vadd.f32 %v20656_v45, %v18235_v49  ;;  %v20658_v49 = vld [vmem:[#allocation90_spill] sm:$0xff]  ;;  %v20660_v45 = vld [vmem:[#allocation87_spill] sm:$0xff] }
 0x3d6   : > { %20654 = vst [vmem:[#allocation28_spill] sm:$0xff] %v18389_v47  ;;  %v7079_v40 = vadd.f32 %v18185_v61, %v7040_v21  ;;  %v7043_v15 = vadd.f32 %v14023_v0, %v6781_v41  ;;  %14064 = vmatprep.mubr.msk.f32.mxu0 %vm3887_vm8, %v18389_v47  ;;  %14119 = vmatprep.mubr.msk.f32.mxu1 %vm3887_vm8, %v18371_v13  ;;  %v7202_v25 = vrot.slane %v18371_v13, 1  ;;  %v18400_v54 = vmax.f32 %v7080_v55, 0.0  ;;  %v18404_v21 = vpop.f32.mrf.mxu0  ;;  %v20659_v55 = vld [vmem:[#allocation59_spill] sm:$0xff] }
 0x3d7   : > { %v6931_v30 = vpop.f32.mrf.mxu1  ;;  %v7204_v41 = vrot.slane %v18365_v14, 1  ;;  %v6015_v6 = vadd.f32 %v20659_v55, %v20658_v49  ;;  %v18417_v38 = vadd.f32 %v20660_v45, %v5626_v2  ;;  %v20663_v49 = vld [vmem:[#allocation113_spill] sm:$0xff] }
 0x3d8   : > { %v18406_v43 = vmax.f32 %v7079_v40, 0.0  ;;  %v7082_v52 = vadd.f32 %v18185_v61, %v7043_v15  ;;  %v7042_v0 = vadd.f32 %v6931_v30, %v6780_v39  ;;  %14120 = vmatmul.mubr.msk.f32.gmra.mxu1 %vm3887_vm8, %v18365_v14  ;;  %v18412_v12 = vsel %vm476_vm0, %v7200_v59, %v7202_v25  ;;  %v20662_v39 = vld [vmem:[#allocation111_spill] sm:$0xff] }
 0x3d9   : > { %20657 = vst [vmem:[#allocation17_spill] sm:$0xff] %v18412_v12  ;;  %v14026_v1 = vpop.f32.mrf.mxu1  ;;  %14065 = vmatmul.mubr.msk.f32.gmra.mxu0 %vm3887_vm8, %v18412_v12  ;;  %v18422_v40 = vsel %vm476_vm0, %v7202_v25, %v7204_v41  ;;  %v6782_v15 = vadd.f32 %v18137_v20, %v6394_v22  ;;  %v6396_v30 = vadd.f32 %v20662_v39, %v18248_v19  ;;  %v7208_v19 = vrot.slane %v18400_v54, 1 }
 0x3da   : > { %20661 = vst [vmem:[#allocation30_spill] sm:$0xff] %v18422_v40  ;;  %v7081_v59 = vadd.f32 %v18185_v61, %v7042_v0  ;;  %v7045_v47 = vadd.f32 %v14026_v1, %v6783_v35  ;;  %14067 = vmatprep.mubr.msk.f32.mxu0 %vm3887_vm8, %v18422_v40  ;;  %14122 = vmatprep.mubr.msk.f32.mxu1 %vm3887_vm8, %v18406_v43  ;;  %v7206_v2 = vrot.slane %v18406_v43, 1  ;;  %v18435_v55 = vmax.f32 %v7082_v52, 0.0  ;;  %v18439_v0 = vpop.f32.mrf.mxu0  ;;  %v20668_v40 = vld [vmem:[#allocation54_spill] sm:$0xff] }
 0x3db   : > { %v6399_v25 = vadd.f32 %v20663_v49, %v18272_v24  ;;  %v6941_v20 = vpop.f32.mrf.mxu1  ;;  %v6785_v22 = vadd.f32 %v18173_v62, %v6397_v5  ;;  %v20665_v24 = vld [vmem:[#allocation92_spill] sm:$0xff]  ;;  %v20666_v62 = vld [vmem:[#allocation114_spill] sm:$0xff]  ;;  %v20667_v49 = vld [vmem:[#allocation63_spill] sm:$0xff] }
 0x3dc   : > { %v18441_v35 = vmax.f32 %v7081_v59, 0.0  ;;  %v7084_v45 = vadd.f32 %v18185_v61, %v7045_v47  ;;  %v7044_v1 = vadd.f32 %v6941_v20, %v6782_v15  ;;  %14123 = vmatmul.mubr.msk.f32.gmra.mxu1 %vm3887_vm8, %v18400_v54  ;;  %v18447_v39 = vsel %vm476_vm0, %v7204_v41, %v7206_v2 }
 0x3dd   : > { %20664 = vst [vmem:[#allocation16_spill] sm:$0xff] %v18447_v39  ;;  %v5628_v52 = vadd.f32 %v20665_v24, %v18158_v50  ;;  %v6398_v5 = vadd.f32 %v20666_v62, %v18306_v46  ;;  %v6017_v12 = vadd.f32 %v20668_v40, %v20667_v49  ;;  %v14029_v59 = vpop.f32.mrf.mxu1  ;;  %14068 = vmatmul.mubr.msk.f32.gmra.mxu0 %vm3887_vm8, %v18447_v39  ;;  %v20670_v40 = vld [vmem:[#allocation116_spill] sm:$0xff] }
 0x3de   : > { %v18458_v47 = vsel %vm476_vm0, %v7206_v2, %v7208_v19  ;;  %v7083_v15 = vadd.f32 %v18185_v61, %v7044_v1  ;;  %v7047_v41 = vadd.f32 %v14029_v59, %v6785_v22  ;;  %14125 = vmatprep.mubr.msk.f32.mxu1 %vm3887_vm8, %v18441_v35  ;;  %v6784_v50 = vadd.f32 %v18197_v58, %v6396_v30  ;;  %v18473_v1 = vpop.f32.mrf.mxu0 }
 0x3df   : > { %20669 = vst [vmem:[#allocation15_spill] sm:$0xff] %v18458_v47  ;;  %14070 = vmatprep.mubr.msk.f32.mxu0 %vm3887_vm8, %v18458_v47  ;;  %v7210_v46 = vrot.slane %v18441_v35, 1  ;;  %v6401_v20 = vadd.f32 %v20670_v40, %v18345_v23  ;;  %v18469_v24 = vmax.f32 %v7084_v45, 0.0  ;;  %v6951_v2 = vpop.f32.mrf.mxu1  ;;  %v6787_v62 = vadd.f32 %v18223_v16, %v6399_v25  ;;  %v20672_v23 = vld [vmem:[#allocation64_spill] sm:$0xff]  ;;  %v20673_v45 = vld [vmem:[#allocation61_spill] sm:$0xff] }
 0x3e0   : > { %v7212_v22 = vrot.slane %v18435_v55, 1  ;;  %v18475_v49 = vmax.f32 %v7083_v15, 0.0  ;;  %v7086_v59 = vadd.f32 %v18185_v61, %v7047_v41  ;;  %v7046_v47 = vadd.f32 %v6951_v2, %v6784_v50  ;;  %14126 = vmatmul.mubr.msk.f32.gmra.mxu1 %vm3887_vm8, %v18435_v55  ;;  %v20675_v50 = vld [vmem:[#allocation117_spill] sm:$0xff] }
 0x3e1   : > { %v18481_v58 = vsel %vm476_vm0, %v7208_v19, %v7210_v46  ;;  %v5630_v30 = vadd.f32 %v20672_v23, %v18161_v51  ;;  %v6016_v16 = vadd.f32 %v20673_v45, %v5628_v52  ;;  %v14032_v25 = vpop.f32.mrf.mxu1  ;;  %v6786_v41 = vadd.f32 %v18255_v42, %v6398_v5  ;;  %v20676_v52 = vld [vmem:[#allocation119_spill] sm:$0xff]  ;;  %v18505_v5 = vpop.f32.mrf.mxu0 }
 0x3e2   : > { %20671 = vst [vmem:[#allocation40_spill] sm:$0xff] %v18481_v58  ;;  %14071 = vmatmul.mubr.msk.f32.gmra.mxu0 %vm3887_vm8, %v18481_v58  ;;  %v18489_v15 = vsel %vm476_vm0, %v7210_v46, %v7212_v22  ;;  %v6400_v40 = vadd.f32 %v20675_v50, %v18384_v11  ;;  %v7085_v19 = vadd.f32 %v18185_v61, %v7046_v47  ;;  %v7214_v51 = vrot.slane %v18475_v49, 1 }
 0x3e3   : > { %20674 = vst [vmem:[#allocation45_spill] sm:$0xff] %v18489_v15  ;;  %v7049_v2 = vadd.f32 %v14032_v25, %v6787_v62  ;;  %14073 = vmatprep.mubr.msk.f32.mxu0 %vm3887_vm8, %v18489_v15  ;;  %14128 = vmatprep.mubr.msk.f32.mxu1 %vm3887_vm8, %v18475_v49  ;;  %v6403_v23 = vadd.f32 %v20676_v52, %v6015_v6  ;;  %v18501_v46 = vmax.f32 %v7086_v59, 0.0  ;;  %v6961_v45 = vpop.f32.mrf.mxu1  ;;  %v7216_v11 = vrot.slane %v18469_v24, 1  ;;  %v20677_v6 = vld [vmem:[#allocation120_spill] sm:$0xff]  ;;  %v20678_v52 = vld [vmem:[#allocation58_spill] sm:$0xff] }
 0x3e4   : > { %v6789_v42 = vadd.f32 %v18290_v28, %v6401_v20  ;;  %v18507_v47 = vmax.f32 %v7085_v19, 0.0  ;;  %v7048_v25 = vadd.f32 %v6961_v45, %v6786_v41  ;;  %14129 = vmatmul.mubr.msk.f32.gmra.mxu1 %vm3887_vm8, %v18469_v24  ;;  %v18513_v50 = vsel %vm476_vm0, %v7212_v22, %v7214_v51  ;;  %v20679_v28 = vld [vmem:[#allocation37_spill] sm:$0xff]  ;;  %v20680_v15 = vld [vmem:[#allocation56_spill] sm:$0xff] }
 0x3e5   : > { %v7088_v62 = vadd.f32 %v18185_v61, %v7049_v2  ;;  %v6402_v59 = vadd.f32 %v20677_v6, %v18417_v38  ;;  %v6019_v20 = vadd.f32 %v20679_v28, %v20678_v52  ;;  %v6018_v58 = vadd.f32 %v20680_v15, %v5630_v30  ;;  %v14035_v39 = vpop.f32.mrf.mxu1  ;;  %v20682_v30 = vld [vmem:[#allocation122_spill] sm:$0xff] }
 0x3e6   : > { %14074 = vmatmul.mubr.msk.f32.gmra.mxu0 %vm3887_vm8, %v18513_v50  ;;  %v18523_v41 = vsel %vm476_vm0, %v7214_v51, %v7216_v11  ;;  %v7087_v19 = vadd.f32 %v18185_v61, %v7048_v25  ;;  %v7051_v2 = vadd.f32 %v14035_v39, %v6789_v42  ;;  %14131 = vmatprep.mubr.msk.f32.mxu1 %vm3887_vm8, %v18507_v47  ;;  %v7218_v22 = vrot.slane %v18507_v47, 1  ;;  %v6739_v39 = vpop.f32.mrf.mxu0 }
 0x3e7   : > { %20681 = vst [vmem:[#allocation19_spill] sm:$0xff] %v18523_v41  ;;  %14076 = vmatprep.mubr.msk.f32.mxu0 %vm3887_vm8, %v18523_v41  ;;  %v6788_v38 = vadd.f32 %v18333_v31, %v6400_v40  ;;  %v6405_v15 = vadd.f32 %v20682_v30, %v6017_v12  ;;  %v18533_v45 = vmax.f32 %v7088_v62, 0.0  ;;  %v6971_v6 = vpop.f32.mrf.mxu1  ;;  %v6791_v51 = vadd.f32 %v18369_v60, %v6403_v23  ;;  %v20683_v12 = vld [vmem:[#allocation39_spill] sm:$0xff]  ;;  %v20684_v62 = vld [vmem:[#allocation93_spill] sm:$0xff] }
 0x3e8   : > { %v7220_v25 = vrot.slane %v18501_v46, 1  ;;  %v18537_v42 = vmax.f32 %v7087_v19, 0.0  ;;  %v7090_v52 = vadd.f32 %v18185_v61, %v7051_v2  ;;  %14132 = vmatmul.mubr.msk.f32.gmra.mxu1 %vm3887_vm8, %v18501_v46  ;;  %v18543_v31 = vsel %vm476_vm0, %v7216_v11, %v7218_v22  ;;  %v20685_v30 = vld [vmem:[#allocation91_spill] sm:$0xff] }
 0x3e9   : > { %v7050_v28 = vadd.f32 %v6971_v6, %v6788_v38  ;;  %v5632_v40 = vadd.f32 %v20683_v12, %v18164_v48  ;;  %v6021_v60 = vadd.f32 %v20685_v30, %v20684_v62  ;;  %v14038_v23 = vpop.f32.mrf.mxu1  ;;  %v6790_v2 = vadd.f32 %v18404_v21, %v6402_v59  ;;  %v20687_v38 = vld [vmem:[#allocation123_spill] sm:$0xff]  ;;  %v20688_v12 = vld [vmem:[#allocation14_spill] sm:$0xff]  ;;  %v13995_v59 = vpop.f32.mrf.mxu0 }
 0x3ea   : > { %14077 = vmatmul.mubr.msk.f32.gmra.mxu0 %vm3887_vm8, %v18543_v31  ;;  %v18552_v19 = vsel %vm476_vm0, %v7218_v22, %v7220_v25  ;;  %v6404_v6 = vadd.f32 %v20687_v38, %v6016_v16  ;;  %v7053_v41 = vadd.f32 %v14038_v23, %v6791_v51  ;;  %14134 = vmatprep.mubr.msk.f32.mxu1 %vm3887_vm8, %v18537_v42  ;;  %v7222_v48 = vrot.slane %v18537_v42, 1 }
 0x3eb   : > { %20686 = vst [vmem:[#allocation18_spill] sm:$0xff] %v18552_v19  ;;  %v7089_v11 = vadd.f32 %v18185_v61, %v7050_v28  ;;  %14079 = vmatprep.mubr.msk.f32.mxu0 %vm3887_vm8, %v18552_v19  ;;  %v6407_v62 = vadd.f32 %v20688_v12, %v6019_v20  ;;  %v18563_v30 = vmax.f32 %v7090_v52, 0.0  ;;  %v6981_v22 = vpop.f32.mrf.mxu1  ;;  %v6793_v21 = vadd.f32 %v18439_v0, %v6405_v15  ;;  %v20690_v20 = vld [vmem:[#allocation96_spill] sm:$0xff]  ;;  %v20691_v0 = vld [vmem:[#allocation38_spill] sm:$0xff] }
 0x3ec   : > { %v7224_v16 = vrot.slane %v18533_v45, 1  ;;  %v7092_v51 = vadd.f32 %v18185_v61, %v7053_v41  ;;  %v7052_v23 = vadd.f32 %v6981_v22, %v6790_v2  ;;  %14135 = vmatmul.mubr.msk.f32.gmra.mxu1 %vm3887_vm8, %v18533_v45  ;;  %v18573_v38 = vsel %vm476_vm0, %v7220_v25, %v7222_v48 }
 0x3ed   : > { %v18567_v28 = vmax.f32 %v7089_v11, 0.0  ;;  %v5634_v52 = vadd.f32 %v20690_v20, %v18169_v36  ;;  %v6406_v12 = vadd.f32 %v18101_v27, %v6018_v58  ;;  %v6020_v15 = vadd.f32 %v20691_v0, %v5632_v40  ;;  %v14041_v19 = vpop.f32.mrf.mxu1 }
 0x3ee   : > { %14080 = vmatmul.mubr.msk.f32.gmra.mxu0 %vm3887_vm8, %v18573_v38  ;;  %v18582_v41 = vsel %vm476_vm0, %v7222_v48, %v7224_v16  ;;  %v7091_v2 = vadd.f32 %v18185_v61, %v7052_v23  ;;  %v7055_v11 = vadd.f32 %v14041_v19, %v6793_v21  ;;  %v6792_v27 = vadd.f32 %v18473_v1, %v6404_v6  ;;  %v6749_v19 = vpop.f32.mrf.mxu0 }
 0x3ef   : > { %20689 = vst [vmem:[#allocation21_spill] sm:$0xff] %v18567_v28  ;;  %14082 = vmatprep.mubr.msk.f32.mxu0 %vm3887_vm8, %v18582_v41  ;;  %14137 = vmatprep.mubr.msk.f32.mxu1 %vm3887_vm8, %v18567_v28  ;;  %v7226_v36 = vrot.slane %v18567_v28, 1  ;;  %v6409_v58 = vadd.f32 %v18117_v4, %v6021_v60  ;;  %v18592_v25 = vmax.f32 %v7092_v51, 0.0  ;;  %v6991_v40 = vpop.f32.mrf.mxu1  ;;  %v6795_v48 = vadd.f32 %v18505_v5, %v6407_v62  ;;  %v20692_v4 = vld [vmem:[#allocation65_spill] sm:$0xff]  ;;  %v20693_v60 = vld [vmem:[#allocation94_spill] sm:$0xff]  ;;  %v20694_v51 = vld [vmem:[#allocation60_spill] sm:$0xff] }
 0x3f0   : > { %v7228_v22 = vrot.slane %v18563_v30, 1  ;;  %v18596_v21 = vmax.f32 %v7091_v2, 0.0  ;;  %v7094_v23 = vadd.f32 %v18185_v61, %v7055_v11  ;;  %v7054_v20 = vadd.f32 %v6991_v40, %v6792_v27  ;;  %14138 = vmatmul.mubr.msk.f32.gmra.mxu1 %vm3887_vm8, %v18563_v30 }
 0x3f1   : > { %v18602_v1 = vsel %vm476_vm0, %v7224_v16, %v7226_v36  ;;  %v6023_v6 = vadd.f32 %v20693_v60, %v20692_v4  ;;  %v6022_v0 = vadd.f32 %v20694_v51, %v5634_v52  ;;  %v14044_v5 = vpop.f32.mrf.mxu1  ;;  %v6794_v2 = vadd.f32 %v6739_v39, %v6406_v12 }
 0x3f2   : > { %14083 = vmatmul.mubr.msk.f32.gmra.mxu0 %vm3887_vm8, %v18602_v1  ;;  %v18610_v62 = vsel %vm476_vm0, %v7226_v36, %v7228_v22  ;;  %v6408_v11 = vadd.f32 %v18131_v56, %v6020_v15  ;;  %v7093_v27 = vadd.f32 %v18185_v61, %v7054_v20  ;;  %v7057_v40 = vadd.f32 %v14044_v5, %v6795_v48  ;;  %v13998_v56 = vpop.f32.mrf.mxu0 }
 0x3f3   : > { %14085 = vmatprep.mubr.msk.f32.mxu0 %vm3887_vm8, %v18610_v62  ;;  %14140 = vmatprep.mubr.msk.f32.mxu1 %vm3887_vm8, %v18596_v21  ;;  %v7230_v16 = vrot.slane %v18596_v21, 1  ;;  %v6411_v52 = vadd.f32 %v18147_v53, %v6023_v6  ;;  %v18620_v4 = vmax.f32 %v7094_v23, 0.0  ;;  %v7001_v36 = vpop.f32.mrf.mxu1  ;;  %v6797_v60 = vadd.f32 %v13995_v59, %v6409_v58 }
 0x3f4   : > { %v7232_v39 = vrot.slane %v18592_v25, 1  ;;  %v18623_v12 = vmax.f32 %v7093_v27, 0.0  ;;  %v7096_v15 = vadd.f32 %v18185_v61, %v7057_v40  ;;  %v7056_v48 = vadd.f32 %v7001_v36, %v6794_v2  ;;  %14141 = vmatmul.mubr.msk.f32.gmra.mxu1 %vm3887_vm8, %v18592_v25  ;;  %v6759_v27 = vpop.f32.mrf.mxu0 }
 0x3f5   : > { %v18629_v20 = vsel %vm476_vm0, %v7228_v22, %v7230_v16  ;;  %v6410_v53 = vadd.f32 %v18166_v63, %v6022_v0  ;;  %v14047_v23 = vpop.f32.mrf.mxu1  ;;  %v6796_v22 = vadd.f32 %v6749_v19, %v6408_v11  ;;  %v6799_v5 = vadd.f32 %v13998_v56, %v6411_v52 }
 0x3f6   : > { %20695 = vst [vmem:[#allocation67_spill] sm:$0xff] %v18623_v12  ;;  %14086 = vmatmul.mubr.msk.f32.gmra.mxu0 %vm3887_vm8, %v18629_v20  ;;  %v18635_v59 = vsel %vm476_vm0, %v7230_v16, %v7232_v39  ;;  %v7095_v58 = vadd.f32 %v18185_v61, %v7056_v48  ;;  %v7059_v6 = vadd.f32 %v14047_v23, %v6797_v60  ;;  %v7234_v51 = vrot.slane %v18623_v12, 1 }
 0x3f7   : > { %20696 = vst [vmem:[#allocation20_spill] sm:$0xff] %v18635_v59  ;;  %14088 = vmatprep.mubr.msk.f32.mxu0 %vm3887_vm8, %v18635_v59  ;;  %14143 = vmatprep.mubr.msk.f32.mxu1 %vm3887_vm8, %v18623_v12  ;;  %v18643_v63 = vmax.f32 %v7096_v15, 0.0  ;;  %v7011_v0 = vpop.f32.mrf.mxu1  ;;  %v7236_v2 = vrot.slane %v18620_v4, 1  ;;  %v6798_v52 = vadd.f32 %v6759_v27, %v6410_v53 }
 0x3f8   : > { %v18646_v40 = vmax.f32 %v7095_v58, 0.0  ;;  %v7098_v16 = vadd.f32 %v18185_v61, %v7059_v6  ;;  %v7058_v36 = vadd.f32 %v7011_v0, %v6796_v22  ;;  %14144 = vmatmul.mubr.msk.f32.gmra.mxu1 %vm3887_vm8, %v18620_v4  ;;  %v18652_v60 = vsel %vm476_vm0, %v7232_v39, %v7234_v51 }
 0x3f9   : > { %20697 = vst [vmem:[#allocation47_spill] sm:$0xff] %v18652_v60  ;;  %v14050_v19 = vpop.f32.mrf.mxu1  ;;  %v18657_v11 = vsel %vm476_vm0, %v7234_v51, %v7236_v2  ;;  %v7240_v58 = vrot.slane %v18643_v63, 1 }
 0x3fa   : > { %14089 = vmatmul.mubr.msk.f32.gmra.mxu0 %vm3887_vm8, %v18652_v60  ;;  %20698 = vst [vmem:[#allocation41_spill] sm:$0xff] %v18657_v11  ;;  %v18659_v56 = vmax.f32 %v7098_v16, 0.0  ;;  %v7097_v15 = vadd.f32 %v18185_v61, %v7058_v36  ;;  %v7061_v48 = vadd.f32 %v14050_v19, %v6799_v5  ;;  %14146 = vmatprep.mubr.msk.f32.mxu1 %vm3887_vm8, %v18646_v40  ;;  %v7238_v39 = vrot.slane %v18646_v40, 1 }
 0x3fb   : > { %14091 = vmatprep.mubr.msk.f32.mxu0 %vm3887_vm8, %v18657_v11  ;;  %v7021_v23 = vpop.f32.mrf.mxu1 }
 0x3fc   : > { %v18668_v6 = vmax.f32 %v7097_v15, 0.0  ;;  %v7100_v53 = vadd.f32 %v18185_v61, %v7061_v48  ;;  %v7060_v22 = vadd.f32 %v7021_v23, %v6798_v52  ;;  %14147 = vmatmul.mubr.msk.f32.gmra.mxu1 %vm3887_vm8, %v18643_v63  ;;  %v18674_v51 = vsel %vm476_vm0, %v7236_v2, %v7238_v39 }
 0x3fd   : > { %20700 = vst [vmem:[#allocation69_spill] sm:$0xff] %v18674_v51  ;;  %v18679_v0 = vsel %vm476_vm0, %v7238_v39, %v7240_v58  ;;  %v7244_v2 = vrot.slane %v18659_v56, 1  ;;  %v8127_v52 = vrot.slane %v18225_v18, 3  ;;  %v8128_v15 = vrot.slane %v18210_v9, 3 }
 0x3fe   : > { %20699 = vst [vmem:[#allocation71_spill] sm:$0xff] %v18668_v6  ;;  %14092 = vmatmul.mubr.msk.f32.gmra.mxu0 %vm3887_vm8, %v18674_v51  ;;  %20701 = vst [vmem:[#allocation78_spill] sm:$0xff] %v18679_v0  ;;  %v18681_v5 = vmax.f32 %v7100_v53, 0.0  ;;  %v7099_v27 = vadd.f32 %v18185_v61, %v7060_v22  ;;  %14149 = vmatprep.mubr.msk.f32.mxu1 %vm3887_vm8, %v18668_v6  ;;  %v7242_v16 = vrot.slane %v18668_v6, 1  ;;  %v8130_v23 = vrot.slane %v18257_v26, 3 }
 0x3ff   : > { %14094 = vmatprep.mubr.msk.f32.mxu0 %vm3887_vm8, %v18679_v0  ;;  %v9156_v51 = vrot.slane %v18282_v3, 6 }
 0x400   : > { %v18690_v36 = vmax.f32 %v7099_v27, 0.0  ;;  %14150 = vmatmul.mubr.msk.f32.gmra.mxu1 %vm3887_vm8, %v18659_v56  ;;  %v18695_v19 = vsel %vm476_vm0, %v7240_v58, %v7242_v16  ;;  %v18698_v61 = vsel %vm476_vm0, %v7242_v16, %v7244_v2  ;;  %v7248_v39 = vrot.slane %v18681_v5, 1 }
 0x401   : > { %20702 = vst [vmem:[#allocation46_spill] sm:$0xff] %v18695_v19  ;;  %20703 = vst [vmem:[#allocation73_spill] sm:$0xff] %v18698_v61  ;;  %v8129_v58 = vsel %vm1508_vm3, %v8127_v52, %v8128_v15  ;;  %v7787_v27 = vrot.slane %v18225_v18, 2  ;;  %v8132_v16 = vrot.slane %v18250_v10, 3  ;;  %v8131_v52 = vsel %vm1508_vm3, %v8128_v15, %v8130_v23 }
 0x402   : > { %14095 = vmatmul.mubr.msk.f32.gmra.mxu0 %vm3887_vm8, %v18695_v19  ;;  %14152 = vmatprep.mubr.msk.f32.mxu1 %vm3887_vm8, %v18690_v36  ;;  %v7246_v48 = vrot.slane %v18690_v36, 1  ;;  %v7790_v19 = vrot.slane %v18257_v26, 2 }
 0x403   : > { %14097 = vmatprep.mubr.msk.f32.mxu0 %vm3887_vm8, %v18698_v61  ;;  %v8134_v61 = vrot.slane %v18292_v44, 3 }
 0x404   : > { %14153 = vmatmul.mubr.msk.f32.gmra.mxu1 %vm3887_vm8, %v18681_v5  ;;  %v18715_v53 = vsel %vm476_vm0, %v7244_v2, %v7246_v48  ;;  %v18718_v22 = vsel %vm476_vm0, %v7246_v48, %v7248_v39  ;;  %v7788_v2 = vrot.slane %v18210_v9, 2  ;;  %v8133_v48 = vsel %vm1508_vm3, %v8130_v23, %v8132_v16 }
 0x405   : > { %20704 = vst [vmem:[#allocation66_spill] sm:$0xff] %v18715_v53  ;;  %20705 = vst [vmem:[#allocation22_spill] sm:$0xff] %v18718_v22  ;;  %14211 = vmatprep.mubr.msk.f32.mxu1 %vm3887_vm8, %v8129_v58  ;;  %v20706_v58 = vld [vmem:[#allocation9_spill] sm:$0xff]  ;;  %v8136_v23 = vrot.slane %v18282_v3, 3 }
 0x406   : > { %14098 = vmatmul.mubr.msk.f32.gmra.mxu0 %vm3887_vm8, %v18715_v53  ;;  %v18734_v53 = vsel %vm476_vm0, %v7248_v39, %v20706_v58  ;;  %v7789_v15 = vsel %vm1121_vm2, %v7787_v27, %v7788_v2  ;;  %v8135_v39 = vsel %vm1508_vm3, %v8132_v16, %v8134_v61  ;;  %v8138_v58 = vrot.slane %v18335_v37, 3 }
 0x407   : > { %14100 = vmatprep.mubr.msk.f32.mxu0 %vm3887_vm8, %v18718_v22  ;;  %20707 = vst [vmem:[#allocation44_spill] sm:$0xff] %v18734_v53  ;;  %v7143_v22 = vld [vmem:[%s20164_s5 + $0x50] sm:$0xff]  ;;  %v18754_v27 = vsel %vm1121_vm2, %v7788_v2, %v7790_v19 }
 0x408   : > { %14212 = vmatmul.mubr.msk.f32.vlgmr.msra.gmra.mxu1 %vm3887_vm8, %v8131_v52  ;;  %v7792_v52 = vrot.slane %v18250_v10, 2  ;;  %20708 = vst [vmem:[#allocation43_spill] sm:$0xff] %v18754_v27  ;;  %v8139_v2 = vsel %vm1508_vm3, %v8136_v23, %v8138_v58 }
 0x409   : > { %14214 = vmatprep.mubr.msk.f32.mxu1 %vm3887_vm8, %v8133_v48  ;;  %14312 = vmatpush3.msk.msra.mxu1 %vm3056_vm7, %v18266_v34  ;;  %v8137_v48 = vsel %vm1508_vm3, %v8134_v61, %v8136_v23  ;;  %v7141_v34 = vld [vmem:[%s20164_s5 + $0x40] sm:$0xff]  ;;  %v8140_v61 = vrot.slane %v18327_v32, 3  ;;  %v7798_v23 = vrot.slane %v18335_v37, 2 }
 0x40a   : > { %14101 = vmatmul.mubr.msk.f32.gmra.mxu0 %vm3887_vm8, %v18734_v53  ;;  %14313 = vmatprep.subr.mxu1 %v7143_v22  ;;  %v18764_v16 = vsel %vm1121_vm2, %v7790_v19, %v7792_v52  ;;  %v18777_v19 = vld [vmem:[%s20164_s5 + $0x68] sm:$0x1]  ;;  %v8810_v53 = vrot.slane %v18257_v26, 5 }
 0x40b   : > { %14159 = vmatprep.mubr.msk.f32.mxu0 %vm3887_vm8, %v7789_v15  ;;  %v7794_v15 = vrot.slane %v18292_v44, 2  ;;  %20709 = vst [vmem:[#allocation62_spill] sm:$0xff] %v18764_v16  ;;  %14314 = vmatpush3.msra.mxu1 %v7143_v22 }
 0x40c   : > { %14215 = vmatmul.mubr.msk.f32.gmra.mxu1 %vm3887_vm8, %v8135_v39  ;;  %v7796_v39 = vrot.slane %v18282_v3, 2 }
 0x40d   : > { %14217 = vmatprep.mubr.msk.f32.mxu1 %vm3887_vm8, %v8137_v48  ;;  %v8142_v48 = vrot.slane %v18371_v13, 3 }
 0x40e   : > { %14160 = vmatmul.mubr.msk.f32.vlgmr.msra.gmra.mxu0 %vm3887_vm8, %v18754_v27  ;;  %v18788_v27 = vld [vmem:[%s20164_s5 + $0x78] sm:$0x1]  ;;  %v18794_v22 = vsel %vm1121_vm2, %v7794_v15, %v7796_v39 }
 0x40f   : > { %14260 = vmatpush3.msk.msra.mxu0 %vm3056_vm7, %v18323_v17  ;;  %14162 = vmatprep.mubr.msk.f32.mxu0 %vm3887_vm8, %v18764_v16  ;;  %v8141_v17 = vsel %vm1508_vm3, %v8138_v58, %v8140_v61  ;;  %v18782_v16 = vsel %vm1121_vm2, %v7792_v52, %v7794_v15  ;;  %20711 = vst [vmem:[#allocation95_spill] sm:$0xff] %v18794_v22  ;;  %v8144_v58 = vrot.slane %v18365_v14, 3 }
 0x410   : > { %14261 = vmatprep.subr.mxu0 %v7141_v34  ;;  %14218 = vmatmul.mubr.msk.f32.gmra.mxu1 %vm3887_vm8, %v8139_v2  ;;  %20710 = vst [vmem:[#allocation49_spill] sm:$0xff] %v18782_v16  ;;  %v8143_v52 = vsel %vm1508_vm3, %v8140_v61, %v8142_v48  ;;  %v8146_v2 = vrot.slane %v18406_v43, 3 }
 0x411   : > { %14262 = vmatpush3.msra.mxu0 %v7141_v34  ;;  %14220 = vmatprep.mubr.msk.f32.mxu1 %vm3887_vm8, %v8141_v17  ;;  %v7800_v34 = vrot.slane %v18327_v32, 2  ;;  %v8145_v15 = vsel %vm1508_vm3, %v8142_v48, %v8144_v58  ;;  %v18809_v17 = vsel %vm1121_vm2, %v7796_v39, %v7798_v23  ;;  %v7804_v39 = vrot.slane %v18365_v14, 2 }
 0x412   : > { %14163 = vmatmul.mubr.msk.f32.gmra.mxu0 %vm3887_vm8, %v18782_v16  ;;  %14363 = vmatprep.subr.msk.mxu0 %vm3056_vm7, %v18777_v19  ;;  %20712 = vst [vmem:[#allocation76_spill] sm:$0xff] %v18809_v17  ;;  %v8147_v48 = vsel %vm1508_vm3, %v8144_v58, %v8146_v2  ;;  %v8150_v16 = vrot.slane %v18441_v35, 3 }
 0x413   : > { %14165 = vmatprep.mubr.msk.f32.mxu0 %vm3887_vm8, %v18794_v22  ;;  %14415 = vmatprep.subr.msk.mxu1 %vm3056_vm7, %v18788_v27  ;;  %v7802_v22 = vrot.slane %v18371_v13, 2  ;;  %v18816_v61 = vsel %vm1121_vm2, %v7798_v23, %v7800_v34  ;;  %v7806_v23 = vrot.slane %v18406_v43, 2 }
 0x414   : > { %14221 = vmatmul.mubr.msk.f32.gmra.mxu1 %vm3887_vm8, %v8143_v52  ;;  %20713 = vst [vmem:[#allocation75_spill] sm:$0xff] %v18816_v61  ;;  %v8148_v52 = vrot.slane %v18400_v54, 3 }
 0x415   : > { %14223 = vmatprep.mubr.msk.f32.mxu1 %vm3887_vm8, %v8145_v15  ;;  %v18834_v58 = vsel %vm1121_vm2, %v7802_v22, %v7804_v39 }
 0x416   : > { %14166 = vmatmul.mubr.msk.f32.gmra.mxu0 %vm3887_vm8, %v18809_v17  ;;  %v8149_v15 = vsel %vm1508_vm3, %v8146_v2, %v8148_v52  ;;  %v18827_v17 = vsel %vm1121_vm2, %v7800_v34, %v7802_v22  ;;  %20715 = vst [vmem:[#allocation81_spill] sm:$0xff] %v18834_v58  ;;  %v8151_v2 = vsel %vm1508_vm3, %v8148_v52, %v8150_v16  ;;  %v7808_v34 = vrot.slane %v18400_v54, 2 }
 0x417   : > { %14168 = vmatprep.mubr.msk.f32.mxu0 %vm3887_vm8, %v18816_v61  ;;  %20714 = vst [vmem:[#allocation72_spill] sm:$0xff] %v18827_v17  ;;  %v8154_v61 = vrot.slane %v18475_v49, 3  ;;  %v7810_v22 = vrot.slane %v18441_v35, 2 }
 0x418   : > { %14224 = vmatmul.mubr.msk.f32.gmra.mxu1 %vm3887_vm8, %v8147_v48  ;;  %v8152_v48 = vrot.slane %v18435_v55, 3  ;;  %v18852_v52 = vsel %vm1121_vm2, %v7806_v23, %v7808_v34 }
 0x419   : > { %14226 = vmatprep.mubr.msk.f32.mxu1 %vm3887_vm8, %v8149_v15  ;;  %20717 = vst [vmem:[#allocation51_spill] sm:$0xff] %v18852_v52 }
 0x41a   : > { %14169 = vmatmul.mubr.msk.f32.gmra.mxu0 %vm3887_vm8, %v18827_v17  ;;  %v8153_v15 = vsel %vm1508_vm3, %v8150_v16, %v8152_v48  ;;  %v18845_v17 = vsel %vm1121_vm2, %v7804_v39, %v7806_v23  ;;  %v8155_v16 = vsel %vm1508_vm3, %v8152_v48, %v8154_v61  ;;  %v7812_v39 = vrot.slane %v18435_v55, 2 }
 0x41b   : > { %14171 = vmatprep.mubr.msk.f32.mxu0 %vm3887_vm8, %v18834_v58  ;;  %20716 = vst [vmem:[#allocation32_spill] sm:$0xff] %v18845_v17  ;;  %v8158_v58 = vrot.slane %v18507_v47, 3  ;;  %v7814_v23 = vrot.slane %v18475_v49, 2 }
 0x41c   : > { %14227 = vmatmul.mubr.msk.f32.gmra.mxu1 %vm3887_vm8, %v8151_v2  ;;  %v8156_v2 = vrot.slane %v18469_v24, 3  ;;  %v18870_v48 = vsel %vm1121_vm2, %v7810_v22, %v7812_v39 }
 0x41d   : > { %14229 = vmatprep.mubr.msk.f32.mxu1 %vm3887_vm8, %v8153_v15  ;;  %20719 = vst [vmem:[#allocation68_spill] sm:$0xff] %v18870_v48 }
 0x41e   : > { %14172 = vmatmul.mubr.msk.f32.gmra.mxu0 %vm3887_vm8, %v18845_v17  ;;  %v8157_v15 = vsel %vm1508_vm3, %v8154_v61, %v8156_v2  ;;  %v18863_v17 = vsel %vm1121_vm2, %v7808_v34, %v7810_v22  ;;  %v8159_v61 = vsel %vm1508_vm3, %v8156_v2, %v8158_v58  ;;  %v7816_v34 = vrot.slane %v18469_v24, 2 }
 0x41f   : > { %14174 = vmatprep.mubr.msk.f32.mxu0 %vm3887_vm8, %v18852_v52  ;;  %20718 = vst [vmem:[#allocation23_spill] sm:$0xff] %v18863_v17  ;;  %v8162_v52 = vrot.slane %v18537_v42, 3  ;;  %v7818_v22 = vrot.slane %v18507_v47, 2 }
 0x420   : > { %14230 = vmatmul.mubr.msk.f32.gmra.mxu1 %vm3887_vm8, %v8155_v16  ;;  %v8160_v16 = vrot.slane %v18501_v46, 3  ;;  %v18888_v2 = vsel %vm1121_vm2, %v7814_v23, %v7816_v34 }
 0x421   : > { %14232 = vmatprep.mubr.msk.f32.mxu1 %vm3887_vm8, %v8157_v15  ;;  %20721 = vst [vmem:[#allocation26_spill] sm:$0xff] %v18888_v2 }
 0x422   : > { %14175 = vmatmul.mubr.msk.f32.gmra.mxu0 %vm3887_vm8, %v18863_v17  ;;  %v8161_v15 = vsel %vm1508_vm3, %v8158_v58, %v8160_v16  ;;  %v18881_v17 = vsel %vm1121_vm2, %v7812_v39, %v7814_v23  ;;  %v8163_v58 = vsel %vm1508_vm3, %v8160_v16, %v8162_v52  ;;  %v7820_v39 = vrot.slane %v18501_v46, 2 }
 0x423   : > { %14177 = vmatprep.mubr.msk.f32.mxu0 %vm3887_vm8, %v18870_v48  ;;  %20720 = vst [vmem:[#allocation80_spill] sm:$0xff] %v18881_v17  ;;  %v8166_v48 = vrot.slane %v18567_v28, 3  ;;  %v7822_v23 = vrot.slane %v18537_v42, 2 }
 0x424   : > { %14233 = vmatmul.mubr.msk.f32.gmra.mxu1 %vm3887_vm8, %v8159_v61  ;;  %v8164_v61 = vrot.slane %v18533_v45, 3  ;;  %v18906_v16 = vsel %vm1121_vm2, %v7818_v22, %v7820_v39 }
 0x425   : > { %14235 = vmatprep.mubr.msk.f32.mxu1 %vm3887_vm8, %v8161_v15  ;;  %20723 = vst [vmem:[#allocation77_spill] sm:$0xff] %v18906_v16 }
 0x426   : > { %14178 = vmatmul.mubr.msk.f32.gmra.mxu0 %vm3887_vm8, %v18881_v17  ;;  %v8165_v15 = vsel %vm1508_vm3, %v8162_v52, %v8164_v61  ;;  %v18899_v17 = vsel %vm1121_vm2, %v7816_v34, %v7818_v22  ;;  %v8167_v52 = vsel %vm1508_vm3, %v8164_v61, %v8166_v48  ;;  %v7824_v34 = vrot.slane %v18533_v45, 2 }
 0x427   : > { %14180 = vmatprep.mubr.msk.f32.mxu0 %vm3887_vm8, %v18888_v2  ;;  %20722 = vst [vmem:[#allocation84_spill] sm:$0xff] %v18899_v17  ;;  %v8170_v2 = vrot.slane %v18596_v21, 3  ;;  %v7826_v22 = vrot.slane %v18567_v28, 2 }
 0x428   : > { %14236 = vmatmul.mubr.msk.f32.gmra.mxu1 %vm3887_vm8, %v8163_v58  ;;  %v8168_v58 = vrot.slane %v18563_v30, 3  ;;  %v18924_v61 = vsel %vm1121_vm2, %v7822_v23, %v7824_v34 }
 0x429   : > { %14238 = vmatprep.mubr.msk.f32.mxu1 %vm3887_vm8, %v8165_v15  ;;  %20725 = vst [vmem:[#allocation24_spill] sm:$0xff] %v18924_v61 }
 0x42a   : > { %14181 = vmatmul.mubr.msk.f32.gmra.mxu0 %vm3887_vm8, %v18899_v17  ;;  %v8169_v15 = vsel %vm1508_vm3, %v8166_v48, %v8168_v58  ;;  %v18917_v17 = vsel %vm1121_vm2, %v7820_v39, %v7822_v23  ;;  %v8171_v48 = vsel %vm1508_vm3, %v8168_v58, %v8170_v2  ;;  %v7828_v39 = vrot.slane %v18563_v30, 2 }
 0x42b   : > { %14183 = vmatprep.mubr.msk.f32.mxu0 %vm3887_vm8, %v18906_v16  ;;  %20724 = vst [vmem:[#allocation74_spill] sm:$0xff] %v18917_v17  ;;  %v8174_v16 = vrot.slane %v18623_v12, 3  ;;  %v7830_v23 = vrot.slane %v18596_v21, 2 }
 0x42c   : > { %14239 = vmatmul.mubr.msk.f32.gmra.mxu1 %vm3887_vm8, %v8167_v52  ;;  %v8172_v52 = vrot.slane %v18592_v25, 3  ;;  %v18942_v58 = vsel %vm1121_vm2, %v7826_v22, %v7828_v39 }
 0x42d   : > { %14241 = vmatprep.mubr.msk.f32.mxu1 %vm3887_vm8, %v8169_v15  ;;  %20727 = vst [vmem:[#allocation29_spill] sm:$0xff] %v18942_v58 }
 0x42e   : > { %14184 = vmatmul.mubr.msk.f32.gmra.mxu0 %vm3887_vm8, %v18917_v17  ;;  %v8173_v15 = vsel %vm1508_vm3, %v8170_v2, %v8172_v52  ;;  %v18935_v17 = vsel %vm1121_vm2, %v7824_v34, %v7826_v22  ;;  %v8175_v2 = vsel %vm1508_vm3, %v8172_v52, %v8174_v16  ;;  %v7832_v34 = vrot.slane %v18592_v25, 2 }
 0x42f   : > { %14186 = vmatprep.mubr.msk.f32.mxu0 %vm3887_vm8, %v18924_v61  ;;  %20726 = vst [vmem:[#allocation57_spill] sm:$0xff] %v18935_v17  ;;  %v8178_v61 = vrot.slane %v18646_v40, 3  ;;  %v7834_v22 = vrot.slane %v18623_v12, 2 }
 0x430   : > { %14242 = vmatmul.mubr.msk.f32.gmra.mxu1 %vm3887_vm8, %v8171_v48  ;;  %v8176_v48 = vrot.slane %v18620_v4, 3  ;;  %v18960_v52 = vsel %vm1121_vm2, %v7830_v23, %v7832_v34 }
 0x431   : > { %14244 = vmatprep.mubr.msk.f32.mxu1 %vm3887_vm8, %v8173_v15  ;;  %20729 = vst [vmem:[#allocation55_spill] sm:$0xff] %v18960_v52 }
 0x432   : > { %14187 = vmatmul.mubr.msk.f32.gmra.mxu0 %vm3887_vm8, %v18935_v17  ;;  %v8177_v15 = vsel %vm1508_vm3, %v8174_v16, %v8176_v48  ;;  %v18953_v17 = vsel %vm1121_vm2, %v7828_v39, %v7830_v23  ;;  %v8179_v16 = vsel %vm1508_vm3, %v8176_v48, %v8178_v61  ;;  %v7836_v39 = vrot.slane %v18620_v4, 2 }
 0x433   : > { %14189 = vmatprep.mubr.msk.f32.mxu0 %vm3887_vm8, %v18942_v58  ;;  %20728 = vst [vmem:[#allocation42_spill] sm:$0xff] %v18953_v17  ;;  %v8182_v58 = vrot.slane %v18668_v6, 3  ;;  %v7838_v23 = vrot.slane %v18646_v40, 2 }
 0x434   : > { %14245 = vmatmul.mubr.msk.f32.gmra.mxu1 %vm3887_vm8, %v8175_v2  ;;  %v8180_v2 = vrot.slane %v18643_v63, 3  ;;  %v18978_v48 = vsel %vm1121_vm2, %v7834_v22, %v7836_v39 }
 0x435   : > { %14247 = vmatprep.mubr.msk.f32.mxu1 %vm3887_vm8, %v8177_v15  ;;  %20731 = vst [vmem:[#allocation97_spill] sm:$0xff] %v18978_v48 }
 0x436   : > { %14190 = vmatmul.mubr.msk.f32.gmra.mxu0 %vm3887_vm8, %v18953_v17  ;;  %v8181_v15 = vsel %vm1508_vm3, %v8178_v61, %v8180_v2  ;;  %v18971_v17 = vsel %vm1121_vm2, %v7832_v34, %v7834_v22  ;;  %v8183_v61 = vsel %vm1508_vm3, %v8180_v2, %v8182_v58  ;;  %v7840_v34 = vrot.slane %v18643_v63, 2 }
 0x437   : > { %14192 = vmatprep.mubr.msk.f32.mxu0 %vm3887_vm8, %v18960_v52  ;;  %20730 = vst [vmem:[#allocation53_spill] sm:$0xff] %v18971_v17  ;;  %v8186_v52 = vrot.slane %v18690_v36, 3  ;;  %v7842_v22 = vrot.slane %v18668_v6, 2 }
 0x438   : > { %14248 = vmatmul.mubr.msk.f32.gmra.mxu1 %vm3887_vm8, %v8179_v16  ;;  %v8184_v16 = vrot.slane %v18659_v56, 3  ;;  %v18996_v2 = vsel %vm1121_vm2, %v7838_v23, %v7840_v34 }
 0x439   : > { %14250 = vmatprep.mubr.msk.f32.mxu1 %vm3887_vm8, %v8181_v15  ;;  %20733 = vst [vmem:[#allocation88_spill] sm:$0xff] %v18996_v2 }
 0x43a   : > { %14193 = vmatmul.mubr.msk.f32.gmra.mxu0 %vm3887_vm8, %v18971_v17  ;;  %v8185_v15 = vsel %vm1508_vm3, %v8182_v58, %v8184_v16  ;;  %v18989_v17 = vsel %vm1121_vm2, %v7836_v39, %v7838_v23  ;;  %v8187_v58 = vsel %vm1508_vm3, %v8184_v16, %v8186_v52  ;;  %v7844_v39 = vrot.slane %v18659_v56, 2 }
 0x43b   : > { %14195 = vmatprep.mubr.msk.f32.mxu0 %vm3887_vm8, %v18978_v48  ;;  %20732 = vst [vmem:[#allocation25_spill] sm:$0xff] %v18989_v17  ;;  %v7846_v23 = vrot.slane %v18690_v36, 2 }
 0x43c   : > { %14251 = vmatmul.mubr.msk.f32.gmra.mxu1 %vm3887_vm8, %v8183_v61  ;;  %v8188_v61 = vrot.slane %v18681_v5, 3  ;;  %v19014_v16 = vsel %vm1121_vm2, %v7842_v22, %v7844_v39 }
 0x43d   : > { %14253 = vmatprep.mubr.msk.f32.mxu1 %vm3887_vm8, %v8185_v15  ;;  %v19006_v15 = vsel %vm1121_vm2, %v7840_v34, %v7842_v22  ;;  %20735 = vst [vmem:[#allocation33_spill] sm:$0xff] %v19014_v16 }
 0x43e   : > { %14196 = vmatmul.mubr.msk.f32.gmra.mxu0 %vm3887_vm8, %v18989_v17  ;;  %v8189_v48 = vsel %vm1508_vm3, %v8186_v52, %v8188_v61  ;;  %20734 = vst [vmem:[#allocation50_spill] sm:$0xff] %v19006_v15  ;;  %v8807_v17 = vrot.slane %v18225_v18, 5  ;;  %v8808_v52 = vrot.slane %v18210_v9, 5 }
 0x43f   : > { %14198 = vmatprep.mubr.msk.f32.mxu0 %vm3887_vm8, %v18996_v2  ;;  %v7848_v2 = vrot.slane %v18681_v5, 2 }
 0x440   : > { %14254 = vmatmul.mubr.msk.f32.gmra.mxu1 %vm3887_vm8, %v8187_v58  ;;  %v20736_v58 = vld [vmem:[#allocation11_spill] sm:$0xff] }
 0x441   : > { %14256 = vmatprep.mubr.msk.f32.mxu1 %vm3887_vm8, %v8189_v48  ;;  %v8190_v34 = vsel %vm1508_vm3, %v8188_v61, %v20736_v58  ;;  %v8809_v48 = vsel %vm2282_vm5, %v8807_v17, %v8808_v52  ;;  %v19032_v22 = vsel %vm1121_vm2, %v7846_v23, %v7848_v2  ;;  %v8467_v61 = vrot.slane %v18225_v18, 4 }
 0x442   : > { %14199 = vmatmul.mubr.msk.f32.gmra.mxu0 %vm3887_vm8, %v19006_v15  ;;  %v19026_v15 = vsel %vm1121_vm2, %v7844_v39, %v7846_v23  ;;  %20738 = vst [vmem:[#allocation98_spill] sm:$0xff] %v19032_v22  ;;  %v8812_v58 = vrot.slane %v18250_v10, 5  ;;  %v8811_v17 = vsel %vm2282_vm5, %v8808_v52, %v8810_v53  ;;  %v8468_v39 = vrot.slane %v18210_v9, 4 }
 0x443   : > { %14201 = vmatprep.mubr.msk.f32.mxu0 %vm3887_vm8, %v19014_v16  ;;  %20737 = vst [vmem:[#allocation100_spill] sm:$0xff] %v19026_v15  ;;  %v8470_v16 = vrot.slane %v18257_v26, 4 }
 0x444   : > { %14257 = vmatmul.mubr.msk.f32.gmra.mxu1 %vm3887_vm8, %v8190_v34  ;;  %v8814_v34 = vrot.slane %v18292_v44, 5  ;;  %v8469_v52 = vsel %vm1895_vm4, %v8467_v61, %v8468_v39 }
 0x445   : > { %14315 = vmatprep.mubr.msk.f32.mxu1 %vm3887_vm8, %v8809_v48  ;;  %v8813_v48 = vsel %vm2282_vm5, %v8810_v53, %v8812_v58  ;;  %v8816_v53 = vrot.slane %v18282_v3, 5  ;;  %v8471_v61 = vsel %vm1895_vm4, %v8468_v39, %v8470_v16 }
 0x446   : > { %14202 = vmatmul.mubr.msk.f32.gmra.mxu0 %vm3887_vm8, %v19026_v15  ;;  %v20739_v15 = vld [vmem:[#allocation10_spill] sm:$0xff] }
 0x447   : > { %14204 = vmatprep.mubr.msk.f32.mxu0 %vm3887_vm8, %v19032_v22  ;;  %v19045_v23 = vsel %vm1121_vm2, %v7848_v2, %v20739_v15  ;;  %v7147_v22 = vld [vmem:[%s20164_s5 + $0x70] sm:$0xff]  ;;  %v8815_v2 = vsel %vm2282_vm5, %v8812_v58, %v8814_v34  ;;  %v8818_v15 = vrot.slane %v18335_v37, 5  ;;  %v8820_v58 = vrot.slane %v18327_v32, 5 }
 0x448   : > { %14316 = vmatmul.mubr.msk.f32.vlgmr.msra.gmra.mxu1 %vm3887_vm8, %v8811_v17  ;;  %20740 = vst [vmem:[#allocation48_spill] sm:$0xff] %v19045_v23  ;;  %v8472_v17 = vrot.slane %v18250_v10, 4 }
 0x449   : > { %14318 = vmatprep.mubr.msk.f32.mxu1 %vm3887_vm8, %v8813_v48  ;;  %14416 = vmatpush3.msk.msra.mxu1 %vm3056_vm7, %v18788_v27  ;;  %v8817_v48 = vsel %vm2282_vm5, %v8814_v34, %v8816_v53  ;;  %v8819_v39 = vsel %vm2282_vm5, %v8816_v53, %v8818_v15  ;;  %v8476_v34 = vrot.slane %v18282_v3, 4  ;;  %v19091_v53 = vld [vmem:[%s20164_s5 + $0x98] sm:$0x1] }
 0x44a   : > { %14205 = vmatmul.mubr.msk.f32.gmra.mxu0 %vm3887_vm8, %v19045_v23  ;;  %14417 = vmatprep.subr.mxu1 %v7147_v22  ;;  %v7145_v23 = vld [vmem:[%s20164_s5 + $0x60] sm:$0xff]  ;;  %v8473_v27 = vsel %vm1895_vm4, %v8470_v16, %v8472_v17 }
 0x44b   : > { %14263 = vmatprep.mubr.msk.f32.mxu0 %vm3887_vm8, %v8469_v52  ;;  %v8474_v52 = vrot.slane %v18292_v44, 4  ;;  %14418 = vmatpush3.msra.mxu1 %v7147_v22 }
 0x44c   : > { %14319 = vmatmul.mubr.msk.f32.gmra.mxu1 %vm3887_vm8, %v8815_v2  ;;  %v8822_v2 = vrot.slane %v18371_v13, 5  ;;  %14519 = vmatprep.subr.msk.mxu1 %vm3056_vm7, %v19091_v53 }
 0x44d   : > { %14321 = vmatprep.mubr.msk.f32.mxu1 %vm3887_vm8, %v8817_v48  ;;  %v19082_v48 = vld [vmem:[%s20164_s5 + $0x88] sm:$0x1]  ;;  %v8475_v16 = vsel %vm1895_vm4, %v8472_v17, %v8474_v52  ;;  %v8477_v22 = vsel %vm1895_vm4, %v8474_v52, %v8476_v34  ;;  %v8480_v17 = vrot.slane %v18327_v32, 4 }
 0x44e   : > { %14264 = vmatmul.mubr.msk.f32.vlgmr.msra.gmra.mxu0 %vm3887_vm8, %v8471_v61  ;;  %v8478_v61 = vrot.slane %v18335_v37, 4 }
 0x44f   : > { %14364 = vmatpush3.msk.msra.mxu0 %vm3056_vm7, %v18777_v19  ;;  %14266 = vmatprep.mubr.msk.f32.mxu0 %vm3887_vm8, %v8473_v27  ;;  %v8821_v19 = vsel %vm2282_vm5, %v8818_v15, %v8820_v58  ;;  %v8824_v15 = vrot.slane %v18365_v14, 5  ;;  %v8826_v27 = vrot.slane %v18406_v43, 5 }
 0x450   : > { %14365 = vmatprep.subr.mxu0 %v7145_v23  ;;  %14322 = vmatmul.mubr.msk.f32.gmra.mxu1 %vm3887_vm8, %v8819_v39  ;;  %v8479_v39 = vsel %vm1895_vm4, %v8476_v34, %v8478_v61 }
 0x451   : > { %14366 = vmatpush3.msra.mxu0 %v7145_v23  ;;  %14324 = vmatprep.mubr.msk.f32.mxu1 %vm3887_vm8, %v8821_v19  ;;  %v8823_v23 = vsel %vm2282_vm5, %v8820_v58, %v8822_v2  ;;  %v8825_v52 = vsel %vm2282_vm5, %v8822_v2, %v8824_v15  ;;  %v8482_v19 = vrot.slane %v18371_v13, 4  ;;  %v8481_v58 = vsel %vm1895_vm4, %v8478_v61, %v8480_v17 }
 0x452   : > { %14267 = vmatmul.mubr.msk.f32.gmra.mxu0 %vm3887_vm8, %v8475_v16  ;;  %14467 = vmatprep.subr.msk.mxu0 %vm3056_vm7, %v19082_v48  ;;  %v8828_v16 = vrot.slane %v18400_v54, 5  ;;  %v8830_v2 = vrot.slane %v18441_v35, 5 }
 0x453   : > { %14269 = vmatprep.mubr.msk.f32.mxu0 %vm3887_vm8, %v8477_v22  ;;  %v8827_v22 = vsel %vm2282_vm5, %v8824_v15, %v8826_v27  ;;  %v8832_v15 = vrot.slane %v18435_v55, 5 }
 0x454   : > { %14325 = vmatmul.mubr.msk.f32.gmra.mxu1 %vm3887_vm8, %v8823_v23  ;;  %v8484_v23 = vrot.slane %v18365_v14, 4  ;;  %v8829_v34 = vsel %vm2282_vm5, %v8826_v27, %v8828_v16  ;;  %v8834_v27 = vrot.slane %v18475_v49, 5 }
 0x455   : > { %14327 = vmatprep.mubr.msk.f32.mxu1 %vm3887_vm8, %v8825_v52  ;;  %v8483_v52 = vsel %vm1895_vm4, %v8480_v17, %v8482_v19  ;;  %v8833_v17 = vsel %vm2282_vm5, %v8830_v2, %v8832_v15 }
 0x456   : > { %14270 = vmatmul.mubr.msk.f32.gmra.mxu0 %vm3887_vm8, %v8479_v39  ;;  %v8486_v39 = vrot.slane %v18406_v43, 4  ;;  %v8485_v61 = vsel %vm1895_vm4, %v8482_v19, %v8484_v23 }
 0x457   : > { %14272 = vmatprep.mubr.msk.f32.mxu0 %vm3887_vm8, %v8481_v58  ;;  %v8831_v58 = vsel %vm2282_vm5, %v8828_v16, %v8830_v2  ;;  %v8836_v16 = vrot.slane %v18469_v24, 5  ;;  %v8838_v2 = vrot.slane %v18507_v47, 5 }
 0x458   : > { %14328 = vmatmul.mubr.msk.f32.gmra.mxu1 %vm3887_vm8, %v8827_v22  ;;  %v8488_v22 = vrot.slane %v18400_v54, 4 }
 0x459   : > { %14330 = vmatprep.mubr.msk.f32.mxu1 %vm3887_vm8, %v8829_v34  ;;  %v8487_v34 = vsel %vm1895_vm4, %v8484_v23, %v8486_v39  ;;  %v8837_v23 = vsel %vm2282_vm5, %v8834_v27, %v8836_v16 }
 0x45a   : > { %14273 = vmatmul.mubr.msk.f32.gmra.mxu0 %vm3887_vm8, %v8483_v52  ;;  %v8490_v52 = vrot.slane %v18441_v35, 4  ;;  %v8489_v19 = vsel %vm1895_vm4, %v8486_v39, %v8488_v22 }
 0x45b   : > { %14275 = vmatprep.mubr.msk.f32.mxu0 %vm3887_vm8, %v8485_v61  ;;  %v8835_v61 = vsel %vm2282_vm5, %v8832_v15, %v8834_v27  ;;  %v8840_v15 = vrot.slane %v18501_v46, 5  ;;  %v8842_v27 = vrot.slane %v18537_v42, 5 }
 0x45c   : > { %14331 = vmatmul.mubr.msk.f32.gmra.mxu1 %vm3887_vm8, %v8831_v58  ;;  %v8492_v58 = vrot.slane %v18435_v55, 4 }
 0x45d   : > { %14333 = vmatprep.mubr.msk.f32.mxu1 %vm3887_vm8, %v8833_v17  ;;  %v8491_v17 = vsel %vm1895_vm4, %v8488_v22, %v8490_v52  ;;  %v8841_v22 = vsel %vm2282_vm5, %v8838_v2, %v8840_v15 }
 0x45e   : > { %14276 = vmatmul.mubr.msk.f32.gmra.mxu0 %vm3887_vm8, %v8487_v34  ;;  %v8494_v34 = vrot.slane %v18475_v49, 4  ;;  %v8493_v39 = vsel %vm1895_vm4, %v8490_v52, %v8492_v58 }
 0x45f   : > { %14278 = vmatprep.mubr.msk.f32.mxu0 %vm3887_vm8, %v8489_v19  ;;  %v8839_v19 = vsel %vm2282_vm5, %v8836_v16, %v8838_v2  ;;  %v8844_v16 = vrot.slane %v18533_v45, 5  ;;  %v8846_v2 = vrot.slane %v18567_v28, 5 }
 0x460   : > { %14334 = vmatmul.mubr.msk.f32.gmra.mxu1 %vm3887_vm8, %v8835_v61  ;;  %v8496_v61 = vrot.slane %v18469_v24, 4 }
 0x461   : > { %14336 = vmatprep.mubr.msk.f32.mxu1 %vm3887_vm8, %v8837_v23  ;;  %v8495_v23 = vsel %vm1895_vm4, %v8492_v58, %v8494_v34  ;;  %v8845_v58 = vsel %vm2282_vm5, %v8842_v27, %v8844_v16 }
 0x462   : > { %14279 = vmatmul.mubr.msk.f32.gmra.mxu0 %vm3887_vm8, %v8491_v17  ;;  %v8498_v17 = vrot.slane %v18507_v47, 4  ;;  %v8497_v52 = vsel %vm1895_vm4, %v8494_v34, %v8496_v61 }
 0x463   : > { %14281 = vmatprep.mubr.msk.f32.mxu0 %vm3887_vm8, %v8493_v39  ;;  %v8843_v39 = vsel %vm2282_vm5, %v8840_v15, %v8842_v27  ;;  %v8848_v15 = vrot.slane %v18563_v30, 5  ;;  %v8850_v27 = vrot.slane %v18596_v21, 5 }
 0x464   : > { %14337 = vmatmul.mubr.msk.f32.gmra.mxu1 %vm3887_vm8, %v8839_v19  ;;  %v8500_v19 = vrot.slane %v18501_v46, 4 }
 0x465   : > { %14339 = vmatprep.mubr.msk.f32.mxu1 %vm3887_vm8, %v8841_v22  ;;  %v8499_v22 = vsel %vm1895_vm4, %v8496_v61, %v8498_v17  ;;  %v8849_v61 = vsel %vm2282_vm5, %v8846_v2, %v8848_v15 }
 0x466   : > { %14282 = vmatmul.mubr.msk.f32.gmra.mxu0 %vm3887_vm8, %v8495_v23  ;;  %v8502_v23 = vrot.slane %v18537_v42, 4  ;;  %v8501_v34 = vsel %vm1895_vm4, %v8498_v17, %v8500_v19 }
 0x467   : > { %14284 = vmatprep.mubr.msk.f32.mxu0 %vm3887_vm8, %v8497_v52  ;;  %v8847_v52 = vsel %vm2282_vm5, %v8844_v16, %v8846_v2  ;;  %v8852_v16 = vrot.slane %v18592_v25, 5  ;;  %v8854_v2 = vrot.slane %v18623_v12, 5 }
 0x468   : > { %14340 = vmatmul.mubr.msk.f32.gmra.mxu1 %vm3887_vm8, %v8843_v39  ;;  %v8504_v39 = vrot.slane %v18533_v45, 4 }
 0x469   : > { %14342 = vmatprep.mubr.msk.f32.mxu1 %vm3887_vm8, %v8845_v58  ;;  %v8503_v58 = vsel %vm1895_vm4, %v8500_v19, %v8502_v23  ;;  %v8853_v19 = vsel %vm2282_vm5, %v8850_v27, %v8852_v16 }
 0x46a   : > { %14285 = vmatmul.mubr.msk.f32.gmra.mxu0 %vm3887_vm8, %v8499_v22  ;;  %v8506_v22 = vrot.slane %v18567_v28, 4  ;;  %v8505_v17 = vsel %vm1895_vm4, %v8502_v23, %v8504_v39 }
 0x46b   : > { %14287 = vmatprep.mubr.msk.f32.mxu0 %vm3887_vm8, %v8501_v34  ;;  %v8851_v34 = vsel %vm2282_vm5, %v8848_v15, %v8850_v27  ;;  %v8856_v15 = vrot.slane %v18620_v4, 5  ;;  %v8858_v27 = vrot.slane %v18646_v40, 5 }
 0x46c   : > { %14343 = vmatmul.mubr.msk.f32.gmra.mxu1 %vm3887_vm8, %v8847_v52  ;;  %v8508_v52 = vrot.slane %v18563_v30, 4 }
 0x46d   : > { %14345 = vmatprep.mubr.msk.f32.mxu1 %vm3887_vm8, %v8849_v61  ;;  %v8507_v61 = vsel %vm1895_vm4, %v8504_v39, %v8506_v22  ;;  %v8857_v39 = vsel %vm2282_vm5, %v8854_v2, %v8856_v15 }
 0x46e   : > { %14288 = vmatmul.mubr.msk.f32.gmra.mxu0 %vm3887_vm8, %v8503_v58  ;;  %v8510_v58 = vrot.slane %v18596_v21, 4  ;;  %v8509_v23 = vsel %vm1895_vm4, %v8506_v22, %v8508_v52 }
 0x46f   : > { %14290 = vmatprep.mubr.msk.f32.mxu0 %vm3887_vm8, %v8505_v17  ;;  %v8855_v17 = vsel %vm2282_vm5, %v8852_v16, %v8854_v2  ;;  %v8860_v16 = vrot.slane %v18643_v63, 5  ;;  %v8862_v2 = vrot.slane %v18668_v6, 5 }
 0x470   : > { %14346 = vmatmul.mubr.msk.f32.gmra.mxu1 %vm3887_vm8, %v8851_v34  ;;  %v8512_v34 = vrot.slane %v18592_v25, 4 }
 0x471   : > { %14348 = vmatprep.mubr.msk.f32.mxu1 %vm3887_vm8, %v8853_v19  ;;  %v8511_v19 = vsel %vm1895_vm4, %v8508_v52, %v8510_v58  ;;  %v8861_v52 = vsel %vm2282_vm5, %v8858_v27, %v8860_v16 }
 0x472   : > { %14291 = vmatmul.mubr.msk.f32.gmra.mxu0 %vm3887_vm8, %v8507_v61  ;;  %v8514_v61 = vrot.slane %v18623_v12, 4  ;;  %v8513_v22 = vsel %vm1895_vm4, %v8510_v58, %v8512_v34 }
 0x473   : > { %14293 = vmatprep.mubr.msk.f32.mxu0 %vm3887_vm8, %v8509_v23  ;;  %v8859_v23 = vsel %vm2282_vm5, %v8856_v15, %v8858_v27  ;;  %v8864_v15 = vrot.slane %v18659_v56, 5  ;;  %v8866_v27 = vrot.slane %v18690_v36, 5 }
 0x474   : > { %14349 = vmatmul.mubr.msk.f32.gmra.mxu1 %vm3887_vm8, %v8855_v17  ;;  %v8516_v17 = vrot.slane %v18620_v4, 4 }
 0x475   : > { %14351 = vmatprep.mubr.msk.f32.mxu1 %vm3887_vm8, %v8857_v39  ;;  %v8515_v39 = vsel %vm1895_vm4, %v8512_v34, %v8514_v61  ;;  %v8865_v34 = vsel %vm2282_vm5, %v8862_v2, %v8864_v15 }
 0x476   : > { %14294 = vmatmul.mubr.msk.f32.gmra.mxu0 %vm3887_vm8, %v8511_v19  ;;  %v8518_v19 = vrot.slane %v18646_v40, 4  ;;  %v8517_v58 = vsel %vm1895_vm4, %v8514_v61, %v8516_v17 }
 0x477   : > { %14296 = vmatprep.mubr.msk.f32.mxu0 %vm3887_vm8, %v8513_v22  ;;  %v8863_v22 = vsel %vm2282_vm5, %v8860_v16, %v8862_v2  ;;  %v8868_v16 = vrot.slane %v18681_v5, 5 }
 0x478   : > { %14352 = vmatmul.mubr.msk.f32.gmra.mxu1 %vm3887_vm8, %v8859_v23  ;;  %v8520_v23 = vrot.slane %v18643_v63, 4 }
 0x479   : > { %14354 = vmatprep.mubr.msk.f32.mxu1 %vm3887_vm8, %v8861_v52  ;;  %v8519_v52 = vsel %vm1895_vm4, %v8516_v17, %v8518_v19  ;;  %v8869_v17 = vsel %vm2282_vm5, %v8866_v27, %v8868_v16 }
 0x47a   : > { %14297 = vmatmul.mubr.msk.f32.gmra.mxu0 %vm3887_vm8, %v8515_v39  ;;  %v8522_v39 = vrot.slane %v18668_v6, 4  ;;  %v8521_v61 = vsel %vm1895_vm4, %v8518_v19, %v8520_v23 }
 0x47b   : > { %14299 = vmatprep.mubr.msk.f32.mxu0 %vm3887_vm8, %v8517_v58  ;;  %v8867_v58 = vsel %vm2282_vm5, %v8864_v15, %v8866_v27  ;;  %v9488_v15 = vrot.slane %v18210_v9, 7  ;;  %v8528_v27 = vrot.slane %v18681_v5, 4 }
 0x47c   : > { %14355 = vmatmul.mubr.msk.f32.gmra.mxu1 %vm3887_vm8, %v8863_v22  ;;  %v8524_v22 = vrot.slane %v18659_v56, 4  ;;  %v8523_v2 = vsel %vm1895_vm4, %v8520_v23, %v8522_v39  ;;  %v9490_v23 = vrot.slane %v18257_v26, 7 }
 0x47d   : > { %14357 = vmatprep.mubr.msk.f32.mxu1 %vm3887_vm8, %v8865_v34  ;;  %v9487_v34 = vrot.slane %v18225_v18, 7 }
 0x47e   : > { %14300 = vmatmul.mubr.msk.f32.gmra.mxu0 %vm3887_vm8, %v8519_v52  ;;  %v8526_v52 = vrot.slane %v18690_v36, 4  ;;  %v8525_v19 = vsel %vm1895_vm4, %v8522_v39, %v8524_v22 }
 0x47f   : > { %14302 = vmatprep.mubr.msk.f32.mxu0 %vm3887_vm8, %v8521_v61  ;;  %v20741_v61 = vld [vmem:[#allocation13_spill] sm:$0xff]  ;;  %v9489_v0 = vsel %vm3056_vm7, %v9487_v34, %v9488_v15  ;;  %v9494_v34 = vrot.slane %v18292_v44, 7 }
 0x480   : > { %14358 = vmatmul.mubr.msk.f32.gmra.mxu1 %vm3887_vm8, %v8867_v58  ;;  %v8870_v58 = vsel %vm2282_vm5, %v8868_v16, %v20741_v61  ;;  %v8529_v39 = vsel %vm1895_vm4, %v8526_v52, %v8528_v27  ;;  %v9492_v16 = vrot.slane %v18250_v10, 7  ;;  %v9491_v61 = vsel %vm3056_vm7, %v9488_v15, %v9490_v23 }
 0x481   : > { %14360 = vmatprep.mubr.msk.f32.mxu1 %vm3887_vm8, %v8869_v17  ;;  %v8527_v17 = vsel %vm1895_vm4, %v8524_v22, %v8526_v52  ;;  %v20742_v22 = vld [vmem:[#allocation12_spill] sm:$0xff] }
 0x482   : > { %14303 = vmatmul.mubr.msk.f32.gmra.mxu0 %vm3887_vm8, %v8523_v2  ;;  %v9147_v2 = vrot.slane %v18225_v18, 6  ;;  %v8530_v52 = vsel %vm1895_vm4, %v8528_v27, %v20742_v22  ;;  %v9150_v18 = vrot.slane %v18257_v26, 6  ;;  %v9498_v22 = vrot.slane %v18335_v37, 7 }
 0x483   : > { %14305 = vmatprep.mubr.msk.f32.mxu0 %vm3887_vm8, %v8525_v19 }
 0x484   : > { %14361 = vmatmul.mubr.msk.f32.gmra.mxu1 %vm3887_vm8, %v8870_v58  ;;  %v9148_v58 = vrot.slane %v18210_v9, 6 }
 0x485   : > { %14419 = vmatprep.mubr.msk.f32.mxu1 %vm3887_vm8, %v9489_v0  ;;  %v9493_v0 = vsel %vm3056_vm7, %v9490_v23, %v9492_v16  ;;  %v9496_v23 = vrot.slane %v18282_v3, 7 }
 0x486   : > { %14306 = vmatmul.mubr.msk.f32.gmra.mxu0 %vm3887_vm8, %v8527_v17  ;;  %v7151_v17 = vld [vmem:[%s20164_s5 + $0x90] sm:$0xff] }
 0x487   : > { %14308 = vmatprep.mubr.msk.f32.mxu0 %vm3887_vm8, %v8529_v39  ;;  %v14109_v19 = vpop.f32.mrf.mxu1  ;;  %v9149_v39 = vsel %vm2669_vm6, %v9147_v2, %v9148_v58  ;;  %v9151_v2 = vsel %vm2669_vm6, %v9148_v58, %v9150_v18  ;;  %v9500_v58 = vrot.slane %v18327_v32, 7 }
 0x488   : > { %14420 = vmatmul.mubr.msk.f32.vlgmr.msra.gmra.mxu1 %vm3887_vm8, %v9491_v61  ;;  %v9495_v19 = vsel %vm3056_vm7, %v9492_v16, %v9494_v34  ;;  %v9152_v61 = vrot.slane %v18250_v10, 6 }
 0x489   : > { %14422 = vmatprep.mubr.msk.f32.mxu1 %vm3887_vm8, %v9493_v0  ;;  %v7652_v15 = vpop.f32.mrf.mxu1  ;;  %14520 = vmatpush3.msk.msra.mxu1 %vm3056_vm7, %v19091_v53  ;;  %v9497_v0 = vsel %vm3056_vm7, %v9494_v34, %v9496_v23  ;;  %v7149_v53 = vld [vmem:[%s20164_s5 + $0x80] sm:$0xff] }
 0x48a   : > { %14309 = vmatmul.mubr.msk.f32.gmra.mxu0 %vm3887_vm8, %v8530_v52  ;;  %14521 = vmatprep.subr.mxu1 %v7151_v17  ;;  %v9154_v52 = vrot.slane %v18292_v44, 6 }
 0x48b   : > { %14367 = vmatprep.mubr.msk.f32.mxu0 %vm3887_vm8, %v9149_v39  ;;  %v14112_v27 = vpop.f32.mrf.mxu1  ;;  %14522 = vmatpush3.msra.mxu1 %v7151_v17 }
 0x48c   : > { %14423 = vmatmul.mubr.msk.f32.gmra.mxu1 %vm3887_vm8, %v9495_v19  ;;  %v9153_v27 = vsel %vm2669_vm6, %v9150_v18, %v9152_v61  ;;  %v9499_v19 = vsel %vm3056_vm7, %v9496_v23, %v9498_v22  ;;  %v19300_v18 = vld [vmem:[%s20164_s5 + $0xa8] sm:$0x1]  ;;  %v9155_v23 = vsel %vm2669_vm6, %v9152_v61, %v9154_v52 }
 0x48d   : > { %14425 = vmatprep.mubr.msk.f32.mxu1 %vm3887_vm8, %v9497_v0  ;;  %v14057_v16 = vpop.f32.mrf.mxu0  ;;  %v7661_v39 = vpop.f32.mrf.mxu1  ;;  %v9502_v0 = vrot.slane %v18371_v13, 7 }
 0x48e   : > { %14368 = vmatmul.mubr.msk.f32.vlgmr.msra.gmra.mxu0 %vm3887_vm8, %v9151_v2  ;;  %v9501_v16 = vsel %vm3056_vm7, %v9498_v22, %v9500_v58  ;;  %v9158_v39 = vrot.slane %v18335_v37, 6 }
 0x48f   : > { %14468 = vmatpush3.msk.msra.mxu0 %vm3056_vm7, %v19082_v48  ;;  %14370 = vmatprep.mubr.msk.f32.mxu0 %vm3887_vm8, %v9153_v27  ;;  %v7384_v34 = vpop.f32.mrf.mxu0  ;;  %v9157_v27 = vsel %vm2669_vm6, %v9154_v52, %v9156_v51  ;;  %v9503_v61 = vsel %vm3056_vm7, %v9500_v58, %v9502_v0 }
 0x490   : > { %14469 = vmatprep.subr.mxu0 %v7149_v53  ;;  %v19302_v2 = vadd.f32 %v7652_v15, %v7384_v34  ;;  %v14115_v48 = vpop.f32.mrf.mxu1  ;;  %14426 = vmatmul.mubr.msk.f32.gmra.mxu1 %vm3887_vm8, %v9499_v19  ;;  %v9504_v15 = vrot.slane %v18365_v14, 7  ;;  %v9506_v34 = vrot.slane %v18406_v43, 7 }
 0x491   : > { %14470 = vmatpush3.msra.mxu0 %v7149_v53  ;;  %14428 = vmatprep.mubr.msk.f32.mxu1 %vm3887_vm8, %v9501_v16  ;;  %v14060_v17 = vpop.f32.mrf.mxu0  ;;  %v9160_v53 = vrot.slane %v18327_v32, 6  ;;  %v9159_v48 = vsel %vm2669_vm6, %v9156_v51, %v9158_v39  ;;  %v9162_v16 = vrot.slane %v18371_v13, 6  ;;  %v9510_v51 = vrot.slane %v18441_v35, 7 }
 0x492   : > { %14371 = vmatmul.mubr.msk.f32.gmra.mxu0 %vm3887_vm8, %v9155_v23  ;;  %v7669_v11 = vpop.f32.mrf.mxu1  ;;  %14571 = vmatprep.subr.msk.mxu0 %vm3056_vm7, %v19300_v18  ;;  %v9505_v52 = vsel %vm3056_vm7, %v9502_v0, %v9504_v15  ;;  %v9164_v0 = vrot.slane %v18365_v14, 6 }
 0x493   : > { %14373 = vmatprep.mubr.msk.f32.mxu0 %vm3887_vm8, %v9157_v27  ;;  %v7393_v22 = vpop.f32.mrf.mxu0  ;;  %v9161_v58 = vsel %vm2669_vm6, %v9158_v39, %v9160_v53  ;;  %v9508_v27 = vrot.slane %v18400_v54, 7  ;;  %v9163_v39 = vsel %vm2669_vm6, %v9160_v53, %v9162_v16  ;;  %v9514_v53 = vrot.slane %v18475_v49, 7 }
 0x494   : > { %v14118_v19 = vpop.f32.mrf.mxu1  ;;  %14429 = vmatmul.mubr.msk.f32.gmra.mxu1 %vm3887_vm8, %v9503_v61  ;;  %v9507_v61 = vsel %vm3056_vm7, %v9504_v15, %v9506_v34  ;;  %v9165_v15 = vsel %vm2669_vm6, %v9162_v16, %v9164_v0  ;;  %v9170_v16 = vrot.slane %v18441_v35, 6 }
 0x495   : > { %14431 = vmatprep.mubr.msk.f32.mxu1 %vm3887_vm8, %v9505_v52  ;;  %v14063_v23 = vpop.f32.mrf.mxu0 }
 0x496   : > { %14374 = vmatmul.mubr.msk.f32.gmra.mxu0 %vm3887_vm8, %v9159_v48  ;;  %v7678_v17 = vpop.f32.mrf.mxu1  ;;  %v9509_v48 = vsel %vm3056_vm7, %v9506_v34, %v9508_v27  ;;  %v9166_v23 = vrot.slane %v18406_v43, 6  ;;  %v9168_v34 = vrot.slane %v18400_v54, 6 }
 0x497   : > { %14376 = vmatprep.mubr.msk.f32.mxu0 %vm3887_vm8, %v9161_v58  ;;  %v7401_v22 = vpop.f32.mrf.mxu0 }
 0x498   : > { %v19330_v19 = vadd.f32 %v7669_v11, %v7401_v22  ;;  %v14121_v52 = vpop.f32.mrf.mxu1  ;;  %14432 = vmatmul.mubr.msk.f32.gmra.mxu1 %vm3887_vm8, %v9507_v61  ;;  %v9512_v11 = vrot.slane %v18435_v55, 7  ;;  %v9511_v61 = vsel %vm3056_vm7, %v9508_v27, %v9510_v51  ;;  %v9169_v27 = vsel %vm2669_vm6, %v9166_v23, %v9168_v34 }
 0x499   : > { %14434 = vmatprep.mubr.msk.f32.mxu1 %vm3887_vm8, %v9509_v48  ;;  %v14066_v58 = vpop.f32.mrf.mxu0 }
 0x49a   : > { %14377 = vmatmul.mubr.msk.f32.gmra.mxu0 %vm3887_vm8, %v9163_v39  ;;  %v7686_v17 = vpop.f32.mrf.mxu1  ;;  %v9513_v48 = vsel %vm3056_vm7, %v9510_v51, %v9512_v11  ;;  %v9167_v39 = vsel %vm2669_vm6, %v9164_v0, %v9166_v23  ;;  %v9172_v51 = vrot.slane %v18435_v55, 6  ;;  %v9518_v0 = vrot.slane %v18507_v47, 7 }
 0x49b   : > { %14379 = vmatprep.mubr.msk.f32.mxu0 %vm3887_vm8, %v9165_v15  ;;  %v7410_v22 = vpop.f32.mrf.mxu0  ;;  %v9171_v23 = vsel %vm2669_vm6, %v9168_v34, %v9170_v16  ;;  %v9522_v34 = vrot.slane %v18537_v42, 7 }
 0x49c   : > { %v14124_v52 = vpop.f32.mrf.mxu1  ;;  %14435 = vmatmul.mubr.msk.f32.gmra.mxu1 %vm3887_vm8, %v9511_v61  ;;  %v9516_v22 = vrot.slane %v18469_v24, 7  ;;  %v9515_v61 = vsel %vm3056_vm7, %v9512_v11, %v9514_v53  ;;  %v9173_v11 = vsel %vm2669_vm6, %v9170_v16, %v9172_v51  ;;  %v9178_v16 = vrot.slane %v18507_v47, 6 }
 0x49d   : > { %14437 = vmatprep.mubr.msk.f32.mxu1 %vm3887_vm8, %v9513_v48  ;;  %v14069_v58 = vpop.f32.mrf.mxu0 }
 0x49e   : > { %14380 = vmatmul.mubr.msk.f32.gmra.mxu0 %vm3887_vm8, %v9167_v39  ;;  %v7695_v15 = vpop.f32.mrf.mxu1  ;;  %v9517_v39 = vsel %vm3056_vm7, %v9514_v53, %v9516_v22  ;;  %v9174_v58 = vrot.slane %v18475_v49, 6  ;;  %v9176_v53 = vrot.slane %v18469_v24, 6 }
 0x49f   : > { %14382 = vmatprep.mubr.msk.f32.mxu0 %vm3887_vm8, %v9169_v27  ;;  %v7418_v52 = vpop.f32.mrf.mxu0 }
 0x4a0   : > { %v19356_v60 = vadd.f32 %v7686_v17, %v7418_v52  ;;  %v14127_v48 = vpop.f32.mrf.mxu1  ;;  %14438 = vmatmul.mubr.msk.f32.gmra.mxu1 %vm3887_vm8, %v9515_v61  ;;  %v9520_v17 = vrot.slane %v18501_v46, 7  ;;  %v9519_v61 = vsel %vm3056_vm7, %v9516_v22, %v9518_v0  ;;  %v9177_v22 = vsel %vm2669_vm6, %v9174_v58, %v9176_v53 }
 0x4a1   : > { %14440 = vmatprep.mubr.msk.f32.mxu1 %vm3887_vm8, %v9517_v39 }
 0x4a2   : > { %v14072_v27 = vpop.f32.mrf.mxu0  ;;  %14383 = vmatmul.mubr.msk.f32.gmra.mxu0 %vm3887_vm8, %v9171_v23  ;;  %v7703_v15 = vpop.f32.mrf.mxu1  ;;  %v9521_v39 = vsel %vm3056_vm7, %v9518_v0, %v9520_v17  ;;  %v9175_v23 = vsel %vm2669_vm6, %v9172_v51, %v9174_v58  ;;  %v9180_v0 = vrot.slane %v18501_v46, 6  ;;  %v9526_v51 = vrot.slane %v18567_v28, 7 }
 0x4a3   : > { %14385 = vmatprep.mubr.msk.f32.mxu0 %vm3887_vm8, %v9173_v11  ;;  %v9179_v58 = vsel %vm2669_vm6, %v9176_v53, %v9178_v16  ;;  %v9530_v53 = vrot.slane %v18596_v21, 7 }
 0x4a4   : > { %v7427_v52 = vpop.f32.mrf.mxu0  ;;  %v14130_v48 = vpop.f32.mrf.mxu1  ;;  %14441 = vmatmul.mubr.msk.f32.gmra.mxu1 %vm3887_vm8, %v9519_v61  ;;  %v9523_v61 = vsel %vm3056_vm7, %v9520_v17, %v9522_v34  ;;  %v9181_v17 = vsel %vm2669_vm6, %v9178_v16, %v9180_v0  ;;  %v9186_v16 = vrot.slane %v18567_v28, 6 }
 0x4a5   : > { %14443 = vmatprep.mubr.msk.f32.mxu1 %vm3887_vm8, %v9521_v39  ;;  %v9524_v52 = vrot.slane %v18533_v45, 7 }
 0x4a6   : > { %v14075_v27 = vpop.f32.mrf.mxu0  ;;  %14386 = vmatmul.mubr.msk.f32.gmra.mxu0 %vm3887_vm8, %v9175_v23  ;;  %v7712_v11 = vpop.f32.mrf.mxu1 }
 0x4a7   : > { %14388 = vmatprep.mubr.msk.f32.mxu0 %vm3887_vm8, %v9177_v22  ;;  %v9525_v23 = vsel %vm3056_vm7, %v9522_v34, %v9524_v52  ;;  %v9182_v27 = vrot.slane %v18537_v42, 6  ;;  %v9184_v34 = vrot.slane %v18533_v45, 6 }
 0x4a8   : > { %v7435_v48 = vpop.f32.mrf.mxu0  ;;  %v14133_v39 = vpop.f32.mrf.mxu1  ;;  %14444 = vmatmul.mubr.msk.f32.gmra.mxu1 %vm3887_vm8, %v9523_v61  ;;  %v9527_v61 = vsel %vm3056_vm7, %v9524_v52, %v9526_v51 }
 0x4a9   : > { %v19382_v59 = vadd.f32 %v7703_v15, %v7435_v48  ;;  %14446 = vmatprep.mubr.msk.f32.mxu1 %vm3887_vm8, %v9525_v23  ;;  %v9528_v15 = vrot.slane %v18563_v30, 7  ;;  %v9185_v52 = vsel %vm2669_vm6, %v9182_v27, %v9184_v34 }
 0x4aa   : > { %v14078_v22 = vpop.f32.mrf.mxu0  ;;  %14389 = vmatmul.mubr.msk.f32.gmra.mxu0 %vm3887_vm8, %v9179_v58  ;;  %v7720_v11 = vpop.f32.mrf.mxu1  ;;  %v9183_v58 = vsel %vm2669_vm6, %v9180_v0, %v9182_v27  ;;  %v9534_v0 = vrot.slane %v18623_v12, 7  ;;  %v9187_v27 = vsel %vm2669_vm6, %v9184_v34, %v9186_v16  ;;  %v9538_v34 = vrot.slane %v18646_v40, 7 }
 0x4ab   : > { %14391 = vmatprep.mubr.msk.f32.mxu0 %vm3887_vm8, %v9181_v17  ;;  %v9529_v23 = vsel %vm3056_vm7, %v9526_v51, %v9528_v15  ;;  %v9188_v51 = vrot.slane %v18563_v30, 6 }
 0x4ac   : > { %v7444_v48 = vpop.f32.mrf.mxu0  ;;  %v14136_v39 = vpop.f32.mrf.mxu1  ;;  %14447 = vmatmul.mubr.msk.f32.gmra.mxu1 %vm3887_vm8, %v9527_v61  ;;  %v9531_v61 = vsel %vm3056_vm7, %v9528_v15, %v9530_v53 }
 0x4ad   : > { %14449 = vmatprep.mubr.msk.f32.mxu1 %vm3887_vm8, %v9529_v23  ;;  %v9532_v48 = vrot.slane %v18592_v25, 7  ;;  %v9189_v15 = vsel %vm2669_vm6, %v9186_v16, %v9188_v51  ;;  %v9194_v16 = vrot.slane %v18623_v12, 6 }
 0x4ae   : > { %v14081_v22 = vpop.f32.mrf.mxu0  ;;  %14392 = vmatmul.mubr.msk.f32.gmra.mxu0 %vm3887_vm8, %v9183_v58  ;;  %v7729_v17 = vpop.f32.mrf.mxu1 }
 0x4af   : > { %14394 = vmatprep.mubr.msk.f32.mxu0 %vm3887_vm8, %v9185_v52  ;;  %v9533_v58 = vsel %vm3056_vm7, %v9530_v53, %v9532_v48  ;;  %v9190_v22 = vrot.slane %v18596_v21, 6  ;;  %v9192_v53 = vrot.slane %v18592_v25, 6 }
 0x4b0   : > { %v7452_v39 = vpop.f32.mrf.mxu0  ;;  %v14139_v23 = vpop.f32.mrf.mxu1  ;;  %14450 = vmatmul.mubr.msk.f32.gmra.mxu1 %vm3887_vm8, %v9531_v61  ;;  %v9535_v61 = vsel %vm3056_vm7, %v9532_v48, %v9534_v0 }
 0x4b1   : > { %v19408_v28 = vadd.f32 %v7720_v11, %v7452_v39  ;;  %14452 = vmatprep.mubr.msk.f32.mxu1 %vm3887_vm8, %v9533_v58  ;;  %v9536_v11 = vrot.slane %v18620_v4, 7  ;;  %v9193_v48 = vsel %vm2669_vm6, %v9190_v22, %v9192_v53 }
 0x4b2   : > { %v14084_v52 = vpop.f32.mrf.mxu0  ;;  %14395 = vmatmul.mubr.msk.f32.gmra.mxu0 %vm3887_vm8, %v9187_v27  ;;  %v7737_v17 = vpop.f32.mrf.mxu1  ;;  %v9191_v27 = vsel %vm2669_vm6, %v9188_v51, %v9190_v22  ;;  %v9542_v51 = vrot.slane %v18668_v6, 7  ;;  %v9195_v22 = vsel %vm2669_vm6, %v9192_v53, %v9194_v16  ;;  %v9546_v53 = vrot.slane %v18690_v36, 7 }
 0x4b3   : > { %14397 = vmatprep.mubr.msk.f32.mxu0 %vm3887_vm8, %v9189_v15  ;;  %v9537_v58 = vsel %vm3056_vm7, %v9534_v0, %v9536_v11  ;;  %v9196_v0 = vrot.slane %v18620_v4, 6 }
 0x4b4   : > { %v7461_v39 = vpop.f32.mrf.mxu0  ;;  %v14142_v23 = vpop.f32.mrf.mxu1  ;;  %14453 = vmatmul.mubr.msk.f32.gmra.mxu1 %vm3887_vm8, %v9535_v61  ;;  %v9539_v61 = vsel %vm3056_vm7, %v9536_v11, %v9538_v34 }
 0x4b5   : > { %14455 = vmatprep.mubr.msk.f32.mxu1 %vm3887_vm8, %v9537_v58  ;;  %v9540_v39 = vrot.slane %v18643_v63, 7  ;;  %v9197_v11 = vsel %vm2669_vm6, %v9194_v16, %v9196_v0  ;;  %v9202_v16 = vrot.slane %v18668_v6, 6 }
 0x4b6   : > { %v14087_v52 = vpop.f32.mrf.mxu0  ;;  %14398 = vmatmul.mubr.msk.f32.gmra.mxu0 %vm3887_vm8, %v9191_v27  ;;  %v7746_v15 = vpop.f32.mrf.mxu1 }
 0x4b7   : > { %14400 = vmatprep.mubr.msk.f32.mxu0 %vm3887_vm8, %v9193_v48  ;;  %v9541_v27 = vsel %vm3056_vm7, %v9538_v34, %v9540_v39  ;;  %v9198_v52 = vrot.slane %v18646_v40, 6  ;;  %v9200_v34 = vrot.slane %v18643_v63, 6 }
 0x4b8   : > { %v7469_v23 = vpop.f32.mrf.mxu0  ;;  %v14145_v58 = vpop.f32.mrf.mxu1  ;;  %14456 = vmatmul.mubr.msk.f32.gmra.mxu1 %vm3887_vm8, %v9539_v61  ;;  %v9543_v61 = vsel %vm3056_vm7, %v9540_v39, %v9542_v51 }
 0x4b9   : > { %v19434_v12 = vadd.f32 %v7737_v17, %v7469_v23  ;;  %14458 = vmatprep.mubr.msk.f32.mxu1 %vm3887_vm8, %v9541_v27  ;;  %v9544_v17 = vrot.slane %v18659_v56, 7  ;;  %v9201_v39 = vsel %vm2669_vm6, %v9198_v52, %v9200_v34 }
 0x4ba   : > { %v14090_v48 = vpop.f32.mrf.mxu0  ;;  %14401 = vmatmul.mubr.msk.f32.gmra.mxu0 %vm3887_vm8, %v9195_v22  ;;  %v7754_v15 = vpop.f32.mrf.mxu1  ;;  %v9199_v22 = vsel %vm2669_vm6, %v9196_v0, %v9198_v52  ;;  %v9206_v52 = vrot.slane %v18690_v36, 6 }
 0x4bb   : > { %14403 = vmatprep.mubr.msk.f32.mxu0 %vm3887_vm8, %v9197_v11  ;;  %v9545_v27 = vsel %vm3056_vm7, %v9542_v51, %v9544_v17  ;;  %v9204_v51 = vrot.slane %v18659_v56, 6 }
 0x4bc   : > { %v7478_v23 = vpop.f32.mrf.mxu0  ;;  %v14148_v58 = vpop.f32.mrf.mxu1  ;;  %14459 = vmatmul.mubr.msk.f32.gmra.mxu1 %vm3887_vm8, %v9543_v61  ;;  %v9547_v61 = vsel %vm3056_vm7, %v9544_v17, %v9546_v53 }
 0x4bd   : > { %14461 = vmatprep.mubr.msk.f32.mxu1 %vm3887_vm8, %v9545_v27  ;;  %v9548_v23 = vrot.slane %v18681_v5, 7  ;;  %v9205_v17 = vsel %vm2669_vm6, %v9202_v16, %v9204_v51 }
 0x4be   : > { %v14093_v48 = vpop.f32.mrf.mxu0  ;;  %14404 = vmatmul.mubr.msk.f32.gmra.mxu0 %vm3887_vm8, %v9199_v22  ;;  %v7763_v11 = vpop.f32.mrf.mxu1  ;;  %v9203_v22 = vsel %vm2669_vm6, %v9200_v34, %v9202_v16  ;;  %v9207_v34 = vsel %vm2669_vm6, %v9204_v51, %v9206_v52 }
 0x4bf   : > { %14406 = vmatprep.mubr.msk.f32.mxu0 %vm3887_vm8, %v9201_v39  ;;  %v9549_v27 = vsel %vm3056_vm7, %v9546_v53, %v9548_v23  ;;  %v9208_v53 = vrot.slane %v18681_v5, 6 }
 0x4c0   : > { %v7486_v58 = vpop.f32.mrf.mxu0  ;;  %v14151_v6 = vpop.f32.mrf.mxu1  ;;  %14462 = vmatmul.mubr.msk.f32.gmra.mxu1 %vm3887_vm8, %v9547_v61 }
 0x4c1   : > { %v19459_v0 = vadd.f32 %v7754_v15, %v7486_v58  ;;  %14464 = vmatprep.mubr.msk.f32.mxu1 %vm3887_vm8, %v9549_v27  ;;  %v20743_v6 = vld [vmem:[#allocation31_spill] sm:$0xff]  ;;  %v9209_v16 = vsel %vm2669_vm6, %v9206_v52, %v9208_v53 }
 0x4c2   : > { %v14096_v48 = vpop.f32.mrf.mxu0  ;;  %14407 = vmatmul.mubr.msk.f32.gmra.mxu0 %vm3887_vm8, %v9203_v22  ;;  %v7771_v39 = vpop.f32.mrf.mxu1  ;;  %v9550_v11 = vsel %vm3056_vm7, %v9548_v23, %v20743_v6 }
 0x4c3   : > { %14409 = vmatprep.mubr.msk.f32.mxu0 %vm3887_vm8, %v9205_v17  ;;  %v20744_v17 = vld [vmem:[#allocation27_spill] sm:$0xff] }
 0x4c4   : > { %v7495_v15 = vpop.f32.mrf.mxu0  ;;  %v14154_v58 = vpop.f32.mrf.mxu1  ;;  %14465 = vmatmul.mubr.msk.f32.gmra.mxu1 %vm3887_vm8, %v9550_v11  ;;  %v9210_v51 = vsel %vm2669_vm6, %v9208_v53, %v20744_v17  ;;  %v20745_v53 = vld [vmem:[#allocation28_spill] sm:$0xff]  ;;  %v20750_v17 = vld [vmem:[#allocation15_spill] sm:$0xff] }
 0x4c5   : > { %14523 = vmatprep.mubr.msk.f32.mxu1 %vm3887_vm8, %v18296_v57  ;;  %v20747_v58 = vmov 0.0  }
 0x4c6   : > { %v14099_v61 = vpop.f32.mrf.mxu0  ;;  %14410 = vmatmul.mubr.msk.f32.gmra.mxu0 %vm3887_vm8, %v9207_v34  ;;  %v7780_v27 = vpop.f32.mrf.mxu1 }
 0x4c7   : > { %14412 = vmatprep.mubr.msk.f32.mxu0 %vm3887_vm8, %v9209_v16  ;;  %v20748_v61 = vld [vmem:[#allocation30_spill] sm:$0xff]  ;;  %v20749_v16 = vld [vmem:[#allocation16_spill] sm:$0xff] }
 0x4c8   : > { %v7503_v22 = vpop.f32.mrf.mxu0  ;;  %v14213_v48 = vpop.f32.mrf.mxu1  ;;  %14524 = vmatmul.mubr.msk.f32.vlgmr.msra.gmra.mxu1 %vm3887_vm8, %v18311_v33  ;;  %v7153_v33 = vld [vmem:[%s20164_s5 + $0xa0] sm:$0xff] }
 0x4c9   : > { %v19479_v23 = vadd.f32 %v7771_v39, %v7503_v22  ;;  %14526 = vmatprep.mubr.msk.f32.mxu1 %vm3887_vm8, %v18341_v8 }
 0x4ca   : > { %v14102_v57 = vpop.f32.mrf.mxu0  ;;  %14413 = vmatmul.mubr.msk.f32.gmra.mxu0 %vm3887_vm8, %v9210_v51  ;;  %v8324_v52 = vpop.f32.mrf.mxu1  ;;  %v20751_v51 = vld [vmem:[#allocation40_spill] sm:$0xff] }
 0x4cb   : > { %14471 = vmatprep.mubr.msk.f32.mxu0 %vm3887_vm8, %v18210_v9 }
 0x4cc   : > { %v7512_v15 = vpop.f32.mrf.mxu0  ;;  %v14216_v39 = vpop.f32.mrf.mxu1  ;;  %14527 = vmatmul.mubr.msk.f32.gmra.mxu1 %vm3887_vm8, %v18350_v29 }
 0x4cd   : > { %14529 = vmatprep.mubr.msk.f32.mxu1 %vm3887_vm8, %v18377_v7  ;;  %v20746_v7 = vld [vmem:[#allocation17_spill] sm:$0xff] }
 0x4ce   : > { %v14161_v8 = vpop.f32.mrf.mxu0  ;;  %14472 = vmatmul.mubr.msk.f32.vlgmr.msra.gmra.mxu0 %vm3887_vm8, %v18257_v26  ;;  %v8333_v6 = vpop.f32.mrf.mxu1 }
 0x4cf   : > { %14572 = vmatpush3.msk.msra.mxu0 %vm3056_vm7, %v19300_v18  ;;  %14474 = vmatprep.mubr.msk.f32.mxu0 %vm3887_vm8, %v18250_v10  ;;  %v20753_v6 = vld [vmem:[#allocation19_spill] sm:$0xff] }
 0x4d0   : > { %v7984_v9 = vpop.f32.mrf.mxu0  ;;  %14573 = vmatprep.subr.mxu0 %v7153_v33  ;;  %v14219_v11 = vpop.f32.mrf.mxu1  ;;  %14530 = vmatmul.mubr.msk.f32.gmra.mxu1 %vm3887_vm8, %v20745_v53 }
 0x4d1   : > { %v8119_v29 = vadd.f32 %v7984_v9, %v19302_v2  ;;  %14574 = vmatpush3.msra.mxu0 %v7153_v33  ;;  %14532 = vmatprep.mubr.msk.f32.mxu1 %vm3887_vm8, %v20746_v7 }
 0x4d2   : > { %v14164_v26 = vpop.f32.mrf.mxu0  ;;  %14475 = vmatmul.mubr.msk.f32.gmra.mxu0 %vm3887_vm8, %v18292_v44  ;;  %v8341_v18 = vpop.f32.mrf.mxu1  ;;  %10995 = vmatprep.subr.mxu0 %v20747_v58 }
 0x4d3   : > { %14477 = vmatprep.mubr.msk.f32.mxu0 %vm3887_vm8, %v18282_v3  ;;  %v19512_v10 = vadd.f32 %v8324_v52, %v8119_v29 }
 0x4d4   : > { %v7993_v2 = vpop.f32.mrf.mxu0  ;;  %v14222_v34 = vpop.f32.mrf.mxu1  ;;  %14533 = vmatmul.mubr.msk.f32.gmra.mxu1 %vm3887_vm8, %v20748_v61  ;;  %v20759_v61 = vld [vmem:[#allocation69_spill] sm:$0xff] }
 0x4d5   : > { %14535 = vmatprep.mubr.msk.f32.mxu1 %vm3887_vm8, %v20749_v16  ;;  %v20757_v2 = vld [vmem:[#allocation21_spill] sm:$0xff] }
 0x4d6   : > { %v14167_v27 = vpop.f32.mrf.mxu0  ;;  %14478 = vmatmul.mubr.msk.f32.gmra.mxu0 %vm3887_vm8, %v18335_v37  ;;  %v8350_v44 = vpop.f32.mrf.mxu1 }
 0x4d7   : > { %14480 = vmatprep.mubr.msk.f32.mxu0 %vm3887_vm8, %v18327_v32 }
 0x4d8   : > { %v8001_v3 = vpop.f32.mrf.mxu0  ;;  %v14225_v48 = vpop.f32.mrf.mxu1  ;;  %14536 = vmatmul.mubr.msk.f32.gmra.mxu1 %vm3887_vm8, %v20750_v17 }
 0x4d9   : > { %v8120_v22 = vadd.f32 %v8001_v3, %v19330_v19  ;;  %14538 = vmatprep.mubr.msk.f32.mxu1 %vm3887_vm8, %v20751_v51  ;;  %v20752_v19 = vld [vmem:[#allocation45_spill] sm:$0xff]  ;;  %v20761_v48 = vld [vmem:[#allocation46_spill] sm:$0xff]  ;;  %v20762_v51 = vld [vmem:[#allocation67_spill] sm:$0xff] }
 0x4da   : > { %v14170_v57 = vpop.f32.mrf.mxu0  ;;  %14481 = vmatmul.mubr.msk.f32.gmra.mxu0 %vm3887_vm8, %v18371_v13  ;;  %v8358_v52 = vpop.f32.mrf.mxu1 }
 0x4db   : > { %14483 = vmatprep.mubr.msk.f32.mxu0 %vm3887_vm8, %v18365_v14  ;;  %v19532_v37 = vadd.f32 %v8341_v18, %v8120_v22  ;;  %v20755_v18 = vld [vmem:[#allocation20_spill] sm:$0xff]  ;;  %v20760_v22 = vld [vmem:[#allocation78_spill] sm:$0xff] }
 0x4dc   : > { %v8010_v32 = vpop.f32.mrf.mxu0  ;;  %v14228_v15 = vpop.f32.mrf.mxu1  ;;  %14539 = vmatmul.mubr.msk.f32.gmra.mxu1 %vm3887_vm8, %v20752_v19 }
 0x4dd   : > { %14541 = vmatprep.mubr.msk.f32.mxu1 %vm3887_vm8, %v18513_v50 }
 0x4de   : > { %v14173_v39 = vpop.f32.mrf.mxu0  ;;  %14484 = vmatmul.mubr.msk.f32.gmra.mxu0 %vm3887_vm8, %v18406_v43  ;;  %v8367_v33 = vpop.f32.mrf.mxu1 }
 0x4df   : > { %14486 = vmatprep.mubr.msk.f32.mxu0 %vm3887_vm8, %v18400_v54  ;;  %v20765_v33 = vld [vmem:[#allocation22_spill] sm:$0xff] }
 0x4e0   : > { %v8018_v13 = vpop.f32.mrf.mxu0  ;;  %v14231_v8 = vpop.f32.mrf.mxu1  ;;  %14542 = vmatmul.mubr.msk.f32.gmra.mxu1 %vm3887_vm8, %v20753_v6 }
 0x4e1   : > { %v8121_v14 = vadd.f32 %v8018_v13, %v19356_v60  ;;  %14544 = vmatprep.mubr.msk.f32.mxu1 %vm3887_vm8, %v18543_v31  ;;  %v20754_v60 = vld [vmem:[#allocation18_spill] sm:$0xff]  ;;  %v20766_v13 = vld [vmem:[#allocation44_spill] sm:$0xff]  ;;  %v20767_v8 = vld [vmem:[#allocation71_spill] sm:$0xff] }
 0x4e2   : > { %v14176_v9 = vpop.f32.mrf.mxu0  ;;  %14487 = vmatmul.mubr.msk.f32.gmra.mxu0 %vm3887_vm8, %v18441_v35  ;;  %v8375_v50 = vpop.f32.mrf.mxu1 }
 0x4e3   : > { %14489 = vmatprep.mubr.msk.f32.mxu0 %vm3887_vm8, %v18435_v55  ;;  %v19551_v43 = vadd.f32 %v8358_v52, %v8121_v14  ;;  %v20763_v52 = vld [vmem:[#allocation73_spill] sm:$0xff] }
 0x4e4   : > { %v8027_v54 = vpop.f32.mrf.mxu0  ;;  %v14234_v29 = vpop.f32.mrf.mxu1  ;;  %14545 = vmatmul.mubr.msk.f32.gmra.mxu1 %vm3887_vm8, %v20754_v60 }
 0x4e5   : > { %14547 = vmatprep.mubr.msk.f32.mxu1 %vm3887_vm8, %v18573_v38 }
 0x4e6   : > { %v14179_v11 = vpop.f32.mrf.mxu0  ;;  %14490 = vmatmul.mubr.msk.f32.gmra.mxu0 %vm3887_vm8, %v18475_v49  ;;  %v8384_v31 = vpop.f32.mrf.mxu1 }
 0x4e7   : > { %14492 = vmatprep.mubr.msk.f32.mxu0 %vm3887_vm8, %v18469_v24 }
 0x4e8   : > { %v8035_v35 = vpop.f32.mrf.mxu0  ;;  %v14237_v53 = vpop.f32.mrf.mxu1  ;;  %14548 = vmatmul.mubr.msk.f32.gmra.mxu1 %vm3887_vm8, %v18582_v41 }
 0x4e9   : > { %v8122_v55 = vadd.f32 %v8035_v35, %v19382_v59  ;;  %14550 = vmatprep.mubr.msk.f32.mxu1 %vm3887_vm8, %v18602_v1  ;;  %v20769_v35 = vld [vmem:[#allocation43_spill] sm:$0xff] }
 0x4ea   : > { %v14182_v7 = vpop.f32.mrf.mxu0  ;;  %14493 = vmatmul.mubr.msk.f32.gmra.mxu0 %vm3887_vm8, %v18507_v47  ;;  %v19568_v38 = vpop.f32.mrf.mxu1 }
 0x4eb   : > { %14495 = vmatprep.mubr.msk.f32.mxu0 %vm3887_vm8, %v18501_v46  ;;  %v19572_v24 = vadd.f32 %v8375_v50, %v8122_v55 }
 0x4ec   : > { %v8044_v49 = vpop.f32.mrf.mxu0  ;;  %v14240_v59 = vpop.f32.mrf.mxu1  ;;  %14551 = vmatmul.mubr.msk.f32.gmra.mxu1 %vm3887_vm8, %v18610_v62  ;;  %v20756_v62 = vld [vmem:[#allocation47_spill] sm:$0xff] }
 0x4ed   : > { %14553 = vmatprep.mubr.msk.f32.mxu1 %vm3887_vm8, %v18629_v20  ;;  %v20770_v49 = vld [vmem:[#allocation62_spill] sm:$0xff]  ;;  %v20771_v59 = vld [vmem:[#allocation49_spill] sm:$0xff] }
 0x4ee   : > { %v14185_v41 = vpop.f32.mrf.mxu0  ;;  %14496 = vmatmul.mubr.msk.f32.gmra.mxu0 %vm3887_vm8, %v18537_v42  ;;  %v8401_v47 = vpop.f32.mrf.mxu1 }
 0x4ef   : > { %14498 = vmatprep.mubr.msk.f32.mxu0 %vm3887_vm8, %v18533_v45 }
 0x4f0   : > { %v8052_v1 = vpop.f32.mrf.mxu0  ;;  %v14243_v26 = vpop.f32.mrf.mxu1  ;;  %14554 = vmatmul.mubr.msk.f32.gmra.mxu1 %vm3887_vm8, %v20755_v18 }
 0x4f1   : > { %v19583_v46 = vadd.f32 %v8052_v1, %v19408_v28  ;;  %14556 = vmatprep.mubr.msk.f32.mxu1 %vm3887_vm8, %v20756_v62  ;;  %v20758_v28 = vld [vmem:[#allocation41_spill] sm:$0xff]  ;;  %v20772_v26 = vld [vmem:[#allocation95_spill] sm:$0xff]  ;;  %v20773_v62 = vld [vmem:[#allocation76_spill] sm:$0xff] }
 0x4f2   : > { %v14188_v20 = vpop.f32.mrf.mxu0  ;;  %14499 = vmatmul.mubr.msk.f32.gmra.mxu0 %vm3887_vm8, %v20757_v2  ;;  %v19591_v42 = vpop.f32.mrf.mxu1 }
 0x4f3   : > { %14501 = vmatprep.mubr.msk.f32.mxu0 %vm3887_vm8, %v18563_v30 }
 0x4f4   : > { %v8061_v45 = vpop.f32.mrf.mxu0  ;;  %v14246_v34 = vpop.f32.mrf.mxu1  ;;  %14557 = vmatmul.mubr.msk.f32.gmra.mxu1 %vm3887_vm8, %v20758_v28  ;;  %v20774_v28 = vld [vmem:[#allocation75_spill] sm:$0xff] }
 0x4f5   : > { %14559 = vmatprep.mubr.msk.f32.mxu1 %vm3887_vm8, %v20759_v61 }
 0x4f6   : > { %v14191_v16 = vpop.f32.mrf.mxu0  ;;  %14502 = vmatmul.mubr.msk.f32.gmra.mxu0 %vm3887_vm8, %v18596_v21  ;;  %v8418_v27 = vpop.f32.mrf.mxu1 }
 0x4f7   : > { %14504 = vmatprep.mubr.msk.f32.mxu0 %vm3887_vm8, %v18592_v25  ;;  %v20775_v16 = vld [vmem:[#allocation72_spill] sm:$0xff] }
 0x4f8   : > { %v8069_v44 = vpop.f32.mrf.mxu0  ;;  %v14249_v30 = vpop.f32.mrf.mxu1  ;;  %14560 = vmatmul.mubr.msk.f32.gmra.mxu1 %vm3887_vm8, %v20760_v22  ;;  %v20776_v22 = vld [vmem:[#allocation81_spill] sm:$0xff] }
 0x4f9   : > { %v19604_v3 = vadd.f32 %v8069_v44, %v19434_v12  ;;  %14562 = vmatprep.mubr.msk.f32.mxu1 %vm3887_vm8, %v20761_v48  ;;  %v20764_v12 = vld [vmem:[#allocation66_spill] sm:$0xff] }
 0x4fa   : > { %v14194_v17 = vpop.f32.mrf.mxu0  ;;  %14505 = vmatmul.mubr.msk.f32.gmra.mxu0 %vm3887_vm8, %v20762_v51  ;;  %v8426_v21 = vpop.f32.mrf.mxu1 }
 0x4fb   : > { %14507 = vmatprep.mubr.msk.f32.mxu0 %vm3887_vm8, %v18620_v4  ;;  %v20777_v17 = vld [vmem:[#allocation32_spill] sm:$0xff] }
 0x4fc   : > { %v8078_v25 = vpop.f32.mrf.mxu0  ;;  %v14252_v57 = vpop.f32.mrf.mxu1  ;;  %14563 = vmatmul.mubr.msk.f32.gmra.mxu1 %vm3887_vm8, %v20763_v52  ;;  %v20778_v52 = vld [vmem:[#allocation51_spill] sm:$0xff] }
 0x4fd   : > { %14565 = vmatprep.mubr.msk.f32.mxu1 %vm3887_vm8, %v20764_v12 }
 0x4fe   : > { %v14197_v32 = vpop.f32.mrf.mxu0  ;;  %14508 = vmatmul.mubr.msk.f32.gmra.mxu0 %vm3887_vm8, %v18646_v40  ;;  %v8435_v15 = vpop.f32.mrf.mxu1 }
 0x4ff   : > { %14510 = vmatprep.mubr.msk.f32.mxu0 %vm3887_vm8, %v18643_v63  ;;  %v20779_v32 = vld [vmem:[#allocation23_spill] sm:$0xff] }
 0x500   : > { %v8086_v19 = vpop.f32.mrf.mxu0  ;;  %v14255_v4 = vpop.f32.mrf.mxu1  ;;  %14566 = vmatmul.mubr.msk.f32.gmra.mxu1 %vm3887_vm8, %v20765_v33 }
 0x501   : > { %v8125_v39 = vadd.f32 %v8086_v19, %v19459_v0  ;;  %14568 = vmatprep.mubr.msk.f32.mxu1 %vm3887_vm8, %v20766_v13  ;;  %v20768_v0 = vld [vmem:[#allocation9_spill] sm:$0xff]  ;;  %v20780_v4 = vld [vmem:[#allocation68_spill] sm:$0xff] }
 0x502   : > { %v14200_v14 = vpop.f32.mrf.mxu0  ;;  %14511 = vmatmul.mubr.msk.f32.gmra.mxu0 %vm3887_vm8, %v20767_v8  ;;  %v8443_v6 = vpop.f32.mrf.mxu1  ;;  %v20781_v13 = vld [vmem:[#allocation80_spill] sm:$0xff] }
 0x503   : > { %14513 = vmatprep.mubr.msk.f32.mxu0 %vm3887_vm8, %v18659_v56  ;;  %v19631_v40 = vadd.f32 %v8426_v21, %v8125_v39 }
 0x504   : > { %v8095_v63 = vpop.f32.mrf.mxu0  ;;  %v14258_v9 = vpop.f32.mrf.mxu1  ;;  %14569 = vmatmul.mubr.msk.f32.gmra.mxu1 %vm3887_vm8, %v20768_v0 }
 0x505   : > { %10774 = vmatprep.mubr.f32.mxu1 %v20747_v58  ;;  %v20782_v9 = vld [vmem:[#allocation26_spill] sm:$0xff] }
 0x506   : > { %v14203_v50 = vpop.f32.mrf.mxu0  ;;  %14514 = vmatmul.mubr.msk.f32.gmra.mxu0 %vm3887_vm8, %v18690_v36  ;;  %v8452_v54 = vpop.f32.mrf.mxu1 }
 0x507   : > { %14516 = vmatprep.mubr.msk.f32.mxu0 %vm3887_vm8, %v18681_v5  ;;  %v20783_v50 = vld [vmem:[#allocation84_spill] sm:$0xff] }
 0x508   : > { %v8103_v29 = vpop.f32.mrf.mxu0  ;;  %v14317_v60 = vpop.f32.mrf.mxu1 }
 0x509   : > { %v8126_v56 = vadd.f32 %v8103_v29, %v19479_v23  ;;  %v20784_v60 = vld [vmem:[#allocation77_spill] sm:$0xff] }
 0x50a   : > { %v14206_v11 = vpop.f32.mrf.mxu0  ;;  %14517 = vmatmul.mubr.f32.gmra.mxu0 %v20747_v58  ;;  %v9004_v31 = vpop.f32.mrf.mxu1 }
 0x50b   : > { %14575 = vmatprep.mubr.msk.f32.mxu0 %vm3887_vm8, %v20769_v35  ;;  %v19644_v55 = vadd.f32 %v8443_v6, %v8126_v56 }
 0x50c   : > { %v8112_v36 = vpop.f32.mrf.mxu0  ;;  %v14320_v53 = vpop.f32.mrf.mxu1 }
 0x50e   : > { %v14265_v7 = vpop.f32.mrf.mxu0  ;;  %14576 = vmatmul.mubr.msk.f32.vlgmr.msra.gmra.mxu0 %vm3887_vm8, %v20770_v49  ;;  %v9013_v5 = vpop.f32.mrf.mxu1  ;;  %v20786_v49 = vld [vmem:[#allocation24_spill] sm:$0xff] }
 0x50f   : > { %14578 = vmatprep.mubr.msk.f32.mxu0 %vm3887_vm8, %v20771_v59  ;;  %v20787_v59 = vld [vmem:[#allocation57_spill] sm:$0xff] }
 0x510   : > { %v8664_v23 = vpop.f32.mrf.mxu0  ;;  %v14323_v47 = vpop.f32.mrf.mxu1 }
 0x511   : > { %v8799_v41 = vadd.f32 %v8664_v23, %v19512_v10 }
 0x512   : > { %v14268_v1 = vpop.f32.mrf.mxu0  ;;  %14579 = vmatmul.mubr.msk.f32.gmra.mxu0 %vm3887_vm8, %v20772_v26  ;;  %v9021_v18 = vpop.f32.mrf.mxu1  ;;  %v20788_v26 = vld [vmem:[#allocation29_spill] sm:$0xff] }
 0x513   : > { %14581 = vmatprep.mubr.msk.f32.mxu0 %vm3887_vm8, %v20773_v62  ;;  %v19655_v20 = vadd.f32 %v9004_v31, %v8799_v41  ;;  %v20785_v31 = vld [vmem:[#allocation74_spill] sm:$0xff] }
 0x514   : > { %v8673_v2 = vpop.f32.mrf.mxu0  ;;  %v14326_v45 = vpop.f32.mrf.mxu1  ;;  %v20789_v62 = vld [vmem:[#allocation42_spill] sm:$0xff] }
 0x516   : > { %v14271_v34 = vpop.f32.mrf.mxu0  ;;  %14582 = vmatmul.mubr.msk.f32.gmra.mxu0 %vm3887_vm8, %v20774_v28  ;;  %v9030_v61 = vpop.f32.mrf.mxu1 }
 0x517   : > { %14584 = vmatprep.mubr.msk.f32.mxu0 %vm3887_vm8, %v20775_v16  ;;  %v20790_v61 = vld [vmem:[#allocation55_spill] sm:$0xff]  ;;  %v8464_v16 = vadd.f32 %v19591_v42, %v19604_v3  ;;  %v20795_v3 = vld [vmem:[#allocation50_spill] sm:$0xff] }
 0x518   : > { %v8681_v10 = vpop.f32.mrf.mxu0  ;;  %v14329_v44 = vpop.f32.mrf.mxu1 }
 0x519   : > { %v8800_v27 = vadd.f32 %v8681_v10, %v19532_v37 }
 0x51a   : > { %v14274_v30 = vpop.f32.mrf.mxu0  ;;  %14585 = vmatmul.mubr.msk.f32.gmra.mxu0 %vm3887_vm8, %v20776_v22  ;;  %v9038_v48 = vpop.f32.mrf.mxu1  ;;  %v20792_v22 = vld [vmem:[#allocation97_spill] sm:$0xff] }
 0x51b   : > { %14587 = vmatprep.mubr.msk.f32.mxu0 %vm3887_vm8, %v20777_v17  ;;  %v19666_v51 = vadd.f32 %v9021_v18, %v8800_v27  ;;  %v20793_v17 = vld [vmem:[#allocation25_spill] sm:$0xff] }
 0x51c   : > { %v8690_v21 = vpop.f32.mrf.mxu0  ;;  %v14332_v25 = vpop.f32.mrf.mxu1 }
 0x51e   : > { %v14277_v57 = vpop.f32.mrf.mxu0  ;;  %14588 = vmatmul.mubr.msk.f32.gmra.mxu0 %vm3887_vm8, %v20778_v52  ;;  %v9047_v12 = vpop.f32.mrf.mxu1 }
 0x51f   : > { %14590 = vmatprep.mubr.msk.f32.mxu0 %vm3887_vm8, %v20779_v32  ;;  %v20794_v12 = vld [vmem:[#allocation88_spill] sm:$0xff] }
 0x520   : > { %v8698_v37 = vpop.f32.mrf.mxu0  ;;  %v14335_v19 = vpop.f32.mrf.mxu1 }
 0x521   : > { %v8801_v15 = vadd.f32 %v8698_v37, %v19551_v43 }
 0x522   : > { %v14280_v39 = vpop.f32.mrf.mxu0  ;;  %14591 = vmatmul.mubr.msk.f32.gmra.mxu0 %vm3887_vm8, %v20780_v4  ;;  %v9055_v33 = vpop.f32.mrf.mxu1 }
 0x523   : > { %14593 = vmatprep.mubr.msk.f32.mxu0 %vm3887_vm8, %v20781_v13  ;;  %v19677_v14 = vadd.f32 %v9038_v48, %v8801_v15  ;;  %v20796_v39 = vld [vmem:[#allocation33_spill] sm:$0xff] }
 0x524   : > { %v8707_v8 = vpop.f32.mrf.mxu0  ;;  %v14338_v6 = vpop.f32.mrf.mxu1 }
 0x526   : > { %v14283_v63 = vpop.f32.mrf.mxu0  ;;  %14594 = vmatmul.mubr.msk.f32.gmra.mxu0 %vm3887_vm8, %v20782_v9  ;;  %v9064_v0 = vpop.f32.mrf.mxu1  ;;  %v20798_v9 = vld [vmem:[#allocation98_spill] sm:$0xff] }
 0x527   : > { %14596 = vmatprep.mubr.msk.f32.mxu0 %vm3887_vm8, %v20783_v50  ;;  %v20799_v50 = vld [vmem:[#allocation48_spill] sm:$0xff] }
 0x528   : > { %v8715_v43 = vpop.f32.mrf.mxu0  ;;  %v14341_v29 = vpop.f32.mrf.mxu1 }
 0x529   : > { %v8802_v54 = vadd.f32 %v8715_v43, %v19572_v24  ;;  %v8463_v24 = vadd.f32 %v19568_v38, %v19583_v46  ;;  %v20791_v46 = vld [vmem:[#allocation53_spill] sm:$0xff] }
 0x52a   : > { %v14286_v56 = vpop.f32.mrf.mxu0  ;;  %14597 = vmatmul.mubr.msk.f32.gmra.mxu0 %vm3887_vm8, %v20784_v60  ;;  %v9072_v11 = vpop.f32.mrf.mxu1 }
 0x52b   : > { %14599 = vmatprep.mubr.msk.f32.mxu0 %vm3887_vm8, %v20785_v31  ;;  %v19688_v35 = vadd.f32 %v9055_v33, %v8802_v54  ;;  %v20797_v33 = vld [vmem:[#allocation100_spill] sm:$0xff]  ;;  %v20800_v56 = vld [vmem:[#allocation10_spill] sm:$0xff] }
 0x52c   : > { %v8724_v36 = vpop.f32.mrf.mxu0  ;;  %v14344_v53 = vpop.f32.mrf.mxu1 }
 0x52e   : > { %v14289_v7 = vpop.f32.mrf.mxu0  ;;  %14600 = vmatmul.mubr.msk.f32.gmra.mxu0 %vm3887_vm8, %v20786_v49  ;;  %v9081_v5 = vpop.f32.mrf.mxu1 }
 0x52f   : > { %14602 = vmatprep.mubr.msk.f32.mxu0 %vm3887_vm8, %v20787_v59 }
 0x530   : > { %v8732_v23 = vpop.f32.mrf.mxu0  ;;  %v14347_v47 = vpop.f32.mrf.mxu1 }
 0x531   : > { %v8803_v41 = vadd.f32 %v8732_v23, %v8463_v24 }
 0x532   : > { %v14292_v1 = vpop.f32.mrf.mxu0  ;;  %14603 = vmatmul.mubr.msk.f32.gmra.mxu0 %vm3887_vm8, %v20788_v26  ;;  %v9089_v18 = vpop.f32.mrf.mxu1 }
 0x533   : > { %14605 = vmatprep.mubr.msk.f32.mxu0 %vm3887_vm8, %v20789_v62  ;;  %v19700_v2 = vadd.f32 %v9072_v11, %v8803_v41 }
 0x534   : > { %v8741_v45 = vpop.f32.mrf.mxu0  ;;  %v14350_v34 = vpop.f32.mrf.mxu1 }
 0x536   : > { %v14295_v28 = vpop.f32.mrf.mxu0  ;;  %14606 = vmatmul.mubr.msk.f32.gmra.mxu0 %vm3887_vm8, %v20790_v61  ;;  %v9098_v38 = vpop.f32.mrf.mxu1 }
 0x537   : > { %14608 = vmatprep.mubr.msk.f32.mxu0 %vm3887_vm8, %v20791_v46 }
 0x538   : > { %v8749_v10 = vpop.f32.mrf.mxu0  ;;  %v14353_v44 = vpop.f32.mrf.mxu1 }
 0x539   : > { %v8804_v27 = vadd.f32 %v8749_v10, %v8464_v16 }
 0x53a   : > { %v14298_v30 = vpop.f32.mrf.mxu0  ;;  %14609 = vmatmul.mubr.msk.f32.gmra.mxu0 %vm3887_vm8, %v20792_v22  ;;  %v9106_v48 = vpop.f32.mrf.mxu1 }
 0x53b   : > { %14611 = vmatprep.mubr.msk.f32.mxu0 %vm3887_vm8, %v20793_v17  ;;  %v19712_v21 = vadd.f32 %v9089_v18, %v8804_v27 }
 0x53c   : > { %v8758_v25 = vpop.f32.mrf.mxu0  ;;  %v14356_v57 = vpop.f32.mrf.mxu1 }
 0x53e   : > { %v14301_v52 = vpop.f32.mrf.mxu0  ;;  %14612 = vmatmul.mubr.msk.f32.gmra.mxu0 %vm3887_vm8, %v20794_v12  ;;  %v9115_v42 = vpop.f32.mrf.mxu1 }
 0x53f   : > { %14614 = vmatprep.mubr.msk.f32.mxu0 %vm3887_vm8, %v20795_v3 }
 0x540   : > { %v8766_v32 = vpop.f32.mrf.mxu0  ;;  %v14359_v15 = vpop.f32.mrf.mxu1 }
 0x541   : > { %v8805_v37 = vadd.f32 %v8766_v32, %v19631_v40 }
 0x542   : > { %v14304_v19 = vpop.f32.mrf.mxu0  ;;  %14615 = vmatmul.mubr.msk.f32.gmra.mxu0 %vm3887_vm8, %v20796_v39  ;;  %v9123_v4 = vpop.f32.mrf.mxu1 }
 0x543   : > { %14617 = vmatprep.mubr.msk.f32.mxu0 %vm3887_vm8, %v20797_v33  ;;  %v19723_v13 = vadd.f32 %v9106_v48, %v8805_v37 }
 0x544   : > { %v8775_v8 = vpop.f32.mrf.mxu0  ;;  %v14362_v6 = vpop.f32.mrf.mxu1 }
 0x546   : > { %v14307_v63 = vpop.f32.mrf.mxu0  ;;  %14618 = vmatmul.mubr.msk.f32.gmra.mxu0 %vm3887_vm8, %v20798_v9  ;;  %v9132_v0 = vpop.f32.mrf.mxu1 }
 0x547   : > { %14620 = vmatprep.mubr.msk.f32.mxu0 %vm3887_vm8, %v20799_v50 }
 0x548   : > { %v8783_v40 = vpop.f32.mrf.mxu0  ;;  %v14421_v54 = vpop.f32.mrf.mxu1 }
 0x549   : > { %v8806_v43 = vadd.f32 %v8783_v40, %v19644_v55 }
 0x54a   : > { %v14310_v29 = vpop.f32.mrf.mxu0  ;;  %14621 = vmatmul.mubr.msk.f32.gmra.mxu0 %vm3887_vm8, %v20800_v56  ;;  %v9684_v60 = vpop.f32.mrf.mxu1 }
 0x54b   : > { %v19732_v11 = vadd.f32 %v9123_v4, %v8806_v43 }
 0x54c   : > { %v8792_v31 = vpop.f32.mrf.mxu0  ;;  %v14424_v36 = vpop.f32.mrf.mxu1 }
 0x54e   : > { %v14369_v53 = vpop.f32.mrf.mxu0  ;;  %v9693_v7 = vpop.f32.mrf.mxu1 }
 0x550   : > { %v9344_v49 = vpop.f32.mrf.mxu0  ;;  %v14427_v59 = vpop.f32.mrf.mxu1 }
 0x551   : > { %v9479_v5 = vadd.f32 %v9344_v49, %v19655_v20 }
 0x552   : > { %v14372_v24 = vpop.f32.mrf.mxu0  ;;  %v9701_v23 = vpop.f32.mrf.mxu1 }
 0x553   : > { %v19735_v41 = vadd.f32 %v9684_v60, %v9479_v5 }
 0x554   : > { %v9353_v55 = vpop.f32.mrf.mxu0  ;;  %v14430_v47 = vpop.f32.mrf.mxu1 }
 0x556   : > { %v14375_v1 = vpop.f32.mrf.mxu0  ;;  %v9710_v26 = vpop.f32.mrf.mxu1 }
 0x558   : > { %v9361_v18 = vpop.f32.mrf.mxu0  ;;  %v14433_v45 = vpop.f32.mrf.mxu1 }
 0x559   : > { %v9480_v62 = vadd.f32 %v9361_v18, %v19666_v51 }
 0x55a   : > { %v14378_v34 = vpop.f32.mrf.mxu0  ;;  %v9718_v28 = vpop.f32.mrf.mxu1 }
 0x55b   : > { %v19738_v61 = vadd.f32 %v9701_v23, %v9480_v62 }
 0x55c   : > { %v9370_v38 = vpop.f32.mrf.mxu0  ;;  %v14436_v46 = vpop.f32.mrf.mxu1 }
 0x55e   : > { %v14381_v20 = vpop.f32.mrf.mxu0  ;;  %v9727_v16 = vpop.f32.mrf.mxu1 }
 0x560   : > { %v9378_v10 = vpop.f32.mrf.mxu0  ;;  %v14439_v44 = vpop.f32.mrf.mxu1 }
 0x561   : > { %v9481_v27 = vadd.f32 %v9378_v10, %v19677_v14 }
 0x562   : > { %v14384_v30 = vpop.f32.mrf.mxu0  ;;  %v9735_v22 = vpop.f32.mrf.mxu1 }
 0x563   : > { %v19741_v48 = vadd.f32 %v9718_v28, %v9481_v27 }
 0x564   : > { %v9387_v17 = vpop.f32.mrf.mxu0  ;;  %v14442_v25 = vpop.f32.mrf.mxu1 }
 0x566   : > { %v14387_v51 = vpop.f32.mrf.mxu0  ;;  %v9744_v57 = vpop.f32.mrf.mxu1 }
 0x568   : > { %v9395_v52 = vpop.f32.mrf.mxu0  ;;  %v14445_v42 = vpop.f32.mrf.mxu1 }
 0x569   : > { %v9482_v12 = vadd.f32 %v9395_v52, %v19688_v35 }
 0x56a   : > { %v14390_v3 = vpop.f32.mrf.mxu0  ;;  %v9752_v32 = vpop.f32.mrf.mxu1 }
 0x56b   : > { %v19744_v37 = vadd.f32 %v9735_v22, %v9482_v12 }
 0x56c   : > { %v9404_v15 = vpop.f32.mrf.mxu0  ;;  %v14448_v19 = vpop.f32.mrf.mxu1 }
 0x56e   : > { %v14393_v14 = vpop.f32.mrf.mxu0  ;;  %v9761_v39 = vpop.f32.mrf.mxu1 }
 0x570   : > { %v9412_v4 = vpop.f32.mrf.mxu0  ;;  %v14451_v8 = vpop.f32.mrf.mxu1 }
 0x571   : > { %v9483_v33 = vadd.f32 %v9412_v4, %v19700_v2 }
 0x572   : > { %v14396_v6 = vpop.f32.mrf.mxu0  ;;  %v9769_v63 = vpop.f32.mrf.mxu1 }
 0x573   : > { %v19747_v9 = vadd.f32 %v9752_v32, %v9483_v33  ;;  %v10669_v6 = vld [vmem:[%s20166_s7 + $0xe8] sm:$0xf] }
 0x574   : > { %v9421_v0 = vpop.f32.mrf.mxu0  ;;  %v14454_v50 = vpop.f32.mrf.mxu1  ;;  %12108 = vmatprep.subr.msk.mxu1 %vm1895_vm4, %v10669_v6 }
 0x576   : > { %v14399_v35 = vpop.f32.mrf.mxu0  ;;  %v9778_v40 = vpop.f32.mrf.mxu1 }
 0x577   : > { %v10661_v40 = vld [vmem:[%s20166_s7 + $0xa8] sm:$0xff] }
 0x578   : > { %v9429_v43 = vpop.f32.mrf.mxu0  ;;  %v14457_v29 = vpop.f32.mrf.mxu1 }
 0x579   : > { %v9484_v54 = vadd.f32 %v9429_v43, %v19712_v21 }
 0x57a   : > { %v14402_v56 = vpop.f32.mrf.mxu0  ;;  %v9786_v60 = vpop.f32.mrf.mxu1 }
 0x57b   : > { %v19750_v31 = vadd.f32 %v9769_v63, %v9484_v54  ;;  %v10665_v63 = vld [vmem:[%s20166_s7 + $0xc8] sm:$0xff]  ;;  %v10660_v54 = vld [vmem:[%s20166_s7 + $0xa0] sm:$0xff] }
 0x57c   : > { %v9438_v36 = vpop.f32.mrf.mxu0  ;;  %v14460_v53 = vpop.f32.mrf.mxu1  ;;  %v10657_v56 = vld [vmem:[%s20166_s7 + $0x88] sm:$0xff] }
 0x57d   : > { %v10656_v36 = vld [vmem:[%s20166_s7 + $0x80] sm:$0xff] }
 0x57e   : > { %v14405_v2 = vpop.f32.mrf.mxu0  ;;  %v9795_v7 = vpop.f32.mrf.mxu1 }
 0x57f   : > { %v10653_v2 = vld [vmem:[%s20166_s7 + $0x68] sm:$0xff] }
 0x580   : > { %v9446_v49 = vpop.f32.mrf.mxu0  ;;  %v14463_v59 = vpop.f32.mrf.mxu1 }
 0x581   : > { %v9485_v5 = vadd.f32 %v9446_v49, %v19723_v13  ;;  %v10652_v49 = vld [vmem:[%s20166_s7 + $0x60] sm:$0xff] }
 0x582   : > { %v14408_v24 = vpop.f32.mrf.mxu0  ;;  %v9803_v23 = vpop.f32.mrf.mxu1 }
 0x583   : > { %v19753_v55 = vadd.f32 %v9786_v60, %v9485_v5  ;;  %v10649_v24 = vld [vmem:[%s20166_s7 + $0x48] sm:$0xff] }
 0x584   : > { %v9455_v47 = vpop.f32.mrf.mxu0  ;;  %v14466_v1 = vpop.f32.mrf.mxu1 }
 0x585   : > { %v10648_v47 = vld [vmem:[%s20166_s7 + $0x40] sm:$0xff] }
 0x586   : > { %v14411_v21 = vpop.f32.mrf.mxu0  ;;  %v9812_v26 = vpop.f32.mrf.mxu1 }
 0x588   : > { %v9463_v18 = vpop.f32.mrf.mxu0  ;;  %v14525_v45 = vpop.f32.mrf.mxu1 }
 0x589   : > { %v9486_v62 = vadd.f32 %v9463_v18, %v19732_v11  ;;  %v10644_v18 = vld [vmem:[%s20166_s7 + $0x20] sm:$0xff] }
 0x58a   : > { %v14414_v34 = vpop.f32.mrf.mxu0  ;;  %v10111_v28 = vpop.f32.mrf.mxu1 }
 0x58b   : > { %v19756_v38 = vadd.f32 %v9803_v23, %v9486_v62 }
 0x58c   : > { %v9472_v46 = vpop.f32.mrf.mxu0  ;;  %v14528_v20 = vpop.f32.mrf.mxu1 }
 0x58e   : > { %v14473_v13 = vpop.f32.mrf.mxu0  ;;  %v10120_v16 = vpop.f32.mrf.mxu1 }
 0x590   : > { %v9896_v10 = vpop.f32.mrf.mxu0  ;;  %v14531_v44 = vpop.f32.mrf.mxu1 }
 0x591   : > { %v10031_v27 = vadd.f32 %v9896_v10, %v19735_v41 }
 0x592   : > { %v14476_v30 = vpop.f32.mrf.mxu0  ;;  %v10128_v22 = vpop.f32.mrf.mxu1 }
 0x593   : > { %v19759_v17 = vadd.f32 %v10111_v28, %v10031_v27 }
 0x594   : > { %v9905_v25 = vpop.f32.mrf.mxu0  ;;  %v14534_v51 = vpop.f32.mrf.mxu1 }
 0x596   : > { %v14479_v11 = vpop.f32.mrf.mxu0  ;;  %v10137_v57 = vpop.f32.mrf.mxu1 }
 0x598   : > { %v9913_v52 = vpop.f32.mrf.mxu0  ;;  %v14537_v42 = vpop.f32.mrf.mxu1 }
 0x599   : > { %v10032_v12 = vadd.f32 %v9913_v52, %v19738_v61  ;;  %v10668_v61 = vld [vmem:[%s20166_s7 + $0xe0] sm:$0xf] }
 0x59a   : > { %v14482_v3 = vpop.f32.mrf.mxu0  ;;  %v10145_v32 = vpop.f32.mrf.mxu1  ;;  %12109 = vmatpush1.msk.msra.mxu1 %vm1895_vm4, %v10668_v61 }
 0x59b   : > { %v19762_v15 = vadd.f32 %v10128_v22, %v10032_v12  ;;  %10728 = vmatprep.subr.mxu1 %v10665_v63 }
 0x59c   : > { %v9922_v19 = vpop.f32.mrf.mxu0  ;;  %v14540_v14 = vpop.f32.mrf.mxu1 }
 0x59e   : > { %v14485_v41 = vpop.f32.mrf.mxu0  ;;  %v10154_v39 = vpop.f32.mrf.mxu1 }
 0x5a0   : > { %v9930_v4 = vpop.f32.mrf.mxu0  ;;  %v14543_v8 = vpop.f32.mrf.mxu1 }
 0x5a1   : > { %v10033_v33 = vadd.f32 %v9930_v4, %v19741_v48  ;;  %v10664_v48 = vld [vmem:[%s20166_s7 + $0xc0] sm:$0xff] }
 0x5a2   : > { %v14488_v0 = vpop.f32.mrf.mxu0  ;;  %v10162_v50 = vpop.f32.mrf.mxu1  ;;  %10729 = vmatpush1.msra.mxu1 %v10664_v48 }
 0x5a3   : > { %v19778_v35 = vadd.f32 %v10145_v32, %v10033_v33  ;;  %10730 = vmatprep.subr.mxu1 %v10661_v40 }
 0x5a4   : > { %v9939_v43 = vpop.f32.mrf.mxu0  ;;  %v14546_v29 = vpop.f32.mrf.mxu1  ;;  %10731 = vmatpush1.msra.mxu1 %v10660_v54 }
 0x5a5   : > { %10732 = vmatprep.subr.mxu1 %v10657_v56 }
 0x5a6   : > { %v14491_v60 = vpop.f32.mrf.mxu0  ;;  %v10171_v53 = vpop.f32.mrf.mxu1  ;;  %10733 = vmatpush1.msra.mxu1 %v10656_v36 }
 0x5a7   : > { %10734 = vmatprep.subr.mxu1 %v10653_v2 }
 0x5a8   : > { %v9947_v7 = vpop.f32.mrf.mxu0  ;;  %v14549_v59 = vpop.f32.mrf.mxu1  ;;  %10735 = vmatpush1.msra.mxu1 %v10652_v49 }
 0x5a9   : > { %v10034_v5 = vadd.f32 %v9947_v7, %v19744_v37  ;;  %v10645_v37 = vld [vmem:[%s20166_s7 + $0x28] sm:$0xff]  ;;  %10736 = vmatprep.subr.mxu1 %v10649_v24  ;;  %v19830_v7 = vld [vmem:[%s20165_s6] ss:$0 sm:$0xff] }
 0x5aa   : > { %v14494_v23 = vpop.f32.mrf.mxu0  ;;  %v10179_v1 = vpop.f32.mrf.mxu1  ;;  %10737 = vmatpush1.msra.mxu1 %v10648_v47  ;;  %v10497_v47 = vlaneseq }
 0x5ab   : > { %v19806_v21 = vadd.f32 %v10162_v50, %v10034_v5  ;;  %10738 = vmatprep.subr.mxu1 %v10645_v37 }
 0x5ac   : > { %v9956_v26 = vpop.f32.mrf.mxu0  ;;  %v14552_v62 = vpop.f32.mrf.mxu1  ;;  %10739 = vmatpush1.msra.mxu1 %v10644_v18  ;;  %v14813_v18 = vmov 1983009808  }
 0x5ad   : > { %v10495_v62 = vunpack.c.l.s4 %v14813_v18 }
 0x5ae   : > { %v14497_v45 = vpop.f32.mrf.mxu0  ;;  %v10188_v34 = vpop.f32.mrf.mxu1 }
 0x5b0   : > { %v9964_v28 = vpop.f32.mrf.mxu0  ;;  %v14555_v20 = vpop.f32.mrf.mxu1 }
 0x5b1   : > { %v10035_v46 = vadd.f32 %v9964_v28, %v19747_v9 }
 0x5b2   : > { %v14500_v13 = vpop.f32.mrf.mxu0  ;;  %v10196_v16 = vpop.f32.mrf.mxu1 }
 0x5b3   : > { %v19815_v10 = vadd.f32 %v10179_v1, %v10035_v46  ;;  %v10496_v13 = vunpack.c.0.s8 %v10495_v62 }
 0x5b4   : > { %v9973_v27 = vpop.f32.mrf.mxu0  ;;  %v14558_v44 = vpop.f32.mrf.mxu1 }
 0x5b6   : > { %v14503_v30 = vpop.f32.mrf.mxu0  ;;  %v10205_v22 = vpop.f32.mrf.mxu1 }
 0x5b8   : > { %v9981_v25 = vpop.f32.mrf.mxu0  ;;  %v14561_v11 = vpop.f32.mrf.mxu1 }
 0x5b9   : > { %v10036_v51 = vadd.f32 %v9981_v25, %v19750_v31 }
 0x5ba   : > { %v14506_v57 = vpop.f32.mrf.mxu0  ;;  %v10213_v52 = vpop.f32.mrf.mxu1 }
 0x5bb   : > { %v19818_v12 = vadd.f32 %v10196_v16, %v10036_v51  ;;  %v19837_v16 = vshrl.u32 %v10497_v47, 7  ;;  %v10641_v47 = vld [vmem:[%s20166_s7 + $0x8] sm:$0xff] }
 0x5bc   : > { %v9990_v42 = vpop.f32.mrf.mxu0  ;;  %v14564_v3 = vpop.f32.mrf.mxu1  ;;  %10740 = vmatprep.subr.mxu1 %v10641_v47  ;;  %v10651_v47 = vld [vmem:[%s20166_s7 + $0x58] sm:$0xff] }
 0x5be   : > { %v14509_v9 = vpop.f32.mrf.mxu0  ;;  %v10222_v32 = vpop.f32.mrf.mxu1 }
 0x5c0   : > { %v9998_v19 = vpop.f32.mrf.mxu0  ;;  %v14567_v41 = vpop.f32.mrf.mxu1 }
 0x5c1   : > { %v10037_v14 = vadd.f32 %v9998_v19, %v19753_v55 }
 0x5c2   : > { %v14512_v39 = vpop.f32.mrf.mxu0  ;;  %v10230_v4 = vpop.f32.mrf.mxu1 }
 0x5c3   : > { %v19821_v33 = vadd.f32 %v10213_v52, %v10037_v14 }
 0x5c4   : > { %v10007_v8 = vpop.f32.mrf.mxu0  ;;  %v14570_v6 = vpop.f32.mrf.mxu1 }
 0x5c6   : > { %v14515_v31 = vpop.f32.mrf.mxu0  ;;  %v10239_v61 = vpop.f32.mrf.mxu1 }
 0x5c8   : > { %v10015_v63 = vpop.f32.mrf.mxu0 }
 0x5c9   : > { %v10038_v0 = vadd.f32 %v10015_v63, %v19756_v38 }
 0x5ca   : > { %v14518_v48 = vpop.f32.mrf.mxu0 }
 0x5cb   : > { %v19824_v50 = vadd.f32 %v10230_v4, %v10038_v0 }
 0x5cc   : > { %v10024_v40 = vpop.f32.mrf.mxu0 }
 0x5ce   : > { %v14577_v43 = vpop.f32.mrf.mxu0 }
 0x5d0   : > { %v10326_v54 = vpop.f32.mrf.mxu0 }
 0x5d1   : > { %v10461_v2 = vadd.f32 %v10326_v54, %v19759_v17 }
 0x5d2   : > { %v14580_v29 = vpop.f32.mrf.mxu0 }
 0x5d3   : > { %v10476_v5 = vadd.f32 %v19830_v7, %v10461_v2 }
 0x5d4   : > { %v10335_v55 = vpop.f32.mrf.mxu0 }
 0x5d5   : > { %v10484_v37 = vmax.f32 %v10476_v5, 0.0 }
 0x5d6   : > { %v14583_v56 = vpop.f32.mrf.mxu0 }
 0x5d8   : > { %v10343_v60 = vpop.f32.mrf.mxu0 }
 0x5d9   : > { %v10462_v26 = vadd.f32 %v10343_v60, %v19762_v15  ;;  %v10499_v15 = vsub.s32 %v10496_v13, %v19837_v16 }
 0x5da   : > { %v14586_v36 = vpop.f32.mrf.mxu0 }
 0x5db   : > { %v10477_v20 = vadd.f32 %v19830_v7, %v10462_v26 }
 0x5dc   : > { %v10352_v53 = vpop.f32.mrf.mxu0 }
 0x5dd   : > { %v10485_v22 = vmax.f32 %v10477_v20, 0.0 }
 0x5de   : > { %v14589_v38 = vpop.f32.mrf.mxu0 }
 0x5e0   : > { %v10360_v49 = vpop.f32.mrf.mxu0 }
 0x5e1   : > { %v10463_v59 = vadd.f32 %v10360_v49, %v19778_v35  ;;  %v14814_v49 = vmov 1934713408  }
 0x5e2   : > { %v14592_v24 = vpop.f32.mrf.mxu0 }
 0x5e3   : > { %v10478_v23 = vadd.f32 %v19830_v7, %v10463_v59 }
 0x5e4   : > { %v10369_v1 = vpop.f32.mrf.mxu0 }
 0x5e5   : > { %v10486_v17 = vmax.f32 %v10478_v23, 0.0 }
 0x5e6   : > { %v14595_v45 = vpop.f32.mrf.mxu0 }
 0x5e7   : > { %v10492_v34 = vcombine.low %v10484_v37, %v10486_v17  ;;  %v10493_v28 = vcombine.high %v10484_v37, %v10486_v17 }
 0x5e8   : > { %v10377_v46 = vpop.f32.mrf.mxu0 }
 0x5e9   : > { %v10464_v35 = vadd.f32 %v10377_v46, %v19806_v21  ;;  %v10500_v42 = vrot.slane %v10492_v34, %v10499_v15  ;;  %v10507_v3 = vrot.slane %v10493_v28, %v10499_v15 }
 0x5ea   : > { %v14598_v27 = vpop.f32.mrf.mxu0 }
 0x5eb   : > { %v10479_v44 = vadd.f32 %v19830_v7, %v10464_v35  ;;  %v10671_v27 = vld [vmem:[%s20166_s7 + $0xf8] sm:$0xf] }
 0x5ec   : > { %v10386_v30 = vpop.f32.mrf.mxu0 }
 0x5ed   : > { %v10487_v25 = vmax.f32 %v10479_v44, 0.0 }
 0x5ee   : > { %v14601_v51 = vpop.f32.mrf.mxu0 }
 0x5ef   : > { %v10508_v11 = vcombine.low %v10485_v22, %v10487_v25  ;;  %v10509_v57 = vcombine.high %v10485_v22, %v10487_v25 }
 0x5f0   : > { %v10394_v52 = vpop.f32.mrf.mxu0 }
 0x5f1   : > { %v10516_v9 = vrot.slane %v10508_v11, %v10499_v15  ;;  %v10523_v32 = vrot.slane %v10509_v57, %v10499_v15  ;;  %v10465_v61 = vadd.f32 %v10394_v52, %v19815_v10  ;;  %v10559_v10 = vunpack.c.l.s4 %v14814_v49  ;;  %v10666_v49 = vld [vmem:[%s20166_s7 + $0xd0] sm:$0xff] }
 0x5f2   : > { %v14604_v19 = vpop.f32.mrf.mxu0 }
 0x5f3   : > { %v10557_v14 = vcombine.high %v10500_v42, %v10516_v9  ;;  %v10556_v41 = vcombine.low %v10500_v42, %v10516_v9  ;;  %v10572_v21 = vcombine.low %v10507_v3, %v10523_v32  ;;  %v10480_v48 = vadd.f32 %v19830_v7, %v10465_v61  ;;  %v10903_v3 = vld [vmem:[%s20168_s9 + $0x178] sm:$0xff]  ;;  %v10902_v9 = vld [vmem:[%s20168_s9 + $0x170] sm:$0xff]  ;;  %v10901_v32 = vld [vmem:[%s20168_s9 + $0x168] sm:$0xff] }
 0x5f4   : > { %v10403_v39 = vpop.f32.mrf.mxu0  ;;  %v10560_v23 = vunpack.c.0.s8 %v10559_v10  ;;  %10996 = vmatpush1.msra.mxu0 %v10903_v3  ;;  %v10900_v19 = vld [vmem:[%s20168_s9 + $0x160] sm:$0xff]  ;;  %v10891_v61 = vld [vmem:[%s20168_s9 + $0x118] sm:$0xff] }
 0x5f5   : > { %v10488_v55 = vmax.f32 %v10480_v48, 0.0  ;;  %10997 = vmatprep.subr.mxu0 %v20747_v58  ;;  %v10896_v39 = vld [vmem:[%s20168_s9 + $0x140] sm:$0xff]  ;;  %v10663_v10 = vld [vmem:[%s20166_s7 + $0xb8] sm:$0xff] }
 0x5f6   : > { %v14607_v4 = vpop.f32.mrf.mxu0  ;;  %10998 = vmatpush1.msra.mxu0 %v10902_v9  ;;  %v10876_v3 = vld [vmem:[%s20168_s9 + $0xa0] sm:$0xff] }
 0x5f7   : > { %10999 = vmatprep.subr.mxu0 %v20747_v58  ;;  %v10895_v4 = vld [vmem:[%s20168_s9 + $0x138] sm:$0xff]  ;;  %v10860_v9 = vld [vmem:[%s20168_s9 + $0x20] sm:$0xff] }
 0x5f8   : > { %v10411_v8 = vpop.f32.mrf.mxu0  ;;  %11000 = vmatpush1.msra.mxu0 %v10901_v32  ;;  %v10875_v32 = vld [vmem:[%s20168_s9 + $0x98] sm:$0xff] }
 0x5f9   : > { %v10466_v56 = vadd.f32 %v10411_v8, %v19818_v12  ;;  %v10640_v12 = vld [vmem:[%s20166_s7] sm:$0xff]  ;;  %11001 = vmatprep.subr.mxu0 %v20747_v58  ;;  %v10894_v8 = vld [vmem:[%s20168_s9 + $0x130] sm:$0xff] }
 0x5fa   : > { %v14610_v6 = vpop.f32.mrf.mxu0  ;;  %10741 = vmatpush1.msra.mxu1 %v10640_v12  ;;  %11002 = vmatpush1.msra.mxu0 %v10900_v19  ;;  %v10650_v12 = vld [vmem:[%s20166_s7 + $0x50] sm:$0xff]  ;;  %v10859_v19 = vld [vmem:[%s20168_s9 + $0x18] sm:$0xff] }
 0x5fb   : > { %v10481_v5 = vadd.f32 %v19830_v7, %v10466_v56  ;;  %12111 = vmatprep.subr.msk.mxu1 %vm1895_vm4, %v10671_v27  ;;  %11003 = vmatprep.subr.mxu0 %v20747_v58  ;;  %v10893_v6 = vld [vmem:[%s20168_s9 + $0x128] sm:$0xff]  ;;  %v10866_v27 = vld [vmem:[%s20168_s9 + $0x50] sm:$0xff] }
 0x5fc   : > { %v10420_v31 = vpop.f32.mrf.mxu0 }
 0x5fd   : > { %v10489_v37 = vmax.f32 %v10481_v5, 0.0  ;;  %v10892_v31 = vld [vmem:[%s20168_s9 + $0x120] sm:$0xff]  ;;  %v10662_v5 = vld [vmem:[%s20166_s7 + $0xb0] sm:$0xff] }
 0x5fe   : > { %v14613_v63 = vpop.f32.mrf.mxu0 }
 0x5ff   : > { %v10890_v63 = vld [vmem:[%s20168_s9 + $0x110] sm:$0xff] }
 0x600   : > { %v10428_v0 = vpop.f32.mrf.mxu0 }
 0x601   : > { %v10467_v40 = vadd.f32 %v10428_v0, %v19821_v33  ;;  %v10889_v0 = vld [vmem:[%s20168_s9 + $0x108] sm:$0xff] }
 0x602   : > { %v14616_v43 = vpop.f32.mrf.mxu0 }
 0x603   : > { %v10482_v54 = vadd.f32 %v19830_v7, %v10467_v40 }
 0x604   : > { %v10437_v29 = vpop.f32.mrf.mxu0 }
 0x605   : > { %v10490_v60 = vmax.f32 %v10482_v54, 0.0 }
 0x606   : > { %v14619_v36 = vpop.f32.mrf.mxu0 }
 0x607   : > { %v10524_v53 = vcombine.low %v10488_v55, %v10490_v60  ;;  %v10525_v2 = vcombine.high %v10488_v55, %v10490_v60 }
 0x608   : > { %v10445_v38 = vpop.f32.mrf.mxu0 }
 0x609   : > { %v10468_v59 = vadd.f32 %v10445_v38, %v19824_v50  ;;  %v10563_v50 = vsub.s32 %v10560_v23, %v19837_v16  ;;  %v10532_v62 = vrot.slane %v10524_v53, %v10499_v15  ;;  %v10670_v53 = vld [vmem:[%s20166_s7 + $0xf0] sm:$0xf]  ;;  %v10667_v38 = vld [vmem:[%s20166_s7 + $0xd8] sm:$0xff] }
 0x60a   : > { %v14622_v24 = vpop.f32.mrf.mxu0  ;;  %v10654_v23 = vld [vmem:[%s20166_s7 + $0x70] sm:$0xff] }
 0x60b   : > { %v10483_v33 = vadd.f32 %v19830_v7, %v10468_v59  ;;  %v10539_v7 = vrot.slane %v10525_v2, %v10499_v15  ;;  %v10571_v13 = vrot.slane %v10557_v14, %v10563_v50  ;;  %v19857_v35 = vrot.slane %v10556_v41, %v10563_v50  ;;  %v10899_v14 = vld [vmem:[%s20168_s9 + $0x158] sm:$0xff]  ;;  %v10898_v41 = vld [vmem:[%s20168_s9 + $0x150] sm:$0xff] }
 0x60c   : > { %v10454_v1 = vpop.f32.mrf.mxu0  ;;  %v10579_v22 = vrot.slane %v10572_v21, %v10563_v50  ;;  %11004 = vmatpush1.msra.mxu0 %v10899_v14  ;;  %v10897_v21 = vld [vmem:[%s20168_s9 + $0x148] sm:$0xff]  ;;  %v10659_v59 = vld [vmem:[%s20166_s7 + $0x98] sm:$0xff]  ;;  %v10658_v24 = vld [vmem:[%s20166_s7 + $0x90] sm:$0xff] }
 0x60d   : > { %v10491_v26 = vmax.f32 %v10483_v33, 0.0  ;;  %11005 = vmatprep.subr.mxu0 %v20747_v58  ;;  %v10655_v33 = vld [vmem:[%s20166_s7 + $0x78] sm:$0xff]  ;;  %v10888_v14 = vld [vmem:[%s20168_s9 + $0x100] sm:$0xff] }
 0x60e   : > { %11006 = vmatpush1.msra.mxu0 %v10898_v41  ;;  %v10647_v1 = vld [vmem:[%s20166_s7 + $0x38] sm:$0xff]  ;;  %v10874_v41 = vld [vmem:[%s20168_s9 + $0x90] sm:$0xff] }
 0x60f   : > { %v10540_v17 = vcombine.low %v10489_v37, %v10491_v26  ;;  %v10541_v18 = vcombine.high %v10489_v37, %v10491_v26  ;;  %11007 = vmatprep.subr.mxu0 %v20747_v58  ;;  %v10646_v37 = vld [vmem:[%s20166_s7 + $0x30] sm:$0xff]  ;;  %v10643_v26 = vld [vmem:[%s20166_s7 + $0x18] sm:$0xff] }
 0x610   : > { %11008 = vmatpush1.msra.mxu0 %v10897_v21  ;;  %v10858_v21 = vld [vmem:[%s20168_s9 + $0x10] sm:$0xff] }
 0x611   : > { %v10548_v45 = vrot.slane %v10540_v17, %v10499_v15  ;;  %v10555_v34 = vrot.slane %v10541_v18, %v10499_v15  ;;  %11009 = vmatprep.subr.mxu0 %v20747_v58  ;;  %v10642_v17 = vld [vmem:[%s20166_s7 + $0x10] sm:$0xff]  ;;  %v10887_v18 = vld [vmem:[%s20168_s9 + $0xf8] sm:$0xff] }
 0x612   : > { %11010 = vmatpush1.msra.mxu0 %v10896_v39  ;;  %v10873_v39 = vld [vmem:[%s20168_s9 + $0x88] sm:$0xff] }
 0x613   : > { %v10581_v28 = vcombine.high %v10532_v62, %v10548_v45  ;;  %v10580_v46 = vcombine.low %v10532_v62, %v10548_v45  ;;  %v10596_v20 = vcombine.low %v10539_v7, %v10555_v34  ;;  %11011 = vmatprep.subr.mxu0 %v20747_v58  ;;  %v10886_v62 = vld [vmem:[%s20168_s9 + $0xf0] sm:$0xff]  ;;  %v10885_v45 = vld [vmem:[%s20168_s9 + $0xe8] sm:$0xff] }
 0x614   : > { %11012 = vmatpush1.msra.mxu0 %v10895_v4  ;;  %v10870_v7 = vld [vmem:[%s20168_s9 + $0x70] sm:$0xff]  ;;  %v10869_v34 = vld [vmem:[%s20168_s9 + $0x68] sm:$0xff] }
 0x615   : > { %v10595_v44 = vrot.slane %v10581_v28, %v10563_v50  ;;  %v19862_v30 = vrot.slane %v10580_v46, %v10563_v50  ;;  %v10603_v25 = vrot.slane %v10596_v20, %v10563_v50  ;;  %11013 = vmatprep.subr.mxu0 %v20747_v58  ;;  %v10871_v50 = vld [vmem:[%s20168_s9 + $0x78] sm:$0xff]  ;;  %v10884_v28 = vld [vmem:[%s20168_s9 + $0xe0] sm:$0xff]  ;;  %v10910_v4 = vld [vmem:[%s20168_s9 + $0x1b0] sm:$0x7] }
 0x616   : > { %11014 = vmatpush1.msra.mxu0 %v10894_v8  ;;  %v10868_v46 = vld [vmem:[%s20168_s9 + $0x60] sm:$0xff]  ;;  %v10883_v20 = vld [vmem:[%s20168_s9 + $0xd8] sm:$0xff]  ;;  %v10857_v8 = vld [vmem:[%s20168_s9 + $0x8] sm:$0xff] }
 0x617   : > { %v10607_v51 = vcombine.high %v10571_v13, %v10595_v44  ;;  %v10605_v15 = vcombine.high %v19857_v35, %v19862_v30  ;;  %v10604_v11 = vcombine.low %v19857_v35, %v19862_v30  ;;  %v10608_v57 = vcombine.low %v10579_v22, %v10603_v25  ;;  %11015 = vmatprep.subr.mxu0 %v20747_v58  ;;  %v10882_v35 = vld [vmem:[%s20168_s9 + $0xd0] sm:$0xff]  ;;  %v10865_v30 = vld [vmem:[%s20168_s9 + $0x48] sm:$0xff] }
 0x618   : > { %v10606_v52 = vcombine.low %v10571_v13, %v10595_v44  ;;  %v10609_v42 = vcombine.high %v10579_v22, %v10603_v25  ;;  %11016 = vmatpush1.msra.mxu0 %v10893_v6  ;;  %v10867_v13 = vld [vmem:[%s20168_s9 + $0x58] sm:$0xff]  ;;  %v10881_v44 = vld [vmem:[%s20168_s9 + $0xc8] sm:$0xff]  ;;  %v10880_v22 = vld [vmem:[%s20168_s9 + $0xc0] sm:$0xff] }
 0x619   : > { %10619 = vrot.lane.b32.xlu1 %v10607_v51, %s14815_s13  ;;  %10611 = vrot.lane.b32.xlu0 %v10605_v15, %s14816_s26  ;;  %v10864_v25 = vld [vmem:[%s20168_s9 + $0x40] sm:$0xff]  ;;  %v10879_v51 = vld [vmem:[%s20168_s9 + $0xb8] sm:$0xff] }
 0x61a   : > { %11017 = vmatprep.subr.mxu0 %v20747_v58  ;;  %v10863_v15 = vld [vmem:[%s20168_s9 + $0x38] sm:$0xff]  ;;  %v10872_v6 = vld [vmem:[%s20168_s9 + $0x80] sm:$0xff] }
 0x61b   : > { %11018 = vmatpush1.msra.mxu0 %v10892_v31  ;;  %v10909_v31 = vld [vmem:[%s20168_s9 + $0x1a8] sm:$0xff] }
 0x61c   : > { %11019 = vmatprep.subr.mxu0 %v20747_v58 }
 0x61d   : > { %10623 = vrot.lane.b32.xlu1 %v10608_v57, %s14817_s29  ;;  %10615 = vrot.lane.b32.xlu0 %v10606_v52, %s14818_s12  ;;  %v10862_v57 = vld [vmem:[%s20168_s9 + $0x30] sm:$0xff]  ;;  %v10877_v52 = vld [vmem:[%s20168_s9 + $0xa8] sm:$0xff]  ;;  %s20124_s29 = scalar_lea.hbm %s20170_s11, %s12118_s24 }
 0x61e   : > { %11020 = vmatpush1.msra.mxu0 %v10891_v61  ;;  %v10856_v61 = vld [vmem:[%s20168_s9] sm:$0xff] }
 0x61f   : > { %11021 = vmatprep.subr.mxu0 %v20747_v58 }
 0x620   : > { %11022 = vmatpush1.msra.mxu0 %v10890_v63  ;;  %v10908_v63 = vld [vmem:[%s20168_s9 + $0x1a0] sm:$0xff] }
 0x621   : > { %10627 = vrot.lane.b32.xlu0 %v10609_v42, %s14819_s14  ;;  %11023 = vmatprep.subr.mxu0 %v20747_v58  ;;  %v10861_v42 = vld [vmem:[%s20168_s9 + $0x28] sm:$0xff]  ;;  %s393_s14 = sand.u32 1, %s14799_s18  }
 0x622   : > { %11024 = vmatpush1.msra.mxu0 %v10889_v0  ;;  %v10907_v0 = vld [vmem:[%s20168_s9 + $0x198] sm:$0xff]  ;;  %s11157_s15 = sshll.u32 %s393_s14, 3  ;;  %s11067_s12 = scalar_lea.sflag [#allocation4], %s393_s14 }
 0x623   : > { %11025 = vmatprep.subr.mxu0 %v20747_v58  ;;  %s395_s25 = scalar_lea.vmem [#allocation5], %s11157_s15  ;;  %s14747_s15 = sshll.u32 %s14820_s21, 4  ;;  %s14748_s15 = int_to_ptr.vmem [resolvable:$false] %s14747_s15 }
 0x624   : > { %11026 = vmatpush1.msra.mxu0 %v10888_v14  ;;  %s11080_s30 = sshll.u32 %s395_s25, 4  ;;  %s14749_s16 = scalar_lea.vmem %s14748_s15, 256  ;;  %s11081_s30 = int_to_ptr.vmem [resolvable:$true] %s11080_s30 }
 0x625   : > { %11045 = vmatprep.subr.mxu0 %v20747_v58  ;;  %s14743_s0 = scalar_lea.vmem %s11081_s30, 128  ;;  %p14750_p11 = scmp.lt.s32.totalorder %s11081_s30, %s14748_s15 }
 0x626   : > { %12115 = vmatpush2.msk.msra.mxu0 %vm2282_vm5, %v10910_v4  ;;  %p14744_p6 = scmp.ne.s32.totalorder %s11081_s30, %s14743_s0  ;;  %p14751_p12 = scmp.lt.s32.totalorder %s14749_s16, %s14743_s0 }
 0x627   : > { %11047 = vmatprep.subr.mxu0 %v20747_v58 }
 0x628   : > { %11048 = vmatpush2.msra.mxu0 %v10909_v31  ;;  %p14745_p9 = pnand %p14744_p6, %p14919_p5  ;;  %p14752_p13 = por %p14751_p12, %p14750_p11 }
 0x629   : > { %11049 = vmatprep.subr.mxu0 %v20747_v58 }
 0x62a   : > { %11050 = vmatpush2.msra.mxu0 %v10908_v63  ;;  %p14746_p10 = pneg %p14745_p9 }
 0x62b   : > { %11051 = vmatprep.subr.mxu0 %v20747_v58 }
 0x62c   : > { %11052 = vmatpush2.msra.mxu0 %v10907_v0  ;;  %p14753_p0 = pnand %p14752_p13, %p14746_p10 }
 0x62d   : > { %11053 = vmatprep.subr.mxu0 %v20747_v58 }
 0x68b   : > { %v10620_v48 = vpop.permute.xlu1 %10619  ;;  %v10612_v40 = vpop.permute.xlu0 %10611 }
 0x68c   : > { %v10631_v43 = vsel %vm10630_vm9, %v10604_v11, %v10612_v40  ;;  %v10878_v11 = vld [vmem:[%s20168_s9 + $0xb0] sm:$0xff]  ;;  %v10905_v40 = vld [vmem:[%s20168_s9 + $0x188] sm:$0xff] }
 0x68f   : > { %v10616_v54 = vpop.permute.xlu0 %10615  ;;  %v10624_v55 = vpop.permute.xlu1 %10623 }
 0x690   : > { %v10633_v29 = vsel %vm10632_vm10, %v10631_v43, %v10616_v54  ;;  %v10904_v43 = vld [vmem:[%s20168_s9 + $0x180] sm:$0xff]  ;;  %v10676_v54 = vsub.s32 0, %v19837_v16 }
 0x691   : > { %v10635_v56 = vsel %vm10634_vm11, %v10633_v29, %v10620_v48  ;;  %v10906_v48 = vld [vmem:[%s20168_s9 + $0x190] sm:$0xff]  ;;  %v10672_v29 = vld [vmem:[%s20167_s8] sm:$0xf] }
 0x692   : > { %v10637_v60 = vsel %vm10636_vm12, %v10635_v56, %v10624_v55  ;;  %11054 = vmatpush2.msra.mxu0 %v10906_v48  ;;  %v10680_v55 = vsub.s32 1, %v19837_v16  ;;  %v10677_v56 = vrot.slane %v10672_v29, %v10676_v54 }
 0x693   : > { %v10628_v36 = vpop.permute.xlu0 %10627  ;;  %11055 = vmatprep.subr.mxu0 %v20747_v58 }
 0x694   : > { %v10639_v2 = vsel %vm10638_vm13, %v10637_v60, %v10628_v36  ;;  %11056 = vmatpush2.msra.mxu0 %v10905_v40  ;;  %v10681_v60 = vrot.slane %v10672_v29, %v10680_v55 }
 0x695   : > { %12110 = vmatmul.mubr.msk.f32.vlgmr.msra.gmra.mxu1 %vm10694_vm14, %v10639_v2  ;;  %11057 = vmatprep.subr.mxu0 %v20747_v58 }
 0x696   : > { %12112 = vmatpush1.msk.msra.mxu1 %vm1895_vm4, %v10670_v53  ;;  %10845 = vmatprep.mubr.f32.mxu1 %v20747_v58  ;;  %v10684_v58 = vsub.s32 2, %v19837_v16 }
 0x697   : > { %10799 = vmatprep.subr.mxu1 %v10667_v38  ;;  %11058 = vmatpush2.msra.mxu0 %v10904_v43 }
 0x698   : > { %10800 = vmatpush1.msra.mxu1 %v10666_v49 }
 0x699   : > { %10801 = vmatprep.subr.mxu1 %v10663_v10 }
 0x69a   : > { %10802 = vmatpush1.msra.mxu1 %v10662_v5  ;;  %v10688_v5 = vsub.s32 3, %v19837_v16  ;;  %v12114_v16 = vld [vmem:[%s20169_s10] ss:$0 sm:$0xff] }
 0x69b   : > { %10803 = vmatprep.subr.mxu1 %v10659_v59  ;;  %v10685_v59 = vrot.slane %v10672_v29, %v10684_v58 }
 0x69c   : > { %10804 = vmatpush1.msra.mxu1 %v10658_v24  ;;  %v10689_v24 = vrot.slane %v10672_v29, %v10688_v5 }
 0x69d   : > { %10805 = vmatprep.subr.mxu1 %v10655_v33 }
 0x69e   : > { %10806 = vmatpush1.msra.mxu1 %v10654_v23 }
 0x69f   : > { %10807 = vmatprep.subr.mxu1 %v10651_v47 }
 0x6a0   : > { %10808 = vmatpush1.msra.mxu1 %v10650_v12 }
 0x6a1   : > { %10809 = vmatprep.subr.mxu1 %v10647_v1 }
 0x6a2   : > { %10810 = vmatpush1.msra.mxu1 %v10646_v37 }
 0x6a3   : > { %10811 = vmatprep.subr.mxu1 %v10643_v26 }
 0x6a4   : > { %10812 = vmatpush1.msra.mxu1 %v10642_v17 }
 0x6a5   : > { %12113 = vmatmul.mubr.msk.f32.vlgmr.msra.gmra.mxu1 %vm10694_vm14, %v10639_v2  ;;  %13098 = vmatprep.subr.mxu1 %v10887_v18 }
 0x6a6   : > { %13099 = vmatpush3.msra.mxu1 %v10871_v50 }
 0x6a7   : > { %13100 = vmatprep.subr.mxu1 %v10886_v62 }
 0x6a8   : > { %13101 = vmatpush3.msra.mxu1 %v10870_v7 }
 0x6a9   : > { %13102 = vmatprep.subr.mxu1 %v10885_v45 }
 0x6aa   : > { %13103 = vmatpush3.msra.mxu1 %v10869_v34 }
 0x6ab   : > { %13104 = vmatprep.subr.mxu1 %v10884_v28 }
 0x6ac   : > { %13105 = vmatpush3.msra.mxu1 %v10868_v46 }
 0x6ad   : > { %13106 = vmatprep.subr.mxu1 %v10883_v20 }
 0x6ae   : > { %13107 = vmatpush3.msra.mxu1 %v10867_v13 }
 0x6af   : > { %13108 = vmatprep.subr.mxu1 %v10882_v35 }
 0x6b0   : > { %13109 = vmatpush3.msra.mxu1 %v10866_v27 }
 0x6b1   : > { %13110 = vmatprep.subr.mxu1 %v10881_v44 }
 0x6b2   : > { %13111 = vmatpush3.msra.mxu1 %v10865_v30 }
 0x6b3   : > { %13112 = vmatprep.subr.mxu1 %v10880_v22 }
 0x6b4   : > { %13113 = vmatpush3.msra.mxu1 %v10864_v25 }
 0x6b5   : > { %13114 = vmatprep.subr.mxu1 %v10879_v51 }
 0x6b6   : > { %13115 = vmatpush3.msra.mxu1 %v10863_v15 }
 0x6b7   : > { %13116 = vmatprep.subr.mxu1 %v10878_v11 }
 0x6b8   : > { %13117 = vmatpush3.msra.mxu1 %v10862_v57 }
 0x6b9   : > { %13118 = vmatprep.subr.mxu1 %v10877_v52 }
 0x6ba   : > { %13119 = vmatpush3.msra.mxu1 %v10861_v42 }
 0x6bb   : > { %13120 = vmatprep.subr.mxu1 %v10876_v3 }
 0x6bc   : > { %13121 = vmatpush3.msra.mxu1 %v10860_v9 }
 0x6bd   : > { %13122 = vmatprep.subr.mxu1 %v10875_v32 }
 0x6be   : > { %13123 = vmatpush3.msra.mxu1 %v10859_v19 }
 0x6bf   : > { %13124 = vmatprep.subr.mxu1 %v10874_v41 }
 0x6c0   : > { %13125 = vmatpush3.msra.mxu1 %v10858_v21 }
 0x6c1   : > { %13126 = vmatprep.subr.mxu1 %v10873_v39 }
 0x6c2   : > { %13127 = vmatpush3.msra.mxu1 %v10857_v8 }
 0x6c3   : > { %13128 = vmatprep.subr.mxu1 %v10872_v6 }
 0x6c4   : > { %13129 = vmatpush3.msra.mxu1 %v10856_v61 }
 0x755   : > { %v10776_v36 = vpop.f32.mrf.mxu1 }
 0x756   : > { %v10777_v53 = vadd.f32 %v10776_v36, %v10677_v56 }
 0x757   : > { %v10778_v2 = vpop.f32.mrf.mxu1 }
 0x758   : > { %v10779_v38 = vadd.f32 %v10778_v2, %v10681_v60  ;;  %v10852_v10 = vmax.f32 %v10777_v53, 0.0 }
 0x75a   : > { %v10853_v49 = vmax.f32 %v10779_v38, 0.0 }
 0x75c   : > { %10989 = vmatprep.mubr.f32.mxu1 %v10853_v49 }
 0x75d   : > { %10990 = vmatmul.mubr.f32.vlgmr.msra.gmra.mxu1 %v10852_v10 }
 0x765   : > { %v10847_v33 = vpop.f32.mrf.mxu1 }
 0x766   : > { %v10848_v23 = vadd.f32 %v10847_v33, %v10685_v59 }
 0x767   : > { %v10849_v47 = vpop.f32.mrf.mxu1 }
 0x768   : > { %v10850_v12 = vadd.f32 %v10849_v47, %v10689_v24  ;;  %v10854_v37 = vmax.f32 %v10848_v23, 0.0 }
 0x76a   : > { %v10855_v1 = vmax.f32 %v10850_v12, 0.0 }
 0x76c   : > { %12116 = vmatprep.mubr.msk.f32.mxu0 %vm10918_vm15, %v10855_v1 }
 0x76d   : > { %11060 = vmatmul.mubr.f32.vlgmr.msra.gmra.mxu0 %v10854_v37 }
 0x81d   : > { %v13130_v26 = vpop.f32.mrf.mxu1 }
 0x81f   : > { %v13131_v17 = vpop.f32.mrf.mxu1 }
 0x820   : > { %v13132_v18 = vadd.f32 %v13131_v17, %v13130_v26 }
 0x822   : > { %v10992_v50 = vadd.f32 %v13132_v18, %v12114_v16 }
 0x82d   : > { %v11061_v62 = vpop.f32.mrf.mxu0 }
 0x82e   : > { %v11062_v7 = vadd.f32 %v11061_v62, %v10992_v50 }
 0x82f   : > { %v11063_v45 = vpop.f32.mrf.mxu0 }
 0x830   : > { %11065 = vst [vmem:[%s395_s25] sm:$0xff] %v11062_v7 }
 0x831   : > { %14756 = shalt.err (!%p14753_p0)
}
 0x832   : > { %s14757_s22 = scalar_lea.hbm %s20124_s29, 128  ;;  %s14761_s25 = scalar_lea.hbm %s20170_s11, 256 }
 0x833   : > { %p14758_p1 = scmp.ne.s32.totalorder %s20124_s29, %s14757_s22  ;;  %p14762_p4 = scmp.lt.s32.totalorder %s20124_s29, %s20170_s11 }
 0x834   : > { %p14763_p7 = scmp.lt.s32.totalorder %s14761_s25, %s14757_s22 }
 0x835   : > { %p14759_p2 = pnand %p14758_p1, %p14919_p5 }
 0x836   : > { %p14764_p8 = por %p14763_p7, %p14762_p4 }
 0x837   : > { %p14760_p3 = pneg %p14759_p2 }
 0x839   : > { %p14765_p6 = pnand %p14764_p8, %p14760_p3 }
 0x83b   : > { %14768 = shalt.err (!%p14765_p6)
}
 0x83c   : > { %14629 = dma.vmem_to_hbm [thread:$0]  (%p14919_p5), %s11081_s30, 128, %s20124_s29, %s11067_s12  }
 0x83d PF: > { %p14641_p9 = scmp.ge.s32.totalorder %s14807_s20, 2  ;;  %s11092_s0 = sand.u32 1, %s14795_s17  }
 0x83e   : > { %p20801_p10 = scmp.ne.s32.totalorder %s20260_s28, 0  ;;  %s11093_s21 = scalar_lea.sflag [#allocation4], %s11092_s0 }
 0x840   : > { %p14636_p11 = pnand %p14641_p9, %p20801_p10 }
 0x842   : > { %p14637_p12 = pneg %p14636_p11 }
 0x844   : > { %14790 = dma.done.wait (%p14637_p12), %s11093_s21, 128  }
 0x845   : > { %14792 = vsyncadd (%p14637_p12), %s11093_s21, 4294967168  ;;  %s20802_s15 = sld [smem:[#allocation8_spill]]  ;;  %p22_p13 = scmp.ge.s32.totalorder %s14906_s23, 4  }
 0x846   : > { %s20803_s17 = smov %s14799_s18  ;;  %s20804_s18 = smov %s14803_s19 }
 0x847   : > { %s20806_s20 = smov %s14906_s23  ;;  %24 = sbr.rel (!%p22_p13) target bundleno = 6 (0x6), region = 104 }
 0x84b   : > { %s20805_s19 = smov %s20802_s15 }
 0x84c   :  { %11098 = vsyncpa [#allocation3], 1 }
 0x84d   :  { %11100 = vsyncpa [#allocation3 + $0x1], 1 }
 0x84e   :  { %11101 = vsyncpa [#allocation4], 1 }
 0x84f   :  { %11103 = vsyncpa [#allocation4 + $0x1], 1 }

</bundles_post_ra>
